<compile_context>
chip_gen: v7x
topology: tpu7x:2x2x1
jax: 0.10.0
libtpu: 0.0.40
codegen_flags: <defaults>
</compile_context>

<pallas_src>
import jax
import jax.numpy as jnp
from jax.experimental import pallas as pl
from jax.experimental.pallas import tpu as pltpu

BN_EPS = 1e-3

_CFG = None


def _tpu_config():
    """(num_tensorcores, vmem_limit_bytes, row_tile_vmem_budget) heuristics."""
    global _CFG
    if _CFG is None:
        kind = ""
        try:
            kind = jax.devices()[0].device_kind.lower()
        except Exception:
            pass
        is_v7 = "v7" in kind
        n_tc = 2 if is_v7 else 1                              # v7x: 2 TCs/chip
        vmem_limit = (48 if is_v7 else 64) * 1024 * 1024      # v7x: 64 MiB phys
        budget = (12 if is_v7 else 24) * 1024 * 1024
        _CFG = (n_tc, vmem_limit, budget)
    return _CFG


def _pick_tile_rows(m, row_bytes, budget, min_steps):
    """Largest sublane-aligned row tile dividing m that fits the double-buffer
    budget and leaves >= min_steps grid steps."""
    cands = [t for t in (8192, 4096, 2048, 1024, 512, 256, 128, 64, 32, 16, 8)
             if t <= m and m % t == 0]
    if not cands:
        return m                       # ragged m: single full block (still legal)
    for t in cands:
        if 2 * t * row_bytes <= budget and m // t >= min_steps:
            return t
    for t in cands:
        if 2 * t * row_bytes <= budget:
            return t
    return cands[-1]


def _bn_fold(gamma, beta, mean, var):
    scale = gamma / jnp.sqrt(var + BN_EPS)
    return scale, beta - mean * scale


# ----------------------------------------------------------------------------
# Kernel A ("head"): fused (b1a | b2a) 1x1x1 conv + BN + ReLU, plus bf16 cast
# of x for downstream consumers.  Output dtype bf16 -> half the HBM bytes.
# ----------------------------------------------------------------------------
def _head_kernel(x_ref, w_ref, b_ref, y_ref, xb_ref):
    xb = x_ref[...].astype(jnp.bfloat16)
    xb_ref[...] = xb
    acc = jnp.dot(xb, w_ref[...], preferred_element_type=jnp.float32)
    y_ref[...] = jnp.maximum(acc + b_ref[...], 0.0).astype(y_ref.dtype)


def _head_call(x2d, wy, by):
    m, cin = x2d.shape
    cy = wy.shape[1]
    n_tc, vmem_limit, budget = _tpu_config()
    row_bytes = cin * 4 + (cy + cin) * 2
    tm = _pick_tile_rows(m, row_bytes, budget,
                         min_steps=4 if n_tc > 1 else 1)
    return pl.pallas_call(
        _head_kernel,
        out_shape=(jax.ShapeDtypeStruct((m, cy), jnp.bfloat16),
                   jax.ShapeDtypeStruct((m, cin), jnp.bfloat16)),
        grid_spec=pltpu.PrefetchScalarGridSpec(
            num_scalar_prefetch=0,
            grid=(m // tm,),
            in_specs=[pl.BlockSpec((tm, cin), lambda i: (i, 0)),
                      pl.BlockSpec((cin, cy), lambda i: (0, 0)),
                      pl.BlockSpec((1, cy), lambda i: (0, 0))],
            out_specs=[pl.BlockSpec((tm, cy), lambda i: (i, 0)),
                       pl.BlockSpec((tm, cin), lambda i: (i, 0))],
        ),
        compiler_params=pltpu.CompilerParams(
            dimension_semantics=("parallel",),
            vmem_limit_bytes=vmem_limit),
    )(x2d, wy, by)


# ----------------------------------------------------------------------------
# Kernel B ("tail"): per (n, d) output depth plane, computes all four branch
# outputs and writes one lane-dense (H*W, Ctot) slab of the concatenated
# result.  Depth halo via clamped index_maps + 0/1 tap masks; H/W SAME halo
# via zero-bordered VMEM scratches; b1/b2 fused through block-diagonal weights.
# ----------------------------------------------------------------------------
def _tail_kernel(xm_ref, xc_ref, xp_ref, ym_ref, yc_ref, yp_ref,
                 w0_ref, wbd_ref, w5_ref, b0_ref, b12_ref, b5_ref,
                 o_ref, pad_y, pad_x):
    d = pl.program_id(1)
    nd = pl.num_programs(1)
    lo = (d > 0).astype(jnp.bfloat16)          # 0/1 mask for depth tap d-1
    hi = (d < nd - 1).astype(jnp.bfloat16)     # 0/1 mask for depth tap d+1

    h, w, cin = xc_ref.shape[2], xc_ref.shape[3], xc_ref.shape[4]
    cy = yc_ref.shape[4]
    c0 = w0_ref.shape[1]
    c12 = wbd_ref.shape[2]
    c5 = w5_ref.shape[1]
    hw = h * w

    # ---- branch 0: 1x1x1 conv + BN + ReLU on the center x slice ------------
    xc = xc_ref[0, 0]                                         # (H, W, Cin) bf16
    z0 = jnp.dot(xc.reshape(hw, cin), w0_ref[...],
                 preferred_element_type=jnp.float32)
    o_ref[0, 0, :, 0:c0] = jnp.maximum(z0 + b0_ref[...], 0.0).astype(o_ref.dtype)

    # ---- branches 1 + 2: block-diagonal 3x3x3 conv + BN + ReLU -------------
    # zero-masked boundary taps == zero SAME padding in depth
    y_taps = (ym_ref[0, 0] * lo, yc_ref[0, 0], yp_ref[0, 0] * hi)
    pad_y[...] = jnp.zeros(pad_y.shape, pad_y.dtype)          # zero border once
    acc = jnp.zeros((hw, c12), jnp.float32)
    for kd in range(3):
        pad_y[1:h + 1, 1:w + 1, :] = y_taps[kd]
        for i in range(3):
            for j in range(3):
                patch = pad_y[i:i + h, j:j + w, :].reshape(hw, cy)
                acc = acc + jnp.dot(patch, wbd_ref[kd * 9 + i * 3 + j],
                                    preferred_element_type=jnp.float32)
    o_ref[0, 0, :, c0:c0 + c12] = jnp.maximum(
        acc + b12_ref[...], 0.0).astype(o_ref.dtype)

    # ---- branch 3: zero-SAME 3x3x3 maxpool + 1x1x1 conv + BN + ReLU --------
    # running max over the depth taps first, then one 9-window in-plane tree.
    dmax = jnp.maximum(jnp.maximum(xm_ref[0, 0] * lo, xc), xp_ref[0, 0] * hi)
    pad_x[...] = jnp.zeros(pad_x.shape, pad_x.dtype)
    pad_x[1:h + 1, 1:w + 1, :] = dmax
    wins = [pad_x[i:i + h, j:j + w, :] for i in range(3) for j in range(3)]
    while len(wins) > 1:
        nxt = [jnp.maximum(wins[k], wins[k + 1])
               for k in range(0, len(wins) - 1, 2)]
        if len(wins) % 2:
            nxt.append(wins[-1])
        wins = nxt
    z3 = jnp.dot(wins[0].reshape(hw, cin), w5_ref[...],
                 preferred_element_type=jnp.float32)
    o_ref[0, 0, :, c0 + c12:c0 + c12 + c5] = jnp.maximum(
        z3 + b5_ref[...], 0.0).astype(o_ref.dtype)


def _tail_call(xb5, y5, w0, wbd, w5, b0, b12, b5):
    n, dd, h, w, cin = xb5.shape
    cy = y5.shape[-1]
    c0 = w0.shape[1]
    c12 = wbd.shape[2]
    c5 = w5.shape[1]
    ctot = c0 + c12 + c5
    hw = h * w
    _, vmem_limit, _ = _tpu_config()

    def tap_map(k):
        if k == 0:
            return lambda ni, di: (ni, jnp.maximum(di - 1, 0), 0, 0, 0)
        if k == 1:
            return lambda ni, di: (ni, di, 0, 0, 0)
        return lambda ni, di: (ni, jnp.minimum(di + 1, dd - 1), 0, 0, 0)

    x_specs = [pl.BlockSpec((1, 1, h, w, cin), tap_map(k)) for k in range(3)]
    y_specs = [pl.BlockSpec((1, 1, h, w, cy), tap_map(k)) for k in range(3)]
    p_specs = [
        pl.BlockSpec((cin, c0), lambda ni, di: (0, 0)),
        pl.BlockSpec((27, cy, c12), lambda ni, di: (0, 0, 0)),
        pl.BlockSpec((cin, c5), lambda ni, di: (0, 0)),
        pl.BlockSpec((1, c0), lambda ni, di: (0, 0)),
        pl.BlockSpec((1, c12), lambda ni, di: (0, 0)),
        pl.BlockSpec((1, c5), lambda ni, di: (0, 0)),
    ]

    return pl.pallas_call(
        _tail_kernel,
        out_shape=jax.ShapeDtypeStruct((n, dd, hw, ctot), jnp.float32),
        grid_spec=pltpu.PrefetchScalarGridSpec(
            num_scalar_prefetch=0,
            grid=(n, dd),
            in_specs=x_specs + y_specs + p_specs,
            out_specs=pl.BlockSpec((1, 1, hw, ctot),
                                   lambda ni, di: (ni, di, 0, 0)),
            scratch_shapes=[
                pltpu.VMEM((h + 2, w + 2, cy), jnp.bfloat16),
                pltpu.VMEM((h + 2, w + 2, cin), jnp.bfloat16),
            ],
        ),
        compiler_params=pltpu.CompilerParams(
            dimension_semantics=("parallel", "parallel"),
            vmem_limit_bytes=vmem_limit),
    )(xb5, xb5, xb5, y5, y5, y5, w0, wbd, w5, b0, b12, b5)


# ----------------------------------------------------------------------------
# InceptionBlock
# ----------------------------------------------------------------------------
def inception_block(x_ncdhw, params):
    n, cin, dd, h, w = x_ncdhw.shape
    x = jnp.transpose(x_ncdhw, (0, 2, 3, 4, 1))               # NDHWC

    def fold_1x1(p):
        wt, gamma, beta, mean, var = p
        cout = wt.shape[0]
        scale, bias = _bn_fold(gamma, beta, mean, var)
        wmat = (wt.reshape(cout, -1).T * scale).astype(jnp.bfloat16)
        return wmat, bias.reshape(1, cout).astype(jnp.float32)

    def fold_3x3(p):
        wt, gamma, beta, mean, var = p
        cout = wt.shape[0]
        scale, bias = _bn_fold(gamma, beta, mean, var)
        wt = jnp.transpose(wt, (2, 3, 4, 1, 0)) * scale       # (3,3,3,Cin,Cout)
        return wt, bias.reshape(1, cout).astype(jnp.float32)

    w1a, b1a = fold_1x1(params["b1a"])
    w2a, b2a = fold_1x1(params["b2a"])
    wy = jnp.concatenate([w1a, w2a], axis=1)                  # (Cin, C1+C3)
    by = jnp.concatenate([b1a, b2a], axis=1)                  # (1, C1+C3)

    w0, b0 = fold_1x1(params["b0"])
    w5, b5 = fold_1x1(params["b3b"])

    w1b, bias1 = fold_3x3(params["b1b"])
    w2b, bias2 = fold_3x3(params["b2b"])
    c1, c2 = w1b.shape[3], w1b.shape[4]
    c3, c4 = w2b.shape[3], w2b.shape[4]
    wbd = jnp.zeros((3, 3, 3, c1 + c3, c2 + c4), jnp.float32)
    wbd = wbd.at[:, :, :, :c1, :c2].set(w1b)
    wbd = wbd.at[:, :, :, c1:, c2:].set(w2b)
    wbd = wbd.reshape(27, c1 + c3, c2 + c4).astype(jnp.bfloat16)
    b12 = jnp.concatenate([bias1, bias2], axis=1)             # (1, C2+C4)

    # Kernel A: y1a|y2a (bf16) + bf16 cast of x.
    ycat2d, xb2d = _head_call(x.reshape(-1, cin), wy, by)
    y5 = ycat2d.reshape(n, dd, h, w, c1 + c3)
    xb5 = xb2d.reshape(n, dd, h, w, cin)

    # Kernel B: all four branches -> one concatenated channel-minor slab.
    out = _tail_call(xb5, y5, w0, wbd, w5, b0, b12, b5)
    ctot = out.shape[-1]
    out = out.reshape(n, dd, h, w, ctot)
    return jnp.transpose(out, (0, 4, 1, 2, 3))                # back to NCDHW


def make_conv_params(key, cin, cout, k):
    kw_key, g_key, b_key, m_key, v_key = jax.random.split(key, 5)
    w = jax.random.normal(kw_key, (cout, cin) + k, jnp.float32) * 0.1
    gamma = 1.0 + 0.1 * jax.random.normal(g_key, (cout,), jnp.float32)
    beta = 0.1 * jax.random.normal(b_key, (cout,), jnp.float32)
    mean = 0.1 * jax.random.normal(m_key, (cout,), jnp.float32)
    var = jnp.abs(jax.random.normal(v_key, (cout,), jnp.float32)) * 0.1 + 0.9
    return (w, gamma, beta, mean, var)


def init_inception_block(key, in_channels, out_channels):
    ks = jax.random.split(key, 6)
    return {
        "b0": make_conv_params(ks[0], in_channels, out_channels[0], (1, 1, 1)),
        "b1a": make_conv_params(ks[1], in_channels, out_channels[1], (1, 1, 1)),
        "b1b": make_conv_params(ks[2], out_channels[1], out_channels[2], (3, 3, 3)),
        "b2a": make_conv_params(ks[3], in_channels, out_channels[3], (1, 1, 1)),
        "b2b": make_conv_params(ks[4], out_channels[3], out_channels[4], (3, 3, 3)),
        "b3b": make_conv_params(ks[5], in_channels, out_channels[5], (1, 1, 1)),
    }


# ----------------------------------------------------------------------------
# Pure-JAX f32 reference (self-check; loose tol because of bf16 MXU operands)
# ----------------------------------------------------------------------------
def _ref_conv_block(x, w, gamma, beta, mean, var):
    cout, cin, kd, kh, kw = w.shape
    pad = [(0, 0)] + [((k - 1) // 2, k - 1 - (k - 1) // 2) for k in (kd, kh, kw)] + [(0, 0)]
    xp = jnp.pad(x, pad)
    n, d, h, wd, _ = x.shape
    acc = jnp.zeros((n, d, h, wd, cout), jnp.float32)
    for a in range(kd):
        for b in range(kh):
            for c in range(kw):
                win = xp[:, a:a + d, b:b + h, c:c + wd, :]
                acc = acc + jnp.einsum("ndhwc,oc->ndhwo", win, w[:, :, a, b, c])
    scale = gamma / jnp.sqrt(var + BN_EPS)
    return jnp.maximum(acc * scale + (beta - mean * scale), 0.0)


def _ref_maxpool(x):
    n, d, h, wd, c = x.shape
    xp = jnp.pad(x, ((0, 0), (1, 1), (1, 1), (1, 1), (0, 0)))
    out = None
    for a in range(3):
        for b in range(3):
            for cc in range(3):
                tap = xp[:, a:a + d, b:b + h, cc:cc + wd, :]
                out = tap if out is None else jnp.maximum(out, tap)
    return out


def _ref_inception(x_ncdhw, params):
    x = jnp.transpose(x_ncdhw, (0, 2, 3, 4, 1))
    b0 = _ref_conv_block(x, *params["b0"])
    b1 = _ref_conv_block(_ref_conv_block(x, *params["b1a"]), *params["b1b"])
    b2 = _ref_conv_block(_ref_conv_block(x, *params["b2a"]), *params["b2b"])
    b3 = _ref_conv_block(_ref_maxpool(x), *params["b3b"])
    out = jnp.concatenate([b0, b1, b2, b3], axis=-1)
    return jnp.transpose(out, (0, 4, 1, 2, 3))


if __name__ == "__main__":
    key = jax.random.PRNGKey(0)
    kx, kp = jax.random.split(key)

    in_channels = 8
    out_channels = [8, 8, 16, 8, 16, 8]
    N, D, H, W = 2, 4, 8, 8

    x = jax.random.normal(kx, (N, in_channels, D, H, W), jnp.float32)
    params = init_inception_block(kp, in_channels, out_channels)

    fn = jax.jit(inception_block)
    out = fn(x, params)
    jax.block_until_ready(out)

    expected_c = out_channels[0] + out_channels[2] + out_channels[4] + out_channels[5]
    assert out.shape == (N, expected_c, D, H, W), out.shape
    assert bool(jnp.all(jnp.isfinite(out)))

    # Self-check against the f32 reference (bf16 MXU operands -> loose tolerance).
    ref = _ref_inception(x, params)
    max_err = float(jnp.max(jnp.abs(out - ref)))
    assert max_err < 1e-1, max_err

    print("KERNEL_OK")
</pallas_src>

<mosaic_0001>
module attributes {stable_mosaic.version = 11 : i64} {
  func.func @_head_kernel(%arg0: i32, %arg1: memref<512x8xf32, #tpu.memory_space<vmem>>, %arg2: memref<8x16xbf16, #tpu.memory_space<vmem>>, %arg3: memref<1x16xf32, #tpu.memory_space<vmem>>, %arg4: memref<512x16xbf16, #tpu.memory_space<vmem>>, %arg5: memref<512x8xbf16, #tpu.memory_space<vmem>>) attributes {dimension_semantics = [#tpu.dimension_semantics<parallel>], iteration_bounds = array<i64: 1>, scalar_prefetch = 0 : i64, scratch_operands = 0 : i64, tpu.core_type = #tpu.core_type<tc>, window_params = [{transform_indices = @transform_0, window_bounds = array<i64: 512, 8>}, {pipeline_mode = #tpu.pipeline_mode<synchronous>, transform_indices = @transform_1, window_bounds = array<i64: 8, 16>}, {pipeline_mode = #tpu.pipeline_mode<synchronous>, transform_indices = @transform_2, window_bounds = array<i64: 1, 16>}, {transform_indices = @transform_3, window_bounds = array<i64: 512, 16>}, {transform_indices = @transform_4, window_bounds = array<i64: 512, 8>}]} {
    %c0 = arith.constant 0 : index
    %c0_0 = arith.constant 0 : index
    %0 = vector.load %arg1[%c0, %c0_0] : memref<512x8xf32, #tpu.memory_space<vmem>>, vector<512x8xf32>
    %1 = arith.truncf %0 : vector<512x8xf32> to vector<512x8xbf16>
    %c0_1 = arith.constant 0 : index
    %c0_2 = arith.constant 0 : index
    %2 = vector.load %arg5[%c0_1, %c0_2] : memref<512x8xbf16, #tpu.memory_space<vmem>>, vector<512x8xbf16>
    tpu.vector_store %arg5[%c0_1, %c0_2], %1 {strides = array<i32>} : memref<512x8xbf16, #tpu.memory_space<vmem>>, vector<512x8xbf16>,
    %c0_3 = arith.constant 0 : index
    %c0_4 = arith.constant 0 : index
    %3 = vector.load %arg2[%c0_3, %c0_4] : memref<8x16xbf16, #tpu.memory_space<vmem>>, vector<8x16xbf16>
    %cst = arith.constant dense<0.000000e+00> : vector<512x16xf32>
    %4 = tpu.matmul %1, %3, %cst {dimension_numbers = #tpu.dot_dimension_numbers<[1], [0], [0], [1], [0, 0, 1, 1], [], []>} : vector<512x8xbf16>, vector<8x16xbf16>, vector<512x16xf32> -> vector<512x16xf32>
    %c0_5 = arith.constant 0 : index
    %c0_6 = arith.constant 0 : index
    %5 = vector.load %arg3[%c0_5, %c0_6] : memref<1x16xf32, #tpu.memory_space<vmem>>, vector<1x16xf32>
    %6 = vector.broadcast %5 : vector<1x16xf32> to vector<512x16xf32>
    %7 = arith.addf %4, %6 : vector<512x16xf32>
    %cst_7 = arith.constant 0.000000e+00 : f32
    %8 = vector.broadcast %cst_7 : f32 to vector<512x16xf32>
    %9 = arith.maximumf %7, %8 : vector<512x16xf32>
    %10 = arith.truncf %9 : vector<512x16xf32> to vector<512x16xbf16>
    %c0_8 = arith.constant 0 : index
    %c0_9 = arith.constant 0 : index
    %11 = vector.load %arg4[%c0_8, %c0_9] : memref<512x16xbf16, #tpu.memory_space<vmem>>, vector<512x16xbf16>
    tpu.vector_store %arg4[%c0_8, %c0_9], %10 {strides = array<i32>} : memref<512x16xbf16, #tpu.memory_space<vmem>>, vector<512x16xbf16>,
    return
  }
  func.func @transform_0(%arg0: i32) -> (i32, i32) {
    %c0_i32 = arith.constant 0 : i32
    %c0_i32_0 = arith.constant 0 : i32
    return %arg0, %c0_i32 : i32, i32
  }
  func.func @transform_1(%arg0: i32) -> (i32, i32) {
    %c0_i32 = arith.constant 0 : i32
    %c0_i32_0 = arith.constant 0 : i32
    %c0_i32_1 = arith.constant 0 : i32
    return %c0_i32, %c0_i32_0 : i32, i32
  }
  func.func @transform_2(%arg0: i32) -> (i32, i32) {
    %c0_i32 = arith.constant 0 : i32
    %c0_i32_0 = arith.constant 0 : i32
    %c0_i32_1 = arith.constant 0 : i32
    return %c0_i32, %c0_i32_0 : i32, i32
  }
  func.func @transform_3(%arg0: i32) -> (i32, i32) {
    %c0_i32 = arith.constant 0 : i32
    %c0_i32_0 = arith.constant 0 : i32
    return %arg0, %c0_i32 : i32, i32
  }
  func.func @transform_4(%arg0: i32) -> (i32, i32) {
    %c0_i32 = arith.constant 0 : i32
    %c0_i32_0 = arith.constant 0 : i32
    return %arg0, %c0_i32 : i32, i32
  }
}

module attributes {stable_mosaic.version = 11 : i64} {
  func.func @_tail_kernel(%arg0: i32, %arg1: i32, %arg2: memref<1x1x8x8x8xbf16, #tpu.memory_space<vmem>>, %arg3: memref<1x1x8x8x8xbf16, #tpu.memory_space<vmem>>, %arg4: memref<1x1x8x8x8xbf16, #tpu.memory_space<vmem>>, %arg5: memref<1x1x8x8x16xbf16, #tpu.memory_space<vmem>>, %arg6: memref<1x1x8x8x16xbf16, #tpu.memory_space<vmem>>, %arg7: memref<1x1x8x8x16xbf16, #tpu.memory_space<vmem>>, %arg8: memref<8x8xbf16, #tpu.memory_space<vmem>>, %arg9: memref<27x16x32xbf16, #tpu.memory_space<vmem>>, %arg10: memref<8x8xbf16, #tpu.memory_space<vmem>>, %arg11: memref<1x8xf32, #tpu.memory_space<vmem>>, %arg12: memref<1x32xf32, #tpu.memory_space<vmem>>, %arg13: memref<1x8xf32, #tpu.memory_space<vmem>>, %arg14: memref<1x1x64x48xf32, #tpu.memory_space<vmem>>, %arg15: memref<10x10x16xbf16, #tpu.memory_space<vmem>>, %arg16: memref<10x10x8xbf16, #tpu.memory_space<vmem>>) attributes {dimension_semantics = [#tpu.dimension_semantics<parallel>, #tpu.dimension_semantics<parallel>], iteration_bounds = array<i64: 2, 4>, scalar_prefetch = 0 : i64, scratch_operands = 2 : i64, tpu.core_type = #tpu.core_type<tc>, window_params = [{transform_indices = @transform_0, window_bounds = array<i64: 1, 1, 8, 8, 8>}, {transform_indices = @transform_1, window_bounds = array<i64: 1, 1, 8, 8, 8>}, {transform_indices = @transform_2, window_bounds = array<i64: 1, 1, 8, 8, 8>}, {transform_indices = @transform_3, window_bounds = array<i64: 1, 1, 8, 8, 16>}, {transform_indices = @transform_4, window_bounds = array<i64: 1, 1, 8, 8, 16>}, {transform_indices = @transform_5, window_bounds = array<i64: 1, 1, 8, 8, 16>}, {pipeline_mode = #tpu.pipeline_mode<synchronous>, transform_indices = @transform_6, window_bounds = array<i64: 8, 8>}, {pipeline_mode = #tpu.pipeline_mode<synchronous>, transform_indices = @transform_7, window_bounds = array<i64: 27, 16, 32>}, {pipeline_mode = #tpu.pipeline_mode<synchronous>, transform_indices = @transform_8, window_bounds = array<i64: 8, 8>}, {pipeline_mode = #tpu.pipeline_mode<synchronous>, transform_indices = @transform_9, window_bounds = array<i64: 1, 8>}, {pipeline_mode = #tpu.pipeline_mode<synchronous>, transform_indices = @transform_10, window_bounds = array<i64: 1, 32>}, {pipeline_mode = #tpu.pipeline_mode<synchronous>, transform_indices = @transform_11, window_bounds = array<i64: 1, 8>}, {transform_indices = @transform_12, window_bounds = array<i64: 1, 1, 64, 48>}]} {
    %c0_i32 = arith.constant 0 : i32
    %0 = arith.cmpi sgt, %arg1, %c0_i32 : i32
    %1 = arith.extui %0 : i1 to i32
    %2 = arith.sitofp %1 : i32 to f32
    %3 = arith.truncf %2 : f32 to bf16
    %c3_i32 = arith.constant 3 : i32
    %4 = arith.cmpi slt, %arg1, %c3_i32 : i32
    %5 = arith.extui %4 : i1 to i32
    %6 = arith.sitofp %5 : i32 to f32
    %7 = arith.truncf %6 : f32 to bf16
    %c0 = arith.constant 0 : index
    %c0_0 = arith.constant 0 : index
    %c0_1 = arith.constant 0 : index
    %c0_2 = arith.constant 0 : index
    %c0_3 = arith.constant 0 : index
    %8 = vector.load %arg3[%c0, %c0_0, %c0_1, %c0_2, %c0_3] : memref<1x1x8x8x8xbf16, #tpu.memory_space<vmem>>, vector<1x1x8x8x8xbf16>
    %9 = vector.shape_cast %8 : vector<1x1x8x8x8xbf16> to vector<8x8x8xbf16>
    %10 = vector.shape_cast %9 : vector<8x8x8xbf16> to vector<64x8xbf16>
    %c0_4 = arith.constant 0 : index
    %c0_5 = arith.constant 0 : index
    %11 = vector.load %arg8[%c0_4, %c0_5] : memref<8x8xbf16, #tpu.memory_space<vmem>>, vector<8x8xbf16>
    %cst = arith.constant dense<0.000000e+00> : vector<64x8xf32>
    %12 = tpu.matmul %10, %11, %cst {dimension_numbers = #tpu.dot_dimension_numbers<[1], [0], [0], [1], [0, 0, 1, 1], [], []>} : vector<64x8xbf16>, vector<8x8xbf16>, vector<64x8xf32> -> vector<64x8xf32>
    %c0_6 = arith.constant 0 : index
    %c0_7 = arith.constant 0 : index
    %13 = vector.load %arg11[%c0_6, %c0_7] : memref<1x8xf32, #tpu.memory_space<vmem>>, vector<1x8xf32>
    %14 = vector.broadcast %13 : vector<1x8xf32> to vector<64x8xf32>
    %15 = arith.addf %12, %14 : vector<64x8xf32>
    %cst_8 = arith.constant 0.000000e+00 : f32
    %16 = vector.broadcast %cst_8 : f32 to vector<64x8xf32>
    %17 = arith.maximumf %15, %16 : vector<64x8xf32>
    %c0_9 = arith.constant 0 : index
    %c0_10 = arith.constant 0 : index
    %c0_11 = arith.constant 0 : index
    %c0_12 = arith.constant 0 : index
    %18 = vector.load %arg14[%c0_9, %c0_10, %c0_11, %c0_12] : memref<1x1x64x48xf32, #tpu.memory_space<vmem>>, vector<1x1x64x8xf32>
    %19 = vector.shape_cast %18 : vector<1x1x64x8xf32> to vector<64x8xf32>
    %20 = vector.shape_cast %17 : vector<64x8xf32> to vector<1x1x64x8xf32>
    tpu.vector_store %arg14[%c0_9, %c0_10, %c0_11, %c0_12], %20 {strides = array<i32>} : memref<1x1x64x48xf32, #tpu.memory_space<vmem>>, vector<1x1x64x8xf32>,
    %c0_13 = arith.constant 0 : index
    %c0_14 = arith.constant 0 : index
    %c0_15 = arith.constant 0 : index
    %c0_16 = arith.constant 0 : index
    %c0_17 = arith.constant 0 : index
    %21 = vector.load %arg5[%c0_13, %c0_14, %c0_15, %c0_16, %c0_17] : memref<1x1x8x8x16xbf16, #tpu.memory_space<vmem>>, vector<1x1x8x8x16xbf16>
    %22 = vector.shape_cast %21 : vector<1x1x8x8x16xbf16> to vector<8x8x16xbf16>
    %23 = vector.broadcast %3 : bf16 to vector<8x8x16xbf16>
    %24 = arith.mulf %22, %23 : vector<8x8x16xbf16>
    %c0_18 = arith.constant 0 : index
    %c0_19 = arith.constant 0 : index
    %c0_20 = arith.constant 0 : index
    %c0_21 = arith.constant 0 : index
    %c0_22 = arith.constant 0 : index
    %25 = vector.load %arg6[%c0_18, %c0_19, %c0_20, %c0_21, %c0_22] : memref<1x1x8x8x16xbf16, #tpu.memory_space<vmem>>, vector<1x1x8x8x16xbf16>
    %26 = vector.shape_cast %25 : vector<1x1x8x8x16xbf16> to vector<8x8x16xbf16>
    %c0_23 = arith.constant 0 : index
    %c0_24 = arith.constant 0 : index
    %c0_25 = arith.constant 0 : index
    %c0_26 = arith.constant 0 : index
    %c0_27 = arith.constant 0 : index
    %27 = vector.load %arg7[%c0_23, %c0_24, %c0_25, %c0_26, %c0_27] : memref<1x1x8x8x16xbf16, #tpu.memory_space<vmem>>, vector<1x1x8x8x16xbf16>
    %28 = vector.shape_cast %27 : vector<1x1x8x8x16xbf16> to vector<8x8x16xbf16>
    %29 = vector.broadcast %7 : bf16 to vector<8x8x16xbf16>
    %30 = arith.mulf %28, %29 : vector<8x8x16xbf16>
    %cst_28 = arith.constant 0.000000e+00 : bf16
    %31 = vector.broadcast %cst_28 : bf16 to vector<10x10x16xbf16>
    %c0_29 = arith.constant 0 : index
    %c0_30 = arith.constant 0 : index
    %c0_31 = arith.constant 0 : index
    %32 = vector.load %arg15[%c0_29, %c0_30, %c0_31] : memref<10x10x16xbf16, #tpu.memory_space<vmem>>, vector<10x10x16xbf16>
    tpu.vector_store %arg15[%c0_29, %c0_30, %c0_31], %31 {strides = array<i32>} : memref<10x10x16xbf16, #tpu.memory_space<vmem>>, vector<10x10x16xbf16>,
    %cst_32 = arith.constant 0.000000e+00 : f32
    %33 = vector.broadcast %cst_32 : f32 to vector<64x32xf32>
    %c1 = arith.constant 1 : index
    %c1_33 = arith.constant 1 : index
    %c0_34 = arith.constant 0 : index
    %34 = vector.load %arg15[%c1, %c1_33, %c0_34] : memref<10x10x16xbf16, #tpu.memory_space<vmem>>, vector<8x8x16xbf16>
    tpu.vector_store %arg15[%c1, %c1_33, %c0_34], %24 {strides = array<i32>} : memref<10x10x16xbf16, #tpu.memory_space<vmem>>, vector<8x8x16xbf16>,
    %c0_35 = arith.constant 0 : index
    %c0_36 = arith.constant 0 : index
    %c0_37 = arith.constant 0 : index
    %35 = vector.load %arg15[%c0_35, %c0_36, %c0_37] : memref<10x10x16xbf16, #tpu.memory_space<vmem>>, vector<8x8x16xbf16>
    %36 = vector.shape_cast %35 : vector<8x8x16xbf16> to vector<64x16xbf16>
    %c0_38 = arith.constant 0 : index
    %c0_39 = arith.constant 0 : index
    %c0_40 = arith.constant 0 : index
    %37 = vector.load %arg9[%c0_38, %c0_39, %c0_40] : memref<27x16x32xbf16, #tpu.memory_space<vmem>>, vector<1x16x32xbf16>
    %38 = vector.shape_cast %37 : vector<1x16x32xbf16> to vector<16x32xbf16>
    %cst_41 = arith.constant dense<0.000000e+00> : vector<64x32xf32>
    %39 = tpu.matmul %36, %38, %cst_41 {dimension_numbers = #tpu.dot_dimension_numbers<[1], [0], [0], [1], [0, 0, 1, 1], [], []>} : vector<64x16xbf16>, vector<16x32xbf16>, vector<64x32xf32> -> vector<64x32xf32>
    %40 = arith.addf %33, %39 : vector<64x32xf32>
    %c0_42 = arith.constant 0 : index
    %c1_43 = arith.constant 1 : index
    %c0_44 = arith.constant 0 : index
    %41 = vector.load %arg15[%c0_42, %c1_43, %c0_44] : memref<10x10x16xbf16, #tpu.memory_space<vmem>>, vector<8x8x16xbf16>
    %42 = vector.shape_cast %41 : vector<8x8x16xbf16> to vector<64x16xbf16>
    %c1_45 = arith.constant 1 : index
    %c0_46 = arith.constant 0 : index
    %c0_47 = arith.constant 0 : index
    %43 = vector.load %arg9[%c1_45, %c0_46, %c0_47] : memref<27x16x32xbf16, #tpu.memory_space<vmem>>, vector<1x16x32xbf16>
    %44 = vector.shape_cast %43 : vector<1x16x32xbf16> to vector<16x32xbf16>
    %cst_48 = arith.constant dense<0.000000e+00> : vector<64x32xf32>
    %45 = tpu.matmul %42, %44, %cst_48 {dimension_numbers = #tpu.dot_dimension_numbers<[1], [0], [0], [1], [0, 0, 1, 1], [], []>} : vector<64x16xbf16>, vector<16x32xbf16>, vector<64x32xf32> -> vector<64x32xf32>
    %46 = arith.addf %40, %45 : vector<64x32xf32>
    %c0_49 = arith.constant 0 : index
    %c2 = arith.constant 2 : index
    %c0_50 = arith.constant 0 : index
    %47 = vector.load %arg15[%c0_49, %c2, %c0_50] : memref<10x10x16xbf16, #tpu.memory_space<vmem>>, vector<8x8x16xbf16>
    %48 = vector.shape_cast %47 : vector<8x8x16xbf16> to vector<64x16xbf16>
    %c2_51 = arith.constant 2 : index
    %c0_52 = arith.constant 0 : index
    %c0_53 = arith.constant 0 : index
    %49 = vector.load %arg9[%c2_51, %c0_52, %c0_53] : memref<27x16x32xbf16, #tpu.memory_space<vmem>>, vector<1x16x32xbf16>
    %50 = vector.shape_cast %49 : vector<1x16x32xbf16> to vector<16x32xbf16>
    %cst_54 = arith.constant dense<0.000000e+00> : vector<64x32xf32>
    %51 = tpu.matmul %48, %50, %cst_54 {dimension_numbers = #tpu.dot_dimension_numbers<[1], [0], [0], [1], [0, 0, 1, 1], [], []>} : vector<64x16xbf16>, vector<16x32xbf16>, vector<64x32xf32> -> vector<64x32xf32>
    %52 = arith.addf %46, %51 : vector<64x32xf32>
    %c1_55 = arith.constant 1 : index
    %c0_56 = arith.constant 0 : index
    %c0_57 = arith.constant 0 : index
    %53 = vector.load %arg15[%c1_55, %c0_56, %c0_57] : memref<10x10x16xbf16, #tpu.memory_space<vmem>>, vector<8x8x16xbf16>
    %54 = vector.shape_cast %53 : vector<8x8x16xbf16> to vector<64x16xbf16>
    %c3 = arith.constant 3 : index
    %c0_58 = arith.constant 0 : index
    %c0_59 = arith.constant 0 : index
    %55 = vector.load %arg9[%c3, %c0_58, %c0_59] : memref<27x16x32xbf16, #tpu.memory_space<vmem>>, vector<1x16x32xbf16>
    %56 = vector.shape_cast %55 : vector<1x16x32xbf16> to vector<16x32xbf16>
    %cst_60 = arith.constant dense<0.000000e+00> : vector<64x32xf32>
    %57 = tpu.matmul %54, %56, %cst_60 {dimension_numbers = #tpu.dot_dimension_numbers<[1], [0], [0], [1], [0, 0, 1, 1], [], []>} : vector<64x16xbf16>, vector<16x32xbf16>, vector<64x32xf32> -> vector<64x32xf32>
    %58 = arith.addf %52, %57 : vector<64x32xf32>
    %c1_61 = arith.constant 1 : index
    %c1_62 = arith.constant 1 : index
    %c0_63 = arith.constant 0 : index
    %59 = vector.load %arg15[%c1_61, %c1_62, %c0_63] : memref<10x10x16xbf16, #tpu.memory_space<vmem>>, vector<8x8x16xbf16>
    %60 = vector.shape_cast %59 : vector<8x8x16xbf16> to vector<64x16xbf16>
    %c4 = arith.constant 4 : index
    %c0_64 = arith.constant 0 : index
    %c0_65 = arith.constant 0 : index
    %61 = vector.load %arg9[%c4, %c0_64, %c0_65] : memref<27x16x32xbf16, #tpu.memory_space<vmem>>, vector<1x16x32xbf16>
    %62 = vector.shape_cast %61 : vector<1x16x32xbf16> to vector<16x32xbf16>
    %cst_66 = arith.constant dense<0.000000e+00> : vector<64x32xf32>
    %63 = tpu.matmul %60, %62, %cst_66 {dimension_numbers = #tpu.dot_dimension_numbers<[1], [0], [0], [1], [0, 0, 1, 1], [], []>} : vector<64x16xbf16>, vector<16x32xbf16>, vector<64x32xf32> -> vector<64x32xf32>
    %64 = arith.addf %58, %63 : vector<64x32xf32>
    %c1_67 = arith.constant 1 : index
    %c2_68 = arith.constant 2 : index
    %c0_69 = arith.constant 0 : index
    %65 = vector.load %arg15[%c1_67, %c2_68, %c0_69] : memref<10x10x16xbf16, #tpu.memory_space<vmem>>, vector<8x8x16xbf16>
    %66 = vector.shape_cast %65 : vector<8x8x16xbf16> to vector<64x16xbf16>
    %c5 = arith.constant 5 : index
    %c0_70 = arith.constant 0 : index
    %c0_71 = arith.constant 0 : index
    %67 = vector.load %arg9[%c5, %c0_70, %c0_71] : memref<27x16x32xbf16, #tpu.memory_space<vmem>>, vector<1x16x32xbf16>
    %68 = vector.shape_cast %67 : vector<1x16x32xbf16> to vector<16x32xbf16>
    %cst_72 = arith.constant dense<0.000000e+00> : vector<64x32xf32>
    %69 = tpu.matmul %66, %68, %cst_72 {dimension_numbers = #tpu.dot_dimension_numbers<[1], [0], [0], [1], [0, 0, 1, 1], [], []>} : vector<64x16xbf16>, vector<16x32xbf16>, vector<64x32xf32> -> vector<64x32xf32>
    %70 = arith.addf %64, %69 : vector<64x32xf32>
    %c2_73 = arith.constant 2 : index
    %c0_74 = arith.constant 0 : index
    %c0_75 = arith.constant 0 : index
    %71 = vector.load %arg15[%c2_73, %c0_74, %c0_75] : memref<10x10x16xbf16, #tpu.memory_space<vmem>>, vector<8x8x16xbf16>
    %72 = vector.shape_cast %71 : vector<8x8x16xbf16> to vector<64x16xbf16>
    %c6 = arith.constant 6 : index
    %c0_76 = arith.constant 0 : index
    %c0_77 = arith.constant 0 : index
    %73 = vector.load %arg9[%c6, %c0_76, %c0_77] : memref<27x16x32xbf16, #tpu.memory_space<vmem>>, vector<1x16x32xbf16>
    %74 = vector.shape_cast %73 : vector<1x16x32xbf16> to vector<16x32xbf16>
    %cst_78 = arith.constant dense<0.000000e+00> : vector<64x32xf32>
    %75 = tpu.matmul %72, %74, %cst_78 {dimension_numbers = #tpu.dot_dimension_numbers<[1], [0], [0], [1], [0, 0, 1, 1], [], []>} : vector<64x16xbf16>, vector<16x32xbf16>, vector<64x32xf32> -> vector<64x32xf32>
    %76 = arith.addf %70, %75 : vector<64x32xf32>
    %c2_79 = arith.constant 2 : index
    %c1_80 = arith.constant 1 : index
    %c0_81 = arith.constant 0 : index
    %77 = vector.load %arg15[%c2_79, %c1_80, %c0_81] : memref<10x10x16xbf16, #tpu.memory_space<vmem>>, vector<8x8x16xbf16>
    %78 = vector.shape_cast %77 : vector<8x8x16xbf16> to vector<64x16xbf16>
    %c7 = arith.constant 7 : index
    %c0_82 = arith.constant 0 : index
    %c0_83 = arith.constant 0 : index
    %79 = vector.load %arg9[%c7, %c0_82, %c0_83] : memref<27x16x32xbf16, #tpu.memory_space<vmem>>, vector<1x16x32xbf16>
    %80 = vector.shape_cast %79 : vector<1x16x32xbf16> to vector<16x32xbf16>
    %cst_84 = arith.constant dense<0.000000e+00> : vector<64x32xf32>
    %81 = tpu.matmul %78, %80, %cst_84 {dimension_numbers = #tpu.dot_dimension_numbers<[1], [0], [0], [1], [0, 0, 1, 1], [], []>} : vector<64x16xbf16>, vector<16x32xbf16>, vector<64x32xf32> -> vector<64x32xf32>
    %82 = arith.addf %76, %81 : vector<64x32xf32>
    %c2_85 = arith.constant 2 : index
    %c2_86 = arith.constant 2 : index
    %c0_87 = arith.constant 0 : index
    %83 = vector.load %arg15[%c2_85, %c2_86, %c0_87] : memref<10x10x16xbf16, #tpu.memory_space<vmem>>, vector<8x8x16xbf16>
    %84 = vector.shape_cast %83 : vector<8x8x16xbf16> to vector<64x16xbf16>
    %c8 = arith.constant 8 : index
    %c0_88 = arith.constant 0 : index
    %c0_89 = arith.constant 0 : index
    %85 = vector.load %arg9[%c8, %c0_88, %c0_89] : memref<27x16x32xbf16, #tpu.memory_space<vmem>>, vector<1x16x32xbf16>
    %86 = vector.shape_cast %85 : vector<1x16x32xbf16> to vector<16x32xbf16>
    %cst_90 = arith.constant dense<0.000000e+00> : vector<64x32xf32>
    %87 = tpu.matmul %84, %86, %cst_90 {dimension_numbers = #tpu.dot_dimension_numbers<[1], [0], [0], [1], [0, 0, 1, 1], [], []>} : vector<64x16xbf16>, vector<16x32xbf16>, vector<64x32xf32> -> vector<64x32xf32>
    %88 = arith.addf %82, %87 : vector<64x32xf32>
    %c1_91 = arith.constant 1 : index
    %c1_92 = arith.constant 1 : index
    %c0_93 = arith.constant 0 : index
    %89 = vector.load %arg15[%c1_91, %c1_92, %c0_93] : memref<10x10x16xbf16, #tpu.memory_space<vmem>>, vector<8x8x16xbf16>
    tpu.vector_store %arg15[%c1_91, %c1_92, %c0_93], %26 {strides = array<i32>} : memref<10x10x16xbf16, #tpu.memory_space<vmem>>, vector<8x8x16xbf16>,
    %c0_94 = arith.constant 0 : index
    %c0_95 = arith.constant 0 : index
    %c0_96 = arith.constant 0 : index
    %90 = vector.load %arg15[%c0_94, %c0_95, %c0_96] : memref<10x10x16xbf16, #tpu.memory_space<vmem>>, vector<8x8x16xbf16>
    %91 = vector.shape_cast %90 : vector<8x8x16xbf16> to vector<64x16xbf16>
    %c9 = arith.constant 9 : index
    %c0_97 = arith.constant 0 : index
    %c0_98 = arith.constant 0 : index
    %92 = vector.load %arg9[%c9, %c0_97, %c0_98] : memref<27x16x32xbf16, #tpu.memory_space<vmem>>, vector<1x16x32xbf16>
    %93 = vector.shape_cast %92 : vector<1x16x32xbf16> to vector<16x32xbf16>
    %cst_99 = arith.constant dense<0.000000e+00> : vector<64x32xf32>
    %94 = tpu.matmul %91, %93, %cst_99 {dimension_numbers = #tpu.dot_dimension_numbers<[1], [0], [0], [1], [0, 0, 1, 1], [], []>} : vector<64x16xbf16>, vector<16x32xbf16>, vector<64x32xf32> -> vector<64x32xf32>
    %95 = arith.addf %88, %94 : vector<64x32xf32>
    %c0_100 = arith.constant 0 : index
    %c1_101 = arith.constant 1 : index
    %c0_102 = arith.constant 0 : index
    %96 = vector.load %arg15[%c0_100, %c1_101, %c0_102] : memref<10x10x16xbf16, #tpu.memory_space<vmem>>, vector<8x8x16xbf16>
    %97 = vector.shape_cast %96 : vector<8x8x16xbf16> to vector<64x16xbf16>
    %c10 = arith.constant 10 : index
    %c0_103 = arith.constant 0 : index
    %c0_104 = arith.constant 0 : index
    %98 = vector.load %arg9[%c10, %c0_103, %c0_104] : memref<27x16x32xbf16, #tpu.memory_space<vmem>>, vector<1x16x32xbf16>
    %99 = vector.shape_cast %98 : vector<1x16x32xbf16> to vector<16x32xbf16>
    %cst_105 = arith.constant dense<0.000000e+00> : vector<64x32xf32>
    %100 = tpu.matmul %97, %99, %cst_105 {dimension_numbers = #tpu.dot_dimension_numbers<[1], [0], [0], [1], [0, 0, 1, 1], [], []>} : vector<64x16xbf16>, vector<16x32xbf16>, vector<64x32xf32> -> vector<64x32xf32>
    %101 = arith.addf %95, %100 : vector<64x32xf32>
    %c0_106 = arith.constant 0 : index
    %c2_107 = arith.constant 2 : index
    %c0_108 = arith.constant 0 : index
    %102 = vector.load %arg15[%c0_106, %c2_107, %c0_108] : memref<10x10x16xbf16, #tpu.memory_space<vmem>>, vector<8x8x16xbf16>
    %103 = vector.shape_cast %102 : vector<8x8x16xbf16> to vector<64x16xbf16>
    %c11 = arith.constant 11 : index
    %c0_109 = arith.constant 0 : index
    %c0_110 = arith.constant 0 : index
    %104 = vector.load %arg9[%c11, %c0_109, %c0_110] : memref<27x16x32xbf16, #tpu.memory_space<vmem>>, vector<1x16x32xbf16>
    %105 = vector.shape_cast %104 : vector<1x16x32xbf16> to vector<16x32xbf16>
    %cst_111 = arith.constant dense<0.000000e+00> : vector<64x32xf32>
    %106 = tpu.matmul %103, %105, %cst_111 {dimension_numbers = #tpu.dot_dimension_numbers<[1], [0], [0], [1], [0, 0, 1, 1], [], []>} : vector<64x16xbf16>, vector<16x32xbf16>, vector<64x32xf32> -> vector<64x32xf32>
    %107 = arith.addf %101, %106 : vector<64x32xf32>
    %c1_112 = arith.constant 1 : index
    %c0_113 = arith.constant 0 : index
    %c0_114 = arith.constant 0 : index
    %108 = vector.load %arg15[%c1_112, %c0_113, %c0_114] : memref<10x10x16xbf16, #tpu.memory_space<vmem>>, vector<8x8x16xbf16>
    %109 = vector.shape_cast %108 : vector<8x8x16xbf16> to vector<64x16xbf16>
    %c12 = arith.constant 12 : index
    %c0_115 = arith.constant 0 : index
    %c0_116 = arith.constant 0 : index
    %110 = vector.load %arg9[%c12, %c0_115, %c0_116] : memref<27x16x32xbf16, #tpu.memory_space<vmem>>, vector<1x16x32xbf16>
    %111 = vector.shape_cast %110 : vector<1x16x32xbf16> to vector<16x32xbf16>
    %cst_117 = arith.constant dense<0.000000e+00> : vector<64x32xf32>
    %112 = tpu.matmul %109, %111, %cst_117 {dimension_numbers = #tpu.dot_dimension_numbers<[1], [0], [0], [1], [0, 0, 1, 1], [], []>} : vector<64x16xbf16>, vector<16x32xbf16>, vector<64x32xf32> -> vector<64x32xf32>
    %113 = arith.addf %107, %112 : vector<64x32xf32>
    %c1_118 = arith.constant 1 : index
    %c1_119 = arith.constant 1 : index
    %c0_120 = arith.constant 0 : index
    %114 = vector.load %arg15[%c1_118, %c1_119, %c0_120] : memref<10x10x16xbf16, #tpu.memory_space<vmem>>, vector<8x8x16xbf16>
    %115 = vector.shape_cast %114 : vector<8x8x16xbf16> to vector<64x16xbf16>
    %c13 = arith.constant 13 : index
    %c0_121 = arith.constant 0 : index
    %c0_122 = arith.constant 0 : index
    %116 = vector.load %arg9[%c13, %c0_121, %c0_122] : memref<27x16x32xbf16, #tpu.memory_space<vmem>>, vector<1x16x32xbf16>
    %117 = vector.shape_cast %116 : vector<1x16x32xbf16> to vector<16x32xbf16>
    %cst_123 = arith.constant dense<0.000000e+00> : vector<64x32xf32>
    %118 = tpu.matmul %115, %117, %cst_123 {dimension_numbers = #tpu.dot_dimension_numbers<[1], [0], [0], [1], [0, 0, 1, 1], [], []>} : vector<64x16xbf16>, vector<16x32xbf16>, vector<64x32xf32> -> vector<64x32xf32>
    %119 = arith.addf %113, %118 : vector<64x32xf32>
    %c1_124 = arith.constant 1 : index
    %c2_125 = arith.constant 2 : index
    %c0_126 = arith.constant 0 : index
    %120 = vector.load %arg15[%c1_124, %c2_125, %c0_126] : memref<10x10x16xbf16, #tpu.memory_space<vmem>>, vector<8x8x16xbf16>
    %121 = vector.shape_cast %120 : vector<8x8x16xbf16> to vector<64x16xbf16>
    %c14 = arith.constant 14 : index
    %c0_127 = arith.constant 0 : index
    %c0_128 = arith.constant 0 : index
    %122 = vector.load %arg9[%c14, %c0_127, %c0_128] : memref<27x16x32xbf16, #tpu.memory_space<vmem>>, vector<1x16x32xbf16>
    %123 = vector.shape_cast %122 : vector<1x16x32xbf16> to vector<16x32xbf16>
    %cst_129 = arith.constant dense<0.000000e+00> : vector<64x32xf32>
    %124 = tpu.matmul %121, %123, %cst_129 {dimension_numbers = #tpu.dot_dimension_numbers<[1], [0], [0], [1], [0, 0, 1, 1], [], []>} : vector<64x16xbf16>, vector<16x32xbf16>, vector<64x32xf32> -> vector<64x32xf32>
    %125 = arith.addf %119, %124 : vector<64x32xf32>
    %c2_130 = arith.constant 2 : index
    %c0_131 = arith.constant 0 : index
    %c0_132 = arith.constant 0 : index
    %126 = vector.load %arg15[%c2_130, %c0_131, %c0_132] : memref<10x10x16xbf16, #tpu.memory_space<vmem>>, vector<8x8x16xbf16>
    %127 = vector.shape_cast %126 : vector<8x8x16xbf16> to vector<64x16xbf16>
    %c15 = arith.constant 15 : index
    %c0_133 = arith.constant 0 : index
    %c0_134 = arith.constant 0 : index
    %128 = vector.load %arg9[%c15, %c0_133, %c0_134] : memref<27x16x32xbf16, #tpu.memory_space<vmem>>, vector<1x16x32xbf16>
    %129 = vector.shape_cast %128 : vector<1x16x32xbf16> to vector<16x32xbf16>
    %cst_135 = arith.constant dense<0.000000e+00> : vector<64x32xf32>
    %130 = tpu.matmul %127, %129, %cst_135 {dimension_numbers = #tpu.dot_dimension_numbers<[1], [0], [0], [1], [0, 0, 1, 1], [], []>} : vector<64x16xbf16>, vector<16x32xbf16>, vector<64x32xf32> -> vector<64x32xf32>
    %131 = arith.addf %125, %130 : vector<64x32xf32>
    %c2_136 = arith.constant 2 : index
    %c1_137 = arith.constant 1 : index
    %c0_138 = arith.constant 0 : index
    %132 = vector.load %arg15[%c2_136, %c1_137, %c0_138] : memref<10x10x16xbf16, #tpu.memory_space<vmem>>, vector<8x8x16xbf16>
    %133 = vector.shape_cast %132 : vector<8x8x16xbf16> to vector<64x16xbf16>
    %c16 = arith.constant 16 : index
    %c0_139 = arith.constant 0 : index
    %c0_140 = arith.constant 0 : index
    %134 = vector.load %arg9[%c16, %c0_139, %c0_140] : memref<27x16x32xbf16, #tpu.memory_space<vmem>>, vector<1x16x32xbf16>
    %135 = vector.shape_cast %134 : vector<1x16x32xbf16> to vector<16x32xbf16>
    %cst_141 = arith.constant dense<0.000000e+00> : vector<64x32xf32>
    %136 = tpu.matmul %133, %135, %cst_141 {dimension_numbers = #tpu.dot_dimension_numbers<[1], [0], [0], [1], [0, 0, 1, 1], [], []>} : vector<64x16xbf16>, vector<16x32xbf16>, vector<64x32xf32> -> vector<64x32xf32>
    %137 = arith.addf %131, %136 : vector<64x32xf32>
    %c2_142 = arith.constant 2 : index
    %c2_143 = arith.constant 2 : index
    %c0_144 = arith.constant 0 : index
    %138 = vector.load %arg15[%c2_142, %c2_143, %c0_144] : memref<10x10x16xbf16, #tpu.memory_space<vmem>>, vector<8x8x16xbf16>
    %139 = vector.shape_cast %138 : vector<8x8x16xbf16> to vector<64x16xbf16>
    %c17 = arith.constant 17 : index
    %c0_145 = arith.constant 0 : index
    %c0_146 = arith.constant 0 : index
    %140 = vector.load %arg9[%c17, %c0_145, %c0_146] : memref<27x16x32xbf16, #tpu.memory_space<vmem>>, vector<1x16x32xbf16>
    %141 = vector.shape_cast %140 : vector<1x16x32xbf16> to vector<16x32xbf16>
    %cst_147 = arith.constant dense<0.000000e+00> : vector<64x32xf32>
    %142 = tpu.matmul %139, %141, %cst_147 {dimension_numbers = #tpu.dot_dimension_numbers<[1], [0], [0], [1], [0, 0, 1, 1], [], []>} : vector<64x16xbf16>, vector<16x32xbf16>, vector<64x32xf32> -> vector<64x32xf32>
    %143 = arith.addf %137, %142 : vector<64x32xf32>
    %c1_148 = arith.constant 1 : index
    %c1_149 = arith.constant 1 : index
    %c0_150 = arith.constant 0 : index
    %144 = vector.load %arg15[%c1_148, %c1_149, %c0_150] : memref<10x10x16xbf16, #tpu.memory_space<vmem>>, vector<8x8x16xbf16>
    tpu.vector_store %arg15[%c1_148, %c1_149, %c0_150], %30 {strides = array<i32>} : memref<10x10x16xbf16, #tpu.memory_space<vmem>>, vector<8x8x16xbf16>,
    %c0_151 = arith.constant 0 : index
    %c0_152 = arith.constant 0 : index
    %c0_153 = arith.constant 0 : index
    %145 = vector.load %arg15[%c0_151, %c0_152, %c0_153] : memref<10x10x16xbf16, #tpu.memory_space<vmem>>, vector<8x8x16xbf16>
    %146 = vector.shape_cast %145 : vector<8x8x16xbf16> to vector<64x16xbf16>
    %c18 = arith.constant 18 : index
    %c0_154 = arith.constant 0 : index
    %c0_155 = arith.constant 0 : index
    %147 = vector.load %arg9[%c18, %c0_154, %c0_155] : memref<27x16x32xbf16, #tpu.memory_space<vmem>>, vector<1x16x32xbf16>
    %148 = vector.shape_cast %147 : vector<1x16x32xbf16> to vector<16x32xbf16>
    %cst_156 = arith.constant dense<0.000000e+00> : vector<64x32xf32>
    %149 = tpu.matmul %146, %148, %cst_156 {dimension_numbers = #tpu.dot_dimension_numbers<[1], [0], [0], [1], [0, 0, 1, 1], [], []>} : vector<64x16xbf16>, vector<16x32xbf16>, vector<64x32xf32> -> vector<64x32xf32>
    %150 = arith.addf %143, %149 : vector<64x32xf32>
    %c0_157 = arith.constant 0 : index
    %c1_158 = arith.constant 1 : index
    %c0_159 = arith.constant 0 : index
    %151 = vector.load %arg15[%c0_157, %c1_158, %c0_159] : memref<10x10x16xbf16, #tpu.memory_space<vmem>>, vector<8x8x16xbf16>
    %152 = vector.shape_cast %151 : vector<8x8x16xbf16> to vector<64x16xbf16>
    %c19 = arith.constant 19 : index
    %c0_160 = arith.constant 0 : index
    %c0_161 = arith.constant 0 : index
    %153 = vector.load %arg9[%c19, %c0_160, %c0_161] : memref<27x16x32xbf16, #tpu.memory_space<vmem>>, vector<1x16x32xbf16>
    %154 = vector.shape_cast %153 : vector<1x16x32xbf16> to vector<16x32xbf16>
    %cst_162 = arith.constant dense<0.000000e+00> : vector<64x32xf32>
    %155 = tpu.matmul %152, %154, %cst_162 {dimension_numbers = #tpu.dot_dimension_numbers<[1], [0], [0], [1], [0, 0, 1, 1], [], []>} : vector<64x16xbf16>, vector<16x32xbf16>, vector<64x32xf32> -> vector<64x32xf32>
    %156 = arith.addf %150, %155 : vector<64x32xf32>
    %c0_163 = arith.constant 0 : index
    %c2_164 = arith.constant 2 : index
    %c0_165 = arith.constant 0 : index
    %157 = vector.load %arg15[%c0_163, %c2_164, %c0_165] : memref<10x10x16xbf16, #tpu.memory_space<vmem>>, vector<8x8x16xbf16>
    %158 = vector.shape_cast %157 : vector<8x8x16xbf16> to vector<64x16xbf16>
    %c20 = arith.constant 20 : index
    %c0_166 = arith.constant 0 : index
    %c0_167 = arith.constant 0 : index
    %159 = vector.load %arg9[%c20, %c0_166, %c0_167] : memref<27x16x32xbf16, #tpu.memory_space<vmem>>, vector<1x16x32xbf16>
    %160 = vector.shape_cast %159 : vector<1x16x32xbf16> to vector<16x32xbf16>
    %cst_168 = arith.constant dense<0.000000e+00> : vector<64x32xf32>
    %161 = tpu.matmul %158, %160, %cst_168 {dimension_numbers = #tpu.dot_dimension_numbers<[1], [0], [0], [1], [0, 0, 1, 1], [], []>} : vector<64x16xbf16>, vector<16x32xbf16>, vector<64x32xf32> -> vector<64x32xf32>
    %162 = arith.addf %156, %161 : vector<64x32xf32>
    %c1_169 = arith.constant 1 : index
    %c0_170 = arith.constant 0 : index
    %c0_171 = arith.constant 0 : index
    %163 = vector.load %arg15[%c1_169, %c0_170, %c0_171] : memref<10x10x16xbf16, #tpu.memory_space<vmem>>, vector<8x8x16xbf16>
    %164 = vector.shape_cast %163 : vector<8x8x16xbf16> to vector<64x16xbf16>
    %c21 = arith.constant 21 : index
    %c0_172 = arith.constant 0 : index
    %c0_173 = arith.constant 0 : index
    %165 = vector.load %arg9[%c21, %c0_172, %c0_173] : memref<27x16x32xbf16, #tpu.memory_space<vmem>>, vector<1x16x32xbf16>
    %166 = vector.shape_cast %165 : vector<1x16x32xbf16> to vector<16x32xbf16>
    %cst_174 = arith.constant dense<0.000000e+00> : vector<64x32xf32>
    %167 = tpu.matmul %164, %166, %cst_174 {dimension_numbers = #tpu.dot_dimension_numbers<[1], [0], [0], [1], [0, 0, 1, 1], [], []>} : vector<64x16xbf16>, vector<16x32xbf16>, vector<64x32xf32> -> vector<64x32xf32>
    %168 = arith.addf %162, %167 : vector<64x32xf32>
    %c1_175 = arith.constant 1 : index
    %c1_176 = arith.constant 1 : index
    %c0_177 = arith.constant 0 : index
    %169 = vector.load %arg15[%c1_175, %c1_176, %c0_177] : memref<10x10x16xbf16, #tpu.memory_space<vmem>>, vector<8x8x16xbf16>
    %170 = vector.shape_cast %169 : vector<8x8x16xbf16> to vector<64x16xbf16>
    %c22 = arith.constant 22 : index
    %c0_178 = arith.constant 0 : index
    %c0_179 = arith.constant 0 : index
    %171 = vector.load %arg9[%c22, %c0_178, %c0_179] : memref<27x16x32xbf16, #tpu.memory_space<vmem>>, vector<1x16x32xbf16>
    %172 = vector.shape_cast %171 : vector<1x16x32xbf16> to vector<16x32xbf16>
    %cst_180 = arith.constant dense<0.000000e+00> : vector<64x32xf32>
    %173 = tpu.matmul %170, %172, %cst_180 {dimension_numbers = #tpu.dot_dimension_numbers<[1], [0], [0], [1], [0, 0, 1, 1], [], []>} : vector<64x16xbf16>, vector<16x32xbf16>, vector<64x32xf32> -> vector<64x32xf32>
    %174 = arith.addf %168, %173 : vector<64x32xf32>
    %c1_181 = arith.constant 1 : index
    %c2_182 = arith.constant 2 : index
    %c0_183 = arith.constant 0 : index
    %175 = vector.load %arg15[%c1_181, %c2_182, %c0_183] : memref<10x10x16xbf16, #tpu.memory_space<vmem>>, vector<8x8x16xbf16>
    %176 = vector.shape_cast %175 : vector<8x8x16xbf16> to vector<64x16xbf16>
    %c23 = arith.constant 23 : index
    %c0_184 = arith.constant 0 : index
    %c0_185 = arith.constant 0 : index
    %177 = vector.load %arg9[%c23, %c0_184, %c0_185] : memref<27x16x32xbf16, #tpu.memory_space<vmem>>, vector<1x16x32xbf16>
    %178 = vector.shape_cast %177 : vector<1x16x32xbf16> to vector<16x32xbf16>
    %cst_186 = arith.constant dense<0.000000e+00> : vector<64x32xf32>
    %179 = tpu.matmul %176, %178, %cst_186 {dimension_numbers = #tpu.dot_dimension_numbers<[1], [0], [0], [1], [0, 0, 1, 1], [], []>} : vector<64x16xbf16>, vector<16x32xbf16>, vector<64x32xf32> -> vector<64x32xf32>
    %180 = arith.addf %174, %179 : vector<64x32xf32>
    %c2_187 = arith.constant 2 : index
    %c0_188 = arith.constant 0 : index
    %c0_189 = arith.constant 0 : index
    %181 = vector.load %arg15[%c2_187, %c0_188, %c0_189] : memref<10x10x16xbf16, #tpu.memory_space<vmem>>, vector<8x8x16xbf16>
    %182 = vector.shape_cast %181 : vector<8x8x16xbf16> to vector<64x16xbf16>
    %c24 = arith.constant 24 : index
    %c0_190 = arith.constant 0 : index
    %c0_191 = arith.constant 0 : index
    %183 = vector.load %arg9[%c24, %c0_190, %c0_191] : memref<27x16x32xbf16, #tpu.memory_space<vmem>>, vector<1x16x32xbf16>
    %184 = vector.shape_cast %183 : vector<1x16x32xbf16> to vector<16x32xbf16>
    %cst_192 = arith.constant dense<0.000000e+00> : vector<64x32xf32>
    %185 = tpu.matmul %182, %184, %cst_192 {dimension_numbers = #tpu.dot_dimension_numbers<[1], [0], [0], [1], [0, 0, 1, 1], [], []>} : vector<64x16xbf16>, vector<16x32xbf16>, vector<64x32xf32> -> vector<64x32xf32>
    %186 = arith.addf %180, %185 : vector<64x32xf32>
    %c2_193 = arith.constant 2 : index
    %c1_194 = arith.constant 1 : index
    %c0_195 = arith.constant 0 : index
    %187 = vector.load %arg15[%c2_193, %c1_194, %c0_195] : memref<10x10x16xbf16, #tpu.memory_space<vmem>>, vector<8x8x16xbf16>
    %188 = vector.shape_cast %187 : vector<8x8x16xbf16> to vector<64x16xbf16>
    %c25 = arith.constant 25 : index
    %c0_196 = arith.constant 0 : index
    %c0_197 = arith.constant 0 : index
    %189 = vector.load %arg9[%c25, %c0_196, %c0_197] : memref<27x16x32xbf16, #tpu.memory_space<vmem>>, vector<1x16x32xbf16>
    %190 = vector.shape_cast %189 : vector<1x16x32xbf16> to vector<16x32xbf16>
    %cst_198 = arith.constant dense<0.000000e+00> : vector<64x32xf32>
    %191 = tpu.matmul %188, %190, %cst_198 {dimension_numbers = #tpu.dot_dimension_numbers<[1], [0], [0], [1], [0, 0, 1, 1], [], []>} : vector<64x16xbf16>, vector<16x32xbf16>, vector<64x32xf32> -> vector<64x32xf32>
    %192 = arith.addf %186, %191 : vector<64x32xf32>
    %c2_199 = arith.constant 2 : index
    %c2_200 = arith.constant 2 : index
    %c0_201 = arith.constant 0 : index
    %193 = vector.load %arg15[%c2_199, %c2_200, %c0_201] : memref<10x10x16xbf16, #tpu.memory_space<vmem>>, vector<8x8x16xbf16>
    %194 = vector.shape_cast %193 : vector<8x8x16xbf16> to vector<64x16xbf16>
    %c26 = arith.constant 26 : index
    %c0_202 = arith.constant 0 : index
    %c0_203 = arith.constant 0 : index
    %195 = vector.load %arg9[%c26, %c0_202, %c0_203] : memref<27x16x32xbf16, #tpu.memory_space<vmem>>, vector<1x16x32xbf16>
    %196 = vector.shape_cast %195 : vector<1x16x32xbf16> to vector<16x32xbf16>
    %cst_204 = arith.constant dense<0.000000e+00> : vector<64x32xf32>
    %197 = tpu.matmul %194, %196, %cst_204 {dimension_numbers = #tpu.dot_dimension_numbers<[1], [0], [0], [1], [0, 0, 1, 1], [], []>} : vector<64x16xbf16>, vector<16x32xbf16>, vector<64x32xf32> -> vector<64x32xf32>
    %198 = arith.addf %192, %197 : vector<64x32xf32>
    %c0_205 = arith.constant 0 : index
    %c0_206 = arith.constant 0 : index
    %199 = vector.load %arg12[%c0_205, %c0_206] : memref<1x32xf32, #tpu.memory_space<vmem>>, vector<1x32xf32>
    %200 = vector.broadcast %199 : vector<1x32xf32> to vector<64x32xf32>
    %201 = arith.addf %198, %200 : vector<64x32xf32>
    %cst_207 = arith.constant 0.000000e+00 : f32
    %202 = vector.broadcast %cst_207 : f32 to vector<64x32xf32>
    %203 = arith.maximumf %201, %202 : vector<64x32xf32>
    %c0_208 = arith.constant 0 : index
    %c0_209 = arith.constant 0 : index
    %c0_210 = arith.constant 0 : index
    %c8_211 = arith.constant 8 : index
    %204 = vector.load %arg14[%c0_208, %c0_209, %c0_210, %c8_211] : memref<1x1x64x48xf32, #tpu.memory_space<vmem>>, vector<1x1x64x32xf32>
    %205 = vector.shape_cast %204 : vector<1x1x64x32xf32> to vector<64x32xf32>
    %206 = vector.shape_cast %203 : vector<64x32xf32> to vector<1x1x64x32xf32>
    tpu.vector_store %arg14[%c0_208, %c0_209, %c0_210, %c8_211], %206 {strides = array<i32>} : memref<1x1x64x48xf32, #tpu.memory_space<vmem>>, vector<1x1x64x32xf32>,
    %c0_212 = arith.constant 0 : index
    %c0_213 = arith.constant 0 : index
    %c0_214 = arith.constant 0 : index
    %c0_215 = arith.constant 0 : index
    %c0_216 = arith.constant 0 : index
    %207 = vector.load %arg2[%c0_212, %c0_213, %c0_214, %c0_215, %c0_216] : memref<1x1x8x8x8xbf16, #tpu.memory_space<vmem>>, vector<1x1x8x8x8xbf16>
    %208 = vector.shape_cast %207 : vector<1x1x8x8x8xbf16> to vector<8x8x8xbf16>
    %209 = vector.broadcast %3 : bf16 to vector<8x8x8xbf16>
    %210 = arith.mulf %208, %209 : vector<8x8x8xbf16>
    %211 = arith.maximumf %210, %9 : vector<8x8x8xbf16>
    %c0_217 = arith.constant 0 : index
    %c0_218 = arith.constant 0 : index
    %c0_219 = arith.constant 0 : index
    %c0_220 = arith.constant 0 : index
    %c0_221 = arith.constant 0 : index
    %212 = vector.load %arg4[%c0_217, %c0_218, %c0_219, %c0_220, %c0_221] : memref<1x1x8x8x8xbf16, #tpu.memory_space<vmem>>, vector<1x1x8x8x8xbf16>
    %213 = vector.shape_cast %212 : vector<1x1x8x8x8xbf16> to vector<8x8x8xbf16>
    %214 = vector.broadcast %7 : bf16 to vector<8x8x8xbf16>
    %215 = arith.mulf %213, %214 : vector<8x8x8xbf16>
    %216 = arith.maximumf %211, %215 : vector<8x8x8xbf16>
    %cst_222 = arith.constant 0.000000e+00 : bf16
    %217 = vector.broadcast %cst_222 : bf16 to vector<10x10x8xbf16>
    %c0_223 = arith.constant 0 : index
    %c0_224 = arith.constant 0 : index
    %c0_225 = arith.constant 0 : index
    %218 = vector.load %arg16[%c0_223, %c0_224, %c0_225] : memref<10x10x8xbf16, #tpu.memory_space<vmem>>, vector<10x10x8xbf16>
    tpu.vector_store %arg16[%c0_223, %c0_224, %c0_225], %217 {strides = array<i32>} : memref<10x10x8xbf16, #tpu.memory_space<vmem>>, vector<10x10x8xbf16>,
    %c1_226 = arith.constant 1 : index
    %c1_227 = arith.constant 1 : index
    %c0_228 = arith.constant 0 : index
    %219 = vector.load %arg16[%c1_226, %c1_227, %c0_228] : memref<10x10x8xbf16, #tpu.memory_space<vmem>>, vector<8x8x8xbf16>
    tpu.vector_store %arg16[%c1_226, %c1_227, %c0_228], %216 {strides = array<i32>} : memref<10x10x8xbf16, #tpu.memory_space<vmem>>, vector<8x8x8xbf16>,
    %c0_229 = arith.constant 0 : index
    %c0_230 = arith.constant 0 : index
    %c0_231 = arith.constant 0 : index
    %220 = vector.load %arg16[%c0_229, %c0_230, %c0_231] : memref<10x10x8xbf16, #tpu.memory_space<vmem>>, vector<8x8x8xbf16>
    %c0_232 = arith.constant 0 : index
    %c1_233 = arith.constant 1 : index
    %c0_234 = arith.constant 0 : index
    %221 = vector.load %arg16[%c0_232, %c1_233, %c0_234] : memref<10x10x8xbf16, #tpu.memory_space<vmem>>, vector<8x8x8xbf16>
    %c0_235 = arith.constant 0 : index
    %c2_236 = arith.constant 2 : index
    %c0_237 = arith.constant 0 : index
    %222 = vector.load %arg16[%c0_235, %c2_236, %c0_237] : memref<10x10x8xbf16, #tpu.memory_space<vmem>>, vector<8x8x8xbf16>
    %c1_238 = arith.constant 1 : index
    %c0_239 = arith.constant 0 : index
    %c0_240 = arith.constant 0 : index
    %223 = vector.load %arg16[%c1_238, %c0_239, %c0_240] : memref<10x10x8xbf16, #tpu.memory_space<vmem>>, vector<8x8x8xbf16>
    %c1_241 = arith.constant 1 : index
    %c1_242 = arith.constant 1 : index
    %c0_243 = arith.constant 0 : index
    %224 = vector.load %arg16[%c1_241, %c1_242, %c0_243] : memref<10x10x8xbf16, #tpu.memory_space<vmem>>, vector<8x8x8xbf16>
    %c1_244 = arith.constant 1 : index
    %c2_245 = arith.constant 2 : index
    %c0_246 = arith.constant 0 : index
    %225 = vector.load %arg16[%c1_244, %c2_245, %c0_246] : memref<10x10x8xbf16, #tpu.memory_space<vmem>>, vector<8x8x8xbf16>
    %c2_247 = arith.constant 2 : index
    %c0_248 = arith.constant 0 : index
    %c0_249 = arith.constant 0 : index
    %226 = vector.load %arg16[%c2_247, %c0_248, %c0_249] : memref<10x10x8xbf16, #tpu.memory_space<vmem>>, vector<8x8x8xbf16>
    %c2_250 = arith.constant 2 : index
    %c1_251 = arith.constant 1 : index
    %c0_252 = arith.constant 0 : index
    %227 = vector.load %arg16[%c2_250, %c1_251, %c0_252] : memref<10x10x8xbf16, #tpu.memory_space<vmem>>, vector<8x8x8xbf16>
    %c2_253 = arith.constant 2 : index
    %c2_254 = arith.constant 2 : index
    %c0_255 = arith.constant 0 : index
    %228 = vector.load %arg16[%c2_253, %c2_254, %c0_255] : memref<10x10x8xbf16, #tpu.memory_space<vmem>>, vector<8x8x8xbf16>
    %229 = arith.maximumf %220, %221 : vector<8x8x8xbf16>
    %230 = arith.maximumf %222, %223 : vector<8x8x8xbf16>
    %231 = arith.maximumf %224, %225 : vector<8x8x8xbf16>
    %232 = arith.maximumf %226, %227 : vector<8x8x8xbf16>
    %233 = arith.maximumf %229, %230 : vector<8x8x8xbf16>
    %234 = arith.maximumf %231, %232 : vector<8x8x8xbf16>
    %235 = arith.maximumf %233, %234 : vector<8x8x8xbf16>
    %236 = arith.maximumf %235, %228 : vector<8x8x8xbf16>
    %237 = vector.shape_cast %236 : vector<8x8x8xbf16> to vector<64x8xbf16>
    %c0_256 = arith.constant 0 : index
    %c0_257 = arith.constant 0 : index
    %238 = vector.load %arg10[%c0_256, %c0_257] : memref<8x8xbf16, #tpu.memory_space<vmem>>, vector<8x8xbf16>
    %cst_258 = arith.constant dense<0.000000e+00> : vector<64x8xf32>
    %239 = tpu.matmul %237, %238, %cst_258 {dimension_numbers = #tpu.dot_dimension_numbers<[1], [0], [0], [1], [0, 0, 1, 1], [], []>} : vector<64x8xbf16>, vector<8x8xbf16>, vector<64x8xf32> -> vector<64x8xf32>
    %c0_259 = arith.constant 0 : index
    %c0_260 = arith.constant 0 : index
    %240 = vector.load %arg13[%c0_259, %c0_260] : memref<1x8xf32, #tpu.memory_space<vmem>>, vector<1x8xf32>
    %241 = vector.broadcast %240 : vector<1x8xf32> to vector<64x8xf32>
    %242 = arith.addf %239, %241 : vector<64x8xf32>
    %cst_261 = arith.constant 0.000000e+00 : f32
    %243 = vector.broadcast %cst_261 : f32 to vector<64x8xf32>
    %244 = arith.maximumf %242, %243 : vector<64x8xf32>
    %c0_262 = arith.constant 0 : index
    %c0_263 = arith.constant 0 : index
    %c0_264 = arith.constant 0 : index
    %c40 = arith.constant 40 : index
    %245 = vector.load %arg14[%c0_262, %c0_263, %c0_264, %c40] : memref<1x1x64x48xf32, #tpu.memory_space<vmem>>, vector<1x1x64x8xf32>
    %246 = vector.shape_cast %245 : vector<1x1x64x8xf32> to vector<64x8xf32>
    %247 = vector.shape_cast %244 : vector<64x8xf32> to vector<1x1x64x8xf32>
    tpu.vector_store %arg14[%c0_262, %c0_263, %c0_264, %c40], %247 {strides = array<i32>} : memref<1x1x64x48xf32, #tpu.memory_space<vmem>>, vector<1x1x64x8xf32>,
    return
  }
  func.func @transform_0(%arg0: i32, %arg1: i32) -> (i32, i32, i32, i32, i32) {
    %c1_i32 = arith.constant 1 : i32
    %0 = arith.subi %arg1, %c1_i32 : i32
    %c0_i32 = arith.constant 0 : i32
    %1 = arith.maxsi %0, %c0_i32 : i32
    %c0_i32_0 = arith.constant 0 : i32
    %c0_i32_1 = arith.constant 0 : i32
    %c0_i32_2 = arith.constant 0 : i32
    %c0_i32_3 = arith.constant 0 : i32
    return %arg0, %1, %c0_i32_0, %c0_i32_1, %c0_i32_2 : i32, i32, i32, i32, i32
  }
  func.func @transform_1(%arg0: i32, %arg1: i32) -> (i32, i32, i32, i32, i32) {
    %c0_i32 = arith.constant 0 : i32
    %c0_i32_0 = arith.constant 0 : i32
    %c0_i32_1 = arith.constant 0 : i32
    %c0_i32_2 = arith.constant 0 : i32
    return %arg0, %arg1, %c0_i32, %c0_i32_0, %c0_i32_1 : i32, i32, i32, i32, i32
  }
  func.func @transform_2(%arg0: i32, %arg1: i32) -> (i32, i32, i32, i32, i32) {
    %c1_i32 = arith.constant 1 : i32
    %0 = arith.addi %arg1, %c1_i32 : i32
    %c3_i32 = arith.constant 3 : i32
    %1 = arith.minsi %0, %c3_i32 : i32
    %c0_i32 = arith.constant 0 : i32
    %c0_i32_0 = arith.constant 0 : i32
    %c0_i32_1 = arith.constant 0 : i32
    %c0_i32_2 = arith.constant 0 : i32
    return %arg0, %1, %c0_i32, %c0_i32_0, %c0_i32_1 : i32, i32, i32, i32, i32
  }
  func.func @transform_3(%arg0: i32, %arg1: i32) -> (i32, i32, i32, i32, i32) {
    %c1_i32 = arith.constant 1 : i32
    %0 = arith.subi %arg1, %c1_i32 : i32
    %c0_i32 = arith.constant 0 : i32
    %1 = arith.maxsi %0, %c0_i32 : i32
    %c0_i32_0 = arith.constant 0 : i32
    %c0_i32_1 = arith.constant 0 : i32
    %c0_i32_2 = arith.constant 0 : i32
    %c0_i32_3 = arith.constant 0 : i32
    return %arg0, %1, %c0_i32_0, %c0_i32_1, %c0_i32_2 : i32, i32, i32, i32, i32
  }
  func.func @transform_4(%arg0: i32, %arg1: i32) -> (i32, i32, i32, i32, i32) {
    %c0_i32 = arith.constant 0 : i32
    %c0_i32_0 = arith.constant 0 : i32
    %c0_i32_1 = arith.constant 0 : i32
    %c0_i32_2 = arith.constant 0 : i32
    return %arg0, %arg1, %c0_i32, %c0_i32_0, %c0_i32_1 : i32, i32, i32, i32, i32
  }
  func.func @transform_5(%arg0: i32, %arg1: i32) -> (i32, i32, i32, i32, i32) {
    %c1_i32 = arith.constant 1 : i32
    %0 = arith.addi %arg1, %c1_i32 : i32
    %c3_i32 = arith.constant 3 : i32
    %1 = arith.minsi %0, %c3_i32 : i32
    %c0_i32 = arith.constant 0 : i32
    %c0_i32_0 = arith.constant 0 : i32
    %c0_i32_1 = arith.constant 0 : i32
    %c0_i32_2 = arith.constant 0 : i32
    return %arg0, %1, %c0_i32, %c0_i32_0, %c0_i32_1 : i32, i32, i32, i32, i32
  }
  func.func @transform_6(%arg0: i32, %arg1: i32) -> (i32, i32) {
    %c0_i32 = arith.constant 0 : i32
    %c0_i32_0 = arith.constant 0 : i32
    %c0_i32_1 = arith.constant 0 : i32
    return %c0_i32, %c0_i32_0 : i32, i32
  }
  func.func @transform_7(%arg0: i32, %arg1: i32) -> (i32, i32, i32) {
    %c0_i32 = arith.constant 0 : i32
    %c0_i32_0 = arith.constant 0 : i32
    %c0_i32_1 = arith.constant 0 : i32
    %c0_i32_2 = arith.constant 0 : i32
    return %c0_i32, %c0_i32_0, %c0_i32_1 : i32, i32, i32
  }
  func.func @transform_8(%arg0: i32, %arg1: i32) -> (i32, i32) {
    %c0_i32 = arith.constant 0 : i32
    %c0_i32_0 = arith.constant 0 : i32
    %c0_i32_1 = arith.constant 0 : i32
    return %c0_i32, %c0_i32_0 : i32, i32
  }
  func.func @transform_9(%arg0: i32, %arg1: i32) -> (i32, i32) {
    %c0_i32 = arith.constant 0 : i32
    %c0_i32_0 = arith.constant 0 : i32
    %c0_i32_1 = arith.constant 0 : i32
    return %c0_i32, %c0_i32_0 : i32, i32
  }
  func.func @transform_10(%arg0: i32, %arg1: i32) -> (i32, i32) {
    %c0_i32 = arith.constant 0 : i32
    %c0_i32_0 = arith.constant 0 : i32
    %c0_i32_1 = arith.constant 0 : i32
    return %c0_i32, %c0_i32_0 : i32, i32
  }
  func.func @transform_11(%arg0: i32, %arg1: i32) -> (i32, i32) {
    %c0_i32 = arith.constant 0 : i32
    %c0_i32_0 = arith.constant 0 : i32
    %c0_i32_1 = arith.constant 0 : i32
    return %c0_i32, %c0_i32_0 : i32, i32
  }
  func.func @transform_12(%arg0: i32, %arg1: i32) -> (i32, i32, i32, i32) {
    %c0_i32 = arith.constant 0 : i32
    %c0_i32_0 = arith.constant 0 : i32
    %c0_i32_1 = arith.constant 0 : i32
    return %arg0, %arg1, %c0_i32, %c0_i32_0 : i32, i32, i32, i32
  }
}

</mosaic_0001>

<bundles_post_ra>
// kernel: inception_block.2
= control target key start
LH: loop header
LB: loop body
LE: loop exit
PB: predicated region body
PF: predicated region fallthrough
CT: control target
= control target key end

     0   :  { %10 = vsyncpa [#allocation3], 0  ;;  %s2300_s0 = inlined_call_operand.hbm [shape: f32[512,8], index: 0, kind: input, shape index: {}]   ;;  %s2301_s1 = inlined_call_operand.hbm [shape: bf16[8,16], index: 1, kind: input, shape index: {}]   ;;  %s2302_s2 = inlined_call_operand.hbm [shape: f32[1,16], index: 2, kind: input, shape index: {}]   ;;  %s2303_s3 = inlined_call_operand.hbm [shape: bf16[512,16], index: 3, kind: output, shape index: {0}]   ;;  %s2304_s4 = inlined_call_operand.hbm [shape: bf16[512,8], index: 4, kind: output, shape index: {1}]  }
   0x1   :  { %11 = vsyncpa [#allocation6], 0 }
   0x2   :  { %12 = vsyncpa [#allocation4], 0 }
   0x3   :  { %13 = vsyncpa [#allocation10], 0  ;;  %s1777_s15 = smov [#allocation5]   ;;  %s1778_s17 = smov [#allocation2]  }
   0x4   :  { %s32_s16 = sshll.u32 %s1777_s15, 4  ;;  %s19_s18 = sshll.u32 %s1778_s17, 4  ;;  %s33_s16 = int_to_ptr.vmem [resolvable:$true] %s32_s16  ;;  %s1811_s18 = int_to_ptr.vmem [resolvable:$true] %s19_s18 }
   0x5   :  { %s1659_s21 = scalar_lea.hbm %s2301_s1, 64 }
   0x6   :  { %p1660_p0 = scmp.ne.s32.totalorder %s2301_s1, %s1659_s21  ;;  %p1663_p1 = scmp.lt.u32.totalorder %s1659_s21, %s2301_s1 }
   0x8   :  { %p1665_p2 = pnand %p1663_p1, %p1660_p0 }
   0xa   :  { %1668 = shalt.err (!%p1665_p2)
}
   0xb   :  { %s1669_s26 = scalar_lea.vmem %s33_s16, 64  ;;  %p1674_p4 = scmp.lt.s32.totalorder %s33_s16, %s33_s16 }
   0xc   :  { %p1670_p3 = scmp.ne.s32.totalorder %s33_s16, %s1669_s26  ;;  %p1675_p5 = scmp.lt.s32.totalorder %s1669_s26, %s1669_s26 }
   0xe   :  { %p1676_p6 = por %p1675_p5, %p1674_p4 }
  0x10   :  { %p1677_p7 = pnand %p1676_p6, %p1670_p3 }
  0x12   :  { %1680 = shalt.err (!%p1677_p7)
}
  0x13   :  { %35 = dma.hbm_to_vmem [thread:$0]  %s2301_s1, 64, %s33_s16, [#allocation6]  }
  0x14   :  { %s1681_s5 = scalar_lea.hbm %s2300_s0, 8192 }
  0x15   :  { %p1682_p8 = scmp.ne.s32.totalorder %s2300_s0, %s1681_s5  ;;  %p1685_p9 = scmp.lt.u32.totalorder %s1681_s5, %s2300_s0 }
  0x17   :  { %p1687_p10 = pnand %p1685_p9, %p1682_p8 }
  0x19   :  { %1690 = shalt.err (!%p1687_p10)
}
  0x1a   :  { %s1691_s10 = scalar_lea.vmem %s1811_s18, 8192  ;;  %p1696_p12 = scmp.lt.s32.totalorder %s1811_s18, %s1811_s18 }
  0x1b   :  { %p1692_p11 = scmp.ne.s32.totalorder %s1811_s18, %s1691_s10  ;;  %p1697_p13 = scmp.lt.s32.totalorder %s1691_s10, %s1691_s10 }
  0x1d   :  { %p1698_p0 = por %p1697_p13, %p1696_p12 }
  0x1f   :  { %p1699_p1 = pnand %p1698_p0, %p1692_p11 }
  0x21   :  { %1702 = shalt.err (!%p1699_p1)
}
  0x22   :  { %s1779_s1 = smov 128   ;;  %s1780_s11 = smov 8  }
  0x23   :  { %25 = dma.hbm_to_vmem [thread:$0]  %s2300_s0, 8192, %s1811_s18, [#allocation3], %s1779_s1, %s1779_s1, %s1780_s11  }
  0x24   :  { %s1781_s14 = smov [#allocation7]   ;;  %s1703_s19 = scalar_lea.hbm %s2302_s2, 16 }
  0x25   :  { %s42_s15 = sshll.u32 %s1781_s14, 4  ;;  %p1704_p2 = scmp.ne.s32.totalorder %s2302_s2, %s1703_s19  ;;  %s43_s15 = int_to_ptr.vmem [resolvable:$true] %s42_s15 }
  0x26   :  { %p1707_p3 = scmp.lt.u32.totalorder %s1703_s19, %s2302_s2 }
  0x28   :  { %p1709_p4 = pnand %p1707_p3, %p1704_p2 }
  0x2a   :  { %1712 = shalt.err (!%p1709_p4)
}
  0x2b   :  { %s1713_s24 = scalar_lea.vmem %s43_s15, 16  ;;  %s1717_s0 = scalar_lea.vmem %s43_s15, 32 }
  0x2c   :  { %p1714_p5 = scmp.ne.s32.totalorder %s43_s15, %s1713_s24  ;;  %p1718_p6 = scmp.lt.s32.totalorder %s43_s15, %s43_s15 }
  0x2d   :  { %p1719_p7 = scmp.lt.s32.totalorder %s1717_s0, %s1713_s24 }
  0x2f   :  { %p1720_p8 = por %p1719_p7, %p1718_p6 }
  0x31   :  { %p1721_p9 = pnand %p1720_p8, %p1714_p5 }
  0x33   :  { %1724 = shalt.err (!%p1721_p9)
}
  0x34   :  { %45 = dma.hbm_to_vmem [thread:$0]  %s2302_s2, 16, %s43_s15, [#allocation6]  }
  0x35   :  { %1769 = dma.done.wait [#allocation3], 8192  }
  0x36   :  { %1770 = vsyncadd [#allocation3], 4294959104 }
  0x37   :  { %1771 = dma.done.wait [#allocation6], 80  }
  0x38   :  { %1772 = vsyncadd [#allocation6], 4294967216  ;;  %vm546_vm0 = vcmask 1043456   ;;  %v441_v0 = vld [vmem:[#allocation5] sm:$0xf]  ;;  %v57_v2 = vld [vmem:[#allocation2 + $0x8] sm:$0xff] }
  0x39   :  { %v56_v1 = vld [vmem:[#allocation2] sm:$0xff]  ;;  %vm376_vm1 = vcmask 60416   ;;  %vm449_vm2 = vcmask 64512   ;;  %1648 = vmatprep.subr.msk.bf16.mxu0 %vm546_vm0, %v441_v0  ;;  %1649 = vmatprep.subr.msk.bf16.mxu1 %vm546_vm0, %v441_v0  ;;  %v548_v3 = vsel %vm546_vm0, %v441_v0, 0  ;;  %v1420_v6 = vpack.c.bf16 %v57_v2, %v57_v2  ;;  %v89_v8 = vld [vmem:[#allocation2 + $0x108] sm:$0xff]  ;;  %v58_v9 = vld [vmem:[#allocation2 + $0x10] sm:$0xff] }
  0x3a   :  { %v120_v4 = vpack.c.bf16 %v57_v2, %v56_v1  ;;  %v1419_v5 = vpack.c.bf16 %v56_v1, %v56_v1  ;;  %v88_v7 = vld [vmem:[#allocation2 + $0x100] sm:$0xff]  ;;  %1581 = vmatpush3.bf16.msra.mxu0 %v548_v3  ;;  %1647 = vmatpush3.bf16.msra.mxu1 %v548_v3  ;;  %v1452_v12 = vpack.c.bf16 %v89_v8, %v89_v8  ;;  %v59_v13 = vld [vmem:[#allocation2 + $0x18] sm:$0xff]  ;;  %v90_v14 = vld [vmem:[#allocation2 + $0x110] sm:$0xff]  ;;  %s1782_s2 = smov [#allocation9]  }
  0x3b   :  { %v136_v10 = vpack.c.bf16 %v89_v8, %v88_v7  ;;  %v1451_v11 = vpack.c.bf16 %v88_v7, %v88_v7  ;;  %v91_v15 = vld [vmem:[#allocation2 + $0x118] sm:$0xff]  ;;  %378 = vst.msk [vmem:[#allocation9 + $0x4] sm:$0xf] %vm376_vm1, %v1420_v6  ;;  %v121_v16 = vpack.c.bf16 %v59_v13, %v58_v9  ;;  %v1421_v17 = vpack.c.bf16 %v58_v9, %v58_v9  ;;  %v60_v20 = vld [vmem:[#allocation2 + $0x20] sm:$0xff]  ;;  %v61_v21 = vld [vmem:[#allocation2 + $0x28] sm:$0xff]  ;;  %s1241_s26 = sshll.u32 %s1782_s2, 4  ;;  %s1242_s26 = int_to_ptr.vmem [resolvable:$true] %s1241_s26 }
  0x3c   :  { %377 = vst.msk [vmem:[#allocation9] sm:$0xf] %vm376_vm1, %v1419_v5  ;;  %1582 = vmatprep.mubr.msk.bf16.mxu0 %vm449_vm2, %v120_v4  ;;  %v1422_v18 = vpack.c.bf16 %v59_v13, %v59_v13  ;;  %v137_v19 = vpack.c.bf16 %v91_v15, %v90_v14  ;;  %v92_v22 = vld [vmem:[#allocation2 + $0x120] sm:$0xff]  ;;  %410 = vst.msk [vmem:[#allocation9 + $0x84] sm:$0xf] %vm376_vm1, %v1452_v12  ;;  %v1453_v23 = vpack.c.bf16 %v90_v14, %v90_v14  ;;  %v93_v27 = vld [vmem:[#allocation2 + $0x128] sm:$0xff]  ;;  %p1730_p11 = scmp.lt.s32.totalorder %s1242_s26, %s1242_s26 }
  0x3d   :  { %409 = vst.msk [vmem:[#allocation9 + $0x80] sm:$0xf] %vm376_vm1, %v1451_v11  ;;  %1614 = vmatprep.mubr.msk.bf16.mxu1 %vm449_vm2, %v136_v10  ;;  %v1454_v24 = vpack.c.bf16 %v91_v15, %v91_v15  ;;  %v122_v25 = vpack.c.bf16 %v61_v21, %v60_v20  ;;  %v1423_v26 = vpack.c.bf16 %v60_v20, %v60_v20  ;;  %379 = vst.msk [vmem:[#allocation9 + $0x8] sm:$0xf] %vm376_vm1, %v1421_v17  ;;  %v1864_v31 = vld [vmem:[#allocation2 + $0x30] sm:$0xff]  ;;  %v1866_v32 = vld [vmem:[#allocation2 + $0x38] sm:$0xff] }
  0x3e   :  { %380 = vst.msk [vmem:[#allocation9 + $0xc] sm:$0xf] %vm376_vm1, %v1422_v18  ;;  %1583 = vmatmul.mubr.msk.bf16.vlgmr.msra.gmra.mrb[0].mxu0 %vm449_vm2, %v121_v16  ;;  %1615 = vmatmul.mubr.msk.bf16.vlgmr.msra.gmra.mrb[0].mxu1 %vm449_vm2, %v137_v19  ;;  %v1424_v28 = vpack.c.bf16 %v61_v21, %v61_v21  ;;  %v138_v29 = vpack.c.bf16 %v93_v27, %v92_v22  ;;  %411 = vst.msk [vmem:[#allocation9 + $0x88] sm:$0xf] %vm376_vm1, %v1453_v23  ;;  %v94_v36 = vld [vmem:[#allocation2 + $0x130] sm:$0xff]  ;;  %v95_v37 = vld [vmem:[#allocation2 + $0x138] sm:$0xff] }
  0x3f   :  { %v1455_v30 = vpack.c.bf16 %v92_v22, %v92_v22  ;;  %412 = vst.msk [vmem:[#allocation9 + $0x8c] sm:$0xf] %vm376_vm1, %v1454_v24  ;;  %381 = vst.msk [vmem:[#allocation9 + $0x10] sm:$0xf] %vm376_vm1, %v1423_v26  ;;  %1586 = vmatprep.mubr.msk.bf16.mxu0 %vm449_vm2, %v122_v25  ;;  %v1456_v33 = vpack.c.bf16 %v93_v27, %v93_v27  ;;  %v1425_v34 = vpack.c.bf16 %v1864_v31, %v1864_v31  ;;  %v64_v38 = vld [vmem:[#allocation2 + $0x40] sm:$0xff]  ;;  %v65_v41 = vld [vmem:[#allocation2 + $0x48] sm:$0xff] }
  0x40   :  { %v1426_v35 = vpack.c.bf16 %v1866_v32, %v1866_v32  ;;  %382 = vst.msk [vmem:[#allocation9 + $0x14] sm:$0xf] %vm376_vm1, %v1424_v28  ;;  %1618 = vmatprep.mubr.msk.bf16.mxu1 %vm449_vm2, %v138_v29  ;;  %v1457_v39 = vpack.c.bf16 %v94_v36, %v94_v36  ;;  %v1458_v40 = vpack.c.bf16 %v95_v37, %v95_v37  ;;  %v96_v42 = vld [vmem:[#allocation2 + $0x140] sm:$0xff]  ;;  %v97_v43 = vld [vmem:[#allocation2 + $0x148] sm:$0xff]  ;;  %v1884_v48 = vld [vmem:[#allocation2 + $0x50] sm:$0xff]  ;;  %s1725_s27 = scalar_lea.vmem %s1242_s26, 4096 }
  0x41   :  { %413 = vst.msk [vmem:[#allocation9 + $0x90] sm:$0xf] %vm376_vm1, %v1455_v30  ;;  %414 = vst.msk [vmem:[#allocation9 + $0x94] sm:$0xf] %vm376_vm1, %v1456_v33  ;;  %v123_v44 = vpack.c.bf16 %v1866_v32, %v1864_v31  ;;  %v1427_v45 = vpack.c.bf16 %v64_v38, %v64_v38  ;;  %v1428_v46 = vpack.c.bf16 %v65_v41, %v65_v41  ;;  %v1886_v49 = vld [vmem:[#allocation2 + $0x58] sm:$0xff]  ;;  %v1894_v54 = vld [vmem:[#allocation2 + $0x150] sm:$0xff]  ;;  %p1726_p10 = scmp.ne.s32.totalorder %s1242_s26, %s1725_s27  ;;  %p1731_p12 = scmp.lt.s32.totalorder %s1725_s27, %s1725_s27 }
  0x42   :  { %383 = vst.msk [vmem:[#allocation9 + $0x18] sm:$0xf] %vm376_vm1, %v1425_v34  ;;  %384 = vst.msk [vmem:[#allocation9 + $0x1c] sm:$0xf] %vm376_vm1, %v1426_v35  ;;  %v1459_v47 = vpack.c.bf16 %v96_v42, %v96_v42  ;;  %v139_v50 = vpack.c.bf16 %v95_v37, %v94_v36  ;;  %v1460_v51 = vpack.c.bf16 %v97_v43, %v97_v43  ;;  %v1896_v55 = vld [vmem:[#allocation2 + $0x158] sm:$0xff]  ;;  %v1905_v60 = vld [vmem:[#allocation2 + $0x60] sm:$0xff] }
  0x43   :  { %415 = vst.msk [vmem:[#allocation9 + $0x98] sm:$0xf] %vm376_vm1, %v1457_v39  ;;  %416 = vst.msk [vmem:[#allocation9 + $0x9c] sm:$0xf] %vm376_vm1, %v1458_v40  ;;  %v1429_v52 = vpack.c.bf16 %v1884_v48, %v1884_v48  ;;  %v1430_v53 = vpack.c.bf16 %v1886_v49, %v1886_v49  ;;  %v124_v56 = vpack.c.bf16 %v65_v41, %v64_v38  ;;  %v1907_v61 = vld [vmem:[#allocation2 + $0x68] sm:$0xff]  ;;  %v1909_v62 = vld [vmem:[#allocation2 + $0x160] sm:$0xff]  ;;  %p1732_p13 = por %p1731_p12, %p1730_p11 }
  0x44   :  { %385 = vst.msk [vmem:[#allocation9 + $0x20] sm:$0xf] %vm376_vm1, %v1427_v45  ;;  %386 = vst.msk [vmem:[#allocation9 + $0x24] sm:$0xf] %vm376_vm1, %v1428_v46  ;;  %v140_v57 = vpack.c.bf16 %v97_v43, %v96_v42  ;;  %v1461_v58 = vpack.c.bf16 %v1894_v54, %v1894_v54  ;;  %v1462_v59 = vpack.c.bf16 %v1896_v55, %v1896_v55  ;;  %v1918_v1 = vld [vmem:[#allocation2 + $0x168] sm:$0xff]  ;;  %v1922_v3 = vld [vmem:[#allocation2 + $0x70] sm:$0xff] }
  0x45   :  { %417 = vst.msk [vmem:[#allocation9 + $0xa0] sm:$0xf] %vm376_vm1, %v1459_v47  ;;  %418 = vst.msk [vmem:[#allocation9 + $0xa4] sm:$0xf] %vm376_vm1, %v1460_v51  ;;  %v1431_v63 = vpack.c.bf16 %v1905_v60, %v1905_v60  ;;  %v1432_v0 = vpack.c.bf16 %v1907_v61, %v1907_v61  ;;  %v1463_v2 = vpack.c.bf16 %v1909_v62, %v1909_v62  ;;  %v1924_v4 = vld [vmem:[#allocation2 + $0x78] sm:$0xff]  ;;  %v1934_v8 = vld [vmem:[#allocation2 + $0x170] sm:$0xff]  ;;  %p1733_p0 = pnand %p1732_p13, %p1726_p10 }
  0x46   :  { %387 = vst.msk [vmem:[#allocation9 + $0x28] sm:$0xf] %vm376_vm1, %v1429_v52  ;;  %388 = vst.msk [vmem:[#allocation9 + $0x2c] sm:$0xf] %vm376_vm1, %v1430_v53  ;;  %v1464_v5 = vpack.c.bf16 %v1918_v1, %v1918_v1  ;;  %v1433_v6 = vpack.c.bf16 %v1922_v3, %v1922_v3  ;;  %v1434_v7 = vpack.c.bf16 %v1924_v4, %v1924_v4  ;;  %v1936_v9 = vld [vmem:[#allocation2 + $0x178] sm:$0xff]  ;;  %1587 = vmatmul.mubr.msk.bf16.gmra.mrb[4].mxu0 %vm449_vm2, %v123_v44  ;;  %v1947_v12 = vld [vmem:[#allocation2 + $0x80] sm:$0xff] }
  0x47   :  { %419 = vst.msk [vmem:[#allocation9 + $0xa8] sm:$0xf] %vm376_vm1, %v1461_v58  ;;  %420 = vst.msk [vmem:[#allocation9 + $0xac] sm:$0xf] %vm376_vm1, %v1462_v59  ;;  %1619 = vmatmul.mubr.msk.bf16.gmra.mrb[4].mxu1 %vm449_vm2, %v139_v50  ;;  %v1465_v10 = vpack.c.bf16 %v1934_v8, %v1934_v8  ;;  %v1466_v11 = vpack.c.bf16 %v1936_v9, %v1936_v9  ;;  %v1949_v13 = vld [vmem:[#allocation2 + $0x88] sm:$0xff]  ;;  %1590 = vmatprep.mubr.msk.bf16.mxu0 %vm449_vm2, %v124_v56  ;;  %v1960_v16 = vld [vmem:[#allocation2 + $0x180] sm:$0xff] }
  0x48   :  { %389 = vst.msk [vmem:[#allocation9 + $0x30] sm:$0xf] %vm376_vm1, %v1431_v63  ;;  %390 = vst.msk [vmem:[#allocation9 + $0x34] sm:$0xf] %vm376_vm1, %v1432_v0  ;;  %1622 = vmatprep.mubr.msk.bf16.mxu1 %vm449_vm2, %v140_v57  ;;  %v1435_v14 = vpack.c.bf16 %v1947_v12, %v1947_v12  ;;  %v1436_v15 = vpack.c.bf16 %v1949_v13, %v1949_v13  ;;  %v1962_v17 = vld [vmem:[#allocation2 + $0x188] sm:$0xff]  ;;  %v1467_v18 = vpack.c.bf16 %v1960_v16, %v1960_v16  ;;  %v1970_v20 = vld [vmem:[#allocation2 + $0x90] sm:$0xff] }
  0x49   :  { %421 = vst.msk [vmem:[#allocation9 + $0xb0] sm:$0xf] %vm376_vm1, %v1463_v2  ;;  %422 = vst.msk [vmem:[#allocation9 + $0xb4] sm:$0xf] %vm376_vm1, %v1464_v5  ;;  %v1468_v19 = vpack.c.bf16 %v1962_v17, %v1962_v17  ;;  %v1972_v21 = vld [vmem:[#allocation2 + $0x98] sm:$0xff]  ;;  %v1974_v22 = vld [vmem:[#allocation2 + $0x190] sm:$0xff]  ;;  %v125_v23 = vpack.c.bf16 %v1886_v49, %v1884_v48  ;;  %v1437_v24 = vpack.c.bf16 %v1970_v20, %v1970_v20 }
  0x4a   :  { %391 = vst.msk [vmem:[#allocation9 + $0x38] sm:$0xf] %vm376_vm1, %v1433_v6  ;;  %392 = vst.msk [vmem:[#allocation9 + $0x3c] sm:$0xf] %vm376_vm1, %v1434_v7  ;;  %v1438_v25 = vpack.c.bf16 %v1972_v21, %v1972_v21  ;;  %v1984_v26 = vld [vmem:[#allocation2 + $0x198] sm:$0xff]  ;;  %v1469_v27 = vpack.c.bf16 %v1974_v22, %v1974_v22  ;;  %v1988_v28 = vld [vmem:[#allocation2 + $0xa0] sm:$0xff]  ;;  %v141_v30 = vpack.c.bf16 %v1896_v55, %v1894_v54 }
  0x4b   :  { %423 = vst.msk [vmem:[#allocation9 + $0xb8] sm:$0xf] %vm376_vm1, %v1465_v10  ;;  %424 = vst.msk [vmem:[#allocation9 + $0xbc] sm:$0xf] %vm376_vm1, %v1466_v11  ;;  %v1990_v29 = vld [vmem:[#allocation2 + $0xa8] sm:$0xff]  ;;  %v1470_v31 = vpack.c.bf16 %v1984_v26, %v1984_v26  ;;  %v1439_v32 = vpack.c.bf16 %v1988_v28, %v1988_v28  ;;  %v2002_v34 = vld [vmem:[#allocation2 + $0x1a0] sm:$0xff]  ;;  %v126_v36 = vpack.c.bf16 %v1907_v61, %v1905_v60 }
  0x4c   :  { %393 = vst.msk [vmem:[#allocation9 + $0x40] sm:$0xf] %vm376_vm1, %v1435_v14  ;;  %394 = vst.msk [vmem:[#allocation9 + $0x44] sm:$0xf] %vm376_vm1, %v1436_v15  ;;  %v1440_v33 = vpack.c.bf16 %v1990_v29, %v1990_v29  ;;  %v2004_v35 = vld [vmem:[#allocation2 + $0x1a8] sm:$0xff]  ;;  %v142_v37 = vpack.c.bf16 %v1918_v1, %v1909_v62  ;;  %v1471_v38 = vpack.c.bf16 %v2002_v34, %v2002_v34  ;;  %v2017_v40 = vld [vmem:[#allocation2 + $0xb0] sm:$0xff] }
  0x4d   :  { %425 = vst.msk [vmem:[#allocation9 + $0xc0] sm:$0xf] %vm376_vm1, %v1467_v18  ;;  %426 = vst.msk [vmem:[#allocation9 + $0xc4] sm:$0xf] %vm376_vm1, %v1468_v19  ;;  %v1472_v39 = vpack.c.bf16 %v2004_v35, %v2004_v35  ;;  %v2019_v41 = vld [vmem:[#allocation2 + $0xb8] sm:$0xff]  ;;  %v2021_v42 = vld [vmem:[#allocation2 + $0x1b0] sm:$0xff]  ;;  %v1441_v43 = vpack.c.bf16 %v2017_v40, %v2017_v40  ;;  %v127_v5 = vpack.c.bf16 %v1924_v4, %v1922_v3 }
  0x4e   :  { %395 = vst.msk [vmem:[#allocation9 + $0x48] sm:$0xf] %vm376_vm1, %v1437_v24  ;;  %396 = vst.msk [vmem:[#allocation9 + $0x4c] sm:$0xf] %vm376_vm1, %v1438_v25  ;;  %v1442_v44 = vpack.c.bf16 %v2019_v41, %v2019_v41  ;;  %v2030_v45 = vld [vmem:[#allocation2 + $0x1b8] sm:$0xff]  ;;  %v1473_v46 = vpack.c.bf16 %v2021_v42, %v2021_v42  ;;  %v2034_v47 = vld [vmem:[#allocation2 + $0xc0] sm:$0xff]  ;;  %1591 = vmatmul.mubr.msk.bf16.gmra.mrb[8].mxu0 %vm449_vm2, %v125_v23  ;;  %v143_v18 = vpack.c.bf16 %v1936_v9, %v1934_v8 }
  0x4f   :  { %427 = vst.msk [vmem:[#allocation9 + $0xc8] sm:$0xf] %vm376_vm1, %v1469_v27  ;;  %428 = vst.msk [vmem:[#allocation9 + $0xcc] sm:$0xf] %vm376_vm1, %v1470_v31  ;;  %v2036_v48 = vld [vmem:[#allocation2 + $0xc8] sm:$0xff]  ;;  %v1474_v49 = vpack.c.bf16 %v2030_v45, %v2030_v45  ;;  %v1443_v50 = vpack.c.bf16 %v2034_v47, %v2034_v47  ;;  %v2046_v52 = vld [vmem:[#allocation2 + $0x1c0] sm:$0xff]  ;;  %1623 = vmatmul.mubr.msk.bf16.gmra.mrb[8].mxu1 %vm449_vm2, %v141_v30  ;;  %1594 = vmatprep.mubr.msk.bf16.mxu0 %vm449_vm2, %v126_v36 }
  0x50   :  { %397 = vst.msk [vmem:[#allocation9 + $0x50] sm:$0xf] %vm376_vm1, %v1439_v32  ;;  %398 = vst.msk [vmem:[#allocation9 + $0x54] sm:$0xf] %vm376_vm1, %v1440_v33  ;;  %v1444_v51 = vpack.c.bf16 %v2036_v48, %v2036_v48  ;;  %v2048_v53 = vld [vmem:[#allocation2 + $0x1c8] sm:$0xff]  ;;  %v1475_v54 = vpack.c.bf16 %v2046_v52, %v2046_v52  ;;  %v2059_v56 = vld [vmem:[#allocation2 + $0xd0] sm:$0xff]  ;;  %1626 = vmatprep.mubr.msk.bf16.mxu1 %vm449_vm2, %v142_v37  ;;  %v128_v25 = vpack.c.bf16 %v1949_v13, %v1947_v12 }
  0x51   :  { %429 = vst.msk [vmem:[#allocation9 + $0xd0] sm:$0xf] %vm376_vm1, %v1471_v38  ;;  %430 = vst.msk [vmem:[#allocation9 + $0xd4] sm:$0xf] %vm376_vm1, %v1472_v39  ;;  %v1476_v55 = vpack.c.bf16 %v2048_v53, %v2048_v53  ;;  %v2061_v57 = vld [vmem:[#allocation2 + $0xd8] sm:$0xff]  ;;  %v1445_v58 = vpack.c.bf16 %v2059_v56, %v2059_v56  ;;  %v2072_v60 = vld [vmem:[#allocation2 + $0x1d0] sm:$0xff]  ;;  %v144_v27 = vpack.c.bf16 %v1962_v17, %v1960_v16 }
  0x52   :  { %399 = vst.msk [vmem:[#allocation9 + $0x58] sm:$0xf] %vm376_vm1, %v1441_v43  ;;  %400 = vst.msk [vmem:[#allocation9 + $0x5c] sm:$0xf] %vm376_vm1, %v1442_v44  ;;  %v1446_v59 = vpack.c.bf16 %v2061_v57, %v2061_v57  ;;  %v2074_v61 = vld [vmem:[#allocation2 + $0x1d8] sm:$0xff]  ;;  %v1477_v62 = vpack.c.bf16 %v2072_v60, %v2072_v60  ;;  %v84_v0 = vld [vmem:[#allocation2 + $0xe0] sm:$0xff]  ;;  %v129_v12 = vpack.c.bf16 %v1972_v21, %v1970_v20 }
  0x53   :  { %431 = vst.msk [vmem:[#allocation9 + $0xd8] sm:$0xf] %vm376_vm1, %v1473_v46  ;;  %432 = vst.msk [vmem:[#allocation9 + $0xdc] sm:$0xf] %vm376_vm1, %v1474_v49  ;;  %v1478_v63 = vpack.c.bf16 %v2074_v61, %v2074_v61  ;;  %v85_v1 = vld [vmem:[#allocation2 + $0xe8] sm:$0xff]  ;;  %v116_v2 = vld [vmem:[#allocation2 + $0x1e0] sm:$0xff]  ;;  %v1447_v6 = vpack.c.bf16 %v84_v0, %v84_v0  ;;  %v145_v13 = vpack.c.bf16 %v1984_v26, %v1974_v22 }
  0x54   :  { %401 = vst.msk [vmem:[#allocation9 + $0x60] sm:$0xf] %vm376_vm1, %v1443_v50  ;;  %402 = vst.msk [vmem:[#allocation9 + $0x64] sm:$0xf] %vm376_vm1, %v1444_v51  ;;  %v1448_v7 = vpack.c.bf16 %v85_v1, %v85_v1  ;;  %v117_v10 = vld [vmem:[#allocation2 + $0x1e8] sm:$0xff]  ;;  %v1479_v11 = vpack.c.bf16 %v116_v2, %v116_v2  ;;  %v86_v14 = vld [vmem:[#allocation2 + $0xf0] sm:$0xff]  ;;  %v130_v16 = vpack.c.bf16 %v1990_v29, %v1988_v28 }
  0x55   :  { %433 = vst.msk [vmem:[#allocation9 + $0xe0] sm:$0xf] %vm376_vm1, %v1475_v54  ;;  %434 = vst.msk [vmem:[#allocation9 + $0xe4] sm:$0xf] %vm376_vm1, %v1476_v55  ;;  %v87_v15 = vld [vmem:[#allocation2 + $0xf8] sm:$0xff]  ;;  %v1480_v19 = vpack.c.bf16 %v117_v10, %v117_v10  ;;  %v1449_v23 = vpack.c.bf16 %v86_v14, %v86_v14  ;;  %v118_v4 = vld [vmem:[#allocation2 + $0x1f0] sm:$0xff]  ;;  %v146_v17 = vpack.c.bf16 %v2004_v35, %v2002_v34 }
  0x56   :  { %403 = vst.msk [vmem:[#allocation9 + $0x68] sm:$0xf] %vm376_vm1, %v1445_v58  ;;  %404 = vst.msk [vmem:[#allocation9 + $0x6c] sm:$0xf] %vm376_vm1, %v1446_v59  ;;  %v1450_v3 = vpack.c.bf16 %v87_v15, %v87_v15  ;;  %v119_v24 = vld [vmem:[#allocation2 + $0x1f8] sm:$0xff]  ;;  %v1481_v8 = vpack.c.bf16 %v118_v4, %v118_v4  ;;  %1595 = vmatmul.mubr.msk.bf16.gmra.mrb[12].mxu0 %vm449_vm2, %v127_v5  ;;  %v131_v20 = vpack.c.bf16 %v2019_v41, %v2017_v40 }
  0x57   :  { %435 = vst.msk [vmem:[#allocation9 + $0xe8] sm:$0xf] %vm376_vm1, %v1477_v62  ;;  %436 = vst.msk [vmem:[#allocation9 + $0xec] sm:$0xf] %vm376_vm1, %v1478_v63  ;;  %v1482_v9 = vpack.c.bf16 %v119_v24, %v119_v24  ;;  %1627 = vmatmul.mubr.msk.bf16.gmra.mrb[12].mxu1 %vm449_vm2, %v143_v18  ;;  %1598 = vmatprep.mubr.msk.bf16.mxu0 %vm449_vm2, %v128_v25  ;;  %v147_v21 = vpack.c.bf16 %v2030_v45, %v2021_v42 }
  0x58   :  { %405 = vst.msk [vmem:[#allocation9 + $0x70] sm:$0xf] %vm376_vm1, %v1447_v6  ;;  %406 = vst.msk [vmem:[#allocation9 + $0x74] sm:$0xf] %vm376_vm1, %v1448_v7  ;;  %1630 = vmatprep.mubr.msk.bf16.mxu1 %vm449_vm2, %v144_v27  ;;  %v132_v22 = vpack.c.bf16 %v2036_v48, %v2034_v47  ;;  %v148_v26 = vpack.c.bf16 %v2048_v53, %v2046_v52  ;;  %v133_v28 = vpack.c.bf16 %v2061_v57, %v2059_v56 }
  0x59   :  { %437 = vst.msk [vmem:[#allocation9 + $0xf0] sm:$0xf] %vm376_vm1, %v1479_v11  ;;  %438 = vst.msk [vmem:[#allocation9 + $0xf4] sm:$0xf] %vm376_vm1, %v1480_v19  ;;  %v149_v29 = vpack.c.bf16 %v2074_v61, %v2072_v60  ;;  %v134_v30 = vpack.c.bf16 %v85_v1, %v84_v0  ;;  %v150_v31 = vpack.c.bf16 %v117_v10, %v116_v2 }
  0x5a   :  { %407 = vst.msk [vmem:[#allocation9 + $0x78] sm:$0xf] %vm376_vm1, %v1449_v23  ;;  %408 = vst.msk [vmem:[#allocation9 + $0x7c] sm:$0xf] %vm376_vm1, %v1450_v3  ;;  %v135_v32 = vpack.c.bf16 %v87_v15, %v86_v14  ;;  %v151_v33 = vpack.c.bf16 %v119_v24, %v118_v4 }
  0x5b   :  { %439 = vst.msk [vmem:[#allocation9 + $0xf8] sm:$0xf] %vm376_vm1, %v1481_v8  ;;  %440 = vst.msk [vmem:[#allocation9 + $0xfc] sm:$0xf] %vm376_vm1, %v1482_v9 }
  0x5e   :  { %1599 = vmatmul.mubr.msk.bf16.gmra.mrb[16].mxu0 %vm449_vm2, %v129_v12 }
  0x5f   :  { %1631 = vmatmul.mubr.msk.bf16.gmra.mrb[16].mxu1 %vm449_vm2, %v145_v13  ;;  %1602 = vmatprep.mubr.msk.bf16.mxu0 %vm449_vm2, %v130_v16 }
  0x60   :  { %1634 = vmatprep.mubr.msk.bf16.mxu1 %vm449_vm2, %v146_v17 }
  0x66   :  { %1603 = vmatmul.mubr.msk.bf16.gmra.mrb[20].mxu0 %vm449_vm2, %v131_v20 }
  0x67   :  { %1635 = vmatmul.mubr.msk.bf16.gmra.mrb[20].mxu1 %vm449_vm2, %v147_v21  ;;  %1606 = vmatprep.mubr.msk.bf16.mxu0 %vm449_vm2, %v132_v22 }
  0x68   :  { %1638 = vmatprep.mubr.msk.bf16.mxu1 %vm449_vm2, %v148_v26 }
  0x6e   :  { %1607 = vmatmul.mubr.msk.bf16.gmra.mrb[24].mxu0 %vm449_vm2, %v133_v28 }
  0x6f   :  { %1639 = vmatmul.mubr.msk.bf16.gmra.mrb[24].mxu1 %vm449_vm2, %v149_v29  ;;  %1610 = vmatprep.mubr.msk.bf16.mxu0 %vm449_vm2, %v134_v30 }
  0x70   :  { %1642 = vmatprep.mubr.msk.bf16.mxu1 %vm449_vm2, %v150_v31 }
  0x76   :  { %1611 = vmatmul.mubr.msk.bf16.gmra.mrb[28].mxu0 %vm449_vm2, %v135_v32 }
  0x77   :  { %1643 = vmatmul.mubr.msk.bf16.gmra.mrb[28].mxu1 %vm449_vm2, %v151_v33 }
  0x78   :  { %1736 = shalt.err (!%p1733_p0)
}
  0x79   :  { %s1737_s30 = scalar_lea.hbm %s2304_s4, 4096 }
  0x7a   :  { %p1738_p1 = scmp.ne.s32.totalorder %s2304_s4, %s1737_s30  ;;  %p1741_p2 = scmp.lt.u32.totalorder %s1737_s30, %s2304_s4 }
  0x7c   :  { %p1743_p3 = pnand %p1741_p2, %p1738_p1 }
  0x7e   :  { %1746 = shalt.err (!%p1743_p3)
}
  0x7f   :  { %s1783_s9 = smov 64   ;;  %s1784_s10 = smov 4   ;;  %v2155_v34 = vld [vmem:[#allocation7] ss:$0 sm:$0xff]  ;;  %vm1159_vm3 = vcmask 125952  }
  0x80   :  { %1247 = dma.vmem_to_hbm [thread:$0]  %s1242_s26, 4096, %s2304_s4, [#allocation10], %s1783_s9, %s1783_s9, %s1784_s10  }
  0x81   :  { %s1785_s4 = smov [#allocation8]  }
  0x82   :  { %s1229_s12 = sshll.u32 %s1785_s4, 4  ;;  %s1230_s12 = int_to_ptr.vmem [resolvable:$true] %s1229_s12 }
  0x83   :  { %s1747_s13 = scalar_lea.vmem %s1230_s12, 4096  ;;  %p1752_p5 = scmp.lt.s32.totalorder %s1230_s12, %s1230_s12 }
  0x84   :  { %p1748_p4 = scmp.ne.s32.totalorder %s1230_s12, %s1747_s13  ;;  %p1753_p6 = scmp.lt.s32.totalorder %s1747_s13, %s1747_s13 }
  0x86   :  { %p1754_p7 = por %p1753_p6, %p1752_p5 }
  0x88   :  { %p1755_p8 = pnand %p1754_p7, %p1748_p4 }
 0x111   :  { %v1584_v35 = vpop.f32.mrb[0].mxu0  ;;  %v1616_v36 = vpop.f32.mrb[0].mxu1 }
 0x112   :  { %v593_v37 = vadd.f32 %v1584_v35, %v2155_v34  ;;  %v721_v38 = vadd.f32 %v1616_v36, %v2155_v34  ;;  %v584_v39 = vpop.f32.mrb[1].mxu0  ;;  %v712_v40 = vpop.f32.mrb[1].mxu1 }
 0x113   :  { %v585_v41 = vadd.f32 %v2155_v34, %v584_v39  ;;  %v713_v42 = vadd.f32 %v2155_v34, %v712_v40  ;;  %v1585_v43 = vpop.f32.mrb[2].mxu0  ;;  %v1617_v44 = vpop.f32.mrb[2].mxu1 }
 0x114   :  { %v841_v45 = vmax.f32 %v593_v37, 0.0  ;;  %v873_v46 = vmax.f32 %v721_v38, 0.0  ;;  %v596_v47 = vadd.f32 %v1585_v43, %v2155_v34  ;;  %v724_v48 = vadd.f32 %v1617_v44, %v2155_v34  ;;  %v587_v49 = vpop.f32.mrb[3].mxu0  ;;  %v715_v50 = vpop.f32.mrb[3].mxu1 }
 0x115   :  { %v839_v51 = vmax.f32 %v585_v41, 0.0  ;;  %v871_v52 = vmax.f32 %v713_v42, 0.0  ;;  %v588_v53 = vadd.f32 %v2155_v34, %v587_v49  ;;  %v716_v54 = vadd.f32 %v2155_v34, %v715_v50 }
 0x116   :  { %v1485_v55 = vpack.c.bf16 %v841_v45, %v841_v45  ;;  %v1517_v56 = vpack.c.bf16 %v873_v46, %v873_v46  ;;  %v842_v57 = vmax.f32 %v596_v47, 0.0  ;;  %v874_v58 = vmax.f32 %v724_v48, 0.0 }
 0x117   :  { %v1483_v59 = vpack.c.bf16 %v839_v51, %v839_v51  ;;  %v1515_v60 = vpack.c.bf16 %v871_v52, %v871_v52  ;;  %v840_v61 = vmax.f32 %v588_v53, 0.0  ;;  %v872_v62 = vmax.f32 %v716_v54, 0.0 }
 0x118   :  { %1162 = vst.msk [vmem:[#allocation8 + $0x8] sm:$0xf] %vm1159_vm3, %v1485_v55  ;;  %1194 = vst.msk [vmem:[#allocation8 + $0x88] sm:$0xf] %vm1159_vm3, %v1517_v56  ;;  %v1486_v63 = vpack.c.bf16 %v842_v57, %v842_v57  ;;  %v1518_v0 = vpack.c.bf16 %v874_v58, %v874_v58 }
 0x119   :  { %1160 = vst.msk [vmem:[#allocation8] sm:$0xf] %vm1159_vm3, %v1483_v59  ;;  %1192 = vst.msk [vmem:[#allocation8 + $0x80] sm:$0xf] %vm1159_vm3, %v1515_v60  ;;  %v1484_v1 = vpack.c.bf16 %v840_v61, %v840_v61  ;;  %v1516_v2 = vpack.c.bf16 %v872_v62, %v872_v62  ;;  %v1588_v5 = vpop.f32.mrb[4].mxu0 }
 0x11a   :  { %v1620_v6 = vpop.f32.mrb[4].mxu1  ;;  %1163 = vst.msk [vmem:[#allocation8 + $0xc] sm:$0xf] %vm1159_vm3, %v1486_v63  ;;  %1195 = vst.msk [vmem:[#allocation8 + $0x8c] sm:$0xf] %vm1159_vm3, %v1518_v0  ;;  %v609_v7 = vadd.f32 %v1588_v5, %v2155_v34  ;;  %v600_v11 = vpop.f32.mrb[5].mxu0 }
 0x11b   :  { %v737_v10 = vadd.f32 %v1620_v6, %v2155_v34  ;;  %v728_v14 = vpop.f32.mrb[5].mxu1  ;;  %1161 = vst.msk [vmem:[#allocation8 + $0x4] sm:$0xf] %vm1159_vm3, %v1484_v1  ;;  %1193 = vst.msk [vmem:[#allocation8 + $0x84] sm:$0xf] %vm1159_vm3, %v1516_v2  ;;  %v601_v15 = vadd.f32 %v2155_v34, %v600_v11  ;;  %v1589_v19 = vpop.f32.mrb[6].mxu0 }
 0x11c   :  { %v729_v18 = vadd.f32 %v2155_v34, %v728_v14  ;;  %v1621_v23 = vpop.f32.mrb[6].mxu1  ;;  %v845_v3 = vmax.f32 %v609_v7, 0.0  ;;  %v612_v24 = vadd.f32 %v1589_v19, %v2155_v34  ;;  %v603_v27 = vpop.f32.mrb[7].mxu0 }
 0x11d   :  { %v877_v4 = vmax.f32 %v737_v10, 0.0  ;;  %v740_v25 = vadd.f32 %v1621_v23, %v2155_v34  ;;  %v731_v8 = vpop.f32.mrb[7].mxu1  ;;  %v843_v9 = vmax.f32 %v601_v15, 0.0  ;;  %v604_v13 = vadd.f32 %v2155_v34, %v603_v27 }
 0x11e   :  { %v875_v12 = vmax.f32 %v729_v18, 0.0  ;;  %v732_v16 = vadd.f32 %v2155_v34, %v731_v8  ;;  %v1489_v17 = vpack.c.bf16 %v845_v3, %v845_v3  ;;  %v846_v21 = vmax.f32 %v612_v24, 0.0 }
 0x11f   :  { %v1521_v20 = vpack.c.bf16 %v877_v4, %v877_v4  ;;  %v878_v22 = vmax.f32 %v740_v25, 0.0  ;;  %v1487_v26 = vpack.c.bf16 %v843_v9, %v843_v9  ;;  %v844_v29 = vmax.f32 %v604_v13, 0.0 }
 0x120   :  { %v1519_v28 = vpack.c.bf16 %v875_v12, %v875_v12  ;;  %v876_v30 = vmax.f32 %v732_v16, 0.0  ;;  %1166 = vst.msk [vmem:[#allocation8 + $0x18] sm:$0xf] %vm1159_vm3, %v1489_v17  ;;  %v1490_v31 = vpack.c.bf16 %v846_v21, %v846_v21 }
 0x121   :  { %1198 = vst.msk [vmem:[#allocation8 + $0x98] sm:$0xf] %vm1159_vm3, %v1521_v20  ;;  %v1522_v32 = vpack.c.bf16 %v878_v22, %v878_v22  ;;  %1164 = vst.msk [vmem:[#allocation8 + $0x10] sm:$0xf] %vm1159_vm3, %v1487_v26  ;;  %v1488_v33 = vpack.c.bf16 %v844_v29, %v844_v29  ;;  %v1592_v36 = vpop.f32.mrb[8].mxu0 }
 0x122   :  { %1196 = vst.msk [vmem:[#allocation8 + $0x90] sm:$0xf] %vm1159_vm3, %v1519_v28  ;;  %v1520_v35 = vpack.c.bf16 %v876_v30, %v876_v30  ;;  %v1624_v37 = vpop.f32.mrb[8].mxu1  ;;  %1167 = vst.msk [vmem:[#allocation8 + $0x1c] sm:$0xf] %vm1159_vm3, %v1490_v31  ;;  %v625_v38 = vadd.f32 %v1592_v36, %v2155_v34  ;;  %v616_v40 = vpop.f32.mrb[9].mxu0 }
 0x123   :  { %1199 = vst.msk [vmem:[#allocation8 + $0x9c] sm:$0xf] %vm1159_vm3, %v1522_v32  ;;  %v753_v39 = vadd.f32 %v1624_v37, %v2155_v34  ;;  %v744_v41 = vpop.f32.mrb[9].mxu1  ;;  %1165 = vst.msk [vmem:[#allocation8 + $0x14] sm:$0xf] %vm1159_vm3, %v1488_v33  ;;  %v617_v42 = vadd.f32 %v2155_v34, %v616_v40  ;;  %v1593_v44 = vpop.f32.mrb[10].mxu0 }
 0x124   :  { %1197 = vst.msk [vmem:[#allocation8 + $0x94] sm:$0xf] %vm1159_vm3, %v1520_v35  ;;  %v745_v43 = vadd.f32 %v2155_v34, %v744_v41  ;;  %v1625_v45 = vpop.f32.mrb[10].mxu1  ;;  %v849_v46 = vmax.f32 %v625_v38, 0.0  ;;  %v628_v48 = vadd.f32 %v1593_v44, %v2155_v34  ;;  %v619_v50 = vpop.f32.mrb[11].mxu0 }
 0x125   :  { %v881_v47 = vmax.f32 %v753_v39, 0.0  ;;  %v756_v49 = vadd.f32 %v1625_v45, %v2155_v34  ;;  %v747_v51 = vpop.f32.mrb[11].mxu1  ;;  %v847_v52 = vmax.f32 %v617_v42, 0.0  ;;  %v620_v54 = vadd.f32 %v2155_v34, %v619_v50 }
 0x126   :  { %v879_v53 = vmax.f32 %v745_v43, 0.0  ;;  %v748_v55 = vadd.f32 %v2155_v34, %v747_v51  ;;  %v1493_v56 = vpack.c.bf16 %v849_v46, %v849_v46  ;;  %v850_v58 = vmax.f32 %v628_v48, 0.0 }
 0x127   :  { %v1525_v57 = vpack.c.bf16 %v881_v47, %v881_v47  ;;  %v882_v59 = vmax.f32 %v756_v49, 0.0  ;;  %v1491_v60 = vpack.c.bf16 %v847_v52, %v847_v52  ;;  %v848_v62 = vmax.f32 %v620_v54, 0.0 }
 0x128   :  { %v1523_v61 = vpack.c.bf16 %v879_v53, %v879_v53  ;;  %v880_v63 = vmax.f32 %v748_v55, 0.0  ;;  %1170 = vst.msk [vmem:[#allocation8 + $0x28] sm:$0xf] %vm1159_vm3, %v1493_v56  ;;  %v1494_v0 = vpack.c.bf16 %v850_v58, %v850_v58 }
 0x129   :  { %1202 = vst.msk [vmem:[#allocation8 + $0xa8] sm:$0xf] %vm1159_vm3, %v1525_v57  ;;  %v1526_v1 = vpack.c.bf16 %v882_v59, %v882_v59  ;;  %1168 = vst.msk [vmem:[#allocation8 + $0x20] sm:$0xf] %vm1159_vm3, %v1491_v60  ;;  %v1492_v2 = vpack.c.bf16 %v848_v62, %v848_v62  ;;  %v1596_v6 = vpop.f32.mrb[12].mxu0 }
 0x12a   :  { %1200 = vst.msk [vmem:[#allocation8 + $0xa0] sm:$0xf] %vm1159_vm3, %v1523_v61  ;;  %v1524_v5 = vpack.c.bf16 %v880_v63, %v880_v63  ;;  %v1628_v7 = vpop.f32.mrb[12].mxu1  ;;  %1171 = vst.msk [vmem:[#allocation8 + $0x2c] sm:$0xf] %vm1159_vm3, %v1494_v0  ;;  %v641_v10 = vadd.f32 %v1596_v6, %v2155_v34  ;;  %v632_v14 = vpop.f32.mrb[13].mxu0 }
 0x12b   :  { %1203 = vst.msk [vmem:[#allocation8 + $0xac] sm:$0xf] %vm1159_vm3, %v1526_v1  ;;  %v769_v11 = vadd.f32 %v1628_v7, %v2155_v34  ;;  %v760_v15 = vpop.f32.mrb[13].mxu1  ;;  %1169 = vst.msk [vmem:[#allocation8 + $0x24] sm:$0xf] %vm1159_vm3, %v1492_v2  ;;  %v633_v18 = vadd.f32 %v2155_v34, %v632_v14  ;;  %v1597_v23 = vpop.f32.mrb[14].mxu0 }
 0x12c   :  { %1201 = vst.msk [vmem:[#allocation8 + $0xa4] sm:$0xf] %vm1159_vm3, %v1524_v5  ;;  %v761_v19 = vadd.f32 %v2155_v34, %v760_v15  ;;  %v1629_v3 = vpop.f32.mrb[14].mxu1  ;;  %v853_v4 = vmax.f32 %v641_v10, 0.0  ;;  %v644_v25 = vadd.f32 %v1597_v23, %v2155_v34  ;;  %v635_v8 = vpop.f32.mrb[15].mxu0 }
 0x12d   :  { %v885_v24 = vmax.f32 %v769_v11, 0.0  ;;  %v772_v27 = vadd.f32 %v1629_v3, %v2155_v34  ;;  %v763_v9 = vpop.f32.mrb[15].mxu1  ;;  %v851_v12 = vmax.f32 %v633_v18, 0.0  ;;  %v636_v16 = vadd.f32 %v2155_v34, %v635_v8 }
 0x12e   :  { %v883_v13 = vmax.f32 %v761_v19, 0.0  ;;  %v764_v17 = vadd.f32 %v2155_v34, %v763_v9  ;;  %v1497_v20 = vpack.c.bf16 %v853_v4, %v853_v4  ;;  %v854_v22 = vmax.f32 %v644_v25, 0.0 }
 0x12f   :  { %v1529_v21 = vpack.c.bf16 %v885_v24, %v885_v24  ;;  %v886_v26 = vmax.f32 %v772_v27, 0.0  ;;  %v1495_v28 = vpack.c.bf16 %v851_v12, %v851_v12  ;;  %v852_v30 = vmax.f32 %v636_v16, 0.0 }
 0x130   :  { %v1527_v29 = vpack.c.bf16 %v883_v13, %v883_v13  ;;  %v884_v31 = vmax.f32 %v764_v17, 0.0  ;;  %1174 = vst.msk [vmem:[#allocation8 + $0x38] sm:$0xf] %vm1159_vm3, %v1497_v20  ;;  %v1498_v32 = vpack.c.bf16 %v854_v22, %v854_v22 }
 0x131   :  { %1206 = vst.msk [vmem:[#allocation8 + $0xb8] sm:$0xf] %vm1159_vm3, %v1529_v21  ;;  %v1530_v33 = vpack.c.bf16 %v886_v26, %v886_v26  ;;  %1172 = vst.msk [vmem:[#allocation8 + $0x30] sm:$0xf] %vm1159_vm3, %v1495_v28  ;;  %v1496_v35 = vpack.c.bf16 %v852_v30, %v852_v30  ;;  %v1600_v37 = vpop.f32.mrb[16].mxu0 }
 0x132   :  { %1204 = vst.msk [vmem:[#allocation8 + $0xb0] sm:$0xf] %vm1159_vm3, %v1527_v29  ;;  %v1528_v36 = vpack.c.bf16 %v884_v31, %v884_v31  ;;  %v1632_v38 = vpop.f32.mrb[16].mxu1  ;;  %1175 = vst.msk [vmem:[#allocation8 + $0x3c] sm:$0xf] %vm1159_vm3, %v1498_v32  ;;  %v657_v39 = vadd.f32 %v1600_v37, %v2155_v34  ;;  %v648_v41 = vpop.f32.mrb[17].mxu0 }
 0x133   :  { %1207 = vst.msk [vmem:[#allocation8 + $0xbc] sm:$0xf] %vm1159_vm3, %v1530_v33  ;;  %v785_v40 = vadd.f32 %v1632_v38, %v2155_v34  ;;  %v776_v42 = vpop.f32.mrb[17].mxu1  ;;  %1173 = vst.msk [vmem:[#allocation8 + $0x34] sm:$0xf] %vm1159_vm3, %v1496_v35  ;;  %v649_v43 = vadd.f32 %v2155_v34, %v648_v41  ;;  %v1601_v45 = vpop.f32.mrb[18].mxu0 }
 0x134   :  { %1205 = vst.msk [vmem:[#allocation8 + $0xb4] sm:$0xf] %vm1159_vm3, %v1528_v36  ;;  %v777_v44 = vadd.f32 %v2155_v34, %v776_v42  ;;  %v1633_v46 = vpop.f32.mrb[18].mxu1  ;;  %v857_v47 = vmax.f32 %v657_v39, 0.0  ;;  %v660_v49 = vadd.f32 %v1601_v45, %v2155_v34  ;;  %v651_v51 = vpop.f32.mrb[19].mxu0 }
 0x135   :  { %v889_v48 = vmax.f32 %v785_v40, 0.0  ;;  %v788_v50 = vadd.f32 %v1633_v46, %v2155_v34  ;;  %v779_v52 = vpop.f32.mrb[19].mxu1  ;;  %v855_v53 = vmax.f32 %v649_v43, 0.0  ;;  %v652_v55 = vadd.f32 %v2155_v34, %v651_v51 }
 0x136   :  { %v887_v54 = vmax.f32 %v777_v44, 0.0  ;;  %v780_v56 = vadd.f32 %v2155_v34, %v779_v52  ;;  %v1501_v57 = vpack.c.bf16 %v857_v47, %v857_v47  ;;  %v858_v59 = vmax.f32 %v660_v49, 0.0 }
 0x137   :  { %v1533_v58 = vpack.c.bf16 %v889_v48, %v889_v48  ;;  %v890_v60 = vmax.f32 %v788_v50, 0.0  ;;  %v1499_v61 = vpack.c.bf16 %v855_v53, %v855_v53  ;;  %v856_v63 = vmax.f32 %v652_v55, 0.0 }
 0x138   :  { %v1531_v62 = vpack.c.bf16 %v887_v54, %v887_v54  ;;  %v888_v0 = vmax.f32 %v780_v56, 0.0  ;;  %1178 = vst.msk [vmem:[#allocation8 + $0x48] sm:$0xf] %vm1159_vm3, %v1501_v57  ;;  %v1502_v1 = vpack.c.bf16 %v858_v59, %v858_v59 }
 0x139   :  { %1210 = vst.msk [vmem:[#allocation8 + $0xc8] sm:$0xf] %vm1159_vm3, %v1533_v58  ;;  %v1534_v2 = vpack.c.bf16 %v890_v60, %v890_v60  ;;  %1176 = vst.msk [vmem:[#allocation8 + $0x40] sm:$0xf] %vm1159_vm3, %v1499_v61  ;;  %v1500_v5 = vpack.c.bf16 %v856_v63, %v856_v63  ;;  %v1604_v7 = vpop.f32.mrb[20].mxu0 }
 0x13a   :  { %1208 = vst.msk [vmem:[#allocation8 + $0xc0] sm:$0xf] %vm1159_vm3, %v1531_v62  ;;  %v1532_v6 = vpack.c.bf16 %v888_v0, %v888_v0  ;;  %v1636_v10 = vpop.f32.mrb[20].mxu1  ;;  %1179 = vst.msk [vmem:[#allocation8 + $0x4c] sm:$0xf] %vm1159_vm3, %v1502_v1  ;;  %v673_v11 = vadd.f32 %v1604_v7, %v2155_v34  ;;  %v664_v15 = vpop.f32.mrb[21].mxu0 }
 0x13b   :  { %1211 = vst.msk [vmem:[#allocation8 + $0xcc] sm:$0xf] %vm1159_vm3, %v1534_v2  ;;  %v801_v14 = vadd.f32 %v1636_v10, %v2155_v34  ;;  %v792_v18 = vpop.f32.mrb[21].mxu1  ;;  %1177 = vst.msk [vmem:[#allocation8 + $0x44] sm:$0xf] %vm1159_vm3, %v1500_v5  ;;  %v665_v19 = vadd.f32 %v2155_v34, %v664_v15  ;;  %v1605_v3 = vpop.f32.mrb[22].mxu0 }
 0x13c   :  { %1209 = vst.msk [vmem:[#allocation8 + $0xc4] sm:$0xf] %vm1159_vm3, %v1532_v6  ;;  %v793_v23 = vadd.f32 %v2155_v34, %v792_v18  ;;  %v1637_v4 = vpop.f32.mrb[22].mxu1  ;;  %v861_v24 = vmax.f32 %v673_v11, 0.0  ;;  %v676_v27 = vadd.f32 %v1605_v3, %v2155_v34  ;;  %v667_v9 = vpop.f32.mrb[23].mxu0 }
 0x13d   :  { %v893_v25 = vmax.f32 %v801_v14, 0.0  ;;  %v804_v8 = vadd.f32 %v1637_v4, %v2155_v34  ;;  %v795_v12 = vpop.f32.mrb[23].mxu1  ;;  %v859_v13 = vmax.f32 %v665_v19, 0.0  ;;  %v668_v17 = vadd.f32 %v2155_v34, %v667_v9 }
 0x13e   :  { %v891_v16 = vmax.f32 %v793_v23, 0.0  ;;  %v796_v20 = vadd.f32 %v2155_v34, %v795_v12  ;;  %v1505_v21 = vpack.c.bf16 %v861_v24, %v861_v24  ;;  %v862_v26 = vmax.f32 %v676_v27, 0.0 }
 0x13f   :  { %v1537_v22 = vpack.c.bf16 %v893_v25, %v893_v25  ;;  %v894_v28 = vmax.f32 %v804_v8, 0.0  ;;  %v1503_v29 = vpack.c.bf16 %v859_v13, %v859_v13  ;;  %v860_v31 = vmax.f32 %v668_v17, 0.0 }
 0x140   :  { %v1535_v30 = vpack.c.bf16 %v891_v16, %v891_v16  ;;  %v892_v32 = vmax.f32 %v796_v20, 0.0  ;;  %1182 = vst.msk [vmem:[#allocation8 + $0x58] sm:$0xf] %vm1159_vm3, %v1505_v21  ;;  %v1506_v33 = vpack.c.bf16 %v862_v26, %v862_v26 }
 0x141   :  { %1214 = vst.msk [vmem:[#allocation8 + $0xd8] sm:$0xf] %vm1159_vm3, %v1537_v22  ;;  %v1538_v35 = vpack.c.bf16 %v894_v28, %v894_v28  ;;  %1180 = vst.msk [vmem:[#allocation8 + $0x50] sm:$0xf] %vm1159_vm3, %v1503_v29  ;;  %v1504_v36 = vpack.c.bf16 %v860_v31, %v860_v31  ;;  %v1608_v38 = vpop.f32.mrb[24].mxu0 }
 0x142   :  { %1212 = vst.msk [vmem:[#allocation8 + $0xd0] sm:$0xf] %vm1159_vm3, %v1535_v30  ;;  %v1536_v37 = vpack.c.bf16 %v892_v32, %v892_v32  ;;  %v1640_v39 = vpop.f32.mrb[24].mxu1  ;;  %1183 = vst.msk [vmem:[#allocation8 + $0x5c] sm:$0xf] %vm1159_vm3, %v1506_v33  ;;  %v689_v40 = vadd.f32 %v1608_v38, %v2155_v34  ;;  %v680_v42 = vpop.f32.mrb[25].mxu0 }
 0x143   :  { %1215 = vst.msk [vmem:[#allocation8 + $0xdc] sm:$0xf] %vm1159_vm3, %v1538_v35  ;;  %v817_v41 = vadd.f32 %v1640_v39, %v2155_v34  ;;  %v808_v43 = vpop.f32.mrb[25].mxu1  ;;  %1181 = vst.msk [vmem:[#allocation8 + $0x54] sm:$0xf] %vm1159_vm3, %v1504_v36  ;;  %v681_v44 = vadd.f32 %v2155_v34, %v680_v42  ;;  %v1609_v46 = vpop.f32.mrb[26].mxu0 }
 0x144   :  { %1213 = vst.msk [vmem:[#allocation8 + $0xd4] sm:$0xf] %vm1159_vm3, %v1536_v37  ;;  %v809_v45 = vadd.f32 %v2155_v34, %v808_v43  ;;  %v1641_v47 = vpop.f32.mrb[26].mxu1  ;;  %v865_v48 = vmax.f32 %v689_v40, 0.0  ;;  %v692_v50 = vadd.f32 %v1609_v46, %v2155_v34  ;;  %v683_v52 = vpop.f32.mrb[27].mxu0 }
 0x145   :  { %v897_v49 = vmax.f32 %v817_v41, 0.0  ;;  %v820_v51 = vadd.f32 %v1641_v47, %v2155_v34  ;;  %v811_v53 = vpop.f32.mrb[27].mxu1  ;;  %v863_v54 = vmax.f32 %v681_v44, 0.0  ;;  %v684_v56 = vadd.f32 %v2155_v34, %v683_v52 }
 0x146   :  { %v895_v55 = vmax.f32 %v809_v45, 0.0  ;;  %v812_v57 = vadd.f32 %v2155_v34, %v811_v53  ;;  %v1509_v58 = vpack.c.bf16 %v865_v48, %v865_v48  ;;  %v866_v60 = vmax.f32 %v692_v50, 0.0 }
 0x147   :  { %v1541_v59 = vpack.c.bf16 %v897_v49, %v897_v49  ;;  %v898_v61 = vmax.f32 %v820_v51, 0.0  ;;  %v1507_v62 = vpack.c.bf16 %v863_v54, %v863_v54  ;;  %v864_v0 = vmax.f32 %v684_v56, 0.0 }
 0x148   :  { %v1539_v63 = vpack.c.bf16 %v895_v55, %v895_v55  ;;  %v896_v1 = vmax.f32 %v812_v57, 0.0  ;;  %1186 = vst.msk [vmem:[#allocation8 + $0x68] sm:$0xf] %vm1159_vm3, %v1509_v58  ;;  %v1510_v2 = vpack.c.bf16 %v866_v60, %v866_v60 }
 0x149   :  { %1218 = vst.msk [vmem:[#allocation8 + $0xe8] sm:$0xf] %vm1159_vm3, %v1541_v59  ;;  %v1542_v5 = vpack.c.bf16 %v898_v61, %v898_v61  ;;  %1184 = vst.msk [vmem:[#allocation8 + $0x60] sm:$0xf] %vm1159_vm3, %v1507_v62  ;;  %v1508_v6 = vpack.c.bf16 %v864_v0, %v864_v0  ;;  %v1612_v10 = vpop.f32.mrb[28].mxu0 }
 0x14a   :  { %1216 = vst.msk [vmem:[#allocation8 + $0xe0] sm:$0xf] %vm1159_vm3, %v1539_v63  ;;  %v1540_v7 = vpack.c.bf16 %v896_v1, %v896_v1  ;;  %v1644_v11 = vpop.f32.mrb[28].mxu1  ;;  %1187 = vst.msk [vmem:[#allocation8 + $0x6c] sm:$0xf] %vm1159_vm3, %v1510_v2  ;;  %v705_v14 = vadd.f32 %v1612_v10, %v2155_v34  ;;  %v696_v18 = vpop.f32.mrb[29].mxu0 }
 0x14b   :  { %1219 = vst.msk [vmem:[#allocation8 + $0xec] sm:$0xf] %vm1159_vm3, %v1542_v5  ;;  %v833_v15 = vadd.f32 %v1644_v11, %v2155_v34  ;;  %v824_v19 = vpop.f32.mrb[29].mxu1  ;;  %1185 = vst.msk [vmem:[#allocation8 + $0x64] sm:$0xf] %vm1159_vm3, %v1508_v6  ;;  %v697_v23 = vadd.f32 %v2155_v34, %v696_v18  ;;  %v1613_v4 = vpop.f32.mrb[30].mxu0 }
 0x14c   :  { %1217 = vst.msk [vmem:[#allocation8 + $0xe4] sm:$0xf] %vm1159_vm3, %v1540_v7  ;;  %v825_v3 = vadd.f32 %v2155_v34, %v824_v19  ;;  %v1645_v24 = vpop.f32.mrb[30].mxu1  ;;  %v869_v25 = vmax.f32 %v705_v14, 0.0  ;;  %v708_v8 = vadd.f32 %v1613_v4, %v2155_v34  ;;  %v699_v12 = vpop.f32.mrb[31].mxu0 }
 0x14d   :  { %v901_v27 = vmax.f32 %v833_v15, 0.0  ;;  %v836_v9 = vadd.f32 %v1645_v24, %v2155_v34  ;;  %v827_v13 = vpop.f32.mrb[31].mxu1  ;;  %v867_v16 = vmax.f32 %v697_v23, 0.0  ;;  %v700_v20 = vadd.f32 %v2155_v34, %v699_v12 }
 0x14e   :  { %v899_v17 = vmax.f32 %v825_v3, 0.0  ;;  %v828_v21 = vadd.f32 %v2155_v34, %v827_v13  ;;  %v1513_v22 = vpack.c.bf16 %v869_v25, %v869_v25  ;;  %v870_v28 = vmax.f32 %v708_v8, 0.0 }
 0x14f   :  { %v1545_v26 = vpack.c.bf16 %v901_v27, %v901_v27  ;;  %v902_v29 = vmax.f32 %v836_v9, 0.0  ;;  %v1511_v30 = vpack.c.bf16 %v867_v16, %v867_v16  ;;  %v868_v32 = vmax.f32 %v700_v20, 0.0 }
 0x150   :  { %v1543_v31 = vpack.c.bf16 %v899_v17, %v899_v17  ;;  %v900_v33 = vmax.f32 %v828_v21, 0.0  ;;  %1190 = vst.msk [vmem:[#allocation8 + $0x78] sm:$0xf] %vm1159_vm3, %v1513_v22  ;;  %v1514_v35 = vpack.c.bf16 %v870_v28, %v870_v28 }
 0x151   :  { %1222 = vst.msk [vmem:[#allocation8 + $0xf8] sm:$0xf] %vm1159_vm3, %v1545_v26  ;;  %v1546_v36 = vpack.c.bf16 %v902_v29, %v902_v29  ;;  %1188 = vst.msk [vmem:[#allocation8 + $0x70] sm:$0xf] %vm1159_vm3, %v1511_v30  ;;  %v1512_v34 = vpack.c.bf16 %v868_v32, %v868_v32 }
 0x152   :  { %1220 = vst.msk [vmem:[#allocation8 + $0xf0] sm:$0xf] %vm1159_vm3, %v1543_v31  ;;  %v1544_v37 = vpack.c.bf16 %v900_v33, %v900_v33  ;;  %1191 = vst.msk [vmem:[#allocation8 + $0x7c] sm:$0xf] %vm1159_vm3, %v1514_v35 }
 0x153   :  { %1223 = vst.msk [vmem:[#allocation8 + $0xfc] sm:$0xf] %vm1159_vm3, %v1546_v36  ;;  %1189 = vst.msk [vmem:[#allocation8 + $0x74] sm:$0xf] %vm1159_vm3, %v1512_v34 }
 0x154   :  { %1221 = vst.msk [vmem:[#allocation8 + $0xf4] sm:$0xf] %vm1159_vm3, %v1544_v37 }
 0x155   :  { %1758 = shalt.err (!%p1755_p8)
}
 0x156   :  { %s1759_s16 = scalar_lea.hbm %s2303_s3, 4096 }
 0x157   :  { %p1760_p9 = scmp.ne.s32.totalorder %s2303_s3, %s1759_s16  ;;  %p1763_p10 = scmp.lt.u32.totalorder %s1759_s16, %s2303_s3 }
 0x159   :  { %p1765_p11 = pnand %p1763_p10, %p1760_p9 }
 0x15b   :  { %1768 = shalt.err (!%p1765_p11)
}
 0x15c   :  { %1235 = dma.vmem_to_hbm [thread:$0]  %s1230_s12, 4096, %s2303_s3, [#allocation4], %s1783_s9, %s1783_s9, %s1784_s10  }
 0x15d   :  { %1773 = dma.done.wait [#allocation4], 4096  }
 0x15e   :  { %1774 = vsyncadd [#allocation4], 4294963200 }
 0x15f   :  { %1775 = dma.done.wait [#allocation10], 4096  }
 0x160   :  { %1776 = vsyncadd [#allocation10], 4294963200 }
 0x161   :  { %1254 = vsyncpa [#allocation3], 1 }
 0x162   :  { %1255 = vsyncpa [#allocation6], 1 }
 0x163   :  { %1256 = vsyncpa [#allocation4], 1 }
 0x164   :  { %1257 = vsyncpa [#allocation10], 1 }

// kernel: inception_block.3
= control target key start
LH: loop header
LB: loop body
LE: loop exit
PB: predicated region body
PF: predicated region fallthrough
CT: control target
= control target key end

     0   :  { %s12714_s0 = inlined_call_operand.hbm [shape: bf16[2,4,8,8,8], index: 0, kind: input, shape index: {}, may-alias: {0,1,2}]   ;;  %s12715_s1 = inlined_call_operand.hbm [shape: bf16[2,4,8,8,8], index: 1, kind: input, shape index: {}, may-alias: {0,1,2}]   ;;  %s12716_s2 = inlined_call_operand.hbm [shape: bf16[2,4,8,8,8], index: 2, kind: input, shape index: {}, may-alias: {0,1,2}]   ;;  %s12717_s3 = inlined_call_operand.hbm [shape: bf16[2,4,8,8,16], index: 3, kind: input, shape index: {}, may-alias: {3,4,5}]   ;;  %s12718_s4 = inlined_call_operand.hbm [shape: bf16[2,4,8,8,16], index: 4, kind: input, shape index: {}, may-alias: {3,4,5}]   ;;  %s12719_s5 = inlined_call_operand.hbm [shape: bf16[2,4,8,8,16], index: 5, kind: input, shape index: {}, may-alias: {3,4,5}]   ;;  %s12720_s6 = inlined_call_operand.hbm [shape: bf16[8,8], index: 6, kind: input, shape index: {}]   ;;  %s12721_s7 = inlined_call_operand.hbm [shape: bf16[27,16,32], index: 7, kind: input, shape index: {}]   ;;  %s12722_s8 = inlined_call_operand.hbm [shape: bf16[8,8], index: 8, kind: input, shape index: {}]   ;;  %s12723_s9 = inlined_call_operand.hbm [shape: f32[1,8], index: 9, kind: input, shape index: {}]   ;;  %s12724_s10 = inlined_call_operand.hbm [shape: f32[1,32], index: 10, kind: input, shape index: {}]   ;;  %s12725_s11 = inlined_call_operand.hbm [shape: f32[1,8], index: 11, kind: input, shape index: {}]   ;;  %s12726_s12 = inlined_call_operand.hbm [shape: f32[2,4,64,48], index: 12, kind: output, shape index: {}]  }
   0x1   :  { %12854 = sst [smem:[#allocation141_spill]] %s12714_s0 }
   0x2   :  { %12855 = sst [smem:[#allocation142_spill]] %s12715_s1 }
   0x3   :  { %12856 = sst [smem:[#allocation143_spill]] %s12716_s2 }
   0x4   :  { %12857 = sst [smem:[#allocation144_spill]] %s12717_s3 }
   0x5   :  { %12858 = sst [smem:[#allocation145_spill]] %s12719_s5 }
   0x6   :  { %12859 = sst [smem:[#allocation146_spill]] %s12720_s6 }
   0x7   :  { %12860 = sst [smem:[#allocation147_spill]] %s12721_s7 }
   0x8   :  { %12861 = sst [smem:[#allocation148_spill]] %s12722_s8 }
   0x9   :  { %12862 = sst [smem:[#allocation149_spill]] %s12723_s9 }
   0xa   :  { %12863 = sst [smem:[#allocation150_spill]] %s12724_s10 }
   0xb   :  { %12864 = sst [smem:[#allocation151_spill]] %s12725_s11 }
   0xc   :  { %12865 = sst [smem:[#allocation152_spill]] %s12726_s12 }
   0xd   :  { %17 = vsyncpa [#allocation5], 0 }
   0xe   :  { %19 = vsyncpa [#allocation5 + $0x1], 0 }
   0xf   :  { %20 = vsyncpa [#allocation8], 0 }
  0x10   :  { %22 = vsyncpa [#allocation8 + $0x1], 0 }
  0x11   :  { %23 = vsyncpa [#allocation11], 0 }
  0x12   :  { %25 = vsyncpa [#allocation11 + $0x1], 0 }
  0x13   :  { %26 = vsyncpa [#allocation14], 0 }
  0x14   :  { %28 = vsyncpa [#allocation14 + $0x1], 0 }
  0x15   :  { %29 = vsyncpa [#allocation17], 0 }
  0x16   :  { %30 = vsyncpa [#allocation20], 0 }
  0x17   :  { %31 = vsyncpa [#allocation23], 0 }
  0x18   :  { %32 = vsyncpa [#allocation6], 0 }
  0x19   :  { %34 = vsyncpa [#allocation6 + $0x1], 0  ;;  %s9631_s21 = smov 0   ;;  %s9633_s22 = smov 0  }
  0x1a   :  { %s9635_s23 = smov 0   ;;  %s9637_s24 = smov 0  }
  0x1b   :  { %s9639_s25 = smov 0   ;;  %s9641_s26 = smov 0  }
  0x1c   :  { %s9643_s27 = smov 0   ;;  %s9645_s28 = smov 0  }
  0x1d   :  { %s9647_s29 = smov 0   ;;  %s9649_s30 = smov 0  }
  0x1e   :  { %s9651_s13 = smov 0   ;;  %s9653_s14 = smov 0  }
  0x1f   :  { %s9655_s15 = smov 0   ;;  %s9657_s16 = smov 0  }
  0x20 LB: > { %12866 = sst [smem:[#allocation36_spill]] %s9493_s21  ;;  %s9702_s17 = sadd.s32 4294967295, %s9545_s16   ;;  %s9545_s16 = sphi %s9657_s16, %s40_s16   ;;  %s9541_s15 = sphi %s9655_s15, %s13216_s15   ;;  %s9537_s14 = sphi %s9653_s14, %s13225_s14   ;;  %s9533_s13 = sphi %s9651_s13, %s13224_s13   ;;  %s9529_s30 = sphi %s9649_s30, %s13223_s30   ;;  %s9525_s29 = sphi %s9647_s29, %s13222_s29   ;;  %s9521_s28 = sphi %s9645_s28, %s13221_s28   ;;  %s9517_s27 = sphi %s9643_s27, %s13211_s27   ;;  %s9513_s26 = sphi %s9641_s26, %s13220_s26   ;;  %s9509_s25 = sphi %s9639_s25, %s13209_s25   ;;  %s9505_s24 = sphi %s9637_s24, %s13208_s24   ;;  %s9501_s23 = sphi %s9635_s23, %s13219_s23   ;;  %s9497_s22 = sphi %s9633_s22, %s13207_s22   ;;  %s9493_s21 = sphi %s9631_s21, %s13218_s21  }
  0x21   : > { %12867 = sst [smem:[#allocation37_spill]] %s9497_s22  ;;  %p7684_p0 = scmp.ge.s32.totalorder %s9545_s16, 1 }
  0x22   : > { %12868 = sst [smem:[#allocation38_spill]] %s9501_s23  ;;  %p12735_p1 = scmp.eq.s32.totalorder %s9702_s17, 0 }
  0x23   : > { %12869 = sst [smem:[#allocation39_spill]] %s9505_s24  ;;  %p403_p2 = scmp.lt.s32.totalorder %s9545_s16, 9 }
  0x24   : > { %12870 = sst [smem:[#allocation40_spill]] %s9509_s25  ;;  %s9547_s19 = smov [#allocation15]  }
  0x25   : > { %12871 = sst [smem:[#allocation41_spill]] %s9513_s26  ;;  %p9707_p3 = pnand %p7684_p0, %p403_p2 }
  0x26   : > { %12872 = sst [smem:[#allocation42_spill]] %s9521_s28  ;;  %s416_s20 = sshll.u32 %s9547_s19, 4  ;;  %s417_s20 = int_to_ptr.vmem [resolvable:$true] %s416_s20 }
  0x27   : > { %12873 = sst [smem:[#allocation43_spill]] %s9529_s30  ;;  %p8781_p4 = pneg %p9707_p3 }
  0x28   : > { %12874 = sst [smem:[#allocation44_spill]] %s9533_s13  ;;  %s9548_s12 = smov [#allocation16]  }
  0x29   : > { %12875 = sst [smem:[#allocation45_spill]] %s9537_s14  ;;  %s426_s13 = sshll.u32 %s9548_s12, 4  ;;  %s9719_s13 = int_to_ptr.vmem [resolvable:$true] %s426_s13 }
  0x2a   : > { %12876 = sst [smem:[#allocation46_spill]] %s9541_s15  ;;  %p9715_p5 = pnand %p8781_p4, %p12735_p1 }
  0x2b   : > { %s12877_s18 = scalar_select %p9707_p3, 1, 0 }
  0x2c   : > { %s12879_s30 = scalar_select %p9715_p5, 1, 0 }
  0x2d   : > { %12878 = sst [smem:[#allocation47_spill]] %s12877_s18  ;;  %s9549_s5 = smov [#allocation19]  }
  0x2e   : > { %12880 = sst [smem:[#allocation48_spill]] %s12879_s30  ;;  %s9721_s2 = sshll.u32 %s9549_s5, 4  ;;  %s452_s2 = int_to_ptr.vmem [resolvable:$true] %s9721_s2 }
  0x2f   : > { %s12881_s6 = sld [smem:[#allocation146_spill]]  ;;  %p9731_p7 = pneg %p9715_p5 }
  0x35   : > { %s9015_s19 = scalar_lea.hbm %s12881_s6, 64 }
  0x36   : > { %p9016_p6 = scmp.ne.s32.totalorder %s12881_s6, %s9015_s19  ;;  %p9022_p10 = scmp.lt.u32.totalorder %s9015_s19, %s12881_s6 }
  0x38   : > { %p9018_p8 = pnand %p9731_p7, %p9016_p6 }
  0x3a   : > { %p9019_p9 = pneg %p9018_p8 }
  0x3c   : > { %p9024_p11 = pnand %p9022_p10, %p9019_p9 }
  0x3e   : > { %9027 = shalt.err (!%p9024_p11)
}
  0x3f   : > { %s9028_s21 = scalar_lea.vmem %s417_s20, 64  ;;  %p9036_p2 = scmp.lt.s32.totalorder %s417_s20, %s417_s20 }
  0x40   : > { %p9029_p12 = scmp.ne.s32.totalorder %s417_s20, %s9028_s21  ;;  %p9037_p4 = scmp.lt.s32.totalorder %s9028_s21, %s9028_s21 }
  0x42   : > { %p9031_p13 = pnand %p9029_p12, %p9731_p7  ;;  %p9038_p1 = por %p9037_p4, %p9036_p2 }
  0x44   : > { %p9032_p0 = pneg %p9031_p13 }
  0x46   : > { %p9039_p3 = pnand %p9038_p1, %p9032_p0 }
  0x48   : > { %9042 = shalt.err (!%p9039_p3)
}
  0x49   : > { %8784 = dma.hbm_to_vmem [thread:$0]  (!%p9715_p5), %s12881_s6, 64, %s417_s20, [#allocation14]  }
  0x4a   : > { %s12883_s7 = sld [smem:[#allocation147_spill]] }
  0x50   : > { %s9043_s19 = scalar_lea.hbm %s12883_s7, 3456 }
  0x51   : > { %p9044_p6 = scmp.ne.s32.totalorder %s12883_s7, %s9043_s19  ;;  %p9050_p1 = scmp.lt.u32.totalorder %s9043_s19, %s12883_s7 }
  0x53   : > { %p9046_p8 = pnand %p9044_p6, %p9731_p7 }
  0x55   : > { %p9047_p9 = pneg %p9046_p8 }
  0x57   : > { %p9052_p3 = pnand %p9050_p1, %p9047_p9 }
  0x59   : > { %9055 = shalt.err (!%p9052_p3)
}
  0x5a   : > { %s9056_s20 = scalar_lea.vmem %s9719_s13, 3456  ;;  %p9064_p13 = scmp.lt.s32.totalorder %s9719_s13, %s9719_s13 }
  0x5b   : > { %p9057_p10 = scmp.ne.s32.totalorder %s9719_s13, %s9056_s20  ;;  %p9065_p0 = scmp.lt.s32.totalorder %s9056_s20, %s9056_s20 }
  0x5d   : > { %p9059_p11 = pnand %p9057_p10, %p9731_p7  ;;  %p9066_p2 = por %p9065_p0, %p9064_p13 }
  0x5f   : > { %p9060_p12 = pneg %p9059_p11 }
  0x61   : > { %p9067_p4 = pnand %p9066_p2, %p9060_p12 }
  0x63   : > { %9070 = shalt.err (!%p9067_p4)
}
  0x64   : > { %s12739_s11 = smov 64   ;;  %s12741_s10 = smov 4  }
  0x65   : > { %8787 = dma.hbm_to_vmem [thread:$0]  (!%p9715_p5), %s12883_s7, 3456, %s9719_s13, [#allocation17], %s12739_s11, %s12739_s11, %s12741_s10  }
  0x66   : > { %s12884_s9 = sld [smem:[#allocation149_spill]] }
  0x6c   : > { %s9071_s19 = scalar_lea.hbm %s12884_s9, 16 }
  0x6d   : > { %p9072_p6 = scmp.ne.s32.totalorder %s12884_s9, %s9071_s19  ;;  %p9078_p1 = scmp.lt.u32.totalorder %s9071_s19, %s12884_s9 }
  0x6f   : > { %p9074_p8 = pnand %p9072_p6, %p9731_p7 }
  0x71   : > { %p9075_p9 = pneg %p9074_p8 }
  0x73   : > { %p9080_p3 = pnand %p9078_p1, %p9075_p9 }
  0x75   : > { %9083 = shalt.err (!%p9080_p3)
}
  0x76   : > { %s9084_s22 = scalar_lea.vmem %s452_s2, 16  ;;  %s9091_s13 = scalar_lea.vmem %s452_s2, 32 }
  0x77   : > { %p9085_p10 = scmp.ne.s32.totalorder %s452_s2, %s9084_s22  ;;  %p9092_p13 = scmp.lt.s32.totalorder %s452_s2, %s452_s2 }
  0x78   : > { %p9093_p0 = scmp.lt.s32.totalorder %s9091_s13, %s9084_s22 }
  0x79   : > { %p9087_p11 = pnand %p9085_p10, %p9731_p7 }
  0x7a   : > { %p9094_p2 = por %p9093_p0, %p9092_p13 }
  0x7b   : > { %p9088_p12 = pneg %p9087_p11 }
  0x7d   : > { %p9095_p4 = pnand %p9094_p2, %p9088_p12 }
  0x7f   : > { %9098 = shalt.err (!%p9095_p4)
}
  0x80   : > { %8793 = dma.hbm_to_vmem [thread:$0]  (!%p9715_p5), %s12884_s9, 16, %s452_s2, [#allocation20]  }
  0x81   : > { %s7679_s6 = sadd.s32 4294967294, %s9545_s16   ;;  %s9794_s18 = sadd.s32 1, %s9537_s14 }
  0x82   : > { %12885 = sst [smem:[#allocation49_spill]] %s9794_s18  ;;  %s52_s19 = sadd.s32 1, %s9541_s15 }
  0x83   : > { %p50_p6 = scmp.ge.s32.totalorder %s9794_s18, 4  ;;  %p12756_p8 = scmp.eq.s32.totalorder %s9545_s16, 0 }
  0x84   : > { %p102_p9 = scmp.ne.s32.totalorder %s9513_s26, %s9509_s25  ;;  %p108_p3 = scmp.ne.s32.totalorder %s9509_s25, %s9505_s24 }
  0x85   : > { %s9803_s21 = scalar_select %p50_p6, 0, %s9794_s18  }
  0x86   : > { %s13227_s19 = smov (!%p50_p6, %s52_s19), %s9541_s15  ;;  %p9812_p1 = por %p102_p9, %p12756_p8 }
  0x87   : > { %p390_p10 = scmp.eq.s32.totalorder %s9702_s17, 7  ;;  %p396_p11 = scmp.eq.s32.totalorder %s7679_s6, 7 }
  0x88   : > { %p12755_p12 = scmp.lt.s32.totalorder %s9545_s16, 8  ;;  %p12887_p13 = scmp.eq.s32.totalorder %s9702_s17, 0 }
  0x89   : > { %p9826_p2 = por %p390_p10, %p102_p9  ;;  %p9830_p4 = por %p396_p11, %p108_p3 }
  0x8a   : > { %p9822_p0 = por %p108_p3, %p12887_p13  ;;  %s9835_s0 = sshll.u32 %s9541_s15, 5 }
  0x8b   : > { %s12890_s13 = scalar_select %p9826_p2, 1, 0 }
  0x8c   : > { %s12888_s22 = scalar_select %p9822_p0, 1, 0 }
  0x8d   : > { %12891 = sst [smem:[#allocation51_spill]] %s12890_s13  ;;  %s9838_s6 = sand.u32 1, %s9545_s16  }
  0x8e   : > { %12889 = sst [smem:[#allocation50_spill]] %s12888_s22  ;;  %s512_s5 = sand.u32 1, %s9513_s26  }
  0x8f   : > { %s12892_s23 = scalar_select %p9830_p4, 1, 0 }
  0x90   : > { %12894 = sst [smem:[#allocation53_spill]] %s9838_s6  ;;  %s7697_s2 = sshll.u32 %s512_s5, 5 }
  0x91   : > { %12893 = sst [smem:[#allocation52_spill]] %s12892_s23  ;;  %s7698_s11 = sshll.u32 %s9537_s14, 3 }
  0x92   : > { %s520_s10 = sadd.s32 %s7698_s11, %s9835_s0  ;;  %s514_s7 = scalar_lea.vmem [#allocation7], %s7697_s2 }
  0x93   : > { %s523_s9 = sshll.u32 %s514_s7, 4  ;;  %s7700_s24 = sshll.u32 %s520_s10, 6  ;;  %s9843_s9 = int_to_ptr.vmem [resolvable:$true] %s523_s9 }
  0x94   : > { %s12895_s1 = sld [smem:[#allocation142_spill]]  ;;  %p9854_p6 = pnand %p12755_p12, %p9812_p1 }
  0x95   : > { %s9861_s10 = scalar_lea.hbm %s12718_s4, %s7700_s24  ;;  %s589_s22 = scalar_lea.vmem [#allocation12], %s7697_s2 }
  0x96   : > { %s12896_s5 = scalar_select %p9854_p6, 1, 0 }
  0x97   : > { %s9863_s13 = sshll.u32 %s589_s22, 4  ;;  %s12761_s20 = scalar_lea.sflag [#allocation8], %s9838_s6  ;;  %s9897_s13 = int_to_ptr.vmem [resolvable:$true] %s9863_s13 }
  0x98   : > { %p12767_p3 = pneg %p9854_p6 }
  0x9a   : > { %s9848_s25 = scalar_lea.hbm %s12895_s1, %s7700_s24  ;;  %s9104_s11 = scalar_lea.hbm %s12895_s1, 4096 }
  0x9b   : > { %s9099_s23 = scalar_lea.hbm %s9848_s25, 512  ;;  %p9105_p11 = scmp.lt.u32.totalorder %s9848_s25, %s12895_s1 }
  0x9c   : > { %p9100_p9 = scmp.ne.s32.totalorder %s9848_s25, %s9099_s23  ;;  %p9106_p13 = scmp.lt.u32.totalorder %s9104_s11, %s9099_s23 }
  0x9d   : > { %p9108_p8 = scmp.lt.u32.totalorder %s9099_s23, %s9848_s25 }
  0x9e   : > { %p9102_p1 = pnand %p12767_p3, %p9100_p9  ;;  %p9107_p12 = por %p9106_p13, %p9105_p11 }
  0xa0   : > { %p9103_p10 = pneg %p9102_p1  ;;  %p9109_p4 = por %p9108_p8, %p9107_p12 }
  0xa2   : > { %p9110_p2 = pnand %p9109_p4, %p9103_p10 }
  0xa4   : > { %9113 = shalt.err (!%p9110_p2)
}
  0xa5   : > { %s9114_s24 = scalar_lea.vmem %s9843_s9, 512  ;;  %s9552_s30 = smov [#allocation7]  }
  0xa6   : > { %p9115_p9 = scmp.ne.s32.totalorder %s9843_s9, %s9114_s24  ;;  %s9119_s18 = sshll.u32 %s9552_s30, 4  ;;  %s9120_s18 = int_to_ptr.vmem [resolvable:$false] %s9119_s18 }
  0xa7   : > { %s9121_s8 = scalar_lea.vmem %s9120_s18, 1024  ;;  %p9122_p5 = scmp.lt.s32.totalorder %s9843_s9, %s9120_s18 }
  0xa8   : > { %p9117_p1 = pnand %p9115_p9, %p12767_p3  ;;  %p9123_p11 = scmp.lt.s32.totalorder %s9121_s8, %s9114_s24 }
  0xaa   : > { %p9118_p0 = pneg %p9117_p1  ;;  %p9124_p13 = por %p9123_p11, %p9122_p5 }
  0xac   : > { %p9125_p8 = pnand %p9124_p13, %p9118_p0 }
  0xae   : > { %9128 = shalt.err (!%p9125_p8)
}
  0xaf   : > { %s12897_s2 = smov 4   ;;  %s12898_s23 = smov 64  }
  0xb0   : > { %8806 = dma.hbm_to_vmem [thread:$0]  (!%p9854_p6), %s9848_s25, 512, %s9843_s9, %s12761_s20, %s12898_s23, %s12898_s23, %s12897_s2  }
  0xb1   : > { %12899 = sst [smem:[#allocation54_spill]] %s9897_s13  ;;  %p54_p5 = scmp.ge.s32.totalorder %s13227_s19, 2 }
  0xb2   : > { %s7680_s22 = sadd.s32 4294967295, %s9537_s14  ;;  %s7681_s11 = sadd.s32 4294967295, %s9803_s21 }
  0xb3   : > { %s13229_s19 = smov (%p54_p5, %s13227_s19), 0  ;;  %p57_p12 = scmp.gt.s32.totalorder %s7680_s22, 0 }
  0xb4   : > { %12900 = sst [smem:[#allocation55_spill]] %s13229_s19  ;;  %p60_p0 = scmp.gt.s32.totalorder %s7681_s11, 0 }
  0xb5   : > { %s9907_s7 = ssub.s32 %s9541_s15, %s13229_s19  ;;  %s67_s9 = sadd.s32 1, %s9525_s29 }
  0xb6   : > { %s13231_s22 = smov (!%p57_p12, %s7680_s22), 0  ;;  %s13233_s11 = smov (!%p60_p0, %s7681_s11), 0 }
  0xb7   : > { %p74_p2 = scmp.ne.s32.totalorder %s9525_s29, %s9521_s28  ;;  %p80_p4 = scmp.ne.s32.totalorder %s9521_s28, %s9517_s27 }
  0xb8   : > { %s63_s25 = ssub.s32 %s13231_s22, %s13233_s11  ;;  %s12901_s24 = ssub.s32 %s9537_s14, %s9803_s21 }
  0xb9   : > { %s92_s30 = sor.u32 %s12901_s24, %s9907_s7  ;;  %s64_s18 = sor.u32 %s63_s25, %s9907_s7 }
  0xba   : > { %p12902_p10 = scmp.eq.s32.totalorder %s9545_s16, 0  ;;  %p65_p1 = scmp.eq.s32.totalorder %s64_s18, 0 }
  0xbb   : > { %p12903_p11 = scmp.eq.s32.totalorder %s9702_s17, 0  ;;  %p93_p8 = scmp.eq.s32.totalorder %s92_s30, 0 }
  0xbc   : > { %p76_p9 = por %p12902_p10, %p74_p2  ;;  %s12764_s20 = sand.u32 1, %s9525_s29  }
  0xbd   : > { %p9923_p13 = por %p12903_p11, %p80_p4  ;;  %s12907_s19 = sadd.s32 1, %s9513_s26 }
  0xbe   : > { %s9929_s1 = scalar_select %p65_p1, %s9525_s29, %s67_s9  }
  0xbf   : > { %s12904_s8 = scalar_select %p9923_p13, 1, 0 }
  0xc0   : > { %12906 = sst [smem:[#allocation57_spill]] %s9929_s1  ;;  %s9938_s27 = sshll.u32 %s12764_s20, 5 }
  0xc1   : > { %12905 = sst [smem:[#allocation56_spill]] %s12904_s8  ;;  %s7694_s11 = sshll.u32 %s13231_s22, 3 }
  0xc2   : > { %s9934_s15 = scalar_select %p93_p8, %s9513_s26, %s12907_s19  }
  0xc3   : > { %s9941_s25 = sadd.s32 %s9835_s0, %s7694_s11  ;;  %p12909_p5 = scmp.lt.s32.totalorder %s9545_s16, 8 }
  0xc4   : > { %12908 = sst [smem:[#allocation58_spill]] %s9934_s15  ;;  %s12766_s9 = sshll.u32 %s9941_s25, 6 }
  0xc5   : > { %p9945_p12 = pnand %p12909_p5, %p76_p9  ;;  %s12911_s3 = sld [smem:[#allocation144_spill]] }
  0xc6   : > { %s563_s22 = scalar_lea.vmem [#allocation10], %s9938_s27  ;;  %s12780_s20 = scalar_lea.sflag [#allocation11], %s9838_s6 }
  0xc7   : > { %s12910_s24 = scalar_select %p9945_p12, 1, 0 }
  0xc8   : > { %s575_s11 = sshll.u32 %s563_s22, 4  ;;  %p12777_p2 = pneg %p9945_p12  ;;  %s9958_s11 = int_to_ptr.vmem [resolvable:$true] %s575_s11 }
  0xcb   : > { %s9955_s18 = scalar_lea.hbm %s12911_s3, %s12766_s9  ;;  %s9134_s9 = scalar_lea.hbm %s12911_s3, 4096 }
  0xcc   : > { %s9129_s14 = scalar_lea.hbm %s9955_s18, 512  ;;  %p9135_p9 = scmp.lt.u32.totalorder %s9955_s18, %s12911_s3 }
  0xcd   : > { %p9130_p0 = scmp.ne.s32.totalorder %s9955_s18, %s9129_s14  ;;  %p9136_p1 = scmp.lt.u32.totalorder %s9134_s9, %s9129_s14 }
  0xce   : > { %p9138_p8 = scmp.lt.u32.totalorder %s9129_s14, %s9955_s18 }
  0xcf   : > { %p9132_p4 = pnand %p12777_p2, %p9130_p0  ;;  %p9137_p11 = por %p9136_p1, %p9135_p9 }
  0xd1   : > { %p9133_p10 = pneg %p9132_p4  ;;  %p9139_p5 = por %p9138_p8, %p9137_p11 }
  0xd3   : > { %p9140_p3 = pnand %p9139_p5, %p9133_p10 }
  0xd5   : > { %9143 = shalt.err (!%p9140_p3)
}
  0xd6   : > { %s9144_s22 = scalar_lea.vmem %s9958_s11, 512  ;;  %s9553_s19 = smov [#allocation10]  }
  0xd7   : > { %p9145_p0 = scmp.ne.s32.totalorder %s9958_s11, %s9144_s22  ;;  %s9149_s30 = sshll.u32 %s9553_s19, 4  ;;  %s9150_s30 = int_to_ptr.vmem [resolvable:$false] %s9149_s30 }
  0xd8   : > { %s9151_s1 = scalar_lea.vmem %s9150_s30, 1024  ;;  %p9152_p6 = scmp.lt.s32.totalorder %s9958_s11, %s9150_s30 }
  0xd9   : > { %p9147_p4 = pnand %p9145_p0, %p12777_p2  ;;  %p9153_p9 = scmp.lt.s32.totalorder %s9151_s1, %s9144_s22 }
  0xdb   : > { %p9148_p13 = pneg %p9147_p4  ;;  %p9154_p1 = por %p9153_p9, %p9152_p6 }
  0xdd   : > { %p9155_p11 = pnand %p9154_p1, %p9148_p13 }
  0xdf   : > { %9158 = shalt.err (!%p9155_p11)
}
  0xe0   : > { %8812 = dma.hbm_to_vmem [thread:$0]  (!%p9945_p12), %s9955_s18, 512, %s9958_s11, %s12780_s20, %s12898_s23, %s12898_s23, %s12897_s2  }
  0xe1   : > { %s9554_s14 = smov [#allocation18]   ;;  %s9555_s9 = smov [#allocation21]  }
  0xe2   : > { %s440_s15 = sshll.u32 %s9554_s14, 4  ;;  %s462_s19 = sshll.u32 %s9555_s9, 4  ;;  %s441_s15 = int_to_ptr.vmem [resolvable:$true] %s440_s15  ;;  %s463_s19 = int_to_ptr.vmem [resolvable:$true] %s462_s19 }
  0xe3   : > { %s12912_s1 = sld [smem:[#allocation148_spill]] }
  0xe9   : > { %s9159_s3 = scalar_lea.hbm %s12912_s1, 64 }
  0xea   : > { %p9160_p6 = scmp.ne.s32.totalorder %s12912_s1, %s9159_s3  ;;  %p9166_p10 = scmp.lt.u32.totalorder %s9159_s3, %s12912_s1 }
  0xec   : > { %p9162_p3 = pnand %p9160_p6, %p9731_p7 }
  0xee   : > { %p9163_p13 = pneg %p9162_p3 }
  0xf0   : > { %p9168_p8 = pnand %p9166_p10, %p9163_p13 }
  0xf2   : > { %9171 = shalt.err (!%p9168_p8)
}
  0xf3   : > { %s9172_s18 = scalar_lea.vmem %s441_s15, 64  ;;  %p9180_p9 = scmp.lt.s32.totalorder %s441_s15, %s441_s15 }
  0xf4   : > { %p9173_p5 = scmp.ne.s32.totalorder %s441_s15, %s9172_s18  ;;  %p9181_p1 = scmp.lt.s32.totalorder %s9172_s18, %s9172_s18 }
  0xf6   : > { %p9175_p0 = pnand %p9173_p5, %p9731_p7  ;;  %p9182_p11 = por %p9181_p1, %p9180_p9 }
  0xf8   : > { %p9176_p4 = pneg %p9175_p0 }
  0xfa   : > { %p9183_p2 = pnand %p9182_p11, %p9176_p4 }
  0xfc   : > { %9186 = shalt.err (!%p9183_p2)
}
  0xfd   : > { %s12913_s26 = sld [smem:[#allocation48_spill]]  ;;  %s12915_s6 = sld [smem:[#allocation150_spill]] }
 0x103   : > { %p12914_p6 = scmp.ne.s32.totalorder %s12913_s26, 0  ;;  %s9187_s14 = scalar_lea.hbm %s12915_s6, 16 }
 0x104   : > { %p9188_p3 = scmp.ne.s32.totalorder %s12915_s6, %s9187_s14  ;;  %p9194_p2 = scmp.lt.u32.totalorder %s9187_s14, %s12915_s6 }
 0x105   : > { %8790 = dma.hbm_to_vmem [thread:$0]  (!%p12914_p6), %s12912_s1, 64, %s441_s15, [#allocation17]  }
 0x106   : > { %p9190_p13 = pnand %p9188_p3, %p9731_p7 }
 0x108   : > { %p9191_p10 = pneg %p9190_p13 }
 0x10a   : > { %p9196_p8 = pnand %p9194_p2, %p9191_p10 }
 0x10c   : > { %9199 = shalt.err (!%p9196_p8)
}
 0x10d   : > { %s9200_s8 = scalar_lea.vmem %s463_s19, 16  ;;  %s9207_s15 = scalar_lea.vmem %s463_s19, 32 }
 0x10e   : > { %p9201_p5 = scmp.ne.s32.totalorder %s463_s19, %s9200_s8  ;;  %p9208_p9 = scmp.lt.s32.totalorder %s463_s19, %s463_s19 }
 0x10f   : > { %p9209_p1 = scmp.lt.s32.totalorder %s9207_s15, %s9200_s8 }
 0x110   : > { %p9203_p0 = pnand %p9201_p5, %p9731_p7 }
 0x111   : > { %p9210_p11 = por %p9209_p1, %p9208_p9 }
 0x112   : > { %p9204_p4 = pneg %p9203_p0 }
 0x114   : > { %p9211_p12 = pnand %p9210_p11, %p9204_p4 }
 0x116   : > { %9214 = shalt.err (!%p9211_p12)
}
 0x117   : > { %8796 = dma.hbm_to_vmem [thread:$0]  (!%p12914_p6), %s12915_s6, 16, %s463_s19, [#allocation20]  }
 0x118   : > { %s9556_s28 = smov [#allocation22]   ;;  %s12916_s30 = sld [smem:[#allocation151_spill]] }
 0x119   : > { %s473_s14 = sshll.u32 %s9556_s28, 4  ;;  %s474_s14 = int_to_ptr.vmem [resolvable:$true] %s473_s14 }
 0x11e   : > { %s12917_s18 = smov %s12916_s30  ;;  %s9215_s20 = scalar_lea.hbm %s12916_s30, 16 }
 0x11f   : > { %p9216_p3 = scmp.ne.s32.totalorder %s12917_s18, %s9215_s20  ;;  %p9222_p10 = scmp.lt.u32.totalorder %s9215_s20, %s12917_s18 }
 0x121   : > { %p9218_p12 = pnand %p9216_p3, %p9731_p7 }
 0x123   : > { %p9219_p13 = pneg %p9218_p12 }
 0x125   : > { %p9224_p2 = pnand %p9222_p10, %p9219_p13 }
 0x127   : > { %9227 = shalt.err (!%p9224_p2)
}
 0x128   : > { %s9228_s19 = scalar_lea.vmem %s474_s14, 16  ;;  %s9235_s11 = scalar_lea.vmem %s474_s14, 32 }
 0x129   : > { %p9229_p8 = scmp.ne.s32.totalorder %s474_s14, %s9228_s19  ;;  %p9236_p4 = scmp.lt.s32.totalorder %s474_s14, %s474_s14 }
 0x12a   : > { %p9237_p9 = scmp.lt.s32.totalorder %s9235_s11, %s9228_s19 }
 0x12b   : > { %p9231_p5 = pnand %p9229_p8, %p9731_p7 }
 0x12c   : > { %p9238_p1 = por %p9237_p9, %p9236_p4 }
 0x12d   : > { %p9232_p0 = pneg %p9231_p5 }
 0x12f   : > { %p9239_p11 = pnand %p9238_p1, %p9232_p0 }
 0x131   : > { %9242 = shalt.err (!%p9239_p11)
}
 0x132   : > { %8799 = dma.hbm_to_vmem [thread:$0]  (!%p12914_p6), %s12917_s18, 16, %s474_s14, [#allocation23]  }
 0x133   : > { %s12918_s20 = sshll.u32 %s9941_s25, 6  ;;  %s12919_s28 = sld [smem:[#allocation141_spill]] }
 0x134   : > { %s488_s30 = scalar_lea.vmem [#allocation4], %s9938_s27  ;;  %s12921_s8 = sand.u32 1, %s9525_s29  }
 0x135   : > { %s500_s26 = sshll.u32 %s488_s30, 4  ;;  %s10057_s15 = scalar_lea.sflag [#allocation5], %s12921_s8  ;;  %s10053_s26 = int_to_ptr.vmem [resolvable:$true] %s500_s26 }
 0x136   : > { %p12922_p6 = scmp.ne.s32.totalorder %s12910_s24, 0 }
 0x138   : > { %p12923_p3 = pneg %p12922_p6 }
 0x139   : > { %s12920_s9 = smov %s12919_s28  ;;  %s10050_s22 = scalar_lea.hbm %s12919_s28, %s12918_s20 }
 0x13a   : > { %s9243_s19 = scalar_lea.hbm %s10050_s22, 512  ;;  %s9248_s11 = scalar_lea.hbm %s12920_s9, 4096 }
 0x13b   : > { %p9244_p7 = scmp.ne.s32.totalorder %s10050_s22, %s9243_s19  ;;  %p9249_p10 = scmp.lt.u32.totalorder %s10050_s22, %s12920_s9 }
 0x13c   : > { %p9250_p2 = scmp.lt.u32.totalorder %s9248_s11, %s9243_s19  ;;  %p9252_p5 = scmp.lt.u32.totalorder %s9243_s19, %s10050_s22 }
 0x13d   : > { %p9246_p12 = pnand %p9244_p7, %p12923_p3 }
 0x13e   : > { %p9251_p8 = por %p9250_p2, %p9249_p10 }
 0x13f   : > { %p9247_p13 = pneg %p9246_p12 }
 0x140   : > { %p9253_p0 = por %p9252_p5, %p9251_p8 }
 0x142   : > { %p9254_p4 = pnand %p9253_p0, %p9247_p13 }
 0x144   : > { %9257 = shalt.err (!%p9254_p4)
}
 0x145   : > { %s9258_s27 = scalar_lea.vmem %s10053_s26, 512  ;;  %p12924_p1 = pmov %p12923_p3 }
 0x146   : > { %p9259_p9 = scmp.ne.s32.totalorder %s10053_s26, %s9258_s27  ;;  %s9557_s20 = smov [#allocation4]  }
 0x147   : > { %s9263_s12 = sshll.u32 %s9557_s20, 4  ;;  %s9264_s12 = int_to_ptr.vmem [resolvable:$false] %s9263_s12 }
 0x148   : > { %p9261_p11 = pnand %p9259_p9, %p12924_p1  ;;  %s9265_s3 = scalar_lea.vmem %s9264_s12, 1024 }
 0x149   : > { %p9266_p3 = scmp.lt.s32.totalorder %s10053_s26, %s9264_s12  ;;  %p9267_p12 = scmp.lt.s32.totalorder %s9265_s3, %s9258_s27 }
 0x14a   : > { %p9262_p7 = pneg %p9261_p11 }
 0x14b   : > { %p9268_p10 = por %p9267_p12, %p9266_p3 }
 0x14d   : > { %p9269_p2 = pnand %p9268_p10, %p9262_p7 }
 0x14f   : > { %9272 = shalt.err (!%p9269_p2)
}
 0x150   : > { %s12925_s28 = sld [smem:[#allocation49_spill]]  ;;  %s12926_s30 = sld [smem:[#allocation38_spill]] }
 0x151   : > { %s12927_s8 = sld [smem:[#allocation37_spill]]  ;;  %s12928_s19 = sld [smem:[#allocation36_spill]] }
 0x152   : > { %8803 = dma.hbm_to_vmem [thread:$0]  (!%p12922_p6), %s10050_s22, 512, %s10053_s26, %s10057_s15, %s12898_s23, %s12898_s23, %s12897_s2  }
 0x153   : > { %s121_s24 = sadd.s32 1, %s9803_s21  ;;  %p12929_p4 = scmp.eq.s32.totalorder %s9545_s16, 0 }
 0x154   : > { %p122_p8 = scmp.lt.s32.totalorder %s121_s24, 3  ;;  %p12931_p1 = scmp.eq.s32.totalorder %s9702_s17, 0 }
 0x155   : > { %p12935_p7 = scmp.lt.s32.totalorder %s9545_s16, 8  ;;  %p12937_p10 = scmp.ne.s32.totalorder %s12896_s5, 0 }
 0x156   : > { %p119_p13 = scmp.lt.s32.totalorder %s12925_s28, 3  ;;  %s129_s25 = sadd.s32 1, %s12926_s30 }
 0x157   : > { %p136_p5 = scmp.ne.s32.totalorder %s12926_s30, %s12927_s8  ;;  %p142_p0 = scmp.ne.s32.totalorder %s12927_s8, %s12928_s19 }
 0x158   : > { %s13235_s28 = smov (!%p119_p13, %s12925_s28), 3  ;;  %s535_s14 = sand.u32 1, %s12926_s30  }
 0x159   : > { %s13237_s24 = smov (!%p122_p8, %s121_s24), 3  ;;  %p10097_p9 = por %p136_p5, %p12929_p4 }
 0x15a   : > { %p10103_p6 = por %p142_p0, %p12931_p1  ;;  %s125_s26 = ssub.s32 %s13235_s28, %s13237_s24 }
 0x15b   : > { %s10107_s15 = sshll.u32 %s535_s14, 5  ;;  %s126_s13 = sor.u32 %s125_s26, %s9907_s7 }
 0x15c   : > { %s12932_s22 = scalar_select %p10103_p6, 1, 0 }
 0x15d   : > { %p127_p11 = scmp.eq.s32.totalorder %s126_s13, 0  ;;  %s7702_s1 = sshll.u32 %s13235_s28, 3 }
 0x15e   : > { %s10111_s27 = sadd.s32 %s7702_s1, %s9835_s0  ;;  %s537_s20 = scalar_lea.vmem [#allocation9], %s10107_s15 }
 0x15f   : > { %s549_s12 = sshll.u32 %s537_s20, 4  ;;  %s13239_s30 = smov (!%p127_p11, %s12926_s30), %s129_s25  ;;  %s10118_s12 = int_to_ptr.vmem [resolvable:$true] %s549_s12 }
 0x160   : > { %s7704_s3 = sshll.u32 %s10111_s27, 6  ;;  %s12933_s24 = sld [smem:[#allocation143_spill]] }
 0x161   : > { %p10131_p3 = pnand %p12935_p7, %p10097_p9  ;;  %s9273_s28 = scalar_lea.hbm %s9861_s10, 512 }
 0x162   : > { %p9274_p12 = scmp.ne.s32.totalorder %s9861_s10, %s9273_s28  ;;  %p12938_p2 = pneg %p12937_p10 }
 0x163   : > { %s9278_s26 = scalar_lea.hbm %s12718_s4, 4096  ;;  %p9279_p5 = scmp.lt.u32.totalorder %s9861_s10, %s12718_s4 }
 0x164   : > { %p9276_p13 = pnand %p9274_p12, %p12938_p2  ;;  %p9280_p0 = scmp.lt.u32.totalorder %s9278_s26, %s9273_s28 }
 0x165   : > { %p9282_p9 = scmp.lt.u32.totalorder %s9273_s28, %s9861_s10 }
 0x166   : > { %s12934_s6 = smov %s12933_s24  ;;  %s10125_s7 = scalar_lea.hbm %s12933_s24, %s7704_s3 }
 0x167   : > { %p9277_p8 = pneg %p9276_p13  ;;  %p9281_p4 = por %p9280_p0, %p9279_p5 }
 0x169   : > { %p9283_p1 = por %p9282_p9, %p9281_p4 }
 0x16b   : > { %p9284_p11 = pnand %p9283_p1, %p9277_p8 }
 0x16d   : > { %9287 = shalt.err (!%p9284_p11)
}
 0x16e   : > { %s12939_s11 = sld [smem:[#allocation54_spill]]  ;;  %p12940_p12 = pmov %p12938_p2 }
 0x16f   : > { %s9558_s8 = smov [#allocation12]  }
 0x170   : > { %s9293_s19 = sshll.u32 %s9558_s8, 4  ;;  %s9294_s19 = int_to_ptr.vmem [resolvable:$false] %s9293_s19 }
 0x171   : > { %s9295_s24 = scalar_lea.vmem %s9294_s19, 1024 }
 0x174   : > { %s9288_s20 = scalar_lea.vmem %s12939_s11, 512  ;;  %p9296_p6 = scmp.lt.s32.totalorder %s12939_s11, %s9294_s19 }
 0x175   : > { %p9289_p7 = scmp.ne.s32.totalorder %s12939_s11, %s9288_s20  ;;  %p9297_p5 = scmp.lt.s32.totalorder %s9295_s24, %s9288_s20 }
 0x177   : > { %p9291_p2 = pnand %p9289_p7, %p12940_p12  ;;  %p9298_p0 = por %p9297_p5, %p9296_p6 }
 0x179   : > { %p9292_p13 = pneg %p9291_p2 }
 0x17b   : > { %p9299_p4 = pnand %p9298_p0, %p9292_p13 }
 0x17d   : > { %9302 = shalt.err (!%p9299_p4)
}
 0x17e   : > { %s12941_s28 = sld [smem:[#allocation53_spill]]  ;;  %s9303_s14 = scalar_lea.hbm %s10125_s7, 512 }
 0x17f   : > { %p9304_p6 = scmp.ne.s32.totalorder %s10125_s7, %s9303_s14  ;;  %p9305_p8 = pneg %p10131_p3 }
 0x180   : > { %s9308_s13 = scalar_lea.hbm %s12934_s6, 4096  ;;  %p9309_p11 = scmp.lt.u32.totalorder %s10125_s7, %s12934_s6 }
 0x181   : > { %p9306_p9 = pnand %p9305_p8, %p9304_p6  ;;  %p9310_p7 = scmp.lt.u32.totalorder %s9308_s13, %s9303_s14 }
 0x182   : > { %p9312_p2 = scmp.lt.u32.totalorder %s9303_s14, %s10125_s7 }
 0x183   : > { %p9307_p1 = pneg %p9306_p9  ;;  %p9311_p12 = por %p9310_p7, %p9309_p11 }
 0x184   : > { %s12942_s25 = scalar_lea.sflag [#allocation11], %s12941_s28 }
 0x185   : > { %8815 = dma.hbm_to_vmem [thread:$0]  (!%p12937_p10), %s9861_s10, 512, %s12939_s11, %s12942_s25, %s12898_s23, %s12898_s23, %s12897_s2  }
 0x186   : > { %p9313_p10 = por %p9312_p2, %p9311_p12 }
 0x188   : > { %p9314_p13 = pnand %p9313_p10, %p9307_p1 }
 0x18a   : > { %9317 = shalt.err (!%p9314_p13)
}
 0x18b   : > { %s9318_s10 = scalar_lea.vmem %s10118_s12, 512  ;;  %s9559_s11 = smov [#allocation9]  }
 0x18c   : > { %p9319_p5 = scmp.ne.s32.totalorder %s10118_s12, %s9318_s10  ;;  %s9323_s8 = sshll.u32 %s9559_s11, 4  ;;  %s9324_s8 = int_to_ptr.vmem [resolvable:$false] %s9323_s8 }
 0x18d   : > { %s9325_s19 = scalar_lea.vmem %s9324_s8, 1024  ;;  %p9326_p6 = scmp.lt.s32.totalorder %s10118_s12, %s9324_s8 }
 0x18e   : > { %p9321_p0 = pnand %p9319_p5, %p9305_p8  ;;  %p9327_p9 = scmp.lt.s32.totalorder %s9325_s19, %s9318_s10 }
 0x190   : > { %p9322_p4 = pneg %p9321_p0  ;;  %p9328_p11 = por %p9327_p9, %p9326_p6 }
 0x192   : > { %p9329_p7 = pnand %p9328_p11, %p9322_p4 }
 0x194   : > { %9332 = shalt.err (!%p9329_p7)
}
 0x195   : > { %s12943_s24 = scalar_lea.sflag [#allocation8], %s12941_s28  ;;  %s12944_s5 = sld [smem:[#allocation145_spill]] }
 0x196   : > { %8809 = dma.hbm_to_vmem [thread:$0]  (!%p10131_p3), %s10125_s7, 512, %s10118_s12, %s12943_s24, %s12898_s23, %s12898_s23, %s12897_s2  }
 0x197   : > { %s612_s13 = scalar_lea.vmem [#allocation13], %s10107_s15  ;;  %s609_s20 = scalar_lea.sflag [#allocation14], %s12941_s28 }
 0x198   : > { %s624_s1 = sshll.u32 %s612_s13, 4  ;;  %s10201_s1 = int_to_ptr.vmem [resolvable:$true] %s624_s1 }
 0x19b   : > { %s10198_s26 = scalar_lea.hbm %s12944_s5, %s7704_s3  ;;  %s9338_s3 = scalar_lea.hbm %s12944_s5, 4096 }
 0x19c   : > { %s9333_s10 = scalar_lea.hbm %s10198_s26, 512  ;;  %p9339_p10 = scmp.lt.u32.totalorder %s10198_s26, %s12944_s5 }
 0x19d   : > { %p9334_p1 = scmp.ne.s32.totalorder %s10198_s26, %s9333_s10  ;;  %p9340_p13 = scmp.lt.u32.totalorder %s9338_s3, %s9333_s10 }
 0x19e   : > { %p9342_p0 = scmp.lt.u32.totalorder %s9333_s10, %s10198_s26 }
 0x19f   : > { %p9336_p12 = pnand %p9334_p1, %p9305_p8  ;;  %p9341_p5 = por %p9340_p13, %p9339_p10 }
 0x1a1   : > { %p9337_p2 = pneg %p9336_p12  ;;  %p9343_p4 = por %p9342_p0, %p9341_p5 }
 0x1a3   : > { %p9344_p6 = pnand %p9343_p4, %p9337_p2 }
 0x1a5   : > { %9347 = shalt.err (!%p9344_p6)
}
 0x1a6   : > { %s9348_s15 = scalar_lea.vmem %s10201_s1, 512  ;;  %s9560_s8 = smov [#allocation13]  }
 0x1a7   : > { %p9349_p9 = scmp.ne.s32.totalorder %s10201_s1, %s9348_s15  ;;  %s9353_s19 = sshll.u32 %s9560_s8, 4  ;;  %s9354_s19 = int_to_ptr.vmem [resolvable:$false] %s9353_s19 }
 0x1a8   : > { %s9355_s24 = scalar_lea.vmem %s9354_s19, 1024  ;;  %p9356_p1 = scmp.lt.s32.totalorder %s10201_s1, %s9354_s19 }
 0x1a9   : > { %p9351_p11 = pnand %p9349_p9, %p9305_p8  ;;  %p9357_p12 = scmp.lt.s32.totalorder %s9355_s24, %s9348_s15 }
 0x1ab   : > { %p9352_p7 = pneg %p9351_p11  ;;  %p9358_p10 = por %p9357_p12, %p9356_p1 }
 0x1ad   : > { %p9359_p13 = pnand %p9358_p10, %p9352_p7 }
 0x1af   : > { %9362 = shalt.err (!%p9359_p13)
}
 0x1b0   : > { %8818 = dma.hbm_to_vmem [thread:$0]  (!%p10131_p3), %s10198_s26, 512, %s10201_s1, %s609_s20, %s12898_s23, %s12898_s23, %s12897_s2  }
 0x1b1   : > { %s12945_s25 = sld [smem:[#allocation47_spill]] }
 0x1b7   : > { %p12946_p8 = scmp.ne.s32.totalorder %s12945_s25, 0 }
 0x1b9   : > { %636 = sbr.rel (%p12946_p8) target bundleno = 1384 (0x568), region = 68 }
 0x1c0   : > { %s12947_s14 = sld [smem:[#allocation42_spill]]  ;;  %s12948_s13 = sld [smem:[#allocation56_spill]] }
 0x1c6   : > { %s638_s10 = sand.u32 1, %s12947_s14   ;;  %p12949_p2 = scmp.ne.s32.totalorder %s12948_s13, 0 }
 0x1c7   : > { %s7719_s27 = sshll.u32 %s638_s10, 5  ;;  %s639_s12 = scalar_lea.sflag [#allocation5], %s638_s10 }
 0x1c8   : > { %s10235_s3 = scalar_lea.vmem [#allocation4], %s7719_s27 }
 0x1c9   : > { %9448 = dma.done.wait (%p12949_p2), %s639_s12, 512  }
 0x1ca   : > { %9450 = vsyncadd (%p12949_p2), %s639_s12, 4294966784  ;;  %s12950_s0 = sld [smem:[#allocation40_spill]]  ;;  %s12951_s28 = sld [smem:[#allocation50_spill]] }
 0x1cb   : > { %s647_s7 = sand.u32 1, %s9702_s17  }
 0x1cc   : > { %s648_s26 = scalar_lea.sflag [#allocation8], %s647_s7 }
 0x1d0   : > { %s10243_s2 = sand.u32 1, %s12950_s0   ;;  %p12952_p3 = scmp.ne.s32.totalorder %s12951_s28, 0 }
 0x1d1   : > { %s7720_s23 = sshll.u32 %s10243_s2, 5 }
 0x1d2   : > { %s10246_s1 = scalar_lea.vmem [#allocation7], %s7720_s23 }
 0x1d3   : > { %9452 = dma.done.wait (%p12952_p3), %s648_s26, 512  }
 0x1d4   : > { %9454 = vsyncadd (%p12952_p3), %s648_s26, 4294966784  ;;  %s12953_s20 = sld [smem:[#allocation37_spill]]  ;;  %p12954_p5 = scmp.ne.s32.totalorder %s12932_s22, 0 }
 0x1da   : > { %s658_s11 = sand.u32 1, %s12953_s20  }
 0x1db   : > { %s7721_s15 = sshll.u32 %s658_s11, 5 }
 0x1dc   : > { %s10253_s8 = scalar_lea.vmem [#allocation9], %s7721_s15 }
 0x1dd   : > { %9456 = dma.done.wait (%p12954_p5), %s648_s26, 512  }
 0x1de   : > { %9458 = vsyncadd (%p12954_p5), %s648_s26, 4294966784  ;;  %s666_s19 = scalar_lea.sflag [#allocation11], %s647_s7  ;;  %s10259_s24 = scalar_lea.vmem [#allocation10], %s7719_s27 }
 0x1df   : > { %9460 = dma.done.wait (%p12949_p2), %s666_s19, 512  }
 0x1e0   : > { %9462 = vsyncadd (%p12949_p2), %s666_s19, 4294966784  ;;  %s10265_s25 = scalar_lea.vmem [#allocation12], %s7720_s23 }
 0x1e1   : > { %9464 = dma.done.wait (%p12952_p3), %s666_s19, 512  }
 0x1e2   : > { %9466 = vsyncadd (%p12952_p3), %s666_s19, 4294966784  ;;  %s684_s14 = scalar_lea.sflag [#allocation14], %s647_s7  ;;  %s10271_s10 = scalar_lea.vmem [#allocation13], %s7721_s15 }
 0x1e3   : > { %9468 = dma.done.wait (%p12954_p5), %s684_s14, 512  }
 0x1e4   : > { %9470 = vsyncadd (%p12954_p5), %s684_s14, 4294966784  ;;  %p12955_p0 = scmp.eq.s32.totalorder %s9702_s17, 0 }
 0x1e6   : > { %9472 = dma.done.wait (%p12955_p0), [#allocation14], 64   ;;  %p12956_p4 = pmov %p12955_p0 }
 0x1e7   : > { %p12957_p6 = pmov %p12955_p0 }
 0x1e8   : > { %9474 = vsyncadd (%p12956_p4), [#allocation14], 4294967232 }
 0x1e9   : > { %9476 = dma.done.wait (%p12957_p6), [#allocation17], 3520   ;;  %p12958_p9 = pmov %p12955_p0 }
 0x1ea   : > { %p12959_p11 = pmov %p12955_p0 }
 0x1eb   : > { %9478 = vsyncadd (%p12958_p9), [#allocation17], 4294963776 }
 0x1ec   : > { %9480 = dma.done.wait (%p12959_p11), [#allocation20], 32   ;;  %p12960_p7 = pmov %p12955_p0 }
 0x1ed   : > { %p12961_p1 = pmov %p12955_p0 }
 0x1ee   : > { %9482 = vsyncadd (%p12960_p7), [#allocation20], 4294967264 }
 0x1ef   : > { %9484 = dma.done.wait (%p12961_p1), [#allocation23], 16   ;;  %p12962_p12 = pmov %p12955_p0 }
 0x1f0   : > { %s12963_s22 = sld [smem:[#allocation43_spill]]  ;;  %vm998_vm0 = vcmask 125952   ;;  %vm1000_vm1 = vcmask 122880   ;;  %vm6166_vm2 = vcmask 60416   ;;  %vm6168_vm3 = vcmask 57344   ;;  %v8963_v3 = vld [vmem:[#allocation16 + $0x8] sm:$0xff]  }
 0x1f1   : > { %9486 = vsyncadd (%p12962_p12), [#allocation23], 4294967280  ;;  %v9561_v0 = vmov 0   ;;  %vm865_vm4 = vcmask 1043456   ;;  %vm852_vm5 = vcmask 64512   ;;  %v8966_v6 = vld [vmem:[#allocation16 + $0x60] sm:$0xff]  }
 0x1f2   : > { %999 = vst.msk [vmem:[#allocation2] sm:$0xf] %vm998_vm0, %v9561_v0  ;;  %1002 = vst.msk [vmem:[#allocation2 + $0x8] sm:$0xf] %vm998_vm0, %v9561_v0  ;;  %v824_v1 = vld [vmem:[#allocation15] sm:$0xf]  ;;  %8531 = vmatprep.subr.bf16.mxu1 %v8966_v6 }
 0x1f3   : > { %1001 = vst.msk [vmem:[#allocation2 + $0x4] sm:$0x1] %vm1000_vm1, %v9561_v0  ;;  %1003 = vst.msk [vmem:[#allocation2 + $0xc] sm:$0x1] %vm1000_vm1, %v9561_v0  ;;  %v816_v2 = vld [vmem:[%s10246_s1] sm:$0xf]  ;;  %8741 = vmatprep.subr.msk.bf16.mxu0 %vm865_vm4, %v824_v1  ;;  %8532 = vmatpush3.bf16.msra.mxu1 %v8966_v6 }
 0x1f4   : > { %1004 = vst.msk [vmem:[#allocation2 + $0x10] sm:$0xf] %vm998_vm0, %v9561_v0  ;;  %1006 = vst.msk [vmem:[#allocation2 + $0x18] sm:$0xf] %vm998_vm0, %v9561_v0  ;;  %v867_v4 = vsel %vm865_vm4, %v824_v1, 0  ;;  %v8968_v8 = vld [vmem:[#allocation16 + $0x68] sm:$0xff]  }
 0x1f5   : > { %1005 = vst.msk [vmem:[#allocation2 + $0x14] sm:$0x1] %vm1000_vm1, %v9561_v0  ;;  %1007 = vst.msk [vmem:[#allocation2 + $0x1c] sm:$0x1] %vm1000_vm1, %v9561_v0  ;;  %v817_v5 = vld [vmem:[%s10246_s1 + $0x4] sm:$0xf]  ;;  %8242 = vmatpush3.bf16.msra.mxu0 %v867_v4  ;;  %8381 = vmatprep.subr.bf16.mxu1 %v8968_v8 }
 0x1f6   : > { %p790_p10 = scmp.gt.s32.totalorder %s12963_s22, 0  ;;  %p803_p13 = scmp.lt.s32.totalorder %s12963_s22, 3  ;;  %1008 = vst.msk [vmem:[#allocation2 + $0x20] sm:$0xf] %vm998_vm0, %v9561_v0  ;;  %1010 = vst.msk [vmem:[#allocation2 + $0x28] sm:$0xf] %vm998_vm0, %v9561_v0  ;;  %v7733_v7 = vcombine.low %v816_v2, %v817_v5  ;;  %8251 = vmatprep.subr.bf16.mxu0 %v8963_v3 }
 0x1f7   : > { %1009 = vst.msk [vmem:[#allocation2 + $0x24] sm:$0x1] %vm1000_vm1, %v9561_v0  ;;  %1011 = vst.msk [vmem:[#allocation2 + $0x2c] sm:$0x1] %vm1000_vm1, %v9561_v0  ;;  %v818_v9 = vld [vmem:[%s10246_s1 + $0x8] sm:$0xf] }
 0x1f8   : > { %s10295_s13 = scalar_select %p790_p10, 1, 0  ;;  %1012 = vst.msk [vmem:[#allocation2 + $0x30] sm:$0xf] %vm998_vm0, %v9561_v0  ;;  %1014 = vst.msk [vmem:[#allocation2 + $0x38] sm:$0xf] %vm998_vm0, %v9561_v0  ;;  %8243 = vmatprep.mubr.msk.bf16.mxu0 %vm852_vm5, %v7733_v7 }
 0x1f9   : > { %1013 = vst.msk [vmem:[#allocation2 + $0x34] sm:$0x1] %vm1000_vm1, %v9561_v0  ;;  %1015 = vst.msk [vmem:[#allocation2 + $0x3c] sm:$0x1] %vm1000_vm1, %v9561_v0  ;;  %s804_s17 = scalar_select %p803_p13, 1, 0 }
 0x1fa   : > { %1016 = vst.msk [vmem:[#allocation2 + $0x40] sm:$0xf] %vm998_vm0, %v9561_v0  ;;  %1018 = vst.msk [vmem:[#allocation2 + $0x48] sm:$0xf] %vm998_vm0, %v9561_v0  ;;  %s792_s27 = scvt.s32.f32 %s10295_s13  ;;  %v819_v10 = vld [vmem:[%s10246_s1 + $0xc] sm:$0xf] }
 0x1fb   : > { %1017 = vst.msk [vmem:[#allocation2 + $0x44] sm:$0x1] %vm1000_vm1, %v9561_v0  ;;  %1019 = vst.msk [vmem:[#allocation2 + $0x4c] sm:$0x1] %vm1000_vm1, %v9561_v0  ;;  %s10340_s12 = scvt.s32.f32 %s804_s17  ;;  %v6118_v11 = vld [vmem:[%s10235_s3] sm:$0xf]  ;;  %v7734_v13 = vcombine.low %v818_v9, %v819_v10 }
 0x1fc   : > { %6170 = vst.msk [vmem:[#allocation3 + $0x8] sm:$0xf] %vm6166_vm2, %v9561_v0  ;;  %6172 = vst.msk [vmem:[#allocation3 + $0x10] sm:$0xf] %vm6166_vm2, %v9561_v0  ;;  %p794_p8 = scmp.ne.f32.partialorder %s792_s27, %s792_s27  ;;  %s795_s0 = sshrl.u32 %s792_s27, 16  ;;  %v10359_v14 = vld [vmem:[#allocation16] sm:$0xff]  }
 0x1fd   : > { %6171 = vst.msk [vmem:[#allocation3 + $0xc] sm:$0x1] %vm6168_vm3, %v9561_v0  ;;  %6173 = vst.msk [vmem:[#allocation3 + $0x14] sm:$0x1] %vm6168_vm3, %v9561_v0  ;;  %s796_s28 = sand.u32 1, %s795_s0  ;;  %p807_p2 = scmp.ne.f32.partialorder %s10340_s12, %s10340_s12  ;;  %8244 = vmatmul.mubr.msk.bf16.vlgmr.msra.gmra.mrb[0].mxu0 %vm852_vm5, %v7734_v13  ;;  %vm1309_vm15 = vcmask 130048  }
 0x1fe   : > { %6167 = vst.msk [vmem:[#allocation3] sm:$0xf] %vm6166_vm2, %v9561_v0  ;;  %6174 = vst.msk [vmem:[#allocation3 + $0x18] sm:$0xf] %vm6166_vm2, %v9561_v0  ;;  %s797_s7 = sadd.s32 32767, %s796_s28  ;;  %s808_s23 = sshrl.u32 %s10340_s12, 16  ;;  %8252 = vmatpush3.bf16.msra.mxu0 %v8963_v3 }
 0x1ff   : > { %6169 = vst.msk [vmem:[#allocation3 + $0x4] sm:$0x1] %vm6168_vm3, %v9561_v0  ;;  %6175 = vst.msk [vmem:[#allocation3 + $0x1c] sm:$0x1] %vm6168_vm3, %v9561_v0  ;;  %s798_s26 = sadd.s32 %s797_s7, %s792_s27  ;;  %s809_s20 = sand.u32 1, %s808_s23  ;;  %8261 = vmatprep.subr.bf16.mxu0 %v10359_v14 }
 0x200   : > { %6176 = vst.msk [vmem:[#allocation3 + $0x20] sm:$0xf] %vm6166_vm2, %v9561_v0  ;;  %6178 = vst.msk [vmem:[#allocation3 + $0x28] sm:$0xf] %vm6166_vm2, %v9561_v0  ;;  %s799_s11 = sand.u32 4294901760, %s798_s26  ;;  %s810_s15 = sadd.s32 32767, %s809_s20 }
 0x201   : > { %6177 = vst.msk [vmem:[#allocation3 + $0x24] sm:$0x1] %vm6168_vm3, %v9561_v0  ;;  %6179 = vst.msk [vmem:[#allocation3 + $0x2c] sm:$0x1] %vm6168_vm3, %v9561_v0  ;;  %s13241_s11 = smov (%p794_p8, %s799_s11), 2143289344  ;;  %s811_s19 = sadd.s32 %s810_s15, %s10340_s12 }
 0x202   : > { %6180 = vst.msk [vmem:[#allocation3 + $0x30] sm:$0xf] %vm6166_vm2, %v9561_v0  ;;  %6182 = vst.msk [vmem:[#allocation3 + $0x38] sm:$0xf] %vm6166_vm2, %v9561_v0  ;;  %s802_s14 = sshrl.u32 %s13241_s11, 16  ;;  %s812_s13 = sand.u32 4294901760, %s811_s19 }
 0x203   : > { %6181 = vst.msk [vmem:[#allocation3 + $0x34] sm:$0x1] %vm6168_vm3, %v9561_v0  ;;  %6183 = vst.msk [vmem:[#allocation3 + $0x3c] sm:$0x1] %vm6168_vm3, %v9561_v0  ;;  %s13243_s13 = smov (%p807_p2, %s812_s13), 2143289344  ;;  %s958_s17 = sshll.u32 %s802_s14, 16 }
 0x204   : > { %6184 = vst.msk [vmem:[#allocation3 + $0x40] sm:$0xf] %vm6166_vm2, %v9561_v0  ;;  %6186 = vst.msk [vmem:[#allocation3 + $0x48] sm:$0xf] %vm6166_vm2, %v9561_v0  ;;  %v6119_v12 = vld [vmem:[%s10235_s3 + $0x4] sm:$0xf]  ;;  %s959_s0 = sor.u32 %s958_s17, %s802_s14 }
 0x205   : > { %6185 = vst.msk [vmem:[#allocation3 + $0x44] sm:$0x1] %vm6168_vm3, %v9561_v0  ;;  %6187 = vst.msk [vmem:[#allocation3 + $0x4c] sm:$0x1] %vm6168_vm3, %v9561_v0  ;;  %v6142_v15 = vld [vmem:[%s10253_s8] sm:$0xf]  ;;  %v10367_v20 = vstv %s959_s0 }
 0x206   : > { %v6120_v16 = vld [vmem:[%s10235_s3 + $0x8] sm:$0xf]  ;;  %v6121_v17 = vld [vmem:[%s10235_s3 + $0xc] sm:$0xf]  ;;  %s815_s27 = sshrl.u32 %s13243_s13, 16  ;;  %v6126_v22 = vmul.bf16 %v6118_v11, %v10367_v20  ;;  %v6127_v23 = vmul.bf16 %v6119_v12, %v10367_v20  ;;  %s13199_s26 = sld [smem:[#allocation51_spill]] }
 0x207   : > { %v6143_v18 = vld [vmem:[%s10253_s8 + $0x4] sm:$0xf]  ;;  %v6144_v19 = vld [vmem:[%s10253_s8 + $0x8] sm:$0xf]  ;;  %s986_s12 = sshll.u32 %s815_s27, 16  ;;  %v6128_v24 = vmul.bf16 %v6120_v16, %v10367_v20  ;;  %v6129_v25 = vmul.bf16 %v6121_v17, %v10367_v20  ;;  %s13200_s19 = sld [smem:[#allocation152_spill]] }
 0x208   : > { %vm1102_vm6 = vsmask.f32 7938  ;;  %v6145_v21 = vld [vmem:[%s10253_s8 + $0xc] sm:$0xf]  ;;  %s987_s28 = sor.u32 %s986_s12, %s815_s27  ;;  %v820_v26 = vld [vmem:[%s10246_s1 + $0x10] sm:$0xf]  ;;  %v6134_v32 = vmax.bf16 %v6126_v22, %v816_v2  ;;  %v6135_v33 = vmax.bf16 %v6127_v23, %v817_v5 }
 0x209   : > { %v821_v27 = vld [vmem:[%s10246_s1 + $0x14] sm:$0xf]  ;;  %v10377_v28 = vstv %s987_s28  ;;  %vm1108_vm7 = vsmask.f32 256  ;;  %v6122_v30 = vld [vmem:[%s10235_s3 + $0x10] sm:$0xf]  ;;  %v6136_v38 = vmax.bf16 %v6128_v24, %v818_v9  ;;  %v6137_v39 = vmax.bf16 %v6129_v25, %v819_v10  ;;  %vm10405_vm8 = vmand %vm6166_vm2, %vm1102_vm6 }
 0x20a   : > { %12964 = vst [vmem:[#allocation59_spill] sm:$0xff] %v10377_v28  ;;  %v7735_v29 = vcombine.low %v820_v26, %v821_v27  ;;  %v6123_v31 = vld [vmem:[%s10235_s3 + $0x14] sm:$0xf]  ;;  %v6150_v34 = vmul.bf16 %v6142_v15, %v10377_v28  ;;  %v6151_v35 = vmul.bf16 %v6143_v18, %v10377_v28  ;;  %v10384_v36 = vld [vmem:[%s10253_s8 + $0x10] sm:$0xf]  ;;  %v6152_v40 = vmul.bf16 %v6144_v19, %v10377_v28  ;;  %vm10411_vm9 = vmand %vm6168_vm3, %vm1108_vm7  ;;  %s7392_s13 = scalar_lea.sflag [#allocation6], %s10243_s2 }
 0x20b   : > { %v10387_v37 = vld [vmem:[%s10253_s8 + $0x14] sm:$0xf]  ;;  %v6153_v41 = vmul.bf16 %v6145_v21, %v10377_v28  ;;  %v6130_v44 = vmul.bf16 %v6122_v30, %v10367_v20  ;;  %v6131_v45 = vmul.bf16 %v6123_v31, %v10367_v20  ;;  %v6154_v48 = vmul.bf16 %v10384_v36, %v10377_v28  ;;  %v822_v50 = vld [vmem:[%s10246_s1 + $0x18] sm:$0xf]  ;;  %v10400_v51 = vld [vmem:[%s10246_s1 + $0x1c] sm:$0xf] }
 0x20c   : > { %8247 = vmatprep.mubr.msk.bf16.mxu0 %vm852_vm5, %v7735_v29  ;;  %v6158_v42 = vmax.bf16 %v6150_v34, %v6134_v32  ;;  %v6159_v43 = vmax.bf16 %v6151_v35, %v6135_v33  ;;  %v6160_v46 = vmax.bf16 %v6152_v40, %v6136_v38  ;;  %v6155_v49 = vmul.bf16 %v10387_v37, %v10377_v28  ;;  %v6124_v56 = vld [vmem:[%s10235_s3 + $0x18] sm:$0xf]  ;;  %v6276_v58 = vld [vmem:[#allocation3 + $0xc] sm:$0x1]  ;;  %v6279_v59 = vld [vmem:[#allocation3 + $0x10] sm:$0xf] }
 0x20d   : > { %v6161_v47 = vmax.bf16 %v6153_v41, %v6137_v39  ;;  %v6271_v57 = vld [vmem:[#allocation3 + $0x8] sm:$0xf]  ;;  %v6282_v60 = vld [vmem:[#allocation3 + $0x14] sm:$0x1]  ;;  %v6285_v4 = vld [vmem:[#allocation3 + $0x18] sm:$0xf]  ;;  %v6138_v5 = vmax.bf16 %v6130_v44, %v820_v26  ;;  %v6139_v6 = vmax.bf16 %v6131_v45, %v821_v27  ;;  %v7736_v11 = vcombine.low %v822_v50, %v10400_v51 }
 0x20e   : > { %v6189_v52 = vshrl.u32 %v6158_v42, 16  ;;  %v6192_v53 = vshll.u32 %v6158_v42, 16  ;;  %v6197_v54 = vshrl.u32 %v6159_v43, 16  ;;  %v6200_v55 = vshll.u32 %v6159_v43, 16  ;;  %v6288_v10 = vld [vmem:[#allocation3 + $0x1c] sm:$0x1]  ;;  %vm10452_vm10 = vmand %vm998_vm0, %vm1102_vm6 }
 0x20f   : > { %v6205_v61 = vshrl.u32 %v6160_v46, 16  ;;  %v6208_v62 = vshll.u32 %v6160_v46, 16  ;;  %v6213_v63 = vshrl.u32 %v6161_v47, 16  ;;  %v6216_v0 = vshll.u32 %v6161_v47, 16  ;;  %v6291_v18 = vld [vmem:[#allocation3 + $0x20] sm:$0xf]  ;;  %8248 = vmatmul.mubr.msk.bf16.gmra.mrb[4].mxu0 %vm852_vm5, %v7736_v11  ;;  %vm10466_vm11 = vmand %vm1000_vm1, %vm1108_vm7 }
 0x210   : > { %v6191_v1 = vrot.slane %v6189_v52, 7  ;;  %v6199_v2 = vrot.slane %v6197_v54, 7  ;;  %v6132_v12 = vmul.bf16 %v6124_v56, %v10367_v20  ;;  %v6294_v19 = vld [vmem:[#allocation3 + $0x24] sm:$0x1]  ;;  %v6125_v25 = vld [vmem:[%s10235_s3 + $0x1c] sm:$0xf]  ;;  %v6162_v39 = vmax.bf16 %v6154_v48, %v6138_v5 }
 0x211   : > { %v6207_v8 = vrot.slane %v6205_v61, 7  ;;  %v6215_v9 = vrot.slane %v6213_v63, 7  ;;  %v6148_v26 = vld [vmem:[%s10253_s8 + $0x18] sm:$0xf]  ;;  %v6149_v32 = vld [vmem:[%s10253_s8 + $0x1c] sm:$0xf]  ;;  %v6163_v40 = vmax.bf16 %v6155_v49, %v6139_v6  ;;  %v6133_v41 = vmul.bf16 %v6125_v25, %v10367_v20 }
 0x212   : > { %v6194_v13 = vor.u32 %v6192_v53, %v6191_v1  ;;  %v6195_v15 = vrot.slane %v6191_v1, 4  ;;  %v6202_v16 = vor.u32 %v6200_v55, %v6199_v2  ;;  %v6203_v17 = vrot.slane %v6199_v2, 4  ;;  %v950_v33 = vld [vmem:[%s10259_s24] sm:$0xf]  ;;  %v6297_v55 = vld [vmem:[#allocation3 + $0x28] sm:$0xf] }
 0x213   : > { %v6210_v21 = vor.u32 %v6208_v62, %v6207_v8  ;;  %v6211_v22 = vrot.slane %v6207_v8, 4  ;;  %v6218_v23 = vor.u32 %v6216_v0, %v6215_v9  ;;  %v6219_v24 = vrot.slane %v6215_v9, 4  ;;  %v10430_v34 = vld [vmem:[#allocation2] sm:$0xf]  ;;  %v6300_v56 = vld [vmem:[#allocation3 + $0x2c] sm:$0x1] }
 0x214   : > { %v6272_v27 = vsel %vm10405_vm8, %v6194_v13, %v6271_v57  ;;  %v6277_v29 = vsel %vm10411_vm9, %v6195_v15, %v6276_v58  ;;  %v6280_v30 = vsel %vm10405_vm8, %v6202_v16, %v6279_v59  ;;  %v6283_v31 = vsel %vm10411_vm9, %v6203_v17, %v6282_v60  ;;  %v6303_v48 = vld [vmem:[#allocation3 + $0x30] sm:$0xf]  ;;  %v6306_v61 = vld [vmem:[#allocation3 + $0x34] sm:$0x1]  ;;  %v1104_v11 = vld [vmem:[#allocation2 + $0x8] sm:$0xf] }
 0x215   : > { %6273 = vst [vmem:[#allocation3 + $0x8] sm:$0xf] %v6272_v27  ;;  %6278 = vst [vmem:[#allocation3 + $0xc] sm:$0x1] %v6277_v29  ;;  %v6286_v35 = vsel %vm10405_vm8, %v6210_v21, %v6285_v4  ;;  %v6289_v36 = vsel %vm10411_vm9, %v6211_v22, %v6288_v10  ;;  %v6292_v37 = vsel %vm10405_vm8, %v6218_v23, %v6291_v18  ;;  %v1177_v46 = vshrl.u32 %v10430_v34, 16  ;;  %s7731_s3 = sshll.u32 %s10243_s2, 6 }
 0x216   : > { %6281 = vst [vmem:[#allocation3 + $0x10] sm:$0xf] %v6280_v30  ;;  %6284 = vst [vmem:[#allocation3 + $0x14] sm:$0x1] %v6283_v31  ;;  %v6295_v38 = vsel %vm10411_vm9, %v6219_v24, %v6294_v19  ;;  %v6140_v42 = vmax.bf16 %v6132_v12, %v822_v50  ;;  %v6156_v43 = vmul.bf16 %v6148_v26, %v10377_v28  ;;  %v6221_v47 = vshrl.u32 %v6162_v39, 16  ;;  %s12081_s1 = scalar_lea.vmem [#allocation24], %s7731_s3 }
 0x217   : > { %6287 = vst [vmem:[#allocation3 + $0x18] sm:$0xf] %v6286_v35  ;;  %6290 = vst [vmem:[#allocation3 + $0x1c] sm:$0x1] %v6289_v36  ;;  %v6157_v44 = vmul.bf16 %v6149_v32, %v10377_v28  ;;  %v962_v45 = vmul.bf16 %v10367_v20, %v950_v33  ;;  %v6224_v52 = vshll.u32 %v6162_v39, 16  ;;  %v6229_v53 = vshrl.u32 %v6163_v40, 16 }
 0x218   : > { %6293 = vst [vmem:[#allocation3 + $0x20] sm:$0xf] %v6292_v37  ;;  %6296 = vst [vmem:[#allocation3 + $0x24] sm:$0x1] %v6295_v38  ;;  %v6232_v54 = vshll.u32 %v6163_v40, 16  ;;  %v6141_v49 = vmax.bf16 %v6133_v41, %v10400_v51  ;;  %v6164_v57 = vmax.bf16 %v6156_v43, %v6140_v42  ;;  %v6223_v59 = vrot.slane %v6221_v47, 7 }
 0x219   : > { %v1021_v50 = vshrl.u32 %v962_v45, 16  ;;  %v1024_v58 = vshll.u32 %v962_v45, 16  ;;  %v6231_v60 = vrot.slane %v6229_v53, 7  ;;  %v10446_v62 = vrot.slane %v1177_v46, 4  ;;  %v970_v4 = vld [vmem:[%s10265_s25] sm:$0xf] }
 0x21a   : > { %v1180_v63 = vshll.u32 %v10430_v34, 16  ;;  %v6165_v0 = vmax.bf16 %v6157_v44, %v6141_v49  ;;  %v6237_v1 = vshrl.u32 %v6164_v57, 16  ;;  %v6240_v2 = vshll.u32 %v6164_v57, 16  ;;  %v6309_v51 = vld [vmem:[#allocation3 + $0x38] sm:$0xf]  ;;  %s9562_s8 = smov 40  }
 0x21b   : > { %v1023_v5 = vrot.slane %v1021_v50, 7  ;;  %v6226_v6 = vor.u32 %v6224_v52, %v6223_v59  ;;  %v6227_v8 = vrot.slane %v6223_v59, 4  ;;  %v6234_v9 = vor.u32 %v6232_v54, %v6231_v60  ;;  %v6312_v23 = vld [vmem:[#allocation3 + $0x3c] sm:$0x1]  ;;  %v6315_v24 = vld [vmem:[#allocation3 + $0x40] sm:$0xf] }
 0x21c   : > { %v6235_v10 = vrot.slane %v6231_v60, 4  ;;  %v6239_v13 = vrot.slane %v6237_v1, 7  ;;  %v6245_v15 = vshrl.u32 %v6165_v0, 16  ;;  %v6248_v16 = vshll.u32 %v6165_v0, 16  ;;  %v1110_v25 = vld [vmem:[#allocation2 + $0xc] sm:$0x1] }
 0x21d   : > { %v1026_v17 = vor.u32 %v1024_v58, %v1023_v5  ;;  %v6298_v18 = vsel %vm10405_vm8, %v6226_v6, %v6297_v55  ;;  %v6301_v19 = vsel %vm10411_vm9, %v6227_v8, %v6300_v56  ;;  %v6304_v21 = vsel %vm10405_vm8, %v6234_v9, %v6303_v48  ;;  %v1165_v32 = vld [vmem:[#allocation2 + $0x4] sm:$0x1]  ;;  %v6318_v33 = vld [vmem:[#allocation3 + $0x44] sm:$0x1]  ;;  %v952_v43 = vld [vmem:[%s10259_s24 + $0x8] sm:$0xf] }
 0x21e   : > { %v6307_v22 = vsel %vm10411_vm9, %v6235_v10, %v6306_v61  ;;  %6299 = vst [vmem:[#allocation3 + $0x28] sm:$0xf] %v6298_v18  ;;  %6302 = vst [vmem:[#allocation3 + $0x2c] sm:$0x1] %v6301_v19  ;;  %v6242_v27 = vor.u32 %v6240_v2, %v6239_v13  ;;  %v6243_v29 = vrot.slane %v6239_v13, 4  ;;  %v6247_v30 = vrot.slane %v6245_v15, 7 }
 0x21f   : > { %6305 = vst [vmem:[#allocation3 + $0x30] sm:$0xf] %v6304_v21  ;;  %6308 = vst [vmem:[#allocation3 + $0x34] sm:$0x1] %v6307_v22  ;;  %v1027_v31 = vrot.slane %v1023_v5, 4  ;;  %v1105_v35 = vsel %vm10452_vm10, %v1026_v17, %v1104_v11  ;;  %v1182_v36 = vrot.slane %v1180_v63, 5  ;;  %v964_v56 = vmul.bf16 %v10367_v20, %v952_v43 }
 0x220   : > { %v2693_v37 = vshrl.u32 %v970_v4, 16  ;;  %v951_v38 = vld [vmem:[%s10259_s24 + $0x4] sm:$0xf]  ;;  %v6250_v39 = vor.u32 %v6248_v16, %v6247_v30  ;;  %v6251_v40 = vrot.slane %v6247_v30, 4  ;;  %v6310_v41 = vsel %vm10405_vm8, %v6242_v27, %v6309_v51  ;;  %1106 = vst [vmem:[#allocation2 + $0x8] sm:$0xf] %v1105_v35 }
 0x221   : > { %v6313_v42 = vsel %vm10411_vm9, %v6243_v29, %v6312_v23  ;;  %6311 = vst [vmem:[#allocation3 + $0x38] sm:$0xf] %v6310_v41  ;;  %v1111_v44 = vsel %vm10466_vm11, %v1027_v31, %v1110_v25  ;;  %v1183_v45 = vor.u32 %v1182_v36, %v10446_v62  ;;  %v1186_v46 = vshll.u32 %v1165_v32, 16  ;;  %v1113_v61 = vld [vmem:[#allocation2 + $0x10] sm:$0xf]  ;;  %s7407_s20 = sshll.u32 %s12081_s1, 4  ;;  %s12626_s20 = int_to_ptr.vmem [resolvable:$true] %s7407_s20 }
 0x222   : > { %6314 = vst [vmem:[#allocation3 + $0x3c] sm:$0x1] %v6313_v42  ;;  %v2695_v47 = vrot.slane %v2693_v37, 7  ;;  %v6316_v52 = vsel %vm10405_vm8, %v6250_v39, %v6315_v24  ;;  %v6319_v53 = vsel %vm10411_vm9, %v6251_v40, %v6318_v33  ;;  %1112 = vst [vmem:[#allocation2 + $0xc] sm:$0x1] %v1111_v44  ;;  %v2696_v54 = vshll.u32 %v970_v4, 16 }
 0x223   : > { %v963_v55 = vmul.bf16 %v10367_v20, %v951_v38  ;;  %6317 = vst [vmem:[#allocation3 + $0x40] sm:$0xf] %v6316_v52  ;;  %6320 = vst [vmem:[#allocation3 + $0x44] sm:$0x1] %v6319_v53  ;;  %vm1173_vm12 = vsmask.f32 3328 }
 0x224   : > { %vm1174_vm13 = vsmask.f32 7440  ;;  %v1184_v57 = vrot.slane %v1183_v45, 4  ;;  %v1188_v50 = vrot.slane %v1186_v46, 5  ;;  %v2698_v58 = vor.u32 %v2696_v54, %v2695_v47  ;;  %v1116_v17 = vld [vmem:[#allocation2 + $0x14] sm:$0x1] }
 0x225   : > { %v1029_v48 = vshrl.u32 %v963_v55, 16  ;;  %v1032_v49 = vshll.u32 %v963_v55, 16  ;;  %v2699_v3 = vrot.slane %v2695_v47, 4  ;;  %v1037_v60 = vshrl.u32 %v964_v56, 16  ;;  %vm10511_vm14 = vmor %vm1173_vm12, %vm1174_vm13  ;;  %v971_v19 = vld [vmem:[%s10265_s25 + $0x4] sm:$0xf] }
 0x226   : > { %v1040_v7 = vshll.u32 %v964_v56, 16  ;;  %v1119_v27 = vld [vmem:[#allocation2 + $0x18] sm:$0xf]  ;;  %v1122_v29 = vld [vmem:[#allocation2 + $0x1c] sm:$0x1]  ;;  %v1189_v33 = vsel %vm10511_vm14, %v1184_v57, %v1188_v50  ;;  %v2701_v39 = vshrl.u32 %v971_v19, 16 }
 0x227   : > { %v1031_v59 = vrot.slane %v1029_v48, 7  ;;  %v10487_v62 = vld [vmem:[#allocation2 + $0x8] sm:$0xf]  ;;  %v1039_v22 = vrot.slane %v1037_v60, 7  ;;  %v954_v36 = vld [vmem:[%s10259_s24 + $0x10] sm:$0xf] }
 0x228   : > { %v10489_v63 = vld [vmem:[#allocation2 + $0x8] sm:$0xe]  ;;  %v1191_v1 = vshrl.u32 %v10487_v62, 16  ;;  %v1194_v2 = vshll.u32 %v10487_v62, 16  ;;  %v966_v43 = vmul.bf16 %v10367_v20, %v954_v36  ;;  %v10534_v45 = vrot.slane %v2701_v39, 7  ;;  %s9363_s17 = scalar_lea.vmem %s12626_s20, 1024 }
 0x229   : > { %12973 = vst [vmem:[#allocation60_spill] sm:$0xff] %v10489_v63  ;;  %v10491_v0 = vld [vmem:[#allocation2 + $0x8] sm:$0xf]  ;;  %v1034_v6 = vor.u32 %v1032_v49, %v1031_v59  ;;  %v10499_v8 = vld [vmem:[#allocation2 + $0xc] sm:$0x1]  ;;  %v1035_v21 = vrot.slane %v1031_v59, 4  ;;  %v1042_v30 = vor.u32 %v1040_v7, %v1039_v22  ;;  %p9364_p3 = scmp.ne.s32.totalorder %s12626_s20, %s9363_s17 }
 0x22a   : > { %v10495_v4 = vld [vmem:[#allocation2 + $0x8] sm:$0xf]  ;;  %12976 = vst [vmem:[#allocation63_spill] sm:$0xff] %v10499_v8  ;;  %v10501_v9 = vld [vmem:[#allocation2 + $0xc] sm:$0x1]  ;;  %v1193_v11 = vrot.slane %v1191_v1, 4 }
 0x22b   : > { %12974 = vst [vmem:[#allocation61_spill] sm:$0xff] %v10495_v4  ;;  %v10497_v5 = vld [vmem:[#allocation2 + $0x8] sm:$0xe]  ;;  %12977 = vst [vmem:[#allocation64_spill] sm:$0xff] %v10501_v9  ;;  %v2772_v10 = vsel %vm10452_vm10, %v2698_v58, %v10495_v4  ;;  %v2774_v51 = vld [vmem:[#allocation2 + $0xc] sm:$0x1]  ;;  %v1114_v23 = vsel %vm10452_vm10, %v1034_v6, %v1113_v61  ;;  %v1117_v32 = vsel %vm10466_vm11, %v1035_v21, %v1116_v17 }
 0x22c   : > { %12975 = vst [vmem:[#allocation62_spill] sm:$0xff] %v10497_v5  ;;  %v1196_v13 = vrot.slane %v1194_v2, 5  ;;  %v1200_v15 = vshll.u32 %v10499_v8, 16  ;;  %2773 = vst [vmem:[#allocation2 + $0x8] sm:$0xf] %v2772_v10  ;;  %v2775_v16 = vsel %vm10466_vm11, %v2699_v3, %v2774_v51  ;;  %v1043_v31 = vrot.slane %v1039_v22, 4 }
 0x22d   : > { %2776 = vst [vmem:[#allocation2 + $0xc] sm:$0x1] %v2775_v16  ;;  %1115 = vst [vmem:[#allocation2 + $0x10] sm:$0xf] %v1114_v23  ;;  %v1120_v37 = vsel %vm10452_vm10, %v1042_v30, %v1119_v27  ;;  %v972_v41 = vld [vmem:[%s10265_s25 + $0x8] sm:$0xf] }
 0x22e   : > { %v1197_v24 = vor.u32 %v1196_v13, %v1193_v11  ;;  %v1202_v25 = vrot.slane %v1200_v15, 5  ;;  %1118 = vst [vmem:[#allocation2 + $0x14] sm:$0x1] %v1117_v32  ;;  %v1123_v38 = vsel %vm10466_vm11, %v1043_v31, %v1122_v29  ;;  %1121 = vst [vmem:[#allocation2 + $0x18] sm:$0xf] %v1120_v37  ;;  %v2704_v46 = vshll.u32 %v971_v19, 16 }
 0x22f   : > { %1124 = vst [vmem:[#allocation2 + $0x1c] sm:$0x1] %v1123_v38  ;;  %v2709_v47 = vshrl.u32 %v972_v41, 16  ;;  %v955_v54 = vld [vmem:[%s10259_s24 + $0x14] sm:$0xf]  ;;  %v1053_v56 = vshrl.u32 %v966_v43, 16 }
 0x230   : > { %v1198_v35 = vrot.slane %v1197_v24, 4  ;;  %v2706_v3 = vor.u32 %v2704_v46, %v10534_v45  ;;  %v2712_v60 = vshll.u32 %v972_v41, 16  ;;  %v10548_v7 = vmul.bf16 %v10367_v20, %v955_v54  ;;  %v956_v10 = vld [vmem:[%s10259_s24 + $0x18] sm:$0xf]  ;;  %v957_v16 = vld [vmem:[%s10259_s24 + $0x1c] sm:$0xf] }
 0x231   : > { %v2711_v59 = vrot.slane %v2709_v47, 7  ;;  %v2707_v6 = vrot.slane %v10534_v45, 4  ;;  %v10555_v15 = vrot.slane %v1053_v56, 7  ;;  %v1056_v31 = vshll.u32 %v966_v43, 16  ;;  %v1131_v32 = vld [vmem:[#allocation2 + $0x28] sm:$0xf] }
 0x232   : > { %v1203_v40 = vsel %vm10511_vm14, %v1198_v35, %v1202_v25  ;;  %v974_v45 = vld [vmem:[%s10265_s25 + $0x10] sm:$0xf]  ;;  %v1061_v43 = vshrl.u32 %v10548_v7, 16  ;;  %vm1514_vm0 = vcmask 1042432   ;;  %vm1515_vm1 = vcmask 1046532   ;;  %p13201_p5 = scmp.ne.s32.totalorder %s13199_s26, 0 }
 0x233   : > { %v7741_v42 = vcombine.low %v1189_v33, %v1203_v40  ;;  %v2715_v13 = vrot.slane %v2711_v59, 4  ;;  %v1058_v54 = vor.u32 %v1056_v31, %v10555_v15  ;;  %v1137_v31 = vld [vmem:[#allocation2 + $0x30] sm:$0xf]  ;;  %v1059_v4 = vrot.slane %v10555_v15, 4  ;;  %vm11097_vm2 = vmor %vm1514_vm0, %vm1515_vm1  ;;  %s9564_s27 = smov [#allocation24]  }
 0x234   : > { %v10532_v44 = vld [vmem:[#allocation2 + $0x10] sm:$0xf]  ;;  %vm6109_vm3 = vcmask 326720   ;;  %p9365_p0 = pnand %p9364_p3, %p13201_p5  ;;  %s9367_s0 = sshll.u32 %s9564_s27, 4  ;;  %s9368_s0 = int_to_ptr.vmem [resolvable:$false] %s9367_s0 }
 0x235   : > { %8253 = vmatprep.mubr.msk.bf16.mxu0 %vm1309_vm15, %v7741_v42  ;;  %v1205_v52 = vshrl.u32 %v10532_v44, 16  ;;  %v1208_v53 = vshll.u32 %v10532_v44, 16  ;;  %v10539_v55 = vld [vmem:[#allocation2 + $0x14] sm:$0x1]  ;;  %v10542_v50 = vld [vmem:[#allocation2 + $0x18] sm:$0xf]  ;;  %v2714_v42 = vor.u32 %v2712_v60, %v2711_v59  ;;  %v968_v59 = vmul.bf16 %v10367_v20, %v956_v10  ;;  %p9370_p6 = scmp.lt.s32.totalorder %s12626_s20, %s9368_s0 }
 0x236   : > { %12980 = vst [vmem:[#allocation65_spill] sm:$0xff] %v10539_v55  ;;  %v1214_v57 = vshll.u32 %v10539_v55, 16  ;;  %v10544_v58 = vld [vmem:[#allocation2 + $0x1c] sm:$0x1]  ;;  %v1219_v1 = vshrl.u32 %v10542_v50, 16  ;;  %v1222_v2 = vshll.u32 %v10542_v50, 16  ;;  %v969_v60 = vmul.bf16 %v10367_v20, %v957_v16  ;;  %p9366_p4 = pneg %p9365_p0 }
 0x237   : > { %v1207_v48 = vrot.slane %v1205_v52, 4  ;;  %v1210_v49 = vrot.slane %v1208_v53, 5  ;;  %12981 = vst [vmem:[#allocation66_spill] sm:$0xff] %v10544_v58  ;;  %v1228_v11 = vshll.u32 %v10544_v58, 16  ;;  %v10558_v22 = vld [vmem:[#allocation2 + $0x10] sm:$0xe] }
 0x238   : > { %v1216_v51 = vrot.slane %v1214_v57, 5  ;;  %v1221_v19 = vrot.slane %v1219_v1, 4  ;;  %v1224_v21 = vrot.slane %v1222_v2, 5  ;;  %12982 = vst [vmem:[#allocation67_spill] sm:$0xff] %v10558_v22  ;;  %v10560_v23 = vld [vmem:[#allocation2 + $0x10] sm:$0xf] }
 0x239   : > { %v1211_v61 = vor.u32 %v1210_v49, %v1207_v48  ;;  %v10562_v24 = vld [vmem:[#allocation2 + $0x10] sm:$0xf]  ;;  %v10564_v25 = vld [vmem:[#allocation2 + $0x14] sm:$0x1]  ;;  %v1230_v33 = vrot.slane %v1228_v11, 5  ;;  %s9369_s12 = scalar_lea.vmem %s9368_s0, 2048 }
 0x23a   : > { %12983 = vst [vmem:[#allocation68_spill] sm:$0xff] %v10562_v24  ;;  %12984 = vst [vmem:[#allocation69_spill] sm:$0xff] %v10564_v25  ;;  %v10566_v27 = vld [vmem:[#allocation2 + $0x10] sm:$0xe]  ;;  %v10572_v35 = vld [vmem:[#allocation2 + $0x18] sm:$0xe]  ;;  %v1225_v46 = vor.u32 %v1224_v21, %v1221_v19  ;;  %p9371_p9 = scmp.lt.s32.totalorder %s9369_s12, %s9363_s17 }
 0x23b   : > { %v1212_v17 = vrot.slane %v1211_v61, 4  ;;  %12985 = vst [vmem:[#allocation70_spill] sm:$0xff] %v10566_v27  ;;  %v10568_v29 = vld [vmem:[#allocation2 + $0x10] sm:$0xf]  ;;  %12988 = vst [vmem:[#allocation73_spill] sm:$0xff] %v10572_v35  ;;  %v1064_v21 = vshll.u32 %v10548_v7, 16 }
 0x23c   : > { %12986 = vst [vmem:[#allocation71_spill] sm:$0xff] %v10568_v29  ;;  %v10570_v30 = vld [vmem:[#allocation2 + $0x10] sm:$0xf]  ;;  %v10574_v36 = vld [vmem:[#allocation2 + $0x18] sm:$0xf]  ;;  %v1226_v61 = vrot.slane %v1225_v46, 4  ;;  %p9372_p11 = por %p9371_p9, %p9370_p6 }
 0x23d   : > { %12987 = vst [vmem:[#allocation72_spill] sm:$0xff] %v10570_v30  ;;  %v10576_v37 = vld [vmem:[#allocation2 + $0x18] sm:$0xf]  ;;  %v10578_v38 = vld [vmem:[#allocation2 + $0x1c] sm:$0x1]  ;;  %v1217_v56 = vsel %vm10511_vm14, %v1212_v17, %v1216_v51  ;;  %v10605_v51 = vrot.slane %v1061_v43, 7 }
 0x23e   : > { %12989 = vst [vmem:[#allocation74_spill] sm:$0xff] %v10576_v37  ;;  %12990 = vst [vmem:[#allocation75_spill] sm:$0xff] %v10578_v38  ;;  %v10580_v39 = vld [vmem:[#allocation2 + $0x18] sm:$0xe]  ;;  %v10584_v41 = vld [vmem:[#allocation2 + $0x14] sm:$0x1]  ;;  %p9373_p7 = pnand %p9372_p11, %p9366_p4 }
 0x23f   : > { %12991 = vst [vmem:[#allocation76_spill] sm:$0xff] %v10580_v39  ;;  %v10582_v40 = vld [vmem:[#allocation2 + $0x18] sm:$0xf]  ;;  %12993 = vst [vmem:[#allocation78_spill] sm:$0xff] %v10584_v41  ;;  %v10590_v52 = vld [vmem:[#allocation2 + $0x1c] sm:$0x1] }
 0x240   : > { %12992 = vst [vmem:[#allocation77_spill] sm:$0xff] %v10582_v40  ;;  %v10588_v47 = vld [vmem:[#allocation2 + $0x18] sm:$0xf]  ;;  %12995 = vst [vmem:[#allocation80_spill] sm:$0xff] %v10590_v52  ;;  %v10592_v53 = vld [vmem:[#allocation2 + $0x10] sm:$0xe] }
 0x241   : > { %12994 = vst [vmem:[#allocation79_spill] sm:$0xff] %v10588_v47  ;;  %12996 = vst [vmem:[#allocation81_spill] sm:$0xff] %v10592_v53  ;;  %v10597_v48 = vld [vmem:[#allocation2 + $0x18] sm:$0xe]  ;;  %v2777_v49 = vld [vmem:[#allocation2 + $0x10] sm:$0xf] }
 0x242   : > { %12997 = vst [vmem:[#allocation82_spill] sm:$0xff] %v10597_v48  ;;  %v2780_v57 = vld [vmem:[#allocation2 + $0x14] sm:$0x1]  ;;  %v2778_v1 = vsel %vm10452_vm10, %v2706_v3, %v2777_v49  ;;  %v2783_v11 = vld [vmem:[#allocation2 + $0x18] sm:$0xf]  ;;  %v1132_v3 = vsel %vm10452_vm10, %v1058_v54, %v1131_v32  ;;  %v2725_v43 = vshrl.u32 %v974_v45, 16 }
 0x243   : > { %v2781_v2 = vsel %vm10466_vm11, %v2707_v6, %v2780_v57  ;;  %v2786_v19 = vld [vmem:[#allocation2 + $0x1c] sm:$0x1]  ;;  %2779 = vst [vmem:[#allocation2 + $0x10] sm:$0xf] %v2778_v1  ;;  %v2784_v17 = vsel %vm10452_vm10, %v2714_v42, %v2783_v11  ;;  %v975_v16 = vld [vmem:[%s10265_s25 + $0x14] sm:$0xf]  ;;  %v1231_v6 = vsel %vm10511_vm14, %v1226_v61, %v1230_v33 }
 0x244   : > { %2782 = vst [vmem:[#allocation2 + $0x14] sm:$0x1] %v2781_v2  ;;  %v2787_v10 = vsel %vm10466_vm11, %v2715_v13, %v2786_v19  ;;  %2785 = vst [vmem:[#allocation2 + $0x18] sm:$0xf] %v2784_v17  ;;  %v10618_v46 = vld [vmem:[%s10265_s25 + $0x18] sm:$0xf]  ;;  %v7742_v42 = vcombine.low %v1217_v56, %v1231_v6  ;;  %v1066_v13 = vor.u32 %v1064_v21, %v10605_v51 }
 0x245   : > { %2788 = vst [vmem:[#allocation2 + $0x1c] sm:$0x1] %v2787_v10  ;;  %1133 = vst [vmem:[#allocation2 + $0x28] sm:$0xf] %v1132_v3  ;;  %v2728_v49 = vshll.u32 %v974_v45, 16  ;;  %v1069_v57 = vshrl.u32 %v968_v59, 16 }
 0x246   : > { %v10621_v7 = vld [vmem:[#allocation16 + $0x10] sm:$0xff]   ;;  %v10623_v1 = vrot.slane %v2725_v43, 7  ;;  %v2733_v32 = vshrl.u32 %v975_v16, 16  ;;  %v10626_v54 = vld [vmem:[%s10265_s25 + $0x1c] sm:$0xf]  ;;  %v1072_v33 = vshll.u32 %v968_v59, 16  ;;  %8254 = vmatmul.mubr.msk.bf16.vlgmr.msra.gmra.mrb[8].mxu0 %vm1309_vm15, %v7742_v42  ;;  %v1138_v56 = vsel %vm10452_vm10, %v1066_v13, %v1137_v31 }
 0x247   : > { %v1077_v61 = vshrl.u32 %v969_v60, 16  ;;  %v1143_v2 = vld [vmem:[#allocation2 + $0x38] sm:$0xf]  ;;  %v10631_v11 = vrot.slane %v1069_v57, 7  ;;  %v1080_v45 = vshll.u32 %v969_v60, 16  ;;  %v2741_v19 = vshrl.u32 %v10618_v46, 16  ;;  %8262 = vmatpush3.bf16.msra.mxu0 %v10359_v14 }
 0x248   : > { %1139 = vst [vmem:[#allocation2 + $0x30] sm:$0xf] %v1138_v56  ;;  %v2736_v59 = vshll.u32 %v975_v16, 16  ;;  %v1149_v21 = vld [vmem:[#allocation2 + $0x40] sm:$0xf]  ;;  %8271 = vmatprep.subr.bf16.mxu0 %v10621_v7  ;;  %v2730_v3 = vor.u32 %v2728_v49, %v10623_v1  ;;  %v10640_v6 = vrot.slane %v2733_v32, 7 }
 0x249   : > { %v10634_v17 = vrot.slane %v1077_v61, 7  ;;  %v1074_v10 = vor.u32 %v1072_v33, %v10631_v11  ;;  %v2744_v31 = vshll.u32 %v10618_v46, 16  ;;  %v979_v43 = vld [vmem:[%s10271_s10 + $0x4] sm:$0xf]  ;;  %v980_v42 = vld [vmem:[%s10271_s10 + $0x8] sm:$0xf] }
 0x24a   : > { %v10648_v14 = vrot.slane %v2741_v19, 7  ;;  %v2749_v16 = vshrl.u32 %v10626_v54, 16  ;;  %v2752_v57 = vshll.u32 %v10626_v54, 16  ;;  %v953_v33 = vld [vmem:[%s10259_s24 + $0xc] sm:$0xf]  ;;  %v10681_v52 = vmul.bf16 %v10377_v28, %v979_v43  ;;  %s9563_s24 = smov 8  }
 0x24b   : > { %v1082_v60 = vor.u32 %v1080_v45, %v10634_v17  ;;  %v1144_v13 = vsel %vm10452_vm10, %v1074_v10, %v1143_v2  ;;  %v2738_v10 = vor.u32 %v2736_v59, %v10640_v6  ;;  %v965_v47 = vmul.bf16 %v10367_v20, %v953_v33  ;;  %v1134_v38 = vld [vmem:[#allocation2 + $0x2c] sm:$0x1] }
 0x24c   : > { %v10653_v61 = vld [vmem:[#allocation2 + $0x28] sm:$0xf]  ;;  %1145 = vst [vmem:[#allocation2 + $0x38] sm:$0xf] %v1144_v13  ;;  %v10699_v43 = vrot.slane %v2749_v16, 7  ;;  %v1135_v15 = vsel %vm10466_vm11, %v1059_v4, %v1134_v38  ;;  %v4385_v4 = vshll.u32 %v10681_v52, 16 }
 0x24d   : > { %v10655_v49 = vld [vmem:[#allocation2 + $0x28] sm:$0xe]  ;;  %v1150_v46 = vsel %vm10452_vm10, %v1082_v60, %v1149_v21  ;;  %v1045_v39 = vshrl.u32 %v965_v47, 16  ;;  %v1048_v20 = vshll.u32 %v965_v47, 16  ;;  %v2746_v47 = vor.u32 %v2744_v31, %v10648_v14  ;;  %1136 = vst [vmem:[#allocation2 + $0x2c] sm:$0x1] %v1135_v15 }
 0x24e   : > { %12998 = vst [vmem:[#allocation83_spill] sm:$0xff] %v10655_v49  ;;  %v10657_v32 = vld [vmem:[#allocation2 + $0x28] sm:$0xf]  ;;  %1151 = vst [vmem:[#allocation2 + $0x40] sm:$0xf] %v1150_v46  ;;  %v10684_v46 = vmul.bf16 %v10377_v28, %v980_v42  ;;  %v1075_v15 = vrot.slane %v10631_v11, 4 }
 0x24f   : > { %v10661_v56 = vld [vmem:[#allocation2 + $0x28] sm:$0xf]  ;;  %v10672_v53 = vld [vmem:[#allocation2 + $0x30] sm:$0xf]  ;;  %v981_v42 = vld [vmem:[%s10271_s10 + $0xc] sm:$0xf] }
 0x250   : > { %12999 = vst [vmem:[#allocation84_spill] sm:$0xff] %v10661_v56  ;;  %v10663_v2 = vld [vmem:[#allocation2 + $0x28] sm:$0xe]  ;;  %v10674_v13 = vld [vmem:[#allocation2 + $0x30] sm:$0xe]  ;;  %v10739_v9 = vmul.bf16 %v10377_v28, %v981_v42 }
 0x251   : > { %13000 = vst [vmem:[#allocation85_spill] sm:$0xff] %v10663_v2  ;;  %v10665_v45 = vld [vmem:[#allocation2 + $0x28] sm:$0xf]  ;;  %13004 = vst [vmem:[#allocation89_spill] sm:$0xff] %v10674_v13  ;;  %v10676_v21 = vld [vmem:[#allocation2 + $0x30] sm:$0xf] }
 0x252   : > { %13001 = vst [vmem:[#allocation86_spill] sm:$0xff] %v10665_v45  ;;  %v10667_v19 = vld [vmem:[#allocation2 + $0x28] sm:$0xf]  ;;  %v10688_v59 = vld [vmem:[#allocation2 + $0x30] sm:$0xe]  ;;  %v4382_v2 = vshrl.u32 %v10681_v52, 16 }
 0x253   : > { %13002 = vst [vmem:[#allocation87_spill] sm:$0xff] %v10667_v19  ;;  %v10669_v54 = vld [vmem:[#allocation2 + $0x28] sm:$0xe]  ;;  %13006 = vst [vmem:[#allocation91_spill] sm:$0xff] %v10688_v59  ;;  %v10690_v19 = vld [vmem:[#allocation2 + $0x30] sm:$0xf] }
 0x254   : > { %13003 = vst [vmem:[#allocation88_spill] sm:$0xff] %v10669_v54  ;;  %v2795_v48 = vld [vmem:[#allocation2 + $0x28] sm:$0xf]  ;;  %v10686_v54 = vld [vmem:[#allocation2 + $0x30] sm:$0xf]  ;;  %13007 = vst [vmem:[#allocation92_spill] sm:$0xff] %v10690_v19 }
 0x255   : > { %v2796_v60 = vsel %vm10452_vm10, %v2730_v3, %v2795_v48  ;;  %13005 = vst [vmem:[#allocation90_spill] sm:$0xff] %v10686_v54  ;;  %v10693_v41 = vld [vmem:[#allocation2 + $0x30] sm:$0xf]  ;;  %v4390_v59 = vshrl.u32 %v10684_v46, 16  ;;  %v10705_v33 = vld [vmem:[#allocation2 + $0x38] sm:$0xf]  ;;  %v2754_v54 = vor.u32 %v2752_v57, %v10699_v43 }
 0x256   : > { %2797 = vst [vmem:[#allocation2 + $0x28] sm:$0xf] %v2796_v60  ;;  %13008 = vst [vmem:[#allocation93_spill] sm:$0xff] %v10693_v41  ;;  %v10695_v30 = vld [vmem:[#allocation2 + $0x30] sm:$0xe]  ;;  %v1047_v57 = vrot.slane %v1045_v39, 7 }
 0x257   : > { %13009 = vst [vmem:[#allocation94_spill] sm:$0xff] %v10695_v30  ;;  %v2801_v48 = vld [vmem:[#allocation2 + $0x30] sm:$0xf]  ;;  %v10707_v41 = vld [vmem:[#allocation2 + $0x38] sm:$0xe] }
 0x258   : > { %v2802_v3 = vsel %vm10452_vm10, %v2738_v10, %v2801_v48  ;;  %v982_v60 = vld [vmem:[%s10271_s10 + $0x10] sm:$0xf]  ;;  %13010 = vst [vmem:[#allocation95_spill] sm:$0xff] %v10707_v41  ;;  %v10709_v30 = vld [vmem:[#allocation2 + $0x38] sm:$0xf]  ;;  %v1250_v41 = vshll.u32 %v10653_v61, 16 }
 0x259   : > { %2803 = vst [vmem:[#allocation2 + $0x30] sm:$0xf] %v2802_v3  ;;  %13011 = vst [vmem:[#allocation96_spill] sm:$0xff] %v10709_v30  ;;  %v10711_v27 = vld [vmem:[#allocation2 + $0x40] sm:$0xf]  ;;  %v10742_v31 = vmul.bf16 %v10377_v28, %v982_v60  ;;  %v1050_v60 = vor.u32 %v1048_v20, %v1047_v57  ;;  %v1051_v13 = vrot.slane %v1047_v57, 4 }
 0x25a   : > { %13012 = vst [vmem:[#allocation97_spill] sm:$0xff] %v10711_v27  ;;  %v10713_v16 = vld [vmem:[#allocation2 + $0x38] sm:$0xf]  ;;  %v10715_v10 = vld [vmem:[#allocation2 + $0x40] sm:$0xf] }
 0x25b   : > { %13013 = vst [vmem:[#allocation98_spill] sm:$0xff] %v10713_v16  ;;  %13014 = vst [vmem:[#allocation99_spill] sm:$0xff] %v10715_v10  ;;  %v10717_v48 = vld [vmem:[#allocation2 + $0x38] sm:$0xe]  ;;  %v10719_v3 = vld [vmem:[#allocation2 + $0x40] sm:$0xe] }
 0x25c   : > { %13015 = vst [vmem:[#allocation100_spill] sm:$0xff] %v10717_v48  ;;  %13016 = vst [vmem:[#allocation101_spill] sm:$0xff] %v10719_v3  ;;  %v10721_v5 = vld [vmem:[#allocation2 + $0x38] sm:$0xf]  ;;  %v10726_v56 = vld [vmem:[%s10265_s25 + $0xc] sm:$0xf] }
 0x25d   : > { %13017 = vst [vmem:[#allocation102_spill] sm:$0xff] %v10721_v5  ;;  %v10728_v37 = vld [vmem:[#allocation2 + $0x40] sm:$0xf]  ;;  %v10730_v25 = vld [vmem:[#allocation2 + $0x38] sm:$0xf]  ;;  %v2717_v39 = vshrl.u32 %v10726_v56, 16 }
 0x25e   : > { %13018 = vst [vmem:[#allocation103_spill] sm:$0xff] %v10728_v37  ;;  %13019 = vst [vmem:[#allocation104_spill] sm:$0xff] %v10730_v25  ;;  %v10732_v16 = vld [vmem:[#allocation2 + $0x40] sm:$0xf]  ;;  %v10734_v10 = vld [vmem:[#allocation2 + $0x38] sm:$0xe] }
 0x25f   : > { %13020 = vst [vmem:[#allocation105_spill] sm:$0xff] %v10732_v16  ;;  %13021 = vst [vmem:[#allocation106_spill] sm:$0xff] %v10734_v10  ;;  %v10736_v48 = vld [vmem:[#allocation2 + $0x40] sm:$0xe]  ;;  %v2807_v3 = vld [vmem:[#allocation2 + $0x38] sm:$0xf] }
 0x260   : > { %13022 = vst [vmem:[#allocation107_spill] sm:$0xff] %v10736_v48  ;;  %v2813_v24 = vld [vmem:[#allocation2 + $0x40] sm:$0xf]  ;;  %v2808_v25 = vsel %vm10452_vm10, %v2746_v47, %v2807_v3  ;;  %v1128_v37 = vld [vmem:[#allocation2 + $0x24] sm:$0x1]  ;;  %v1247_v48 = vshrl.u32 %v10653_v61, 16 }
 0x261   : > { %v2814_v16 = vsel %vm10452_vm10, %v2754_v54, %v2813_v24  ;;  %v1125_v10 = vld [vmem:[#allocation2 + $0x20] sm:$0xf]  ;;  %v8967_v42 = vld [vmem:[#allocation2 + $0x28] ss:$8 sps:$4 sm:$0xff]   ;;  %2809 = vst [vmem:[#allocation2 + $0x38] sm:$0xf] %v2808_v25  ;;  %v1129_v20 = vsel %vm10466_vm11, %v1051_v13, %v1128_v37 }
 0x262   : > { %2815 = vst [vmem:[#allocation2 + $0x40] sm:$0xf] %v2814_v16  ;;  %v10754_v3 = vrot.slane %v4382_v2, 7  ;;  %v10756_v24 = vrot.slane %v4390_v59, 7  ;;  %v1249_v54 = vrot.slane %v1247_v48, 4  ;;  %v1252_v47 = vrot.slane %v1250_v41, 5  ;;  %8377 = vmatprep.mubr.msk.bf16.mxu1 %vm1309_vm15, %v8967_v42 }
 0x263   : > { %v1126_v25 = vsel %vm10452_vm10, %v1050_v60, %v1125_v10  ;;  %v4393_v2 = vshll.u32 %v10684_v46, 16  ;;  %1130 = vst [vmem:[#allocation2 + $0x24] sm:$0x1] %v1129_v20  ;;  %v983_v41 = vld [vmem:[%s10271_s10 + $0x14] sm:$0xf]  ;;  %v10768_v57 = vrot.slane %v2717_v39, 7 }
 0x264   : > { %1127 = vst [vmem:[#allocation2 + $0x20] sm:$0xf] %v1126_v25  ;;  %v1140_v16 = vld [vmem:[#allocation2 + $0x34] sm:$0x1]  ;;  %v1253_v48 = vor.u32 %v1252_v47, %v1249_v54  ;;  %v4398_v10 = vshrl.u32 %v10739_v9, 16  ;;  %v1067_v37 = vrot.slane %v10605_v51, 4  ;;  %v10788_v59 = vor.u32 %v4385_v4, %v10754_v3 }
 0x265   : > { %v1146_v52 = vld [vmem:[#allocation2 + $0x3c] sm:$0x1]  ;;  %v2720_v13 = vshll.u32 %v10726_v56, 16  ;;  %v2731_v42 = vrot.slane %v10623_v1, 4  ;;  %v4406_v46 = vshrl.u32 %v10742_v31, 16  ;;  %v10783_v20 = vld [vmem:[#allocation16 + $0x70] sm:$0xff]  }
 0x266   : > { %v984_v60 = vld [vmem:[%s10271_s10 + $0x18] sm:$0xf]  ;;  %v1141_v47 = vsel %vm10466_vm11, %v1067_v37, %v1140_v16  ;;  %v978_v51 = vld [vmem:[%s10271_s10] sm:$0xf]  ;;  %13023 = vst [vmem:[#allocation108_spill] sm:$0xff] %v10783_v20  ;;  %v1147_v1 = vsel %vm10466_vm11, %v1075_v15, %v1146_v52  ;;  %v10792_v25 = vrot.slane %v1253_v48, 4  ;;  %v10799_v16 = vmul.bf16 %v10377_v28, %v983_v41 }
 0x267   : > { %1142 = vst [vmem:[#allocation2 + $0x34] sm:$0x1] %v1141_v47  ;;  %v10790_v11 = vld [vmem:[#allocation2 + $0x2c] sm:$0x1]  ;;  %v10796_v39 = vrot.slane %v4398_v10, 7  ;;  %v10809_v15 = vrot.slane %v4406_v46, 7  ;;  %v10812_v10 = vmul.bf16 %v10377_v28, %v984_v60  ;;  %v10815_v41 = vmul.bf16 %v10377_v28, %v978_v51 }
 0x268   : > { %13024 = vst [vmem:[#allocation109_spill] sm:$0xff] %v10790_v11  ;;  %v10794_v54 = vld [vmem:[#allocation2 + $0x2c] sm:$0x1]  ;;  %1148 = vst [vmem:[#allocation2 + $0x3c] sm:$0x1] %v1147_v1  ;;  %v1256_v4 = vshll.u32 %v10790_v11, 16  ;;  %v10818_v1 = vor.u32 %v4393_v2, %v10756_v24  ;;  %v2722_v22 = vor.u32 %v2720_v13, %v10768_v57 }
 0x269   : > { %v8969_v56 = vld [vmem:[#allocation2 + $0x38] ss:$8 sps:$4 sm:$0xff]   ;;  %13025 = vst [vmem:[#allocation110_spill] sm:$0xff] %v10794_v54  ;;  %v10801_v37 = vld [vmem:[#allocation2 + $0x10] sm:$0xf]  ;;  %v1261_v46 = vshrl.u32 %v10672_v53, 16 }
 0x26a   : > { %13026 = vst [vmem:[#allocation111_spill] sm:$0xff] %v10801_v37  ;;  %v4461_v47 = vld [vmem:[#allocation2 + $0x14] sm:$0x1]  ;;  %v10803_v38 = vld [vmem:[#allocation2 + $0x18] sm:$0xf]  ;;  %8378 = vmatmul.mubr.msk.bf16.vlgmr.msra.gmra.mrb[0].mxu1 %vm1309_vm15, %v8969_v56  ;;  %13029 = vst [vmem:[#allocation114_spill] sm:$0xff] %v10818_v1 }
 0x26b   : > { %13027 = vst [vmem:[#allocation112_spill] sm:$0xff] %v10803_v38  ;;  %v10807_v52 = vld [vmem:[#allocation2 + $0x2c] sm:$0x1]  ;;  %v10820_v49 = vld [vmem:[#allocation2 + $0x20] sm:$0xf]  ;;  %v1264_v60 = vshll.u32 %v10672_v53, 16 }
 0x26c   : > { %13028 = vst [vmem:[#allocation113_spill] sm:$0xff] %v10807_v52  ;;  %v2798_v48 = vld [vmem:[#allocation2 + $0x2c] sm:$0x1]  ;;  %v10822_v56 = vld [vmem:[#allocation2 + $0x24] sm:$0x1]  ;;  %v1233_v51 = vshrl.u32 %v10820_v49, 16 }
 0x26d   : > { %v9010_v54 = vld [vmem:[#allocation16 + $0x68] sm:$0xff]   ;;  %13030 = vst [vmem:[#allocation115_spill] sm:$0xff] %v10822_v56  ;;  %v2799_v52 = vsel %vm10466_vm11, %v2731_v42, %v2798_v48  ;;  %v4467_v11 = vld [vmem:[#allocation2 + $0x1c] sm:$0x1]  ;;  %v1236_v28 = vshll.u32 %v10820_v49, 16  ;;  %v1242_v2 = vshll.u32 %v10822_v56, 16 }
 0x26e   : > { %8382 = vmatpush3.bf16.msra.mxu1 %v9010_v54  ;;  %v1258_v58 = vrot.slane %v1256_v4, 5  ;;  %2800 = vst [vmem:[#allocation2 + $0x2c] sm:$0x1] %v2799_v52  ;;  %v10832_v54 = vld [vmem:[#allocation2 + $0x20] sm:$0xe]  ;;  %v1235_v56 = vrot.slane %v1233_v51, 4 }
 0x26f   : > { %8391 = vmatprep.subr.bf16.mxu1 %v10783_v20  ;;  %13031 = vst [vmem:[#allocation116_spill] sm:$0xff] %v10832_v54  ;;  %v10834_v35 = vld [vmem:[#allocation2 + $0x20] sm:$0xf]  ;;  %v10838_v48 = vld [vmem:[#allocation2 + $0x24] sm:$0x1]  ;;  %v1238_v54 = vrot.slane %v1236_v28, 5 }
 0x270   : > { %v10836_v42 = vld [vmem:[#allocation2 + $0x20] sm:$0xf]  ;;  %13032 = vst [vmem:[#allocation117_spill] sm:$0xff] %v10838_v48  ;;  %v1244_v63 = vrot.slane %v1242_v2, 5  ;;  %v13035_v8 = vrot.slane %v10754_v3, 4  ;;  %v13036_v51 = vrot.slane %v10756_v24, 4 }
 0x271   : > { %v10840_v55 = vld [vmem:[#allocation2 + $0x20] sm:$0xe]  ;;  %v10874_v13 = vld [vmem:[#allocation2 + $0x24] sm:$0x1]  ;;  %v1239_v48 = vor.u32 %v1238_v54, %v1235_v56  ;;  %v10881_v28 = vld [vmem:[#allocation2 + $0x34] sm:$0x1] }
 0x272   : > { %13033 = vst [vmem:[#allocation118_spill] sm:$0xff] %v10840_v55  ;;  %v10849_v20 = vld [vmem:[#allocation2 + $0x20] sm:$0xf]  ;;  %v10860_v4 = vsel %vm10466_vm11, %v13035_v8, %v4461_v47  ;;  %v10870_v2 = vsel %vm10466_vm11, %v13036_v51, %v4467_v11  ;;  %13038 = vst [vmem:[#allocation121_spill] sm:$0xff] %v10874_v13  ;;  %v1259_v8 = vsel %vm10511_vm14, %v10792_v25, %v1258_v58  ;;  %v2792_v55 = vld [vmem:[#allocation2 + $0x24] sm:$0x1] }
 0x273   : > { %13034 = vst [vmem:[#allocation119_spill] sm:$0xff] %v10849_v20  ;;  %v10872_v52 = vld [vmem:[#allocation2 + $0x20] sm:$0xf]  ;;  %v10893_v54 = vld [vmem:[#allocation2 + $0x3c] sm:$0x1]  ;;  %v1263_v58 = vrot.slane %v1261_v46, 4 }
 0x274   : > { %13037 = vst [vmem:[#allocation120_spill] sm:$0xff] %v10872_v52  ;;  %v10876_v3 = vld [vmem:[#allocation2 + $0x20] sm:$0xe]  ;;  %v1266_v25 = vrot.slane %v1264_v60, 5  ;;  %v1240_v13 = vrot.slane %v1239_v48, 4  ;;  %v1270_v24 = vshll.u32 %v10881_v28, 16 }
 0x275   : > { %13039 = vst [vmem:[#allocation122_spill] sm:$0xff] %v10876_v3  ;;  %v2789_v47 = vld [vmem:[#allocation2 + $0x20] sm:$0xf]  ;;  %v13040_v3 = vrot.slane %v10768_v57, 4  ;;  %v1275_v52 = vshrl.u32 %v10705_v33, 16  ;;  %v1278_v11 = vshll.u32 %v10705_v33, 16 }
 0x276   : > { %v2790_v51 = vsel %vm10452_vm10, %v2722_v22, %v2789_v47  ;;  %v13041_v22 = vshll.u32 %v10742_v31, 16  ;;  %v1267_v46 = vor.u32 %v1266_v25, %v1263_v58  ;;  %v10906_v60 = vld [vmem:[#allocation2 + $0x34] sm:$0x1]  ;;  %v2739_v48 = vrot.slane %v10640_v6, 4  ;;  %v10909_v47 = vld [vmem:[#allocation2 + $0x8] sm:$0xf] }
 0x277   : > { %v2793_v56 = vsel %vm10466_vm11, %v13040_v3, %v2792_v55  ;;  %2791 = vst [vmem:[#allocation2 + $0x20] sm:$0xf] %v2790_v51  ;;  %v4412_v55 = vrot.slane %v10809_v15, 4  ;;  %v10904_v3 = vld [vmem:[#allocation2 + $0x28] sm:$0xf]  ;;  %13043 = vst [vmem:[#allocation124_spill] sm:$0xff] %v10906_v60  ;;  %v1245_v51 = vsel %vm10511_vm14, %v1240_v13, %v1244_v63 }
 0x278   : > { %2794 = vst [vmem:[#allocation2 + $0x24] sm:$0x1] %v2793_v56  ;;  %v10901_v57 = vor.u32 %v13041_v22, %v10809_v15  ;;  %13042 = vst [vmem:[#allocation123_spill] sm:$0xff] %v10904_v3  ;;  %v1277_v56 = vrot.slane %v1275_v52, 4  ;;  %v1284_v38 = vshll.u32 %v10893_v54, 16  ;;  %v7743_v58 = vcombine.low %v1245_v51, %v1259_v8  ;;  %s13198_s25 = sld [smem:[#allocation44_spill]] }
 0x279   : > { %v10914_v31 = vld [vmem:[#allocation2 + $0x3c] sm:$0x1]  ;;  %v10916_v22 = vld [vmem:[#allocation2 + $0x34] sm:$0x1]  ;;  %v13046_v25 = vshll.u32 %v10739_v9, 16  ;;  %v1272_v60 = vrot.slane %v1270_v24, 5 }
 0x27a   : > { %13044 = vst [vmem:[#allocation125_spill] sm:$0xff] %v10914_v31  ;;  %13045 = vst [vmem:[#allocation126_spill] sm:$0xff] %v10916_v22  ;;  %v1280_v1 = vrot.slane %v1278_v11, 5  ;;  %v10925_v37 = vld [vmem:[#allocation2 + $0x3c] sm:$0x1]  ;;  %v1268_v52 = vrot.slane %v1267_v46, 4  ;;  %8257 = vmatprep.mubr.msk.bf16.mxu0 %vm1309_vm15, %v7743_v58 }
 0x27b   : > { %v10923_v6 = vor.u32 %v13046_v25, %v10796_v39  ;;  %13047 = vst [vmem:[#allocation127_spill] sm:$0xff] %v10925_v37  ;;  %v2804_v63 = vld [vmem:[#allocation2 + $0x34] sm:$0x1]  ;;  %v2747_v13 = vrot.slane %v10648_v14, 4  ;;  %v2810_v31 = vld [vmem:[#allocation2 + $0x3c] sm:$0x1] }
 0x27c   : > { %v2805_v22 = vsel %vm10466_vm11, %v2739_v48, %v2804_v63  ;;  %v4414_v15 = vshrl.u32 %v10799_v16, 16  ;;  %v4479_v8 = vld [vmem:[#allocation2 + $0x2c] sm:$0x1]  ;;  %v1281_v24 = vor.u32 %v1280_v1, %v1277_v56  ;;  %v4417_v11 = vshll.u32 %v10799_v16, 16  ;;  %v10963_v1 = vld [vmem:[#allocation2 + $0x30] sm:$0xf] }
 0x27d   : > { %2806 = vst [vmem:[#allocation2 + $0x34] sm:$0x1] %v2805_v22  ;;  %v4422_v14 = vshrl.u32 %v10812_v10, 16  ;;  %v2811_v46 = vsel %vm10466_vm11, %v2747_v13, %v2810_v31  ;;  %v3476_v51 = vshrl.u32 %v10909_v47, 16  ;;  %v3479_v58 = vshll.u32 %v10909_v47, 16  ;;  %13049 = vst [vmem:[#allocation129_spill] sm:$0xff] %v10963_v1 }
 0x27e   : > { %v4416_v48 = vrot.slane %v4414_v15, 7  ;;  %v1286_v25 = vrot.slane %v1284_v38, 5  ;;  %2812 = vst [vmem:[#allocation2 + $0x3c] sm:$0x1] %v2811_v46  ;;  %v4425_v63 = vshll.u32 %v10812_v10, 16  ;;  %v10951_v31 = vsel %vm10466_vm11, %v4412_v55, %v4479_v8  ;;  %s8092_s7 = sshll.u32 %s13198_s25, 5 }
 0x27f   : > { %v10947_v56 = vld [vmem:[#allocation2 + $0x20] sm:$0xf]  ;;  %v1273_v22 = vsel %vm10511_vm14, %v1268_v52, %v1272_v60  ;;  %v10955_v15 = vld [vmem:[#allocation2 + $0xc] sm:$0x1]  ;;  %v3461_v38 = vld [vmem:[#allocation2 + $0x10] sm:$0xf] }
 0x280   : > { %v1282_v46 = vrot.slane %v1281_v24, 4  ;;  %v10961_v9 = vor.u32 %v4417_v11, %v4416_v48  ;;  %v4424_v16 = vrot.slane %v4422_v14, 7  ;;  %v10965_v55 = vld [vmem:[#allocation2 + $0x14] sm:$0x1]  ;;  %v4473_v8 = vld [vmem:[#allocation2 + $0x24] sm:$0x1] }
 0x281   : > { %v4420_v10 = vrot.slane %v4416_v48, 4  ;;  %v3478_v37 = vrot.slane %v3476_v51, 4  ;;  %v3481_v13 = vrot.slane %v3479_v58, 5  ;;  %v10977_v45 = vld [vmem:[#allocation2 + $0x38] sm:$0xf]  ;;  %v3485_v20 = vshll.u32 %v10955_v15, 16 }
 0x282   : > { %13048 = vst [vmem:[#allocation128_spill] sm:$0xff] %v10961_v9  ;;  %v1287_v24 = vsel %vm10511_vm14, %v1282_v46, %v1286_v25  ;;  %v10975_v11 = vor.u32 %v4425_v63, %v4424_v16  ;;  %v4428_v14 = vrot.slane %v4424_v16, 4  ;;  %13051 = vst [vmem:[#allocation131_spill] sm:$0xff] %v10977_v45  ;;  %v3490_v40 = vshrl.u32 %v3461_v38, 16  ;;  %v3463_v63 = vld [vmem:[#allocation2 + $0x18] sm:$0xf] }
 0x283   : > { %v7744_v60 = vcombine.low %v1273_v22, %v1287_v24  ;;  %v3482_v19 = vor.u32 %v3481_v13, %v3478_v37  ;;  %v3493_v29 = vshll.u32 %v3461_v38, 16  ;;  %v13052_v52 = vrot.slane %v10796_v39, 4  ;;  %v10991_v16 = vld [vmem:[#allocation2 + $0x1c] sm:$0x1]  ;;  %v11007_v24 = vld [vmem:[#allocation2 + $0x24] sm:$0x1] }
 0x284   : > { %13050 = vst [vmem:[#allocation130_spill] sm:$0xff] %v10975_v11  ;;  %v4485_v5 = vld [vmem:[#allocation2 + $0x34] sm:$0x1]  ;;  %v3487_v58 = vrot.slane %v3485_v20, 5  ;;  %v3499_v25 = vshll.u32 %v10965_v55, 16  ;;  %v3492_v13 = vrot.slane %v3490_v40, 4 }
 0x285   : > { %v10984_v48 = vsel %vm10466_vm11, %v13052_v52, %v4473_v8  ;;  %8258 = vmatmul.mubr.msk.bf16.gmra.mrb[12].mxu0 %vm1309_vm15, %v7744_v60  ;;  %v10996_v39 = vsel %vm10466_vm11, %v4420_v10, %v4485_v5  ;;  %v4491_v22 = vld [vmem:[#allocation2 + $0x3c] sm:$0x1]  ;;  %v3483_v38 = vrot.slane %v3482_v19, 4  ;;  %v3465_v20 = vld [vmem:[#allocation2 + $0x20] sm:$0xf]  ;;  %v3495_v52 = vrot.slane %v3493_v29, 5 }
 0x286   : > { %v11004_v46 = vsel %vm10466_vm11, %v4428_v14, %v4491_v22  ;;  %v3501_v8 = vrot.slane %v3499_v25, 5  ;;  %v4374_v60 = vshrl.u32 %v10815_v41, 16  ;;  %v13053_v5 = vcombine.low %v10430_v34, %v10487_v62  ;;  %v11016_v14 = vld [vmem:[#allocation2 + $0x8] sm:$0xf]  ;;  %v11020_v25 = vld [vmem:[#allocation2 + $0xc] sm:$0x1] }
 0x287   : > { %v3488_v19 = vsel %vm10511_vm14, %v3483_v38, %v3487_v58  ;;  %v4377_v40 = vshll.u32 %v10815_v41, 16  ;;  %v3504_v10 = vshrl.u32 %v3463_v63, 16  ;;  %v3507_v37 = vshll.u32 %v3463_v63, 16  ;;  %13054 = vst [vmem:[#allocation132_spill] sm:$0xff] %v11016_v14  ;;  %v11018_v29 = vld [vmem:[#allocation2 + $0x8] sm:$0xf] }
 0x288   : > { %8263 = vmatprep.mubr.msk.bf16.mxu0 %vm1309_vm15, %v13053_v5  ;;  %13055 = vst [vmem:[#allocation133_spill] sm:$0xff] %v11018_v29  ;;  %13056 = vst [vmem:[#allocation134_spill] sm:$0xff] %v11020_v25  ;;  %v11022_v22 = vld [vmem:[#allocation2 + $0x8] sm:$0xe]  ;;  %v3496_v34 = vor.u32 %v3495_v52, %v3492_v13  ;;  %v4376_v62 = vrot.slane %v4374_v60, 7  ;;  %v3513_v45 = vshll.u32 %v10991_v16, 16 }
 0x289   : > { %13057 = vst [vmem:[#allocation135_spill] sm:$0xff] %v11022_v22  ;;  %v11024_v51 = vld [vmem:[#allocation2 + $0x8] sm:$0xf]  ;;  %v4455_v5 = vld [vmem:[#allocation2 + $0xc] sm:$0x1]  ;;  %v3518_v58 = vshrl.u32 %v3465_v20, 16 }
 0x28a   : > { %13058 = vst [vmem:[#allocation136_spill] sm:$0xff] %v11024_v51  ;;  %v3506_v38 = vrot.slane %v3504_v10, 4  ;;  %v3509_v41 = vrot.slane %v3507_v37, 5  ;;  %v3521_v11 = vshll.u32 %v3465_v20, 16  ;;  %v3527_v63 = vshll.u32 %v11007_v24, 16  ;;  %v11034_v37 = vld [vmem:[#allocation16 + $0x18] sm:$0xff]  }
 0x28b   : > { %v3467_v14 = vld [vmem:[#allocation2 + $0x28] sm:$0xf]  ;;  %v11028_v1 = vld [vmem:[#allocation2 + $0x2c] sm:$0x1]  ;;  %v3469_v29 = vld [vmem:[#allocation2 + $0x30] sm:$0xf]  ;;  %v4379_v9 = vor.u32 %v4377_v40, %v4376_v62 }
 0x28c   : > { %v3497_v25 = vrot.slane %v3496_v34, 4  ;;  %v4380_v22 = vrot.slane %v4376_v62, 4  ;;  %v3515_v27 = vrot.slane %v3513_v45, 5  ;;  %v11030_v51 = vld [vmem:[#allocation2 + $0x8] sm:$0xe]  ;;  %v3510_v13 = vor.u32 %v3509_v41, %v3506_v38 }
 0x28d   : > { %v3520_v52 = vrot.slane %v3518_v58, 4  ;;  %v3523_v60 = vrot.slane %v3521_v11, 5  ;;  %v3529_v30 = vrot.slane %v3527_v63, 5  ;;  %v11032_v3 = vld [vmem:[#allocation2 + $0x34] sm:$0x1]  ;;  %v4453_v10 = vsel %vm10452_vm10, %v4379_v9, %v10909_v47 }
 0x28e   : > { %v3502_v20 = vsel %vm10511_vm14, %v3497_v25, %v3501_v8  ;;  %v4456_v45 = vsel %vm10466_vm11, %v4380_v22, %v4455_v5  ;;  %v3727_v40 = vrot.slane %v10991_v16, 5  ;;  %v3511_v11 = vrot.slane %v3510_v13, 4  ;;  %v3471_v8 = vld [vmem:[#allocation2 + $0x38] sm:$0xf]  ;;  %4454 = vst [vmem:[#allocation2 + $0x8] sm:$0xf] %v4453_v10 }
 0x28f   : > { %v7890_v34 = vcombine.low %v3488_v19, %v3502_v20  ;;  %4457 = vst [vmem:[#allocation2 + $0xc] sm:$0x1] %v4456_v45  ;;  %v3524_v62 = vor.u32 %v3523_v60, %v3520_v52  ;;  %v3731_v58 = vrot.slane %v11007_v24, 5  ;;  %v13059_v38 = vcombine.low %v10532_v44, %v10542_v50  ;;  %v1152_v5 = vld [vmem:[#allocation2 + $0x44] sm:$0x1]  ;;  %v11067_v45 = vld [vmem:[#allocation16 + $0x78] sm:$0xff]  }
 0x290   : > { %v3532_v25 = vshrl.u32 %v3467_v14, 16  ;;  %v3535_v47 = vshll.u32 %v3467_v14, 16  ;;  %v3541_v9 = vshll.u32 %v11028_v1, 16  ;;  %v3546_v22 = vshrl.u32 %v3469_v29, 16  ;;  %v11059_v63 = vld [vmem:[#allocation2 + $0x3c] sm:$0x1] }
 0x291   : > { %8264 = vmatmul.mubr.msk.bf16.vlgmr.msra.gmra.mrb[8].mxu0 %vm1309_vm15, %v13059_v38  ;;  %v13060_v19 = vcombine.low %v10820_v49, %v10653_v61  ;;  %8383 = vmatprep.mubr.msk.bf16.mxu1 %vm1309_vm15, %v7890_v34  ;;  %v3516_v44 = vsel %vm10511_vm14, %v3511_v11, %v3515_v27  ;;  %v3525_v50 = vrot.slane %v3524_v62, 4  ;;  %v3549_v41 = vshll.u32 %v3469_v29, 16  ;;  %v3473_v13 = vld [vmem:[#allocation2 + $0x40] sm:$0xf]  ;;  %v11069_v34 = vld [vmem:[#allocation2 + $0x1c] sm:$0x1] }
 0x292   : > { %8272 = vmatpush3.bf16.msra.mxu0 %v10621_v7  ;;  %v3555_v14 = vshll.u32 %v11032_v3, 16  ;;  %v11062_v7 = vld [vmem:[#allocation2 + $0x14] sm:$0x1]  ;;  %v3534_v52 = vrot.slane %v3532_v25, 4  ;;  %v3537_v61 = vrot.slane %v3535_v47, 5  ;;  %v3543_v49 = vrot.slane %v3541_v9, 5 }
 0x293   : > { %8267 = vmatprep.mubr.msk.bf16.mxu0 %vm1309_vm15, %v13060_v19  ;;  %8281 = vmatprep.subr.bf16.mxu0 %v11034_v37  ;;  %v3548_v60 = vrot.slane %v3546_v22, 4  ;;  %v3530_v20 = vsel %vm10511_vm14, %v3525_v50, %v3529_v30  ;;  %v3551_v10 = vrot.slane %v3549_v41, 5  ;;  %v1083_v29 = vrot.slane %v10634_v17, 4  ;;  %13061 = vst [vmem:[#allocation137_spill] sm:$0xff] %v11069_v34  ;;  %v3694_v22 = vld [vmem:[#allocation2 + $0x10] sm:$0xe] }
 0x294   : > { %v3557_v27 = vrot.slane %v3555_v14, 5  ;;  %v7891_v11 = vcombine.low %v3516_v44, %v3530_v20  ;;  %v3538_v62 = vor.u32 %v3537_v61, %v3534_v52  ;;  %v2755_v38 = vrot.slane %v10699_v43, 4  ;;  %v11075_v50 = vld [vmem:[#allocation2 + $0x24] sm:$0x1]  ;;  %v3695_v52 = vld [vmem:[#allocation2 + $0x18] sm:$0xe] }
 0x295   : > { %v3560_v19 = vshrl.u32 %v3471_v8, 16  ;;  %v3552_v25 = vor.u32 %v3551_v10, %v3548_v60  ;;  %v1153_v47 = vsel %vm10466_vm11, %v1083_v29, %v1152_v5  ;;  %v3563_v9 = vshll.u32 %v3471_v8, 16  ;;  %13062 = vst [vmem:[#allocation138_spill] sm:$0xff] %v11075_v50  ;;  %v11078_v61 = vld [vmem:[#allocation2 + $0x14] sm:$0x1]  ;;  %v13073_v43 = vld [vmem:[#allocation65_spill] sm:$0xff] }
 0x296   : > { %v3569_v30 = vshll.u32 %v11059_v63, 16  ;;  %8384 = vmatmul.mubr.msk.bf16.vlgmr.msra.gmra.mrb[4].mxu1 %vm1309_vm15, %v7891_v11  ;;  %v3539_v17 = vrot.slane %v3538_v62, 4  ;;  %1154 = vst [vmem:[#allocation2 + $0x44] sm:$0x1] %v1153_v47  ;;  %v3574_v44 = vshrl.u32 %v3473_v13, 16  ;;  %v3577_v14 = vshll.u32 %v3473_v13, 16 }
 0x297   : > { %v3562_v41 = vrot.slane %v3560_v19, 4  ;;  %v13063_v60 = vld [vmem:[#allocation108_spill] sm:$0xff]  ;;  %v3553_v20 = vrot.slane %v3552_v25, 4  ;;  %v3565_v5 = vrot.slane %v3563_v9, 5  ;;  %v13064_v10 = vcombine.low %v10672_v53, %v10705_v33  ;;  %v3696_v29 = vld [vmem:[#allocation2 + $0x20] sm:$0xe] }
 0x298   : > { %8392 = vmatpush3.bf16.msra.mxu1 %v13063_v60  ;;  %v11081_v8 = vrot.slane %v3569_v30, 5  ;;  %v1490_v11 = vld [vmem:[#allocation2] sm:$0xe]  ;;  %4463 = vst [vmem:[#allocation2 + $0x14] sm:$0x1] %v10860_v4  ;;  %v3544_v62 = vsel %vm10511_vm14, %v3539_v17, %v3543_v49  ;;  %v3576_v19 = vrot.slane %v3574_v44, 4 }
 0x299   : > { %8268 = vmatmul.mubr.msk.bf16.gmra.mrb[12].mxu0 %vm1309_vm15, %v13064_v10  ;;  %v11088_v13 = vld [vmem:[#allocation2 + $0x2c] sm:$0x1]  ;;  %v3579_v25 = vrot.slane %v3577_v14, 5  ;;  %8401 = vmatprep.subr.bf16.mxu1 %v11067_v45  ;;  %v11093_v47 = vld [vmem:[#allocation2 + $0x1c] sm:$0x1]  ;;  %v3558_v53 = vsel %vm10511_vm14, %v3553_v20, %v3557_v27  ;;  %v3566_v33 = vor.u32 %v3565_v5, %v3562_v41  ;;  %v7899_v4 = vrot.slane %v11030_v51, 9 }
 0x29a   : > { %13065 = vst [vmem:[#allocation108_spill] sm:$0xff] %v11088_v13  ;;  %v3719_v30 = vrot.slane %v10955_v15, 5  ;;  %4469 = vst [vmem:[#allocation2 + $0x1c] sm:$0x1] %v10870_v2  ;;  %v11104_v49 = vld [vmem:[#allocation2 + $0x34] sm:$0x1]  ;;  %v7892_v17 = vcombine.low %v3544_v62, %v3558_v53 }
 0x29b   : > { %13068 = vst [vmem:[#allocation139_spill] sm:$0xff] %v11104_v49  ;;  %v3580_v44 = vor.u32 %v3579_v25, %v3576_v19  ;;  %v7900_v14 = vrot.slane %v3694_v22, 9  ;;  %v3723_v60 = vrot.slane %v10965_v55, 5  ;;  %v11107_v10 = vld [vmem:[#allocation2 + $0x24] sm:$0x1]  ;;  %v11109_v27 = vrot.slane %v3566_v33, 4 }
 0x29c   : > { %v11113_v41 = vsel %vm11097_vm2, %v7899_v4, %v3719_v30  ;;  %v7901_v51 = vrot.slane %v3695_v52, 9  ;;  %v7902_v20 = vrot.slane %v3696_v29, 9  ;;  %v3697_v15 = vld [vmem:[#allocation2 + $0x28] sm:$0xe]  ;;  %v3698_v5 = vld [vmem:[#allocation2 + $0x30] sm:$0xe]  ;;  %8387 = vmatprep.mubr.msk.bf16.mxu1 %vm1309_vm15, %v7892_v17 }
 0x29d   : > { %4475 = vst [vmem:[#allocation2 + $0x24] sm:$0x1] %v10984_v48  ;;  %v11116_v2 = vld [vmem:[#allocation2 + $0x3c] sm:$0x1]  ;;  %v11119_v22 = vrot.slane %v3580_v44, 4  ;;  %v11123_v55 = vsel %vm11097_vm2, %v7900_v14, %v3723_v60  ;;  %v7759_v62 = vrot.slane %v1490_v11, 9 }
 0x29e   : > { %13069 = vst [vmem:[#allocation140_spill] sm:$0xff] %v11116_v2  ;;  %v9011_v19 = vld [vmem:[#allocation2 + $0x4] sm:$0x1]  ;;  %v11125_v53 = vld [vmem:[#allocation2 + $0x2c] sm:$0x1]  ;;  %v11141_v11 = vsel %vm11097_vm2, %v7901_v51, %v3727_v40  ;;  %v11147_v30 = vsel %vm11097_vm2, %v7902_v20, %v3731_v58  ;;  %v13070_v44 = vld [vmem:[#allocation60_spill] sm:$0xff] }
 0x29f   : > { %v1519_v25 = vrot.slane %v9011_v19, 5  ;;  %v11127_v52 = vld [vmem:[#allocation2 + $0x44] sm:$0x1]  ;;  %4481 = vst [vmem:[#allocation2 + $0x2c] sm:$0x1] %v10951_v31  ;;  %v7760_v14 = vrot.slane %v13070_v44, 9 }
 0x2a0   : > { %v11129_v29 = vld [vmem:[#allocation2 + $0x44] sm:$0x1]  ;;  %v3699_v24 = vld [vmem:[#allocation2 + $0x38] sm:$0xe]  ;;  %v11159_v60 = vld [vmem:[#allocation2 + $0x34] sm:$0x1] }
 0x2a1   : > { %v2816_v48 = vld [vmem:[#allocation2 + $0x44] sm:$0x1]  ;;  %v1520_v40 = vsel %vm11097_vm2, %v7759_v62, %v1519_v25  ;;  %v13071_v58 = vld [vmem:[#allocation63_spill] sm:$0xff]  ;;  %v1527_v19 = vrot.slane %v13073_v43, 5  ;;  %v13074_v4 = vld [vmem:[#allocation73_spill] sm:$0xff]  ;;  %v7903_v62 = vrot.slane %v3697_v15, 9 }
 0x2a2   : > { %v2817_v17 = vsel %vm10466_vm11, %v2755_v38, %v2816_v48  ;;  %v1523_v51 = vrot.slane %v13071_v58, 5  ;;  %v13072_v31 = vld [vmem:[#allocation67_spill] sm:$0xff]  ;;  %v7762_v38 = vrot.slane %v13074_v4, 9  ;;  %v3700_v48 = vld [vmem:[#allocation2 + $0x40] sm:$0xe]  ;;  %v3735_v25 = vrot.slane %v11028_v1, 5 }
 0x2a3   : > { %2818 = vst [vmem:[#allocation2 + $0x44] sm:$0x1] %v2817_v17  ;;  %v7761_v20 = vrot.slane %v13072_v31, 9  ;;  %4487 = vst [vmem:[#allocation2 + $0x34] sm:$0x1] %v10996_v39  ;;  %v13075_v16 = vld [vmem:[#allocation66_spill] sm:$0xff] }
 0x2a4   : > { %v1531_v33 = vrot.slane %v13075_v16, 5  ;;  %v7904_v44 = vrot.slane %v3698_v5, 9  ;;  %v11168_v2 = vld [vmem:[#allocation2 + $0x3c] sm:$0x1]  ;;  %v1524_v17 = vsel %vm11097_vm2, %v7760_v14, %v1523_v51  ;;  %v3739_v31 = vrot.slane %v11032_v3, 5  ;;  %v11183_v16 = vld [vmem:[#allocation16 + $0x20] sm:$0xff]  }
 0x2a5   : > { %v1528_v58 = vsel %vm11097_vm2, %v7761_v20, %v1527_v19  ;;  %v7905_v4 = vrot.slane %v3699_v24, 9  ;;  %4493 = vst [vmem:[#allocation2 + $0x3c] sm:$0x1] %v11004_v46  ;;  %v7767_v39 = vcombine.low %v1520_v40, %v1524_v17  ;;  %v11180_v1 = vsel %vm11097_vm2, %v7903_v62, %v3735_v25  ;;  %v3977_v14 = vld [vmem:[#allocation2 + $0x10] sm:$0xf]  ;;  %v13081_v25 = vld [vmem:[#allocation83_spill] sm:$0xff] }
 0x2a6   : > { %v1532_v15 = vsel %vm11097_vm2, %v7762_v38, %v1531_v33  ;;  %v3743_v5 = vrot.slane %v11059_v63, 5  ;;  %v11187_v3 = vsel %vm11097_vm2, %v7904_v44, %v3739_v31  ;;  %v7906_v24 = vrot.slane %v3700_v48, 9  ;;  %v13076_v46 = vld [vmem:[#allocation116_spill] sm:$0xff]  ;;  %v11190_v20 = vld [vmem:[#allocation2 + $0x20] sm:$0xf]  ;;  %v13080_v48 = vld [vmem:[#allocation115_spill] sm:$0xff] }
 0x2a7   : > { %v7768_v51 = vcombine.low %v1528_v58, %v1532_v15  ;;  %v7763_v40 = vrot.slane %v13076_v46, 9  ;;  %v11192_v33 = vld [vmem:[#allocation2 + $0x20] sm:$0xf]  ;;  %8273 = vmatprep.mubr.msk.bf16.mxu0 %vm1309_vm15, %v7767_v39  ;;  %v1535_v62 = vrot.slane %v13080_v48, 5  ;;  %v7764_v44 = vrot.slane %v13081_v25, 9  ;;  %v13082_v17 = vld [vmem:[#allocation109_spill] sm:$0xff] }
 0x2a8   : > { %13077 = vst [vmem:[#allocation60_spill] sm:$0xff] %v11192_v33  ;;  %v11194_v43 = vld [vmem:[#allocation2 + $0x20] sm:$0xe]  ;;  %v11203_v38 = vsel %vm11097_vm2, %v7905_v4, %v3743_v5  ;;  %v1539_v58 = vrot.slane %v13082_v17, 5  ;;  %v13083_v31 = vld [vmem:[#allocation89_spill] sm:$0xff]  ;;  %v1543_v46 = vrot.slane %v10881_v28, 5 }
 0x2a9   : > { %13078 = vst [vmem:[#allocation63_spill] sm:$0xff] %v11194_v43  ;;  %v11196_v19 = vld [vmem:[#allocation2 + $0x20] sm:$0xf]  ;;  %8274 = vmatmul.mubr.msk.bf16.vlgmr.msra.gmra.mrb[8].mxu0 %vm1309_vm15, %v7768_v51  ;;  %v7765_v15 = vrot.slane %v13083_v31, 9  ;;  %v13084_v39 = vld [vmem:[#allocation95_spill] sm:$0xff]  ;;  %v1536_v4 = vsel %vm11097_vm2, %v7763_v40, %v1535_v62  ;;  %v1547_v5 = vrot.slane %v10893_v54, 5 }
 0x2aa   : > { %13079 = vst [vmem:[#allocation67_spill] sm:$0xff] %v11196_v19  ;;  %v7766_v19 = vrot.slane %v13084_v39, 9  ;;  %v3474_v43 = vld [vmem:[#allocation2 + $0x44] sm:$0x1]  ;;  %8282 = vmatpush3.bf16.msra.mxu0 %v11034_v37  ;;  %v11216_v48 = vld [vmem:[#allocation2 + $0x20] ss:$8 sps:$4 sm:$0xff]   ;;  %v1540_v31 = vsel %vm11097_vm2, %v7764_v44, %v1539_v58 }
 0x2ab   : > { %v3994_v25 = vshrl.u32 %v3977_v14, 16  ;;  %v3997_v51 = vshll.u32 %v3977_v14, 16  ;;  %v3583_v63 = vshll.u32 %v3474_v43, 16  ;;  %v3747_v17 = vrot.slane %v3474_v43, 5  ;;  %8291 = vmatprep.subr.bf16.mxu0 %v11183_v16  ;;  %v3979_v37 = vld [vmem:[#allocation2 + $0x18] sm:$0xf] }
 0x2ac   : > { %v1544_v28 = vsel %vm11097_vm2, %v7765_v15, %v1543_v46  ;;  %v3981_v39 = vld [vmem:[#allocation2 + $0x20] sm:$0xf]  ;;  %v7769_v49 = vcombine.low %v1536_v4, %v1540_v31  ;;  %v1548_v54 = vsel %vm11097_vm2, %v7766_v19, %v1547_v5  ;;  %v4003_v58 = vshll.u32 %v11078_v61, 16  ;;  %v3991_v33 = vld [vmem:[#allocation2 + $0x48] sm:$0xf] }
 0x2ad   : > { %v3996_v40 = vrot.slane %v3994_v25, 4  ;;  %v3999_v62 = vrot.slane %v3997_v51, 5  ;;  %v11225_v13 = vld [vmem:[#allocation2 + $0x20] sm:$0xe]  ;;  %v3585_v14 = vrot.slane %v3583_v63, 5  ;;  %v11229_v43 = vsel %vm11097_vm2, %v7906_v24, %v3747_v17 }
 0x2ae   : > { %v7770_v44 = vcombine.low %v1544_v28, %v1548_v54  ;;  %v13085_v15 = vsel %vm10452_vm10, %v10923_v6, %v10947_v56  ;;  %8277 = vmatprep.mubr.msk.bf16.mxu0 %vm1309_vm15, %v7769_v49  ;;  %v4008_v63 = vshrl.u32 %v3979_v37, 16  ;;  %v4011_v4 = vshll.u32 %v3979_v37, 16  ;;  %v3983_v51 = vld [vmem:[#allocation2 + $0x28] sm:$0xf]  ;;  %v11367_v34 = vld [vmem:[#allocation2 + $0x30] sm:$0xe] }
 0x2af   : > { %4472 = vst [vmem:[#allocation2 + $0x20] sm:$0xf] %v13085_v15  ;;  %v4000_v46 = vor.u32 %v3999_v62, %v3996_v40  ;;  %v3586_v24 = vsel %vm10511_vm14, %v11119_v22, %v3585_v14  ;;  %v4005_v5 = vrot.slane %v4003_v58, 5  ;;  %v4017_v25 = vshll.u32 %v11093_v47, 16 }
 0x2b0   : > { %v4022_v17 = vshrl.u32 %v3981_v39, 16  ;;  %v13086_v6 = vsel %vm10511_vm14, %v11109_v27, %v11081_v8  ;;  %v4010_v49 = vrot.slane %v4008_v63, 4  ;;  %v4013_v28 = vrot.slane %v4011_v4, 5  ;;  %v13089_v63 = vld [vmem:[#allocation61_spill] sm:$0xff] }
 0x2b1   : > { %v7893_v56 = vcombine.low %v13086_v6, %v3586_v24  ;;  %v4001_v31 = vrot.slane %v4000_v46, 4  ;;  %8278 = vmatmul.mubr.msk.bf16.gmra.mrb[12].mxu0 %vm1309_vm15, %v7770_v44  ;;  %v4019_v37 = vrot.slane %v4017_v25, 5  ;;  %v4025_v40 = vshll.u32 %v3981_v39, 16 }
 0x2b2   : > { %v4024_v54 = vrot.slane %v4022_v17, 4  ;;  %v4031_v22 = vshll.u32 %v11107_v10, 16  ;;  %v13087_v62 = vcombine.low %v10491_v0, %v10560_v23  ;;  %v4014_v27 = vor.u32 %v4013_v28, %v4010_v49  ;;  %v13091_v49 = vld [vmem:[#allocation68_spill] sm:$0xff] }
 0x2b3   : > { %8388 = vmatmul.mubr.msk.bf16.gmra.mrb[0].mxu1 %vm1309_vm15, %v7893_v56  ;;  %v4006_v8 = vsel %vm10511_vm14, %v4001_v31, %v4005_v5  ;;  %v4036_v14 = vshrl.u32 %v3983_v51, 16  ;;  %v4039_v58 = vshll.u32 %v3983_v51, 16  ;;  %v13088_v44 = vcombine.low %v11113_v41, %v11123_v55  ;;  %v13090_v51 = vld [vmem:[#allocation64_spill] sm:$0xff] }
 0x2b4   : > { %8283 = vmatprep.mubr.msk.bf16.mxu0 %vm1309_vm15, %v13087_v62  ;;  %v4027_v39 = vrot.slane %v4025_v40, 5  ;;  %v4033_v15 = vrot.slane %v4031_v22, 5  ;;  %v4045_v46 = vshll.u32 %v11125_v53, 16  ;;  %v1794_v4 = vshrl.u32 %v13089_v63, 16 }
 0x2b5   : > { %8393 = vmatprep.mubr.msk.bf16.mxu1 %vm1309_vm15, %v13088_v44  ;;  %v4015_v0 = vrot.slane %v4014_v27, 4  ;;  %v4038_v23 = vrot.slane %v4036_v14, 4  ;;  %v4041_v24 = vrot.slane %v4039_v58, 5  ;;  %v1797_v25 = vshll.u32 %v13089_v63, 16  ;;  %v11274_v14 = vld [vmem:[#allocation2 + $0x10] sm:$0xf] }
 0x2b6   : > { %v4028_v5 = vor.u32 %v4027_v39, %v4024_v54  ;;  %v4047_v17 = vrot.slane %v4045_v46, 5  ;;  %v1796_v6 = vrot.slane %v1794_v4, 4  ;;  %v1803_v56 = vshll.u32 %v13090_v51, 16  ;;  %v11276_v54 = vld [vmem:[#allocation2 + $0x18] sm:$0xf]  ;;  %v11280_v44 = vld [vmem:[#allocation16 + $0x80] sm:$0xff]  }
 0x2b7   : > { %v4020_v41 = vsel %vm10511_vm14, %v4015_v0, %v4019_v37  ;;  %v4042_v55 = vor.u32 %v4041_v24, %v4038_v23  ;;  %v1799_v31 = vrot.slane %v1797_v25, 5  ;;  %v1808_v28 = vshrl.u32 %v13091_v49, 16  ;;  %v11278_v58 = vld [vmem:[#allocation2 + $0x10] sm:$0xf]  ;;  %v13092_v63 = vld [vmem:[#allocation69_spill] sm:$0xff] }
 0x2b8   : > { %v11269_v40 = vcombine.low %v4006_v8, %v4020_v41  ;;  %v4029_v22 = vrot.slane %v4028_v5, 4  ;;  %v11271_v62 = vrot.slane %v1803_v56, 5  ;;  %v1811_v27 = vshll.u32 %v13091_v49, 16  ;;  %v3985_v8 = vld [vmem:[#allocation2 + $0x30] sm:$0xf]  ;;  %v13095_v56 = vld [vmem:[#allocation74_spill] sm:$0xff] }
 0x2b9   : > { %v4043_v37 = vrot.slane %v4042_v55, 4  ;;  %v1800_v39 = vor.u32 %v1799_v31, %v1796_v6  ;;  %v1810_v46 = vrot.slane %v1808_v28, 4  ;;  %v1817_v4 = vshll.u32 %v13092_v63, 16  ;;  %v11283_v0 = vld [vmem:[#allocation2 + $0x18] sm:$0xf]  ;;  %v11295_v55 = vld [vmem:[#allocation16 + $0x28] sm:$0xff]  }
 0x2ba   : > { %13093 = vst [vmem:[#allocation65_spill] sm:$0xff] %v11283_v0  ;;  %v11285_v23 = vld [vmem:[#allocation2 + $0x10] ss:$8 sps:$4 sm:$0xff]   ;;  %v13094_v24 = vcombine.low %v10574_v36, %v10834_v35  ;;  %v4034_v25 = vsel %vm10511_vm14, %v4029_v22, %v4033_v15  ;;  %v1813_v5 = vrot.slane %v1811_v27, 5  ;;  %v1822_v41 = vshrl.u32 %v13095_v56, 16  ;;  %v13098_v27 = vld [vmem:[#allocation75_spill] sm:$0xff] }
 0x2bb   : > { %v1825_v6 = vshll.u32 %v13095_v56, 16  ;;  %v11297_v31 = vld [vmem:[#allocation2 + $0x10] sm:$0xe]  ;;  %v11299_v49 = vld [vmem:[#allocation2 + $0x18] sm:$0xe]  ;;  %v13097_v35 = vcombine.low %v11141_v11, %v11147_v30  ;;  %v4048_v36 = vsel %vm10511_vm14, %v4043_v37, %v4047_v17  ;;  %v1801_v15 = vrot.slane %v1800_v39, 4 }
 0x2bc   : > { %8284 = vmatmul.mubr.msk.bf16.vlgmr.msra.gmra.mrb[8].mxu0 %vm1309_vm15, %v13094_v24  ;;  %v11301_v28 = vld [vmem:[#allocation2 + $0x10] sm:$0xe]  ;;  %v1819_v22 = vrot.slane %v1817_v4, 5  ;;  %v1831_v24 = vshll.u32 %v13098_v27, 16  ;;  %v11311_v56 = vld [vmem:[#allocation2 + $0x18] sm:$0xe]  ;;  %v13100_v19 = vcombine.low %v11180_v1, %v11187_v3  ;;  %v11318_v11 = vcombine.low %v4034_v25, %v4048_v36 }
 0x2bd   : > { %13096 = vst [vmem:[#allocation73_spill] sm:$0xff] %v11301_v28  ;;  %8394 = vmatmul.mubr.msk.bf16.vlgmr.msra.gmra.mrb[4].mxu1 %vm1309_vm15, %v13097_v35  ;;  %8292 = vmatpush3.bf16.msra.mxu0 %v11183_v16  ;;  %13099 = vst [vmem:[#allocation66_spill] sm:$0xff] %v11311_v56  ;;  %v1814_v30 = vor.u32 %v1813_v5, %v1810_v46  ;;  %v1824_v16 = vrot.slane %v1822_v41, 4  ;;  %v1827_v35 = vrot.slane %v1825_v6, 5  ;;  %v11320_v28 = vld [vmem:[#allocation2 + $0x10] sm:$0xf] }
 0x2be   : > { %8402 = vmatpush3.bf16.msra.mxu1 %v11067_v45  ;;  %8397 = vmatprep.mubr.msk.bf16.mxu1 %vm1309_vm15, %v13100_v19  ;;  %13101 = vst [vmem:[#allocation116_spill] sm:$0xff] %v11320_v28  ;;  %v11322_v17 = vld [vmem:[#allocation2 + $0x18] sm:$0xf]  ;;  %v13103_v45 = vcombine.low %v10657_v32, %v10676_v21  ;;  %v1806_v1 = vsel %vm10511_vm14, %v1801_v15, %v11271_v62  ;;  %v1833_v3 = vrot.slane %v1831_v24, 5  ;;  %v1836_v19 = vshrl.u32 %v10836_v42, 16  ;;  %v13104_v4 = vld [vmem:[#allocation111_spill] sm:$0xff] }
 0x2bf   : > { %13102 = vst [vmem:[#allocation115_spill] sm:$0xff] %v11322_v17  ;;  %8411 = vmatprep.subr.bf16.mxu1 %v11280_v44  ;;  %v1839_v37 = vshll.u32 %v10836_v42, 16  ;;  %v3987_v39 = vld [vmem:[#allocation2 + $0x38] sm:$0xf]  ;;  %v11334_v46 = vld [vmem:[#allocation2 + $0x28] sm:$0xe]  ;;  %v13105_v25 = vsel %vm10452_vm10, %v10788_v59, %v13104_v4  ;;  %v1828_v6 = vor.u32 %v1827_v35, %v1824_v16  ;;  %8301 = vmatprep.subr.bf16.mxu0 %v11295_v55 }
 0x2c0   : > { %8287 = vmatprep.mubr.msk.bf16.mxu0 %vm1309_vm15, %v13103_v45  ;;  %4460 = vst [vmem:[#allocation2 + $0x10] sm:$0xf] %v13105_v25  ;;  %v13106_v32 = vld [vmem:[#allocation114_spill] sm:$0xff]  ;;  %v13107_v21 = vld [vmem:[#allocation112_spill] sm:$0xff]  ;;  %v11346_v62 = vld [vmem:[#allocation2 + $0x28] sm:$0xf] }
 0x2c1   : > { %v13108_v5 = vsel %vm10452_vm10, %v13106_v32, %v13107_v21  ;;  %v1815_v41 = vrot.slane %v1814_v30, 4  ;;  %v13109_v42 = vld [vmem:[#allocation117_spill] sm:$0xff]  ;;  %v4050_v15 = vshrl.u32 %v3985_v8, 16  ;;  %v3989_v45 = vld [vmem:[#allocation2 + $0x40] sm:$0xf]  ;;  %v1838_v59 = vrot.slane %v1836_v19, 4 }
 0x2c2   : > { %4466 = vst [vmem:[#allocation2 + $0x18] sm:$0xf] %v13108_v5  ;;  %v1845_v36 = vshll.u32 %v13109_v42, 16  ;;  %v985_v24 = vld [vmem:[%s10271_s10 + $0x1c] sm:$0xf]  ;;  %v1841_v4 = vrot.slane %v1839_v37, 5 }
 0x2c3   : > { %v11351_v17 = vld [vmem:[#allocation2 + $0x28] sm:$0xf]  ;;  %v4053_v25 = vshll.u32 %v3985_v8, 16  ;;  %v4059_v28 = vshll.u32 %v11159_v60, 16  ;;  %v1820_v30 = vsel %vm10511_vm14, %v1815_v41, %v1819_v22  ;;  %v1829_v16 = vrot.slane %v1828_v6, 4  ;;  %v13114_v41 = vld [vmem:[#allocation96_spill] sm:$0xff] }
 0x2c4   : > { %13110 = vst [vmem:[#allocation83_spill] sm:$0xff] %v11351_v17  ;;  %v11354_v32 = vld [vmem:[#allocation2 + $0x28] sm:$0xe]  ;;  %v1847_v35 = vrot.slane %v1845_v36, 5  ;;  %v4052_v21 = vrot.slane %v4050_v15, 4  ;;  %v7785_v8 = vcombine.low %v1806_v1, %v1820_v30  ;;  %v1842_v37 = vor.u32 %v1841_v4, %v1838_v59  ;;  %v13115_v6 = vld [vmem:[#allocation97_spill] sm:$0xff] }
 0x2c5   : > { %13111 = vst [vmem:[#allocation109_spill] sm:$0xff] %v11354_v32  ;;  %v11358_v5 = vld [vmem:[#allocation2 + $0x44] sm:$0x1]  ;;  %v13112_v56 = vld [vmem:[#allocation123_spill] sm:$0xff]  ;;  %v11365_v19 = vld [vmem:[#allocation2 + $0x30] ss:$8 sps:$4 sm:$0xff]   ;;  %v13116_v36 = vcombine.low %v13114_v41, %v13115_v6  ;;  %v13118_v4 = vcombine.low %v11203_v38, %v11229_v43 }
 0x2c6   : > { %v13113_v17 = vsel %vm10452_vm10, %v10901_v57, %v13112_v56  ;;  %v4055_v50 = vrot.slane %v4053_v25, 5  ;;  %v4061_v32 = vrot.slane %v4059_v28, 5  ;;  %v11369_v22 = vld [vmem:[#allocation2 + $0x30] sm:$0xf]  ;;  %v1834_v57 = vsel %vm10511_vm14, %v1829_v16, %v1833_v3  ;;  %v11378_v15 = vld [vmem:[#allocation2 + $0x4c] sm:$0x1] }
 0x2c7   : > { %4478 = vst [vmem:[#allocation2 + $0x28] sm:$0xf] %v13113_v17  ;;  %8288 = vmatmul.mubr.msk.bf16.gmra.mrb[12].mxu0 %vm1309_vm15, %v13116_v36  ;;  %v4064_v56 = vshrl.u32 %v3987_v39, 16  ;;  %v4067_v17 = vshll.u32 %v3987_v39, 16  ;;  %v4073_v1 = vshll.u32 %v11168_v2, 16  ;;  %8398 = vmatmul.mubr.msk.bf16.gmra.mrb[0].mxu1 %vm1309_vm15, %v13118_v4  ;;  %v1843_v25 = vrot.slane %v1842_v37, 4 }
 0x2c8   : > { %v11380_v28 = vld [vmem:[#allocation2 + $0x38] sm:$0xf]  ;;  %v11382_v59 = vld [vmem:[#allocation2 + $0x30] sm:$0xf]  ;;  %8293 = vmatprep.mubr.msk.bf16.mxu0 %vm1309_vm15, %v7785_v8  ;;  %v4056_v30 = vor.u32 %v4055_v50, %v4052_v21  ;;  %v13119_v3 = vld [vmem:[#allocation59_spill] sm:$0xff]  ;;  %v4078_v39 = vshrl.u32 %v3989_v45, 16  ;;  %8403 = vmatprep.mubr.msk.bf16.mxu1 %vm1309_vm15, %v11285_v23 }
 0x2c9   : > { %13117 = vst [vmem:[#allocation89_spill] sm:$0xff] %v11382_v59  ;;  %v997_v16 = vmul.bf16 %v13119_v3, %v985_v24  ;;  %v11390_v41 = vld [vmem:[#allocation2 + $0x38] sm:$0xf]  ;;  %v11392_v6 = vld [vmem:[#allocation2 + $0x30] sm:$0xe]  ;;  %v4066_v36 = vrot.slane %v4064_v56, 4  ;;  %v1848_v50 = vsel %vm10511_vm14, %v1843_v25, %v1847_v35 }
 0x2ca   : > { %13120 = vst [vmem:[#allocation95_spill] sm:$0xff] %v11390_v41  ;;  %13121 = vst [vmem:[#allocation61_spill] sm:$0xff] %v11392_v6  ;;  %v4069_v59 = vrot.slane %v4067_v17, 5  ;;  %v4075_v0 = vrot.slane %v4073_v1, 5  ;;  %v4081_v38 = vshll.u32 %v3989_v45, 16  ;;  %v13122_v43 = vld [vmem:[#allocation128_spill] sm:$0xff]  ;;  %v7786_v3 = vcombine.low %v1834_v57, %v1848_v50 }
 0x2cb   : > { %v13123_v8 = vld [vmem:[#allocation129_spill] sm:$0xff]  ;;  %v4057_v24 = vrot.slane %v4056_v30, 4  ;;  %v4080_v21 = vrot.slane %v4078_v39, 4  ;;  %v4087_v4 = vshll.u32 %v11358_v5, 16  ;;  %v4092_v56 = vshrl.u32 %v3991_v33, 16  ;;  %v13126_v35 = vld [vmem:[#allocation130_spill] sm:$0xff] }
 0x2cc   : > { %v13124_v37 = vsel %vm10452_vm10, %v13122_v43, %v13123_v8  ;;  %v4070_v6 = vor.u32 %v4069_v59, %v4066_v36  ;;  %v4083_v23 = vrot.slane %v4081_v38, 5  ;;  %v11404_v17 = vld [vmem:[#allocation2 + $0x38] sm:$0xe]  ;;  %v4095_v8 = vshll.u32 %v3991_v33, 16  ;;  %v13127_v25 = vld [vmem:[#allocation131_spill] sm:$0xff]  ;;  %s8091_s10 = sshll.u32 %s12963_s22, 3 }
 0x2cd   : > { %4484 = vst [vmem:[#allocation2 + $0x30] sm:$0xf] %v13124_v37  ;;  %v11406_v45 = vld [vmem:[#allocation2 + $0x38] sm:$0xe]  ;;  %v4062_v1 = vsel %vm10511_vm14, %v4057_v24, %v4061_v32  ;;  %v4089_v43 = vrot.slane %v4087_v4, 5  ;;  %v4101_v37 = vshll.u32 %v11378_v15, 16  ;;  %v13128_v30 = vsel %vm10452_vm10, %v13126_v35, %v13127_v25  ;;  %s7404_s23 = sadd.s32 %s8092_s7, %s8091_s10 }
 0x2ce   : > { %13125 = vst [vmem:[#allocation64_spill] sm:$0xff] %v11406_v45  ;;  %4490 = vst [vmem:[#allocation2 + $0x38] sm:$0xf] %v13128_v30  ;;  %v11416_v57 = vld [vmem:[#allocation16 + $0x88] sm:$0xff]   ;;  %v4071_v59 = vrot.slane %v4070_v6, 4  ;;  %v4084_v39 = vor.u32 %v4083_v23, %v4080_v21  ;;  %v4094_v36 = vrot.slane %v4092_v56, 4 }
 0x2cf   : > { %v4430_v38 = vshrl.u32 %v997_v16, 16  ;;  %v11418_v50 = vld [vmem:[#allocation16 + $0x30] sm:$0xff]   ;;  %v4494_v45 = vld [vmem:[#allocation2 + $0x40] sm:$0xf]  ;;  %v4097_v32 = vrot.slane %v4095_v8, 5  ;;  %v4103_v24 = vrot.slane %v4101_v37, 5  ;;  %8294 = vmatmul.mubr.msk.bf16.vlgmr.msra.gmra.mrb[8].mxu0 %vm1309_vm15, %v7786_v3  ;;  %8404 = vmatmul.mubr.msk.bf16.vlgmr.msra.gmra.mrb[4].mxu1 %vm1309_vm15, %v11216_v48 }
 0x2d0   : > { %v4433_v33 = vshll.u32 %v997_v16, 16  ;;  %v13129_v4 = vld [vmem:[#allocation84_spill] sm:$0xff]  ;;  %v4076_v35 = vsel %vm10511_vm14, %v4071_v59, %v4075_v0  ;;  %v4085_v25 = vrot.slane %v4084_v39, 4  ;;  %v4497_v56 = vld [vmem:[#allocation2 + $0x44] sm:$0x1]  ;;  %8302 = vmatpush3.bf16.msra.mxu0 %v11295_v55  ;;  %8412 = vmatpush3.bf16.msra.mxu1 %v11280_v44  ;;  %s8093_s11 = sshll.u32 %s7404_s23, 7 }
 0x2d1   : > { %v1850_v41 = vshrl.u32 %v13129_v4, 16  ;;  %v4432_v30 = vrot.slane %v4430_v38, 7  ;;  %v1853_v6 = vshll.u32 %v13129_v4, 16  ;;  %v11427_v21 = vcombine.low %v4062_v1, %v4076_v35  ;;  %v13130_v8 = vld [vmem:[#allocation110_spill] sm:$0xff]  ;;  %8407 = vmatprep.mubr.msk.bf16.mxu1 %vm1309_vm15, %v11365_v19  ;;  %8421 = vmatprep.subr.bf16.mxu1 %v11416_v57  ;;  %s12633_s14 = scalar_lea.hbm %s13200_s19, %s8093_s11 }
 0x2d2   : > { %v4098_v23 = vor.u32 %v4097_v32, %v4094_v36  ;;  %v1859_v37 = vshll.u32 %v13130_v8, 16  ;;  %v4090_v0 = vsel %vm10511_vm14, %v4085_v25, %v4089_v43  ;;  %v8979_v1 = vld [vmem:[#allocation2 + $0x40] ss:$8 sps:$4 sm:$0xff]   ;;  %8311 = vmatprep.subr.bf16.mxu0 %v11418_v50  ;;  %v13132_v32 = vld [vmem:[#allocation124_spill] sm:$0xff] }
 0x2d3   : > { %v1852_v16 = vrot.slane %v1850_v41, 4  ;;  %v4435_v3 = vor.u32 %v4433_v33, %v4432_v30  ;;  %v4436_v59 = vrot.slane %v4432_v30, 4  ;;  %v1855_v48 = vrot.slane %v1853_v6, 5  ;;  %v13131_v55 = vld [vmem:[#allocation90_spill] sm:$0xff] }
 0x2d4   : > { %v4099_v39 = vrot.slane %v4098_v23, 4  ;;  %v1861_v36 = vrot.slane %v1859_v37, 5  ;;  %v1864_v41 = vshrl.u32 %v13131_v55, 16  ;;  %v1867_v38 = vshll.u32 %v13131_v55, 16  ;;  %v11445_v4 = vld [vmem:[#allocation2 + $0x40] sm:$0xe] }
 0x2d5   : > { %v4495_v44 = vsel %vm10452_vm10, %v4435_v3, %v4494_v45  ;;  %v4498_v19 = vsel %vm10466_vm11, %v4436_v59, %v4497_v56  ;;  %v1856_v43 = vor.u32 %v1855_v48, %v1852_v16  ;;  %v1873_v33 = vshll.u32 %v13132_v32, 16  ;;  %v13133_v6 = vld [vmem:[#allocation98_spill] sm:$0xff]  ;;  %v13134_v3 = vld [vmem:[#allocation125_spill] sm:$0xff]  ;;  %v13135_v48 = vld [vmem:[#allocation99_spill] sm:$0xff] }
 0x2d6   : > { %v4104_v35 = vsel %vm10511_vm14, %v4099_v39, %v4103_v24  ;;  %4499 = vst [vmem:[#allocation2 + $0x44] sm:$0x1] %v4498_v19  ;;  %v1866_v25 = vrot.slane %v1864_v41, 4  ;;  %v1869_v30 = vrot.slane %v1867_v38, 5  ;;  %v1878_v23 = vshrl.u32 %v13133_v6, 16 }
 0x2d7   : > { %4496 = vst [vmem:[#allocation2 + $0x40] sm:$0xf] %v4495_v44  ;;  %v11450_v37 = vcombine.low %v4090_v0, %v4104_v35  ;;  %v1857_v12 = vrot.slane %v1856_v43, 4  ;;  %v1875_v45 = vrot.slane %v1873_v33, 5  ;;  %v1881_v26 = vshll.u32 %v13133_v6, 16  ;;  %8408 = vmatmul.mubr.msk.bf16.gmra.mrb[0].mxu1 %vm1309_vm15, %v8979_v1 }
 0x2d8   : > { %v1870_v56 = vor.u32 %v1869_v30, %v1866_v25  ;;  %v1880_v16 = vrot.slane %v1878_v23, 4  ;;  %v1887_v59 = vshll.u32 %v13134_v3, 16  ;;  %v1892_v55 = vshrl.u32 %v13135_v48, 16  ;;  %8413 = vmatprep.mubr.msk.bf16.mxu1 %vm1309_vm15, %v11269_v40 }
 0x2d9   : > { %v1862_v24 = vsel %vm10511_vm14, %v1857_v12, %v1861_v36  ;;  %v1883_v39 = vrot.slane %v1881_v26, 5  ;;  %v1895_v41 = vshll.u32 %v13135_v48, 16  ;;  %v1901_v38 = vshll.u32 %v11127_v52, 16 }
 0x2da   : > { %v1871_v0 = vrot.slane %v1870_v56, 4  ;;  %v1889_v44 = vrot.slane %v1887_v59, 5  ;;  %v1894_v19 = vrot.slane %v1892_v55, 4  ;;  %v7934_v43 = vrot.slane %v11297_v31, 9  ;;  %v13136_v59 = vld [vmem:[#allocation62_spill] sm:$0xff]  ;;  %v11486_v55 = vld [vmem:[#allocation16 + $0x90] sm:$0xff]  }
 0x2db   : > { %v1884_v33 = vor.u32 %v1883_v39, %v1880_v16  ;;  %v1897_v35 = vrot.slane %v1895_v41, 5  ;;  %v1903_v25 = vrot.slane %v1901_v38, 5  ;;  %v4237_v36 = vrot.slane %v11078_v61, 5 }
 0x2dc   : > { %v1876_v30 = vsel %vm10511_vm14, %v1871_v0, %v1875_v45  ;;  %v7935_v6 = vrot.slane %v11299_v49, 9  ;;  %v4241_v1 = vrot.slane %v11093_v47, 5  ;;  %v7936_v23 = vrot.slane %v11225_v13, 9 }
 0x2dd   : > { %v7787_v12 = vcombine.low %v1862_v24, %v1876_v30  ;;  %v1885_v26 = vrot.slane %v1884_v33, 4  ;;  %v1898_v31 = vor.u32 %v1897_v35, %v1894_v19  ;;  %v11471_v40 = vsel %vm11097_vm2, %v7934_v43, %v4237_v36  ;;  %v13137_v24 = vld [vmem:[#allocation70_spill] sm:$0xff] }
 0x2de   : > { %v11475_v56 = vsel %vm11097_vm2, %v7935_v6, %v4241_v1  ;;  %v4245_v61 = vrot.slane %v11107_v10, 5  ;;  %v7937_v45 = vrot.slane %v11334_v46, 9  ;;  %v4249_v49 = vrot.slane %v11125_v53, 5  ;;  %v13139_v35 = vld [vmem:[#allocation118_spill] sm:$0xff]  ;;  %v4218_v6 = vld [vmem:[#allocation2 + $0x48] sm:$0xe] }
 0x2df   : > { %8297 = vmatprep.mubr.msk.bf16.mxu0 %vm1309_vm15, %v7787_v12  ;;  %v1890_v13 = vsel %vm10511_vm14, %v1885_v26, %v1889_v44  ;;  %v1899_v47 = vrot.slane %v1898_v31, 4  ;;  %v7942_v16 = vcombine.low %v11471_v40, %v11475_v56  ;;  %v7794_v48 = vrot.slane %v13136_v59, 9  ;;  %v13138_v44 = vld [vmem:[#allocation76_spill] sm:$0xff]  ;;  %8414 = vmatmul.mubr.msk.bf16.vlgmr.msra.gmra.mrb[4].mxu1 %vm1309_vm15, %v11318_v11  ;;  %v11538_v31 = vld [vmem:[#allocation2 + $0x48] sm:$0xf] }
 0x2e0   : > { %v11490_v10 = vsel %vm11097_vm2, %v7936_v23, %v4245_v61  ;;  %v11494_v53 = vsel %vm11097_vm2, %v7937_v45, %v4249_v49  ;;  %v2037_v46 = vrot.slane %v13090_v51, 5  ;;  %v7795_v39 = vrot.slane %v13137_v24, 9  ;;  %8422 = vmatpush3.bf16.msra.mxu1 %v11416_v57  ;;  %8417 = vmatprep.mubr.msk.bf16.mxu1 %vm1309_vm15, %v11427_v21  ;;  %v4622_v61 = vld [vmem:[#allocation2] sm:$0xf]  ;;  %v4624_v59 = vld [vmem:[#allocation2 + $0x8] sm:$0xf] }
 0x2e1   : > { %v1904_v41 = vsel %vm10511_vm14, %v1899_v47, %v1903_v25  ;;  %v7943_v38 = vcombine.low %v11490_v10, %v11494_v53  ;;  %v2041_v0 = vrot.slane %v13092_v63, 5  ;;  %v7796_v19 = vrot.slane %v13138_v44, 9  ;;  %8431 = vmatprep.subr.bf16.mxu1 %v11486_v55  ;;  %v11548_v47 = vld [vmem:[#allocation2 + $0x4] sm:$0x1]  ;;  %v11559_v44 = vld [vmem:[#allocation2 + $0xc] sm:$0x1] }
 0x2e2   : > { %v7788_v43 = vcombine.low %v1890_v13, %v1904_v41  ;;  %v2038_v33 = vsel %vm11097_vm2, %v7794_v48, %v2037_v46  ;;  %v2045_v51 = vrot.slane %v13098_v27, 5  ;;  %v7797_v36 = vrot.slane %v13139_v35, 9  ;;  %v13141_v48 = vld [vmem:[#allocation91_spill] sm:$0xff]  ;;  %v4626_v35 = vld [vmem:[#allocation2 + $0x10] sm:$0xf]  ;;  %v13146_v53 = vld [vmem:[#allocation78_spill] sm:$0xff] }
 0x2e3   : > { %v2042_v63 = vsel %vm11097_vm2, %v7795_v39, %v2041_v0  ;;  %v2049_v25 = vrot.slane %v13109_v42, 5  ;;  %v7938_v11 = vrot.slane %v11367_v34, 9  ;;  %v4253_v30 = vrot.slane %v11159_v60, 5  ;;  %v13142_v39 = vld [vmem:[#allocation100_spill] sm:$0xff]  ;;  %v11557_v0 = vld [vmem:[#allocation16 + $0x38] sm:$0xff]  }
 0x2e4   : > { %8298 = vmatmul.mubr.msk.bf16.gmra.mrb[12].mxu0 %vm1309_vm15, %v7788_v43  ;;  %v7802_v27 = vcombine.low %v2038_v33, %v2042_v63  ;;  %v2046_v57 = vsel %vm11097_vm2, %v7796_v19, %v2045_v51  ;;  %v7939_v21 = vrot.slane %v11404_v17, 9  ;;  %v4257_v1 = vrot.slane %v11168_v2, 5  ;;  %v13143_v33 = vld [vmem:[#allocation101_spill] sm:$0xff]  ;;  %v13144_v63 = vld [vmem:[#allocation103_spill] sm:$0xff] }
 0x2e5   : > { %v2050_v42 = vsel %vm11097_vm2, %v7797_v36, %v2049_v25  ;;  %v11528_v34 = vsel %vm11097_vm2, %v7938_v11, %v4253_v30  ;;  %v7940_v60 = vrot.slane %v11445_v4, 9  ;;  %v4261_v23 = vrot.slane %v11358_v5, 5  ;;  %v13140_v5 = vld [vmem:[#allocation85_spill] sm:$0xff]  ;;  %v11574_v30 = vld [vmem:[#allocation2 + $0x14] sm:$0x1] }
 0x2e6   : > { %8303 = vmatprep.mubr.msk.bf16.mxu0 %vm1309_vm15, %v7802_v27  ;;  %v7803_v12 = vcombine.low %v2046_v57, %v2050_v42  ;;  %v11535_v26 = vsel %vm11097_vm2, %v7939_v21, %v4257_v1  ;;  %v7941_v17 = vrot.slane %v4218_v6, 9  ;;  %v4265_v2 = vrot.slane %v11378_v15, 5  ;;  %v4628_v6 = vld [vmem:[#allocation2 + $0x18] sm:$0xf] }
 0x2e7   : > { %v7944_v45 = vcombine.low %v11528_v34, %v11535_v26  ;;  %v11544_v4 = vsel %vm11097_vm2, %v7940_v60, %v4261_v23  ;;  %v7798_v49 = vrot.slane %v13140_v5, 9  ;;  %v2053_v13 = vrot.slane %v13130_v8, 5  ;;  %8418 = vmatmul.mubr.msk.bf16.gmra.mrb[0].mxu1 %vm1309_vm15, %v11450_v37  ;;  %v11586_v60 = vld [vmem:[#allocation2 + $0x1c] sm:$0x1]  ;;  %v8985_v26 = vld [vmem:[#allocation2] ss:$8 sps:$4 sm:$0xff]  }
 0x2e8   : > { %v11552_v15 = vsel %vm11097_vm2, %v7941_v17, %v4265_v2  ;;  %v7799_v46 = vrot.slane %v13141_v48, 9  ;;  %v2057_v24 = vrot.slane %v13132_v32, 5  ;;  %v7800_v41 = vrot.slane %v13142_v39, 9  ;;  %8423 = vmatprep.mubr.msk.bf16.mxu1 %vm1309_vm15, %v7942_v16  ;;  %v11593_v48 = vld [vmem:[#allocation16 + $0x98] sm:$0xff]  }
 0x2e9   : > { %v7945_v8 = vcombine.low %v11544_v4, %v11552_v15  ;;  %v2054_v19 = vsel %vm11097_vm2, %v7798_v49, %v2053_v13  ;;  %v2061_v43 = vrot.slane %v13134_v3, 5  ;;  %v7801_v51 = vrot.slane %v13143_v33, 9  ;;  %v4632_v15 = vld [vmem:[#allocation2 + $0x28] sm:$0xf] }
 0x2ea   : > { %v2058_v32 = vsel %vm11097_vm2, %v7799_v46, %v2057_v24  ;;  %v2065_v36 = vrot.slane %v11127_v52, 5  ;;  %v7814_v25 = vcombine.low %v13144_v63, %v11538_v31  ;;  %v4639_v11 = vshrl.u32 %v4622_v61, 16 }
 0x2eb   : > { %v7804_v3 = vcombine.low %v2054_v19, %v2058_v32  ;;  %v2062_v37 = vsel %vm11097_vm2, %v7800_v41, %v2061_v43  ;;  %v4642_v27 = vshll.u32 %v4622_v61, 16  ;;  %v4648_v57 = vshll.u32 %v11548_v47, 16 }
 0x2ec   : > { %8304 = vmatmul.mubr.msk.bf16.vlgmr.msra.gmra.mrb[8].mxu0 %vm1309_vm15, %v7803_v12  ;;  %v2066_v52 = vsel %vm11097_vm2, %v7801_v51, %v2065_v36  ;;  %v4641_v21 = vrot.slane %v4639_v11, 4  ;;  %v4653_v1 = vshrl.u32 %v4624_v59, 16  ;;  %v4656_v42 = vshll.u32 %v4624_v59, 16  ;;  %v13145_v36 = vld [vmem:[#allocation72_spill] sm:$0xff] }
 0x2ed   : > { %8312 = vmatpush3.bf16.msra.mxu0 %v11418_v50  ;;  %8307 = vmatprep.mubr.msk.bf16.mxu0 %vm1309_vm15, %v7804_v3  ;;  %v7805_v40 = vcombine.low %v2062_v37, %v2066_v52  ;;  %v4644_v56 = vrot.slane %v4642_v27, 5  ;;  %v4650_v16 = vrot.slane %v4648_v57, 5  ;;  %v4662_v23 = vshll.u32 %v11559_v44, 16  ;;  %v13148_v57 = vld [vmem:[#allocation77_spill] sm:$0xff] }
 0x2ee   : > { %8321 = vmatprep.subr.bf16.mxu0 %v11557_v0  ;;  %v4655_v12 = vrot.slane %v4653_v1, 4  ;;  %v4658_v17 = vrot.slane %v4656_v42, 5  ;;  %v4667_v2 = vshrl.u32 %v4626_v35, 16  ;;  %v4670_v61 = vshll.u32 %v4626_v35, 16 }
 0x2ef   : > { %v4645_v5 = vor.u32 %v4644_v56, %v4641_v21  ;;  %v4664_v49 = vrot.slane %v4662_v23, 5  ;;  %v4676_v13 = vshll.u32 %v11574_v30, 16  ;;  %v4681_v59 = vshrl.u32 %v4628_v6, 16  ;;  %8424 = vmatmul.mubr.msk.bf16.vlgmr.msra.gmra.mrb[4].mxu1 %vm1309_vm15, %v7943_v38  ;;  %v13150_v56 = vld [vmem:[#allocation79_spill] sm:$0xff] }
 0x2f0   : > { %v4659_v50 = vor.u32 %v4658_v17, %v4655_v12  ;;  %v4669_v46 = vrot.slane %v4667_v2, 4  ;;  %v4672_v24 = vrot.slane %v4670_v61, 5  ;;  %v4684_v39 = vshll.u32 %v4628_v6, 16  ;;  %8432 = vmatpush3.bf16.msra.mxu1 %v11486_v55  ;;  %8427 = vmatprep.mubr.msk.bf16.mxu1 %vm1309_vm15, %v7944_v45  ;;  %v13147_v45 = vld [vmem:[#allocation71_spill] sm:$0xff]  ;;  %v13151_v17 = vld [vmem:[#allocation80_spill] sm:$0xff]  ;;  %v11625_v61 = vpop.f32.mrb[0].mxu0 }
 0x2f1   : > { %v4646_v41 = vrot.slane %v4645_v5, 4  ;;  %v4678_v19 = vrot.slane %v4676_v13, 5  ;;  %v4683_v43 = vrot.slane %v4681_v59, 4  ;;  %v4690_v33 = vshll.u32 %v11586_v60, 16  ;;  %8441 = vmatprep.subr.bf16.mxu1 %v11593_v48  ;;  %v13152_v13 = vld [vmem:[#allocation120_spill] sm:$0xff] }
 0x2f2   : > { %v4660_v51 = vrot.slane %v4659_v50, 4  ;;  %v4673_v35 = vor.u32 %v4672_v24, %v4669_v46  ;;  %v4686_v32 = vrot.slane %v4684_v39, 5  ;;  %v2313_v11 = vshrl.u32 %v13145_v36, 16  ;;  %v4630_v46 = vld [vmem:[#allocation2 + $0x20] sm:$0xf]  ;;  %v11629_v24 = vpop.f32.mrb[1].mxu0 }
 0x2f3   : > { %v4651_v6 = vsel %vm10511_vm14, %v4646_v41, %v4650_v16  ;;  %v4692_v3 = vrot.slane %v4690_v33, 5  ;;  %v2316_v10 = vshll.u32 %v13145_v36, 16  ;;  %v2322_v38 = vshll.u32 %v13146_v53, 16 }
 0x2f4   : > { %8308 = vmatmul.mubr.msk.bf16.gmra.mrb[12].mxu0 %vm1309_vm15, %v7805_v40  ;;  %v4665_v55 = vsel %vm10511_vm14, %v4660_v51, %v4664_v49  ;;  %v4674_v37 = vrot.slane %v4673_v35, 4  ;;  %v4687_v27 = vor.u32 %v4686_v32, %v4683_v43  ;;  %v2315_v34 = vrot.slane %v2313_v11, 4  ;;  %v13153_v43 = vld [vmem:[#allocation121_spill] sm:$0xff] }
 0x2f5   : > { %v13149_v52 = vcombine.low %v13147_v45, %v13148_v57  ;;  %v11618_v21 = vcombine.low %v4651_v6, %v4665_v55  ;;  %v2318_v1 = vrot.slane %v2316_v10, 5  ;;  %v2324_v42 = vrot.slane %v2322_v38, 5  ;;  %v13154_v10 = vld [vmem:[#allocation87_spill] sm:$0xff]  ;;  %v11642_v55 = vld [vmem:[#allocation2 + $0x24] sm:$0x1]  ;;  %v13155_v45 = vld [vmem:[#allocation113_spill] sm:$0xff] }
 0x2f6   : > { %v2327_v40 = vshrl.u32 %v13150_v56, 16  ;;  %v4679_v16 = vsel %vm10511_vm14, %v4674_v37, %v4678_v19  ;;  %v4688_v23 = vrot.slane %v4687_v27, 4  ;;  %v2330_v12 = vshll.u32 %v13150_v56, 16  ;;  %v11644_v37 = vld [vmem:[#allocation16 + $0x40] sm:$0xff]  }
 0x2f7   : > { %8313 = vmatprep.mubr.msk.bf16.mxu0 %vm1309_vm15, %v13149_v52  ;;  %v2336_v2 = vshll.u32 %v13151_v17, 16  ;;  %v2319_v5 = vor.u32 %v2318_v1, %v2315_v34  ;;  %v2341_v59 = vshrl.u32 %v13152_v13, 16  ;;  %v2344_v50 = vshll.u32 %v13152_v13, 16  ;;  %8428 = vmatmul.mubr.msk.bf16.gmra.mrb[0].mxu1 %vm1309_vm15, %v7945_v8  ;;  %v11650_v8 = vld [vmem:[#allocation2 + $0x2c] sm:$0x1]  ;;  %v13157_v56 = vld [vmem:[#allocation86_spill] sm:$0xff] }
 0x2f8   : > { %v2329_v49 = vrot.slane %v2327_v40, 4  ;;  %v4693_v39 = vsel %vm10511_vm14, %v4688_v23, %v4692_v3  ;;  %v2332_v41 = vrot.slane %v2330_v12, 5  ;;  %v2350_v33 = vshll.u32 %v13153_v43, 16  ;;  %8433 = vmatprep.mubr.msk.bf16.mxu1 %vm1309_vm15, %v8985_v26  ;;  %v8987_v52 = vld [vmem:[#allocation2 + $0x10] ss:$8 sps:$4 sm:$0xff]   ;;  %v13156_v1 = vld [vmem:[#allocation119_spill] sm:$0xff] }
 0x2f9   : > { %v2338_v19 = vrot.slane %v2336_v2, 5  ;;  %v11634_v51 = vcombine.low %v4679_v16, %v4693_v39  ;;  %v2320_v35 = vrot.slane %v2319_v5, 4  ;;  %v2343_v32 = vrot.slane %v2341_v59, 4  ;;  %v4634_v2 = vld [vmem:[#allocation2 + $0x30] sm:$0xf]  ;;  %v13160_v5 = vld [vmem:[#allocation102_spill] sm:$0xff] }
 0x2fa   : > { %v2346_v36 = vrot.slane %v2344_v50, 5  ;;  %v2333_v11 = vor.u32 %v2332_v41, %v2329_v49  ;;  %v2352_v6 = vrot.slane %v2350_v33, 5  ;;  %v2355_v38 = vshrl.u32 %v13154_v10, 16 }
 0x2fb   : > { %v2358_v3 = vshll.u32 %v13154_v10, 16  ;;  %v2325_v27 = vsel %vm10511_vm14, %v2320_v35, %v2324_v42  ;;  %v2364_v4 = vshll.u32 %v13155_v45, 16  ;;  %v4695_v57 = vshrl.u32 %v4630_v46, 16  ;;  %v13159_v42 = vld [vmem:[#allocation92_spill] sm:$0xff] }
 0x2fc   : > { %v2347_v34 = vor.u32 %v2346_v36, %v2343_v32  ;;  %v13158_v40 = vcombine.low %v13156_v1, %v13157_v56  ;;  %v2334_v16 = vrot.slane %v2333_v11, 4  ;;  %v2357_v23 = vrot.slane %v2355_v38, 4 }
 0x2fd   : > { %v2360_v12 = vrot.slane %v2358_v3, 5  ;;  %v4698_v26 = vshll.u32 %v4630_v46, 16  ;;  %v13161_v49 = vcombine.low %v13159_v42, %v13160_v5  ;;  %v2366_v59 = vrot.slane %v2364_v4, 5  ;;  %v11664_v46 = vld [vmem:[#allocation2 + $0x34] sm:$0x1] }
 0x2fe   : > { %8314 = vmatmul.mubr.msk.bf16.vlgmr.msra.gmra.mrb[8].mxu0 %vm1309_vm15, %v13158_v40  ;;  %v2348_v13 = vrot.slane %v2347_v34, 4  ;;  %v4697_v50 = vrot.slane %v4695_v57, 4  ;;  %v4704_v39 = vshll.u32 %v11642_v55, 16  ;;  %v2339_v41 = vsel %vm10511_vm14, %v2334_v16, %v2338_v19  ;;  %v4636_v3 = vld [vmem:[#allocation2 + $0x38] sm:$0xf]  ;;  %v11669_v34 = vld [vmem:[#allocation16 + $0xa0] sm:$0xff]  }
 0x2ff   : > { %8322 = vmatpush3.bf16.msra.mxu0 %v11557_v0  ;;  %8317 = vmatprep.mubr.msk.bf16.mxu0 %vm1309_vm15, %v13161_v49  ;;  %v2361_v33 = vor.u32 %v2360_v12, %v2357_v23  ;;  %v4700_v35 = vrot.slane %v4698_v26, 5  ;;  %v4709_v32 = vshrl.u32 %v4632_v15, 16  ;;  %v8988_v0 = vld [vmem:[#allocation2 + $0x20] ss:$8 sps:$4 sm:$0xff]   ;;  %v7820_v36 = vcombine.low %v2325_v27, %v2339_v41  ;;  %v11676_v12 = vld [vmem:[#allocation2 + $0x3c] sm:$0x1] }
 0x300   : > { %8331 = vmatprep.subr.bf16.mxu0 %v11644_v37  ;;  %v2353_v11 = vsel %vm10511_vm14, %v2348_v13, %v2352_v6  ;;  %v4706_v10 = vrot.slane %v4704_v39, 5  ;;  %v4712_v38 = vshll.u32 %v4632_v15, 16  ;;  %v4718_v1 = vshll.u32 %v11650_v8, 16  ;;  %8434 = vmatmul.mubr.msk.bf16.vlgmr.msra.gmra.mrb[4].mxu1 %vm1309_vm15, %v8987_v52 }
 0x301   : > { %v2362_v4 = vrot.slane %v2361_v33, 4  ;;  %v4701_v57 = vor.u32 %v4700_v35, %v4697_v50  ;;  %v4711_v19 = vrot.slane %v4709_v32, 4  ;;  %v4723_v40 = vshrl.u32 %v4634_v2, 16  ;;  %8442 = vmatpush3.bf16.msra.mxu1 %v11593_v48  ;;  %8437 = vmatprep.mubr.msk.bf16.mxu1 %vm1309_vm15, %v8988_v0  ;;  %v13162_v33 = vld [vmem:[#allocation93_spill] sm:$0xff] }
 0x302   : > { %v4714_v56 = vrot.slane %v4712_v38, 5  ;;  %v4726_v16 = vshll.u32 %v4634_v2, 16  ;;  %v4732_v23 = vshll.u32 %v11664_v46, 16  ;;  %v4720_v15 = vrot.slane %v4718_v1, 5  ;;  %8451 = vmatprep.subr.bf16.mxu1 %v11669_v34  ;;  %v8989_v32 = vld [vmem:[#allocation2 + $0x30] ss:$8 sps:$4 sm:$0xff]  }
 0x303   : > { %v2367_v6 = vsel %vm10511_vm14, %v2362_v4, %v2366_v59  ;;  %v4702_v27 = vrot.slane %v4701_v57, 4  ;;  %v4737_v26 = vshrl.u32 %v4636_v3, 16  ;;  %v4725_v49 = vrot.slane %v4723_v40, 4  ;;  %v11695_v57 = vpop.f32.mrb[2].mxu0 }
 0x304   : > { %v7821_v42 = vcombine.low %v2353_v11, %v2367_v6  ;;  %v4715_v5 = vor.u32 %v4714_v56, %v4711_v19  ;;  %v4728_v2 = vrot.slane %v4726_v16, 5  ;;  %v4734_v13 = vrot.slane %v4732_v23, 5  ;;  %v13164_v11 = vld [vmem:[#allocation104_spill] sm:$0xff]  ;;  %v2310_v16 = vld [vmem:[#allocation2 + $0x48] sm:$0xf] }
 0x305   : > { %v4707_v52 = vsel %vm10511_vm14, %v4702_v27, %v4706_v10  ;;  %v4739_v59 = vrot.slane %v4737_v26, 4  ;;  %v4740_v50 = vshll.u32 %v4636_v3, 16  ;;  %v4746_v41 = vshll.u32 %v11676_v12, 16  ;;  %v13165_v26 = vld [vmem:[#allocation127_spill] sm:$0xff] }
 0x306   : > { %8318 = vmatmul.mubr.msk.bf16.gmra.mrb[12].mxu0 %vm1309_vm15, %v7814_v25  ;;  %v4716_v48 = vrot.slane %v4715_v5, 4  ;;  %v4729_v39 = vor.u32 %v4728_v2, %v4725_v49  ;;  %v2369_v35 = vshrl.u32 %v13162_v33, 16  ;;  %v2372_v63 = vshll.u32 %v13162_v33, 16  ;;  %v13163_v25 = vld [vmem:[#allocation126_spill] sm:$0xff]  ;;  %v11701_v49 = vld [vmem:[#allocation2 + $0x4c] sm:$0x1] }
 0x307   : > { %8323 = vmatprep.mubr.msk.bf16.mxu0 %vm1309_vm15, %v7820_v36  ;;  %v4742_v31 = vrot.slane %v4740_v50, 5  ;;  %v2378_v0 = vshll.u32 %v13163_v25, 16  ;;  %v2383_v38 = vshrl.u32 %v13164_v11, 16  ;;  %v4748_v4 = vrot.slane %v4746_v41, 5  ;;  %v13166_v50 = vld [vmem:[#allocation105_spill] sm:$0xff] }
 0x308   : > { %v4721_v10 = vsel %vm10511_vm14, %v4716_v48, %v4720_v15  ;;  %v4730_v3 = vrot.slane %v4729_v39, 4  ;;  %v2371_v36 = vrot.slane %v2369_v35, 4  ;;  %v2374_v56 = vrot.slane %v2372_v63, 5  ;;  %8438 = vmatmul.mubr.msk.bf16.gmra.mrb[0].mxu1 %vm1309_vm15, %v8989_v32  ;;  %v11706_v48 = vld [vmem:[#allocation16 + $0x48] sm:$0xff]   ;;  %v4856_v35 = vld [vmem:[#allocation2] sm:$0xe] }
 0x309   : > { %v7962_v19 = vcombine.low %v4707_v52, %v4721_v10  ;;  %v4743_v1 = vor.u32 %v4742_v31, %v4739_v59  ;;  %v2380_v40 = vrot.slane %v2378_v0, 5  ;;  %v2385_v6 = vrot.slane %v2383_v38, 4  ;;  %8443 = vmatprep.mubr.msk.bf16.mxu1 %vm1309_vm15, %v11618_v21 }
 0x30a   : > { %v4735_v23 = vsel %vm10511_vm14, %v4730_v3, %v4734_v13  ;;  %v2386_v27 = vshll.u32 %v13164_v11, 16  ;;  %v2392_v5 = vshll.u32 %v13165_v26, 16  ;;  %v2375_v2 = vor.u32 %v2374_v56, %v2371_v36  ;;  %v4857_v11 = vld [vmem:[#allocation2 + $0x8] sm:$0xe] }
 0x30b   : > { %v4744_v15 = vrot.slane %v4743_v1, 4  ;;  %v2397_v52 = vshrl.u32 %v13166_v50, 16  ;;  %v2400_v59 = vshll.u32 %v13166_v50, 16  ;;  %v2406_v41 = vshll.u32 %v11129_v29, 16 }
 0x30c   : > { %v2388_v13 = vrot.slane %v2386_v27, 5  ;;  %v2394_v39 = vrot.slane %v2392_v5, 5  ;;  %v2411_v33 = vshrl.u32 %v2310_v16, 16  ;;  %v2376_v31 = vrot.slane %v2375_v2, 4  ;;  %v4858_v27 = vld [vmem:[#allocation2 + $0x10] sm:$0xe] }
 0x30d   : > { %v4749_v32 = vsel %vm10511_vm14, %v4744_v15, %v4748_v4  ;;  %v2399_v63 = vrot.slane %v2397_v52, 4  ;;  %v2402_v0 = vrot.slane %v2400_v59, 5  ;;  %v2408_v10 = vrot.slane %v2406_v41, 5  ;;  %v11722_v2 = vld [vmem:[#allocation16 + $0xa8] sm:$0xff]  }
 0x30e   : > { %8324 = vmatmul.mubr.msk.bf16.vlgmr.msra.gmra.mrb[8].mxu0 %vm1309_vm15, %v7821_v42  ;;  %v11714_v38 = vcombine.low %v4735_v23, %v4749_v32  ;;  %v2389_v21 = vor.u32 %v2388_v13, %v2385_v6  ;;  %v2413_v3 = vrot.slane %v2411_v33, 4  ;;  %v2381_v36 = vsel %vm10511_vm14, %v2376_v31, %v2380_v40  ;;  %v4859_v40 = vld [vmem:[#allocation2 + $0x18] sm:$0xe]  ;;  %v4860_v31 = vld [vmem:[#allocation2 + $0x20] sm:$0xe] }
 0x30f   : > { %8332 = vmatpush3.bf16.msra.mxu0 %v11644_v37  ;;  %v2403_v1 = vor.u32 %v2402_v0, %v2399_v63  ;;  %v2414_v56 = vshll.u32 %v2310_v16, 16  ;;  %v2420_v42 = vshll.u32 %v11701_v49, 16  ;;  %v7969_v5 = vrot.slane %v4856_v35, 9  ;;  %v4861_v63 = vld [vmem:[#allocation2 + $0x28] sm:$0xe] }
 0x310   : > { %8341 = vmatprep.subr.bf16.mxu0 %v11706_v48  ;;  %v2390_v4 = vrot.slane %v2389_v21, 4  ;;  %v4882_v23 = vrot.slane %v11548_v47, 5  ;;  %v7970_v15 = vrot.slane %v4857_v11, 9  ;;  %v4886_v52 = vrot.slane %v11559_v44, 5  ;;  %8444 = vmatmul.mubr.msk.bf16.vlgmr.msra.gmra.mrb[4].mxu1 %vm1309_vm15, %v11634_v51  ;;  %v13167_v11 = vld [vmem:[#allocation81_spill] sm:$0xff] }
 0x311   : > { %v2404_v37 = vrot.slane %v2403_v1, 4  ;;  %v2416_v6 = vrot.slane %v2414_v56, 5  ;;  %v2422_v50 = vrot.slane %v2420_v42, 5  ;;  %v7971_v13 = vrot.slane %v4858_v27, 9  ;;  %8452 = vmatpush3.bf16.msra.mxu1 %v11669_v34  ;;  %8447 = vmatprep.mubr.msk.bf16.mxu1 %vm1309_vm15, %v7962_v19  ;;  %v13168_v19 = vld [vmem:[#allocation82_spill] sm:$0xff] }
 0x312   : > { %v2395_v16 = vsel %vm10511_vm14, %v2390_v4, %v2394_v39  ;;  %v4883_v59 = vsel %vm11097_vm2, %v7969_v5, %v4882_v23  ;;  %v4890_v41 = vrot.slane %v11574_v30, 5  ;;  %v4887_v44 = vsel %vm11097_vm2, %v7970_v15, %v4886_v52  ;;  %8461 = vmatprep.subr.bf16.mxu1 %v11722_v2  ;;  %v13169_v1 = vld [vmem:[#allocation122_spill] sm:$0xff]  ;;  %v13170_v5 = vld [vmem:[#allocation88_spill] sm:$0xff]  ;;  %v4863_v15 = vld [vmem:[#allocation2 + $0x38] sm:$0xe] }
 0x313   : > { %v7822_v47 = vcombine.low %v2381_v36, %v2395_v16  ;;  %v2409_v33 = vsel %vm10511_vm14, %v2404_v37, %v2408_v10  ;;  %v2417_v35 = vor.u32 %v2416_v6, %v2413_v3  ;;  %v7977_v39 = vcombine.low %v4883_v59, %v4887_v44  ;;  %v4862_v3 = vld [vmem:[#allocation2 + $0x30] sm:$0xe]  ;;  %v13171_v44 = vld [vmem:[#allocation94_spill] sm:$0xff] }
 0x314   : > { %v11740_v32 = vsel %vm11097_vm2, %v7971_v13, %v4890_v41  ;;  %v7972_v30 = vrot.slane %v4859_v40, 9  ;;  %v4894_v51 = vrot.slane %v11586_v60, 5  ;;  %v7829_v21 = vrot.slane %v13167_v11, 9 }
 0x315   : > { %8327 = vmatprep.mubr.msk.bf16.mxu0 %vm1309_vm15, %v7822_v47  ;;  %v2418_v0 = vrot.slane %v2417_v35, 4  ;;  %v2556_v34 = vrot.slane %v13146_v53, 5  ;;  %v7830_v10 = vrot.slane %v13168_v19, 9  ;;  %v2560_v60 = vrot.slane %v13151_v17, 5  ;;  %v13173_v19 = vld [vmem:[#allocation107_spill] sm:$0xff] }
 0x316   : > { %v11750_v36 = vsel %vm11097_vm2, %v7972_v30, %v4894_v51  ;;  %v7831_v56 = vrot.slane %v13169_v1, 9  ;;  %v2564_v42 = vrot.slane %v13153_v43, 5  ;;  %v7832_v23 = vrot.slane %v13170_v5, 9  ;;  %v2537_v51 = vld [vmem:[#allocation2 + $0x48] sm:$0xe] }
 0x317   : > { %v2423_v27 = vsel %vm10511_vm14, %v2418_v0, %v2422_v50  ;;  %v7978_v4 = vcombine.low %v11740_v32, %v11750_v36  ;;  %v2557_v53 = vsel %vm11097_vm2, %v7829_v21, %v2556_v34  ;;  %v2561_v17 = vsel %vm11097_vm2, %v7830_v10, %v2560_v60  ;;  %v2941_v32 = vld [vmem:[#allocation2] sm:$0xf] }
 0x318   : > { %v7823_v37 = vcombine.low %v2409_v33, %v2423_v27  ;;  %v2565_v6 = vsel %vm11097_vm2, %v7831_v56, %v2564_v42  ;;  %v2568_v43 = vrot.slane %v13155_v45, 5  ;;  %v7837_v52 = vcombine.low %v2557_v53, %v2561_v17  ;;  %8448 = vmatmul.mubr.msk.bf16.gmra.mrb[0].mxu1 %vm1309_vm15, %v11714_v38  ;;  %v13174_v42 = vld [vmem:[#allocation132_spill] sm:$0xff]  ;;  %v11807_v27 = vld [vmem:[#allocation2 + $0xc] sm:$0x1]  ;;  %v5144_v17 = vld [vmem:[#allocation2 + $0x18] sm:$0xf] }
 0x319   : > { %v7973_v50 = vrot.slane %v4860_v31, 9  ;;  %v4898_v40 = vrot.slane %v11642_v55, 5  ;;  %v7974_v16 = vrot.slane %v4861_v63, 9  ;;  %v4902_v13 = vrot.slane %v11650_v8, 5  ;;  %8453 = vmatprep.mubr.msk.bf16.mxu1 %vm1309_vm15, %v7977_v39  ;;  %v11788_v31 = vld [vmem:[#allocation2] sm:$0xf] }
 0x31a   : > { %8328 = vmatmul.mubr.msk.bf16.gmra.mrb[12].mxu0 %vm1309_vm15, %v7823_v37  ;;  %v2569_v59 = vsel %vm11097_vm2, %v7832_v23, %v2568_v43  ;;  %v7975_v41 = vrot.slane %v4862_v3, 9  ;;  %v4906_v47 = vrot.slane %v11664_v46, 5  ;;  %v7976_v33 = vrot.slane %v4863_v15, 9  ;;  %v13172_v39 = vld [vmem:[#allocation106_spill] sm:$0xff]  ;;  %v5140_v3 = vld [vmem:[#allocation2 + $0x8] sm:$0xf] }
 0x31b   : > { %8333 = vmatprep.mubr.msk.bf16.mxu0 %vm1309_vm15, %v7837_v52  ;;  %v7838_v45 = vcombine.low %v2565_v6, %v2569_v59  ;;  %v4899_v55 = vsel %vm11097_vm2, %v7973_v50, %v4898_v40  ;;  %v4910_v35 = vrot.slane %v11676_v12, 5  ;;  %v4903_v8 = vsel %vm11097_vm2, %v7974_v16, %v4902_v13  ;;  %v5142_v53 = vld [vmem:[#allocation2 + $0x10] sm:$0xf]  ;;  %v11815_v37 = vld [vmem:[#allocation2 + $0x14] sm:$0x1] }
 0x31c   : > { %v11784_v46 = vsel %vm11097_vm2, %v7975_v41, %v4906_v47  ;;  %v7833_v38 = vrot.slane %v13171_v44, 9  ;;  %v2572_v30 = vrot.slane %v13163_v25, 5  ;;  %v7979_v63 = vcombine.low %v4899_v55, %v4903_v8  ;;  %v11819_v6 = vld [vmem:[#allocation16 + $0xb0] sm:$0xff]   ;;  %v11823_v40 = vld [vmem:[#allocation2 + $0x1c] sm:$0x1] }
 0x31d   : > { %v11792_v12 = vsel %vm11097_vm2, %v7976_v33, %v4910_v35  ;;  %v7834_v0 = vrot.slane %v13172_v39, 9  ;;  %v2576_v11 = vrot.slane %v13165_v26, 5  ;;  %v7835_v25 = vrot.slane %v13173_v19, 9  ;;  %v11826_v59 = vld [vmem:[#allocation16 + $0x50] sm:$0xff]   ;;  %v5146_v55 = vld [vmem:[#allocation2 + $0x20] sm:$0xf] }
 0x31e   : > { %v7980_v21 = vcombine.low %v11784_v46, %v11792_v12  ;;  %v2573_v34 = vsel %vm11097_vm2, %v7833_v38, %v2572_v30  ;;  %v2580_v10 = vrot.slane %v11129_v29, 5  ;;  %v7836_v1 = vrot.slane %v2537_v51, 9 }
 0x31f   : > { %v2577_v60 = vsel %vm11097_vm2, %v7834_v0, %v2576_v11  ;;  %v2584_v56 = vrot.slane %v11701_v49, 5  ;;  %v7846_v26 = vcombine.low %v11788_v31, %v13174_v42  ;;  %v7847_v29 = vcombine.low %v11274_v14, %v11276_v54  ;;  %v5152_v54 = vld [vmem:[#allocation2 + $0x38] sm:$0xf] }
 0x320   : > { %v7839_v5 = vcombine.low %v2573_v34, %v2577_v60  ;;  %v2581_v23 = vsel %vm11097_vm2, %v7835_v25, %v2580_v10  ;;  %v7848_v15 = vcombine.low %v11190_v20, %v11346_v62  ;;  %v7849_v43 = vcombine.low %v11369_v22, %v11380_v28  ;;  %8454 = vmatmul.mubr.msk.bf16.vlgmr.msra.gmra.mrb[4].mxu1 %vm1309_vm15, %v7978_v4 }
 0x321   : > { %v2585_v49 = vsel %vm11097_vm2, %v7836_v1, %v2584_v56  ;;  %v5157_v52 = vshrl.u32 %v5140_v3, 16  ;;  %v5160_v50 = vshll.u32 %v5140_v3, 16  ;;  %v5166_v13 = vshll.u32 %v11807_v27, 16  ;;  %8462 = vmatpush3.bf16.msra.mxu1 %v11722_v2  ;;  %8457 = vmatprep.mubr.msk.bf16.mxu1 %vm1309_vm15, %v7979_v63  ;;  %v11844_v3 = vld [vmem:[#allocation2 + $0x4] sm:$0x1] }
 0x322   : > { %8334 = vmatmul.mubr.msk.bf16.vlgmr.msra.gmra.mrb[8].mxu0 %vm1309_vm15, %v7838_v45  ;;  %v7840_v16 = vcombine.low %v2581_v23, %v2585_v49  ;;  %v5171_v41 = vshrl.u32 %v5142_v53, 16  ;;  %v5174_v47 = vshll.u32 %v5142_v53, 16  ;;  %v5180_v8 = vshll.u32 %v11815_v37, 16  ;;  %v11835_v45 = vld [vmem:[#allocation2 + $0x24] sm:$0x1]  ;;  %8471 = vmatprep.subr.bf16.mxu1 %v11819_v6 }
 0x323   : > { %8342 = vmatpush3.bf16.msra.mxu0 %v11706_v48  ;;  %v5159_v33 = vrot.slane %v5157_v52, 4  ;;  %v5162_v35 = vrot.slane %v5160_v50, 5  ;;  %v5185_v44 = vshrl.u32 %v5144_v17, 16  ;;  %v5168_v38 = vrot.slane %v5166_v13, 5  ;;  %8337 = vmatprep.mubr.msk.bf16.mxu0 %vm1309_vm15, %v7839_v5  ;;  %v8995_v1 = vld [vmem:[#allocation2 + $0x8] ss:$8 sps:$4 sm:$0xff]  }
 0x324   : > { %v5173_v30 = vrot.slane %v5171_v41, 4  ;;  %v5176_v51 = vrot.slane %v5174_v47, 5  ;;  %v5188_v39 = vshll.u32 %v5144_v17, 16  ;;  %v5182_v36 = vrot.slane %v5180_v8, 5  ;;  %8351 = vmatprep.subr.bf16.mxu0 %v11826_v59 }
 0x325   : > { %v5163_v48 = vor.u32 %v5162_v35, %v5159_v33  ;;  %v5187_v4 = vrot.slane %v5185_v44, 4  ;;  %v5194_v0 = vshll.u32 %v11823_v40, 16  ;;  %v5199_v34 = vshrl.u32 %v5146_v55, 16  ;;  %v13175_v35 = vld [vmem:[#allocation133_spill] sm:$0xff] }
 0x326   : > { %v5177_v11 = vor.u32 %v5176_v51, %v5173_v30  ;;  %v5190_v2 = vrot.slane %v5188_v39, 5  ;;  %v5202_v63 = vshll.u32 %v5146_v55, 16  ;;  %v5208_v10 = vshll.u32 %v11835_v45, 16  ;;  %v13176_v30 = vld [vmem:[#allocation134_spill] sm:$0xff] }
 0x327   : > { %v5164_v19 = vrot.slane %v5163_v48, 4  ;;  %v5196_v25 = vrot.slane %v5194_v0, 5  ;;  %v2958_v60 = vshrl.u32 %v2941_v32, 16  ;;  %v5201_v5 = vrot.slane %v5199_v34, 4 }
 0x328   : > { %v5178_v56 = vrot.slane %v5177_v11, 4  ;;  %v5191_v53 = vor.u32 %v5190_v2, %v5187_v4  ;;  %v5204_v23 = vrot.slane %v5202_v63, 5  ;;  %v5210_v49 = vrot.slane %v5208_v10, 5  ;;  %8458 = vmatmul.mubr.msk.bf16.gmra.mrb[0].mxu1 %vm1309_vm15, %v7980_v21  ;;  %v5148_v2 = vld [vmem:[#allocation2 + $0x28] sm:$0xf] }
 0x329   : > { %v5169_v17 = vsel %vm10511_vm14, %v5164_v19, %v5168_v38  ;;  %v2960_v52 = vrot.slane %v2958_v60, 4  ;;  %v2961_v50 = vshll.u32 %v2941_v32, 16  ;;  %v2967_v55 = vshll.u32 %v11844_v3, 16  ;;  %v11864_v38 = vpop.f32.mrb[3].mxu0  ;;  %8463 = vmatprep.mubr.msk.bf16.mxu1 %vm1309_vm15, %v8995_v1  ;;  %v8997_v63 = vld [vmem:[#allocation2 + $0x18] ss:$8 sps:$4 sm:$0xff]  }
 0x32a   : > { %8338 = vmatmul.mubr.msk.bf16.gmra.mrb[12].mxu0 %vm1309_vm15, %v7840_v16  ;;  %v5183_v13 = vsel %vm10511_vm14, %v5178_v56, %v5182_v36  ;;  %v5192_v41 = vrot.slane %v5191_v53, 4  ;;  %v5205_v47 = vor.u32 %v5204_v23, %v5201_v5  ;;  %v2972_v8 = vshrl.u32 %v13175_v35, 16  ;;  %v11870_v42 = vpop.f32.mrb[4].mxu0  ;;  %v8998_v19 = vld [vmem:[#allocation2 + $0x28] ss:$8 sps:$4 sm:$0xff]   ;;  %v13177_v23 = vld [vmem:[#allocation65_spill] sm:$0xff] }
 0x32b   : > { %8343 = vmatprep.mubr.msk.bf16.mxu0 %vm1309_vm15, %v7846_v26  ;;  %v11860_v33 = vcombine.low %v5169_v17, %v5183_v13  ;;  %v2963_v16 = vrot.slane %v2961_v50, 5  ;;  %v2975_v44 = vshll.u32 %v13175_v35, 16  ;;  %v2969_v21 = vrot.slane %v2967_v55, 5  ;;  %v11873_v48 = vpop.f32.mrb[5].mxu0  ;;  %v13178_v13 = vld [vmem:[#allocation137_spill] sm:$0xff] }
 0x32c   : > { %v5197_v46 = vsel %vm10511_vm14, %v5192_v41, %v5196_v25  ;;  %v5206_v12 = vrot.slane %v5205_v47, 4  ;;  %v2981_v31 = vshll.u32 %v13176_v30, 16  ;;  %v2974_v51 = vrot.slane %v2972_v8, 4  ;;  %v11879_v34 = vpop.f32.mrb[6].mxu0  ;;  %v11881_v25 = vld [vmem:[#allocation16 + $0xb8] sm:$0xff]  }
 0x32d   : > { %v2964_v26 = vor.u32 %v2963_v16, %v2960_v52  ;;  %v2977_v39 = vrot.slane %v2975_v44, 5  ;;  %v2986_v32 = vshrl.u32 %v11278_v58, 16  ;;  %v2989_v0 = vshll.u32 %v11278_v58, 16  ;;  %v5150_v47 = vld [vmem:[#allocation2 + $0x30] sm:$0xf]  ;;  %v11892_v16 = vpop.f32.mrb[7].mxu0 }
 0x32e   : > { %v5211_v36 = vsel %vm10511_vm14, %v5206_v12, %v5210_v49  ;;  %v2983_v4 = vrot.slane %v2981_v31, 5  ;;  %v2995_v11 = vshll.u32 %v11062_v7, 16  ;;  %v3000_v17 = vshrl.u32 %v13177_v23, 16  ;;  %v11887_v49 = vld [vmem:[#allocation2 + $0x2c] sm:$0x1]  ;;  %v11900_v31 = vld [vmem:[#allocation16 + $0x58] sm:$0xff]  }
 0x32f   : > { %v11883_v10 = vcombine.low %v5197_v46, %v5211_v36  ;;  %v2965_v60 = vrot.slane %v2964_v26, 4  ;;  %v2978_v1 = vor.u32 %v2977_v39, %v2974_v51  ;;  %v2988_v56 = vrot.slane %v2986_v32, 4  ;;  %v11898_v46 = vld [vmem:[#allocation2 + $0x34] sm:$0x1] }
 0x330   : > { %v2991_v53 = vrot.slane %v2989_v0, 5  ;;  %v2997_v5 = vrot.slane %v2995_v11, 5  ;;  %v3003_v58 = vshll.u32 %v13177_v23, 16  ;;  %v3009_v41 = vshll.u32 %v13178_v13, 16  ;;  %8464 = vmatmul.mubr.msk.bf16.vlgmr.msra.gmra.mrb[4].mxu1 %vm1309_vm15, %v8997_v63 }
 0x331   : > { %v2970_v52 = vsel %vm10511_vm14, %v2965_v60, %v2969_v21  ;;  %v2979_v50 = vrot.slane %v2978_v1, 4  ;;  %v5213_v55 = vshrl.u32 %v5148_v2, 16  ;;  %v3002_v8 = vrot.slane %v3000_v17, 4  ;;  %8472 = vmatpush3.bf16.msra.mxu1 %v11819_v6  ;;  %8467 = vmatprep.mubr.msk.bf16.mxu1 %vm1309_vm15, %v8998_v19  ;;  %v8999_v6 = vld [vmem:[#allocation2 + $0x38] ss:$8 sps:$4 sm:$0xff]  }
 0x332   : > { %8344 = vmatmul.mubr.msk.bf16.vlgmr.msra.gmra.mrb[8].mxu0 %vm1309_vm15, %v7847_v29  ;;  %v2992_v35 = vor.u32 %v2991_v53, %v2988_v56  ;;  %v3005_v44 = vrot.slane %v3003_v58, 5  ;;  %v5216_v12 = vshll.u32 %v5148_v2, 16  ;;  %v3011_v26 = vrot.slane %v3009_v41, 5  ;;  %8481 = vmatprep.subr.bf16.mxu1 %v11881_v25  ;;  %v11915_v2 = vld [vmem:[#allocation2 + $0x3c] sm:$0x1] }
 0x333   : > { %8352 = vmatpush3.bf16.msra.mxu0 %v11826_v59  ;;  %v2984_v21 = vsel %vm10511_vm14, %v2979_v50, %v2983_v4  ;;  %v5215_v51 = vrot.slane %v5213_v55, 4  ;;  %v5222_v14 = vshll.u32 %v11887_v49, 16  ;;  %8347 = vmatprep.mubr.msk.bf16.mxu0 %vm1309_vm15, %v7848_v15  ;;  %v5227_v4 = vshrl.u32 %v5150_v47, 16  ;;  %v5154_v1 = vld [vmem:[#allocation2 + $0x40] sm:$0xf] }
 0x334   : > { %v7855_v29 = vcombine.low %v2970_v52, %v2984_v21  ;;  %v2993_v39 = vrot.slane %v2992_v35, 4  ;;  %v3006_v32 = vor.u32 %v3005_v44, %v3002_v8  ;;  %v5218_v36 = vrot.slane %v5216_v12, 5  ;;  %8361 = vmatprep.subr.bf16.mxu0 %v11900_v31  ;;  %v11920_v53 = vld [vmem:[#allocation2 + $0x44] sm:$0x1] }
 0x335   : > { %v5224_v59 = vrot.slane %v5222_v14, 5  ;;  %v5230_v0 = vshll.u32 %v5150_v47, 16  ;;  %v5236_v11 = vshll.u32 %v11898_v46, 16  ;;  %v5241_v56 = vshrl.u32 %v5152_v54, 16  ;;  %v13179_v14 = vld [vmem:[#allocation60_spill] sm:$0xff] }
 0x336   : > { %v2998_v63 = vsel %vm10511_vm14, %v2993_v39, %v2997_v5  ;;  %v3007_v19 = vrot.slane %v3006_v32, 4  ;;  %v5219_v60 = vor.u32 %v5218_v36, %v5215_v51  ;;  %v5229_v20 = vrot.slane %v5227_v4, 4  ;;  %v13180_v39 = vld [vmem:[#allocation138_spill] sm:$0xff] }
 0x337   : > { %v5232_v62 = vrot.slane %v5230_v0, 5  ;;  %v5238_v15 = vrot.slane %v5236_v11, 5  ;;  %v5244_v23 = vshll.u32 %v5152_v54, 16  ;;  %v5243_v52 = vrot.slane %v5241_v56, 4  ;;  %v13182_v56 = vld [vmem:[#allocation108_spill] sm:$0xff] }
 0x338   : > { %v3012_v17 = vsel %vm10511_vm14, %v3007_v19, %v3011_v26  ;;  %v5220_v58 = vrot.slane %v5219_v60, 4  ;;  %v5250_v50 = vshll.u32 %v11915_v2, 16  ;;  %v5255_v55 = vshrl.u32 %v5154_v1, 16  ;;  %8468 = vmatmul.mubr.msk.bf16.gmra.mrb[0].mxu1 %vm1309_vm15, %v8999_v6 }
 0x339   : > { %v7856_v5 = vcombine.low %v2998_v63, %v3012_v17  ;;  %v5233_v41 = vor.u32 %v5232_v62, %v5229_v20  ;;  %v5246_v47 = vrot.slane %v5244_v23, 5  ;;  %v5258_v44 = vshll.u32 %v5154_v1, 16  ;;  %8473 = vmatprep.mubr.msk.bf16.mxu1 %vm1309_vm15, %v11860_v33  ;;  %v13183_v17 = vld [vmem:[#allocation89_spill] sm:$0xff] }
 0x33a   : > { %8348 = vmatmul.mubr.msk.bf16.gmra.mrb[12].mxu0 %vm1309_vm15, %v7849_v43  ;;  %v5225_v35 = vsel %vm10511_vm14, %v5220_v58, %v5224_v59  ;;  %v5252_v8 = vrot.slane %v5250_v50, 5  ;;  %v5264_v12 = vshll.u32 %v11920_v53, 16  ;;  %v5257_v51 = vrot.slane %v5255_v55, 4 }
 0x33b   : > { %8353 = vmatprep.mubr.msk.bf16.mxu0 %vm1309_vm15, %v7855_v29  ;;  %v5234_v21 = vrot.slane %v5233_v41, 4  ;;  %v5247_v26 = vor.u32 %v5246_v47, %v5243_v52  ;;  %v3014_v54 = vshrl.u32 %v13179_v14, 16  ;;  %v5260_v22 = vrot.slane %v5258_v44, 5  ;;  %v13181_v29 = vld [vmem:[#allocation83_spill] sm:$0xff] }
 0x33c   : > { %v5266_v28 = vrot.slane %v5264_v12, 5  ;;  %v3017_v43 = vshll.u32 %v13179_v14, 16  ;;  %v3023_v32 = vshll.u32 %v13180_v39, 16  ;;  %v3028_v0 = vshrl.u32 %v13181_v29, 16  ;;  %v11948_v52 = vld [vmem:[#allocation16 + $0xc0] sm:$0xff]  }
 0x33d   : > { %v5239_v36 = vsel %vm10511_vm14, %v5234_v21, %v5238_v15  ;;  %v5248_v59 = vrot.slane %v5247_v26, 4  ;;  %v3016_v4 = vrot.slane %v3014_v54, 4  ;;  %v5261_v6 = vor.u32 %v5260_v22, %v5257_v51  ;;  %v13184_v47 = vld [vmem:[#allocation139_spill] sm:$0xff]  ;;  %v5375_v14 = vld [vmem:[#allocation2 + $0x10] sm:$0xe] }
 0x33e   : > { %v7997_v11 = vcombine.low %v5225_v35, %v5239_v36  ;;  %v3019_v63 = vrot.slane %v3017_v43, 5  ;;  %v3025_v19 = vrot.slane %v3023_v32, 5  ;;  %v3030_v60 = vrot.slane %v3028_v0, 4  ;;  %v13185_v35 = vld [vmem:[#allocation95_spill] sm:$0xff] }
 0x33f   : > { %v5253_v33 = vsel %vm10511_vm14, %v5248_v59, %v5252_v8  ;;  %v3031_v1 = vshll.u32 %v13181_v29, 16  ;;  %v3037_v20 = vshll.u32 %v13182_v56, 16  ;;  %v5262_v62 = vrot.slane %v5261_v6, 4  ;;  %v5374_v8 = vld [vmem:[#allocation2 + $0x8] sm:$0xe]  ;;  %v13186_v59 = vld [vmem:[#allocation140_spill] sm:$0xff] }
 0x340   : > { %v3020_v23 = vor.u32 %v3019_v63, %v3016_v4  ;;  %v3042_v15 = vshrl.u32 %v13183_v17, 16  ;;  %v3045_v58 = vshll.u32 %v13183_v17, 16  ;;  %v3051_v55 = vshll.u32 %v13184_v47, 16  ;;  %8474 = vmatmul.mubr.msk.bf16.vlgmr.msra.gmra.mrb[4].mxu1 %vm1309_vm15, %v11883_v10  ;;  %v5376_v29 = vld [vmem:[#allocation2 + $0x18] sm:$0xe]  ;;  %v11966_v63 = vld [vmem:[#allocation16 + $0x60] sm:$0xff]  }
 0x341   : > { %v3033_v50 = vrot.slane %v3031_v1, 5  ;;  %v3039_v41 = vrot.slane %v3037_v20, 5  ;;  %v3056_v44 = vshrl.u32 %v13185_v35, 16  ;;  %v5267_v12 = vsel %vm10511_vm14, %v5262_v62, %v5266_v28  ;;  %8482 = vmatpush3.bf16.msra.mxu1 %v11881_v25  ;;  %8477 = vmatprep.mubr.msk.bf16.mxu1 %vm1309_vm15, %v7997_v11 }
 0x342   : > { %8354 = vmatmul.mubr.msk.bf16.vlgmr.msra.gmra.mrb[8].mxu0 %vm1309_vm15, %v7856_v5  ;;  %v3021_v21 = vrot.slane %v3020_v23, 4  ;;  %v3044_v26 = vrot.slane %v3042_v15, 4  ;;  %v3047_v51 = vrot.slane %v3045_v58, 5  ;;  %v7998_v54 = vcombine.low %v5253_v33, %v5267_v12  ;;  %8491 = vmatprep.subr.bf16.mxu1 %v11948_v52  ;;  %v3175_v23 = vld [vmem:[#allocation2] sm:$0xe]  ;;  %v13187_v12 = vld [vmem:[#allocation135_spill] sm:$0xff] }
 0x343   : > { %8362 = vmatpush3.bf16.msra.mxu0 %v11900_v31  ;;  %v3034_v22 = vor.u32 %v3033_v50, %v3030_v60  ;;  %v3053_v43 = vrot.slane %v3051_v55, 5  ;;  %v3058_v32 = vrot.slane %v3056_v44, 4  ;;  %v3059_v36 = vshll.u32 %v13185_v35, 16  ;;  %v5377_v60 = vld [vmem:[#allocation2 + $0x20] sm:$0xe] }
 0x344   : > { %v3026_v5 = vsel %vm10511_vm14, %v3021_v21, %v3025_v19  ;;  %v3048_v28 = vor.u32 %v3047_v51, %v3044_v26  ;;  %v3065_v4 = vshll.u32 %v13186_v59, 16  ;;  %v8004_v0 = vrot.slane %v5374_v8, 9  ;;  %8371 = vmatprep.subr.bf16.mxu0 %v11966_v63  ;;  %v5378_v26 = vld [vmem:[#allocation2 + $0x28] sm:$0xe] }
 0x345   : > { %v3035_v10 = vrot.slane %v3034_v22, 4  ;;  %v5400_v31 = vrot.slane %v11807_v27, 5  ;;  %v8005_v6 = vrot.slane %v5375_v14, 9  ;;  %v3061_v11 = vrot.slane %v3059_v36, 5  ;;  %v13188_v22 = vld [vmem:[#allocation73_spill] sm:$0xff] }
 0x346   : > { %v3049_v25 = vrot.slane %v3048_v28, 4  ;;  %v3067_v19 = vrot.slane %v3065_v4, 5  ;;  %v5404_v33 = vrot.slane %v11815_v37, 5  ;;  %v8006_v27 = vrot.slane %v5376_v29, 9  ;;  %v5380_v4 = vld [vmem:[#allocation2 + $0x38] sm:$0xe] }
 0x347   : > { %v3040_v1 = vsel %vm10511_vm14, %v3035_v10, %v3039_v41  ;;  %v5401_v20 = vsel %vm11097_vm2, %v8004_v0, %v5400_v31  ;;  %v5408_v62 = vrot.slane %v11823_v40, 5  ;;  %v3062_v58 = vor.u32 %v3061_v11, %v3058_v32  ;;  %v5379_v32 = vld [vmem:[#allocation2 + $0x30] sm:$0xe]  ;;  %v5381_v0 = vld [vmem:[#allocation2 + $0x40] sm:$0xe] }
 0x348   : > { %v7857_v17 = vcombine.low %v3026_v5, %v3040_v1  ;;  %v3054_v15 = vsel %vm10511_vm14, %v3049_v25, %v3053_v43  ;;  %v5405_v50 = vsel %vm11097_vm2, %v8005_v6, %v5404_v33  ;;  %v8007_v41 = vrot.slane %v5377_v60, 9  ;;  %8478 = vmatmul.mubr.msk.bf16.gmra.mrb[0].mxu1 %vm1309_vm15, %v7998_v54  ;;  %v13189_v54 = vld [vmem:[#allocation66_spill] sm:$0xff] }
 0x349   : > { %v8012_v37 = vcombine.low %v5401_v20, %v5405_v50  ;;  %v5409_v55 = vsel %vm11097_vm2, %v8006_v27, %v5408_v62  ;;  %v5412_v35 = vrot.slane %v11835_v45, 5  ;;  %v3063_v44 = vrot.slane %v3062_v58, 4 }
 0x34a   : > { %8357 = vmatprep.mubr.msk.bf16.mxu0 %vm1309_vm15, %v7857_v17  ;;  %v7864_v40 = vrot.slane %v3175_v23, 9  ;;  %v3201_v8 = vrot.slane %v11844_v3, 5  ;;  %v7865_v21 = vrot.slane %v13187_v12, 9  ;;  %v3205_v14 = vrot.slane %v13176_v30, 5  ;;  %v12033_v12 = vld [vmem:[#allocation19] ss:$0 sm:$0xff] }
 0x34b   : > { %v5413_v51 = vsel %vm11097_vm2, %v8007_v41, %v5412_v35  ;;  %v7866_v43 = vrot.slane %v13188_v22, 9  ;;  %v3209_v45 = vrot.slane %v11062_v7, 5  ;;  %v3068_v5 = vsel %vm10511_vm14, %v3063_v44, %v3067_v19  ;;  %8483 = vmatprep.mubr.msk.bf16.mxu1 %vm1309_vm15, %v8012_v37  ;;  %v13191_v37 = vld [vmem:[#allocation109_spill] sm:$0xff]  ;;  %v13194_v22 = vld [vmem:[#allocation116_spill] sm:$0xff] }
 0x34c   : > { %v8013_v3 = vcombine.low %v5409_v55, %v5413_v51  ;;  %v3202_v28 = vsel %vm11097_vm2, %v7864_v40, %v3201_v8  ;;  %v7867_v36 = vrot.slane %v13189_v54, 9  ;;  %v7858_v29 = vcombine.low %v3054_v15, %v3068_v5  ;;  %v12020_v15 = vld [vmem:[#allocation16 + $0xc8] sm:$0xff]   ;;  %v7234_v41 = vld [vmem:[#allocation18] sm:$0xf] }
 0x34d   : > { %v3206_v30 = vsel %vm11097_vm2, %v7865_v21, %v3205_v14  ;;  %v3210_v7 = vsel %vm11097_vm2, %v7866_v43, %v3209_v45  ;;  %v3213_v10 = vrot.slane %v13178_v13, 5  ;;  %v8008_v6 = vrot.slane %v5378_v26, 9  ;;  %v12035_v21 = vld [vmem:[#allocation3] sm:$0xf] }
 0x34e   : > { %v7872_v31 = vcombine.low %v3202_v28, %v3206_v30  ;;  %v5416_v25 = vrot.slane %v11887_v49, 5  ;;  %v8009_v11 = vrot.slane %v5379_v32, 9  ;;  %8358 = vmatmul.mubr.msk.bf16.gmra.mrb[12].mxu0 %vm1309_vm15, %v7858_v29  ;;  %v5420_v33 = vrot.slane %v11898_v46, 5  ;;  %v13190_v46 = vld [vmem:[#allocation63_spill] sm:$0xff]  ;;  %v13193_v26 = vld [vmem:[#allocation64_spill] sm:$0xff] }
 0x34f   : > { %v3214_v19 = vsel %vm11097_vm2, %v7867_v36, %v3213_v10  ;;  %v8010_v60 = vrot.slane %v5380_v4, 9  ;;  %v5424_v1 = vrot.slane %v11915_v2, 5  ;;  %v8011_v27 = vrot.slane %v5381_v0, 9  ;;  %v13195_v43 = vld [vmem:[#allocation136_spill] sm:$0xff]  ;;  %v12045_v32 = vld [vmem:[#allocation3 + $0x8] sm:$0xf] }
 0x350   : > { %8363 = vmatprep.mubr.msk.bf16.mxu0 %vm1309_vm15, %v7872_v31  ;;  %v7873_v13 = vcombine.low %v3210_v7, %v3214_v19  ;;  %v5417_v20 = vsel %vm11097_vm2, %v8008_v6, %v5416_v25  ;;  %v5428_v49 = vrot.slane %v11920_v53, 5  ;;  %v5421_v62 = vsel %vm11097_vm2, %v8009_v11, %v5420_v33  ;;  %8484 = vmatmul.mubr.msk.bf16.vlgmr.msra.gmra.mrb[4].mxu1 %vm1309_vm15, %v8013_v3  ;;  %v13196_v3 = vld [vmem:[#allocation67_spill] sm:$0xff]  ;;  %v9004_v4 = vld [vmem:[#allocation2 + $0x10] ss:$8 sps:$4 sm:$0xff]   ;;  %v12063_v7 = vld [vmem:[#allocation3 + $0xc] sm:$0x1] }
 0x351   : > { %v12016_v23 = vsel %vm11097_vm2, %v8010_v60, %v5424_v1  ;;  %v7868_v17 = vrot.slane %v13190_v46, 9  ;;  %v3217_v2 = vrot.slane %v13180_v39, 5  ;;  %v8014_v58 = vcombine.low %v5417_v20, %v5421_v62  ;;  %v13192_v39 = vld [vmem:[#allocation61_spill] sm:$0xff]  ;;  %8492 = vmatpush3.bf16.msra.mxu1 %v11948_v52  ;;  %v13197_v28 = vld [vmem:[#allocation115_spill] sm:$0xff]  ;;  %v6337_v31 = vld [vmem:[#allocation3] sm:$0xe] }
 0x352   : > { %v5429_v50 = vsel %vm11097_vm2, %v8011_v27, %v5428_v49  ;;  %v7869_v55 = vrot.slane %v13191_v37, 9  ;;  %v3221_v53 = vrot.slane %v13182_v56, 5  ;;  %v7870_v40 = vrot.slane %v13192_v39, 9  ;;  %8501 = vmatprep.subr.bf16.mxu1 %v12020_v15  ;;  %v12067_v6 = vld [vmem:[#allocation3 + $0x8] sm:$0xf] }
 0x353   : > { %v8015_v35 = vcombine.low %v12016_v23, %v5429_v50  ;;  %v3218_v44 = vsel %vm11097_vm2, %v7868_v17, %v3217_v2  ;;  %v3225_v8 = vrot.slane %v13184_v47, 5  ;;  %8487 = vmatprep.mubr.msk.bf16.mxu1 %vm1309_vm15, %v8014_v58  ;;  %v7871_v51 = vrot.slane %v13193_v26, 9  ;;  %v12047_v47 = vld [vmem:[#allocation3 + $0x4] sm:$0x1]  ;;  %v6361_v25 = vld [vmem:[#allocation3 + $0x8] sm:$0xe] }
 0x354   : > { %v3222_v56 = vsel %vm11097_vm2, %v7869_v55, %v3221_v53  ;;  %v3229_v14 = vrot.slane %v13186_v59, 5  ;;  %v7881_v45 = vcombine.low %v13195_v43, %v13194_v22  ;;  %v7882_v54 = vcombine.low %v13197_v28, %v13196_v3  ;;  %v6353_v60 = vld [vmem:[#allocation3 + $0xc] sm:$0x1]  ;;  %v12076_v20 = vld [vmem:[#allocation3 + $0x10] sm:$0xf] }
 0x355   : > { %v7874_v5 = vcombine.low %v3218_v44, %v3222_v56  ;;  %v3226_v52 = vsel %vm11097_vm2, %v7870_v40, %v3225_v8  ;;  %v12055_v36 = vsel %vm865_vm4, %v7234_v41, 0  ;;  %v912_v29 = vadd.f32 %v11625_v61, %v12033_v12  ;;  %v6354_v56 = vld [vmem:[#allocation3 + $0x14] sm:$0x1] }
 0x356   : > { %v3230_v59 = vsel %vm11097_vm2, %v7871_v51, %v3229_v14  ;;  %v904_v30 = vadd.f32 %v12033_v12, %v11629_v24  ;;  %v6395_v10 = vshrl.u32 %v12035_v21, 16  ;;  %8364 = vmatmul.mubr.msk.bf16.vlgmr.msra.gmra.mrb[8].mxu0 %vm1309_vm15, %v7873_v13  ;;  %v6398_v11 = vshll.u32 %v12035_v21, 16 }
 0x357   : > { %v7875_v0 = vcombine.low %v3226_v52, %v3230_v59  ;;  %v6404_v19 = vshll.u32 %v12047_v47, 16  ;;  %v6409_v61 = vshrl.u32 %v12045_v32, 16  ;;  %8372 = vmatpush3.bf16.msra.mxu0 %v11966_v63  ;;  %8367 = vmatprep.mubr.msk.bf16.mxu0 %vm1309_vm15, %v7874_v5  ;;  %v936_v24 = vmax.f32 %v912_v29, 0.0  ;;  %v6338_v63 = vld [vmem:[#allocation3 + $0x8] sm:$0xe] }
 0x358   : > { %v934_v33 = vmax.f32 %v904_v30, 0.0  ;;  %v6397_v1 = vrot.slane %v6395_v10, 4  ;;  %v6412_v13 = vshll.u32 %v12045_v32, 16  ;;  %8742 = vmatprep.subr.msk.bf16.mxu0 %vm865_vm4, %v7234_v41  ;;  %v6400_v27 = vrot.slane %v6398_v11, 5  ;;  %8488 = vmatmul.mubr.msk.bf16.gmra.mrb[0].mxu1 %vm1309_vm15, %v8015_v35  ;;  %v6362_v41 = vld [vmem:[#allocation3 + $0x10] sm:$0xe] }
 0x359   : > { %v6406_v49 = vrot.slane %v6404_v19, 5  ;;  %v6411_v62 = vrot.slane %v6409_v61, 4  ;;  %v6418_v23 = vshll.u32 %v12063_v7, 16  ;;  %944 = vst.msk [vmem:[%s12081_s1 + $0x10] sm:$0xff] %vm852_vm5, %v936_v24  ;;  %v6530_v17 = vrot.slane %v12067_v6, 7  ;;  %8493 = vmatprep.mubr.msk.bf16.mxu1 %vm1309_vm15, %v9004_v4 }
 0x35a   : > { %942 = vst.msk [vmem:[%s12081_s1] sm:$0xff] %vm852_vm5, %v934_v33  ;;  %v6414_v46 = vrot.slane %v6412_v13, 5  ;;  %v6532_v2 = vrot.slane %v12076_v20, 7  ;;  %v6579_v58 = vshrl.u32 %v6361_v25, 16  ;;  %v6401_v50 = vor.u32 %v6400_v27, %v6397_v1  ;;  %v9006_v29 = vld [vmem:[#allocation2 + $0x20] ss:$8 sps:$4 sm:$0xff]  }
 0x35b   : > { %v6420_v37 = vrot.slane %v6418_v23, 5  ;;  %v6582_v55 = vshll.u32 %v6361_v25, 16  ;;  %v6588_v53 = vshll.u32 %v6353_v60, 16  ;;  %v6531_v39 = vrot.slane %v6530_v17, 4  ;;  %v12101_v30 = vld [vmem:[#allocation3 + $0x10] sm:$0xf] }
 0x35c   : > { %v6415_v44 = vor.u32 %v6414_v46, %v6411_v62  ;;  %v12091_v40 = vrot.slane %v6532_v2, 4  ;;  %v12093_v8 = vmax.bf16 %v6530_v17, %v6337_v31  ;;  %v6402_v26 = vrot.slane %v6401_v50, 4  ;;  %v12109_v19 = vld [vmem:[#allocation3 + $0x14] sm:$0x1]  ;;  %v12116_v33 = vld [vmem:[#allocation3 + $0x18] sm:$0xf] }
 0x35d   : > { %v12095_v51 = vmax.bf16 %v6532_v2, %v6338_v63  ;;  %v6581_v14 = vrot.slane %v6579_v58, 4  ;;  %v6584_v5 = vrot.slane %v6582_v55, 5  ;;  %v6563_v52 = vmax.bf16 %v6531_v39, %v12047_v47  ;;  %v9007_v47 = vld [vmem:[#allocation2 + $0x30] ss:$8 sps:$4 sm:$0xff]   ;;  %v6379_v27 = vld [vmem:[#allocation3 + $0x1c] sm:$0x1] }
 0x35e   : > { %v6416_v35 = vrot.slane %v6415_v44, 4  ;;  %v6565_v59 = vmax.bf16 %v12091_v40, %v12063_v7  ;;  %v6590_v4 = vrot.slane %v6588_v53, 5  ;;  %8368 = vmatmul.mubr.msk.bf16.gmra.mrb[12].mxu0 %vm1309_vm15, %v7875_v0  ;;  %v6407_v10 = vsel %vm10511_vm14, %v6402_v26, %v6406_v49  ;;  %v9008_v39 = vld [vmem:[#allocation2 + $0x40] ss:$8 sps:$4 sm:$0xff]  }
 0x35f   : > { %v6585_v31 = vor.u32 %v6584_v5, %v6581_v14  ;;  %v6592_v25 = vshrl.u32 %v6353_v60, 16  ;;  %v6597_v11 = vshrl.u32 %v6362_v41, 16  ;;  %8373 = vmatprep.mubr.msk.bf16.mxu0 %vm1309_vm15, %v7881_v45  ;;  %v12114_v0 = vmax.bf16 %v6407_v10, %v12035_v21  ;;  %v12121_v45 = vld [vmem:[#allocation16 + $0xd0] sm:$0xff]  }
 0x360   : > { %v6421_v7 = vsel %vm10511_vm14, %v6416_v35, %v6420_v37  ;;  %v6600_v61 = vshll.u32 %v6362_v41, 16  ;;  %v6606_v24 = vshll.u32 %v6354_v56, 16  ;;  %v6610_v43 = vshrl.u32 %v6354_v56, 16  ;;  %8494 = vmatmul.mubr.msk.bf16.vlgmr.msra.gmra.mrb[4].mxu1 %vm1309_vm15, %v9006_v29  ;;  %v6386_v37 = vld [vmem:[#allocation3 + $0x10] sm:$0xe] }
 0x361   : > { %v12119_v1 = vmax.bf16 %v6421_v7, %v12045_v32  ;;  %v6586_v13 = vrot.slane %v6585_v31, 4  ;;  %v6599_v22 = vrot.slane %v6597_v11, 4  ;;  %v12123_v23 = vmax.bf16 %v6592_v25, %v6353_v60  ;;  %8502 = vmatpush3.bf16.msra.mxu1 %v12020_v15  ;;  %8497 = vmatprep.mubr.msk.bf16.mxu1 %vm1309_vm15, %v9007_v47  ;;  %v5658_v25 = vld [vmem:[#allocation2 + $0x10] sm:$0xf]  ;;  %v5659_v7 = vld [vmem:[#allocation2 + $0x14] sm:$0x1] }
 0x362   : > { %v6602_v49 = vrot.slane %v6600_v61, 5  ;;  %v6608_v62 = vrot.slane %v6606_v24, 5  ;;  %v6755_v21 = vshrl.u32 %v12101_v30, 16  ;;  %v12129_v46 = vmax.bf16 %v6610_v43, %v6354_v56  ;;  %8511 = vmatprep.subr.bf16.mxu1 %v12121_v45  ;;  %v5660_v43 = vld [vmem:[#allocation2 + $0x18] sm:$0xf] }
 0x363   : > { %v6591_v63 = vsel %vm10511_vm14, %v6586_v13, %v6590_v4  ;;  %v6758_v32 = vshll.u32 %v12101_v30, 16  ;;  %v6764_v17 = vshll.u32 %v12109_v19, 16  ;;  %v6769_v50 = vshrl.u32 %v12116_v33, 16 }
 0x364   : > { %v6603_v2 = vor.u32 %v6602_v49, %v6599_v22  ;;  %v12136_v60 = vmax.bf16 %v6591_v63, %v12067_v6  ;;  %v6757_v58 = vrot.slane %v6755_v21, 4  ;;  %v6772_v41 = vshll.u32 %v12116_v33, 16  ;;  %v6387_v6 = vld [vmem:[#allocation3 + $0x18] sm:$0xe]  ;;  %v5661_v21 = vld [vmem:[#allocation2 + $0x1c] sm:$0x1] }
 0x365   : > { %v6760_v55 = vrot.slane %v6758_v32, 5  ;;  %v6766_v53 = vrot.slane %v6764_v17, 5  ;;  %v6778_v44 = vshll.u32 %v6379_v27, 16  ;;  %v6771_v15 = vrot.slane %v6769_v50, 4 }
 0x366   : > { %v6604_v40 = vrot.slane %v6603_v2, 4  ;;  %v8065_v56 = vrot.slane %v12093_v8, 9  ;;  %v6900_v26 = vrot.slane %v6563_v52, 5  ;;  %8374 = vmatmul.mubr.msk.bf16.vlgmr.msra.gmra.mrb[8].mxu0 %vm1309_vm15, %v7882_v54  ;;  %v6774_v5 = vrot.slane %v6772_v41, 5 }
 0x367   : > { %v6761_v14 = vor.u32 %v6760_v55, %v6757_v58  ;;  %v6780_v35 = vrot.slane %v6778_v44, 5  ;;  %v8066_v4 = vrot.slane %v12095_v51, 9  ;;  %8522 = vmatpush3.bf16.msra.mxu0 %v12055_v36  ;;  %v6904_v52 = vrot.slane %v6565_v59, 5  ;;  %v12181_v58 = vld [vmem:[#allocation3 + $0x10] sm:$0xf] }
 0x368   : > { %v6609_v29 = vsel %vm10511_vm14, %v6604_v40, %v6608_v62  ;;  %v12152_v8 = vsel %vm11097_vm2, %v8065_v56, %v6900_v26  ;;  %v8073_v10 = vrot.slane %v6386_v37, 9  ;;  %v6775_v54 = vor.u32 %v6774_v5, %v6771_v15  ;;  %8498 = vmatmul.mubr.msk.bf16.gmra.mrb[0].mxu1 %vm1309_vm15, %v9008_v39 }
 0x369   : > { %v6740_v3 = vmax.bf16 %v6609_v29, %v12076_v20  ;;  %v6762_v28 = vrot.slane %v6761_v14, 4  ;;  %v6938_v31 = vmax.bf16 %v12152_v8, %v12114_v0  ;;  %v12159_v36 = vsel %vm11097_vm2, %v8066_v4, %v6904_v52  ;;  %v12186_v4 = vld [vmem:[#allocation3 + $0x14] sm:$0x1]  ;;  %v6356_v0 = vld [vmem:[#allocation3 + $0x24] sm:$0x1] }
 0x36a   : > { %v7188_v51 = vrot.slane %v12109_v19, 5  ;;  %v8074_v11 = vrot.slane %v6387_v6, 9  ;;  %v7192_v47 = vrot.slane %v6379_v27, 5  ;;  %v6776_v59 = vrot.slane %v6775_v54, 4 }
 0x36b   : > { %v6767_v20 = vsel %vm10511_vm14, %v6762_v28, %v6766_v53  ;;  %v6939_v61 = vmax.bf16 %v12159_v36, %v12119_v1  ;;  %v915_v24 = vadd.f32 %v11695_v57, %v12033_v12  ;;  %v5675_v27 = vshrl.u32 %v5658_v25, 16  ;;  %v6380_v36 = vld [vmem:[#allocation3 + $0x24] sm:$0x1] }
 0x36c   : > { %v6874_v13 = vmax.bf16 %v6767_v20, %v12101_v30  ;;  %v12172_v19 = vsel %vm11097_vm2, %v8073_v10, %v7188_v51  ;;  %v12176_v22 = vsel %vm11097_vm2, %v8074_v11, %v7192_v47  ;;  %v6781_v49 = vsel %vm10511_vm14, %v6776_v59, %v6780_v35 }
 0x36d   : > { %v937_v62 = vmax.f32 %v915_v24, 0.0  ;;  %v5678_v63 = vshll.u32 %v5658_v25, 16  ;;  %v5684_v57 = vshll.u32 %v5659_v7, 16  ;;  %v6875_v32 = vmax.bf16 %v6781_v49, %v12116_v33 }
 0x36e   : > { %v6947_v30 = vshrl.u32 %v6874_v13, 16  ;;  %v6950_v17 = vshll.u32 %v6874_v13, 16  ;;  %v5677_v2 = vrot.slane %v5675_v27, 4  ;;  %v5689_v55 = vshrl.u32 %v5660_v43, 16 }
 0x36f   : > { %945 = vst.msk [vmem:[%s12081_s1 + $0x18] sm:$0xff] %vm852_vm5, %v937_v62  ;;  %v5680_v50 = vrot.slane %v5678_v63, 5  ;;  %v5686_v37 = vrot.slane %v5684_v57, 5  ;;  %v5692_v53 = vshll.u32 %v5660_v43, 16  ;;  %v6955_v44 = vshrl.u32 %v6875_v32, 16 }
 0x370   : > { %v6949_v41 = vrot.slane %v6947_v30, 7  ;;  %v6958_v39 = vshll.u32 %v6875_v32, 16  ;;  %v5698_v40 = vshll.u32 %v5661_v21, 16  ;;  %v5691_v56 = vrot.slane %v5689_v55, 4  ;;  %v12197_v21 = vld [vmem:[#allocation3 + $0x18] sm:$0xf] }
 0x371   : > { %v5681_v15 = vor.u32 %v5680_v50, %v5677_v2  ;;  %v5694_v26 = vrot.slane %v5692_v53, 5  ;;  %v6423_v33 = vshrl.u32 %v12181_v58, 16  ;;  %v6957_v5 = vrot.slane %v6955_v44, 7 }
 0x372   : > { %v6952_v6 = vor.u32 %v6950_v17, %v6949_v41  ;;  %v6953_v14 = vrot.slane %v6949_v41, 4  ;;  %v5700_v35 = vrot.slane %v5698_v40, 5  ;;  %v6426_v28 = vshll.u32 %v12181_v58, 16  ;;  %v12199_v17 = vld [vmem:[#allocation3 + $0x1c] sm:$0x1] }
 0x373   : > { %v5682_v29 = vrot.slane %v5681_v15, 4  ;;  %v5695_v52 = vor.u32 %v5694_v26, %v5691_v56  ;;  %v6425_v10 = vrot.slane %v6423_v33, 4  ;;  %v6960_v54 = vor.u32 %v6958_v39, %v6957_v5  ;;  %v6339_v39 = vld [vmem:[#allocation3 + $0x10] sm:$0xe]  ;;  %v6363_v40 = vld [vmem:[#allocation3 + $0x18] sm:$0xe] }
 0x374   : > { %v6961_v25 = vrot.slane %v6957_v5, 4  ;;  %v7026_v51 = vmax.bf16 %v6952_v6, %v12136_v60  ;;  %v7027_v11 = vmax.bf16 %v6953_v14, %v12123_v23  ;;  %v6428_v20 = vrot.slane %v6426_v28, 5  ;;  %v6347_v14 = vld [vmem:[#allocation3 + $0x18] sm:$0xf]  ;;  %v12207_v5 = vld [vmem:[#allocation3 + $0x20] sm:$0xf] }
 0x375   : > { %v5687_v47 = vsel %vm10511_vm14, %v5682_v29, %v5686_v37  ;;  %v5696_v7 = vrot.slane %v5695_v52, 4  ;;  %v6432_v59 = vshll.u32 %v12186_v4, 16  ;;  %v7028_v24 = vmax.bf16 %v6960_v54, %v6740_v3  ;;  %v6340_v52 = vld [vmem:[#allocation3 + $0x18] sm:$0xe] }
 0x376   : > { %v7029_v13 = vmax.bf16 %v6961_v25, %v12129_v46  ;;  %v7043_v43 = vshrl.u32 %v7026_v51, 16  ;;  %v7046_v27 = vshll.u32 %v7026_v51, 16  ;;  %v7052_v49 = vshll.u32 %v7027_v11, 16 }
 0x377   : > { %v5701_v62 = vsel %vm10511_vm14, %v5696_v7, %v5700_v35  ;;  %v6429_v60 = vor.u32 %v6428_v20, %v6425_v10  ;;  %v6434_v23 = vrot.slane %v6432_v59, 5  ;;  %v7057_v32 = vshrl.u32 %v7028_v24, 16  ;;  %v6355_v59 = vld [vmem:[#allocation3 + $0x1c] sm:$0x1] }
 0x378   : > { %v7045_v63 = vrot.slane %v7043_v43, 4  ;;  %v7048_v57 = vrot.slane %v7046_v27, 5  ;;  %v7060_v30 = vshll.u32 %v7028_v24, 16  ;;  %v7054_v2 = vrot.slane %v7052_v49, 5  ;;  %v6364_v27 = vld [vmem:[#allocation3 + $0x20] sm:$0xe] }
 0x379   : > { %v7066_v3 = vshll.u32 %v7029_v13, 16  ;;  %v8030_v50 = vcombine.low %v5687_v47, %v5701_v62  ;;  %v6430_v46 = vrot.slane %v6429_v60, 4  ;;  %v7059_v55 = vrot.slane %v7057_v32, 4 }
 0x37a   : > { %v7049_v37 = vor.u32 %v7048_v57, %v7045_v63  ;;  %v7062_v53 = vrot.slane %v7060_v30, 5  ;;  %v6437_v41 = vshrl.u32 %v12197_v21, 16  ;;  %v6440_v56 = vshll.u32 %v12197_v21, 16 }
 0x37b   : > { %v7068_v44 = vrot.slane %v7066_v3, 5  ;;  %8503 = vmatprep.mubr.msk.bf16.mxu1 %vm1309_vm15, %v8030_v50  ;;  %v6435_v15 = vsel %vm10511_vm14, %v6430_v46, %v6434_v23  ;;  %v6446_v26 = vshll.u32 %v12199_v17, 16  ;;  %v6534_v54 = vrot.slane %v6347_v14, 7  ;;  %v6372_v50 = vld [vmem:[#allocation3 + $0x20] sm:$0xf] }
 0x37c   : > { %v7050_v33 = vrot.slane %v7049_v37, 4  ;;  %v7063_v6 = vor.u32 %v7062_v53, %v7059_v55  ;;  %v6439_v35 = vrot.slane %v6437_v41, 4  ;;  %v12210_v29 = vmax.bf16 %v6435_v15, %v12181_v58 }
 0x37d   : > { %v6442_v10 = vrot.slane %v6440_v56, 5  ;;  %v6448_v28 = vrot.slane %v6446_v26, 5  ;;  %v6536_v25 = vrot.slane %v12207_v5, 7  ;;  %v6615_v47 = vshrl.u32 %v6363_v40, 16  ;;  %v6381_v26 = vld [vmem:[#allocation3 + $0x2c] sm:$0x1] }
 0x37e   : > { %v7055_v51 = vsel %vm10511_vm14, %v7050_v33, %v7054_v2  ;;  %v7064_v11 = vrot.slane %v7063_v6, 4  ;;  %v6618_v7 = vshll.u32 %v6363_v40, 16  ;;  %v6535_v58 = vrot.slane %v6534_v54, 4 }
 0x37f   : > { %v7162_v20 = vmax.bf16 %v7055_v51, %v6938_v31  ;;  %v6443_v24 = vor.u32 %v6442_v10, %v6439_v35  ;;  %v6537_v13 = vrot.slane %v6536_v25, 4  ;;  %v6566_v49 = vmax.bf16 %v6534_v54, %v6339_v39 }
 0x380   : > { %v7069_v43 = vsel %vm10511_vm14, %v7064_v11, %v7068_v44  ;;  %v12220_v62 = vmax.bf16 %v6536_v25, %v6340_v52  ;;  %v6617_v60 = vrot.slane %v6615_v47, 4  ;;  %v6567_v31 = vmax.bf16 %v6535_v58, %v12186_v4 }
 0x381   : > { %v7163_v23 = vmax.bf16 %v7069_v43, %v6939_v61  ;;  %v7226_v63 = vmax.bf16 %v12172_v19, %v7162_v20  ;;  %v6444_v8 = vrot.slane %v6443_v24, 4  ;;  %v6569_v57 = vmax.bf16 %v6537_v13, %v12199_v17  ;;  %v6373_v17 = vld [vmem:[#allocation3 + $0x28] sm:$0xf] }
 0x382   : > { %v6620_v32 = vrot.slane %v6618_v7, 5  ;;  %v6624_v30 = vshll.u32 %v6355_v59, 16  ;;  %v6628_v2 = vshrl.u32 %v6355_v59, 16  ;;  %v6633_v37 = vshrl.u32 %v6364_v27, 16  ;;  %v6388_v7 = vld [vmem:[#allocation3 + $0x20] sm:$0xe] }
 0x383   : > { %v7227_v3 = vmax.bf16 %v12176_v22, %v7163_v23  ;;  %v6449_v46 = vsel %vm10511_vm14, %v6444_v8, %v6448_v28  ;;  %v6636_v1 = vshll.u32 %v6364_v27, 16  ;;  %v6642_v4 = vshll.u32 %v6356_v0, 16  ;;  %v6389_v13 = vld [vmem:[#allocation3 + $0x28] sm:$0xe] }
 0x384   : > { %v12232_v61 = vmax.bf16 %v6449_v46, %v12197_v21  ;;  %v6621_v19 = vor.u32 %v6620_v32, %v6617_v60  ;;  %v6626_v55 = vrot.slane %v6624_v30, 5  ;;  %v6635_v41 = vrot.slane %v6633_v37, 4 }
 0x385   : > { %v8082_v53 = vcombine.low %v7226_v63, %v7227_v3  ;;  %v6638_v44 = vrot.slane %v6636_v1, 5  ;;  %v6646_v39 = vshrl.u32 %v6356_v0, 16  ;;  %v6644_v22 = vrot.slane %v6642_v4, 5  ;;  %v5662_v3 = vld [vmem:[#allocation2 + $0x20] sm:$0xf] }
 0x386   : > { %v6622_v40 = vrot.slane %v6621_v19, 4  ;;  %v12234_v15 = vmax.bf16 %v6628_v2, %v6355_v59  ;;  %v6783_v56 = vshrl.u32 %v6372_v50, 16  ;;  %v6786_v21 = vshll.u32 %v6372_v50, 16 }
 0x387   : > { %8523 = vmatprep.mubr.msk.bf16.mxu0 %vm852_vm5, %v8082_v53  ;;  %v6639_v33 = vor.u32 %v6638_v44, %v6635_v41  ;;  %v12237_v6 = vmax.bf16 %v6646_v39, %v6356_v0  ;;  %v6792_v35 = vshll.u32 %v6380_v36, 16  ;;  %v6797_v28 = vshrl.u32 %v6373_v17, 16 }
 0x388   : > { %v6627_v52 = vsel %vm10511_vm14, %v6622_v40, %v6626_v55  ;;  %v6785_v10 = vrot.slane %v6783_v56, 4  ;;  %v6800_v54 = vshll.u32 %v6373_v17, 16  ;;  %v6788_v11 = vrot.slane %v6786_v21, 5  ;;  %v5664_v40 = vld [vmem:[#allocation2 + $0x28] sm:$0xf] }
 0x389   : > { %v6640_v25 = vrot.slane %v6639_v33, 4  ;;  %v12241_v51 = vmax.bf16 %v6627_v52, %v6347_v14  ;;  %v6794_v47 = vrot.slane %v6792_v35, 5  ;;  %v6799_v20 = vrot.slane %v6797_v28, 4 }
 0x38a   : > { %v6802_v59 = vrot.slane %v6800_v54, 5  ;;  %v6806_v24 = vshll.u32 %v6381_v26, 16  ;;  %v8067_v58 = vrot.slane %v6566_v49, 9  ;;  %v6789_v27 = vor.u32 %v6788_v11, %v6785_v10 }
 0x38b   : > { %v6645_v43 = vsel %vm10511_vm14, %v6640_v25, %v6644_v22  ;;  %v6908_v60 = vrot.slane %v6567_v31, 5  ;;  %v8068_v23 = vrot.slane %v12220_v62, 9  ;;  %v6912_v8 = vrot.slane %v6569_v57, 5  ;;  %v12257_v31 = vld [vmem:[#allocation2 + $0x24] sm:$0x1] }
 0x38c   : > { %v6744_v63 = vmax.bf16 %v6645_v43, %v12207_v5  ;;  %v6803_v0 = vor.u32 %v6802_v59, %v6799_v20  ;;  %v6808_v14 = vrot.slane %v6806_v24, 5  ;;  %v6790_v32 = vrot.slane %v6789_v27, 4  ;;  %v12275_v22 = vld [vmem:[#allocation2 + $0x2c] sm:$0x1] }
 0x38d   : > { %v12249_v30 = vsel %vm11097_vm2, %v8067_v58, %v6908_v60  ;;  %v8075_v2 = vrot.slane %v6388_v7, 9  ;;  %v7196_v49 = vrot.slane %v6380_v36, 5  ;;  %v12253_v37 = vsel %vm11097_vm2, %v8068_v23, %v6912_v8 }
 0x38e   : > { %v6804_v46 = vrot.slane %v6803_v0, 4  ;;  %v6940_v62 = vmax.bf16 %v12249_v30, %v12210_v29  ;;  %v8076_v5 = vrot.slane %v6389_v13, 9  ;;  %v6795_v57 = vsel %vm10511_vm14, %v6790_v32, %v6794_v47 }
 0x38f   : > { %v6941_v1 = vmax.bf16 %v12253_v37, %v12232_v61  ;;  %v12265_v36 = vsel %vm11097_vm2, %v8075_v2, %v7196_v49  ;;  %v7200_v19 = vrot.slane %v6381_v26, 5  ;;  %v6876_v4 = vmax.bf16 %v6795_v57, %v6372_v50 }
 0x390   : > { %v6809_v55 = vsel %vm10511_vm14, %v6804_v46, %v6808_v14  ;;  %v907_v53 = vadd.f32 %v12033_v12, %v11864_v38  ;;  %v5703_v41 = vshrl.u32 %v5662_v3, 16  ;;  %v5706_v56 = vshll.u32 %v5662_v3, 16 }
 0x391   : > { %v6877_v44 = vmax.bf16 %v6809_v55, %v6373_v17  ;;  %v12273_v39 = vsel %vm11097_vm2, %v8076_v5, %v7200_v19  ;;  %v5712_v26 = vshll.u32 %v12257_v31, 16  ;;  %v6963_v33 = vshrl.u32 %v6876_v4, 16  ;;  %v5666_v55 = vld [vmem:[#allocation2 + $0x30] sm:$0xf] }
 0x392   : > { %v6966_v21 = vshll.u32 %v6876_v4, 16  ;;  %v935_v35 = vmax.f32 %v907_v53, 0.0  ;;  %v5705_v50 = vrot.slane %v5703_v41, 4  ;;  %v5708_v38 = vrot.slane %v5706_v56, 5  ;;  %v5668_v56 = vld [vmem:[#allocation2 + $0x38] sm:$0xf] }
 0x393   : > { %v6971_v52 = vshrl.u32 %v6877_v44, 16  ;;  %v6974_v10 = vshll.u32 %v6877_v44, 16  ;;  %v5714_v28 = vrot.slane %v5712_v26, 5  ;;  %v6965_v54 = vrot.slane %v6963_v33, 7 }
 0x394   : > { %943 = vst.msk [vmem:[%s12081_s1 + $0x8] sm:$0xff] %vm852_vm5, %v935_v35  ;;  %v5717_v17 = vshrl.u32 %v5664_v40, 16  ;;  %v5720_v25 = vshll.u32 %v5664_v40, 16  ;;  %v5726_v11 = vshll.u32 %v12275_v22, 16  ;;  %v5709_v7 = vor.u32 %v5708_v38, %v5705_v50  ;;  %v12300_v50 = vld [vmem:[#allocation2 + $0x3c] sm:$0x1] }
 0x395   : > { %v6973_v47 = vrot.slane %v6971_v52, 7  ;;  %v928_v20 = vadd.f32 %v11870_v42, %v12033_v12  ;;  %v920_v59 = vadd.f32 %v12033_v12, %v11873_v48  ;;  %v6968_v24 = vor.u32 %v6966_v21, %v6965_v54 }
 0x396   : > { %v6969_v58 = vrot.slane %v6965_v54, 4  ;;  %v5719_v13 = vrot.slane %v5717_v17, 4  ;;  %v5722_v43 = vrot.slane %v5720_v25, 5  ;;  %v5710_v23 = vrot.slane %v5709_v7, 4 }
 0x397   : > { %v6976_v27 = vor.u32 %v6974_v10, %v6973_v47  ;;  %v6977_v60 = vrot.slane %v6973_v47, 4  ;;  %v5728_v0 = vrot.slane %v5726_v11, 5  ;;  %v7030_v14 = vmax.bf16 %v6968_v24, %v12241_v51 }
 0x398   : > { %v7031_v8 = vmax.bf16 %v6969_v58, %v12234_v15  ;;  %v5723_v32 = vor.u32 %v5722_v43, %v5719_v13  ;;  %v940_v2 = vmax.f32 %v928_v20, 0.0  ;;  %v5715_v48 = vsel %vm10511_vm14, %v5710_v23, %v5714_v28 }
 0x399   : > { %v7032_v42 = vmax.bf16 %v6976_v27, %v6744_v63  ;;  %v7033_v49 = vmax.bf16 %v6977_v60, %v12237_v6  ;;  %v938_v3 = vmax.f32 %v920_v59, 0.0  ;;  %v7071_v46 = vshrl.u32 %v7030_v14, 16  ;;  %v12296_v6 = vld [vmem:[#allocation2 + $0x34] sm:$0x1]  ;;  %v5670_v59 = vld [vmem:[#allocation2 + $0x40] sm:$0xf] }
 0x39a   : > { %v7074_v5 = vshll.u32 %v7030_v14, 16  ;;  %v7080_v57 = vshll.u32 %v7031_v8, 16  ;;  %v5724_v19 = vrot.slane %v5723_v32, 4  ;;  %948 = vst.msk [vmem:[%s12081_s1 + $0x30] sm:$0xff] %vm852_vm5, %v940_v2  ;;  %v931_v63 = vadd.f32 %v11879_v34, %v12033_v12  ;;  %v5672_v2 = vld [vmem:[#allocation2 + $0x48] sm:$0xf] }
 0x39b   : > { %v7085_v51 = vshrl.u32 %v7032_v42, 16  ;;  %v7088_v4 = vshll.u32 %v7032_v42, 16  ;;  %v7094_v15 = vshll.u32 %v7033_v49, 16  ;;  %946 = vst.msk [vmem:[%s12081_s1 + $0x20] sm:$0xff] %vm852_vm5, %v938_v3  ;;  %v7073_v53 = vrot.slane %v7071_v46, 4 }
 0x39c   : > { %v7076_v41 = vrot.slane %v7074_v5, 5  ;;  %v7082_v44 = vrot.slane %v7080_v57, 5  ;;  %v5729_v40 = vsel %vm10511_vm14, %v5724_v19, %v5728_v0  ;;  %v941_v10 = vmax.f32 %v931_v63, 0.0 }
 0x39d   : > { %v7087_v26 = vrot.slane %v7085_v51, 4  ;;  %v7090_v33 = vrot.slane %v7088_v4, 5  ;;  %v7096_v21 = vrot.slane %v7094_v15, 5  ;;  %v8031_v35 = vcombine.low %v5715_v48, %v5729_v40  ;;  %v12336_v51 = vld [vmem:[#allocation3 + $0x28] sm:$0xf] }
 0x39e   : > { %v7077_v52 = vor.u32 %v7076_v41, %v7073_v53  ;;  %v5731_v38 = vshrl.u32 %v5666_v55, 16  ;;  %v5734_v34 = vshll.u32 %v5666_v55, 16  ;;  %v5740_v54 = vshll.u32 %v12296_v6, 16  ;;  %949 = vst.msk [vmem:[%s12081_s1 + $0x38] sm:$0xff] %vm852_vm5, %v941_v10  ;;  %v12338_v53 = vld [vmem:[#allocation3 + $0x24] sm:$0x1] }
 0x39f   : > { %v7091_v28 = vor.u32 %v7090_v33, %v7087_v26  ;;  %8504 = vmatmul.mubr.msk.bf16.vlgmr.msra.gmra.mrb[4].mxu1 %vm1309_vm15, %v8031_v35  ;;  %v5745_v17 = vshrl.u32 %v5668_v56, 16  ;;  %v5748_v25 = vshll.u32 %v5668_v56, 16  ;;  %v5754_v20 = vshll.u32 %v12300_v50, 16  ;;  %v12340_v40 = vld [vmem:[#allocation3 + $0x2c] sm:$0x1] }
 0x3a0   : > { %v7078_v11 = vrot.slane %v7077_v52, 4  ;;  %8512 = vmatpush3.bf16.msra.mxu1 %v12121_v45  ;;  %v5733_v47 = vrot.slane %v5731_v38, 4  ;;  %v5736_v7 = vrot.slane %v5734_v34, 5  ;;  %v5742_v58 = vrot.slane %v5740_v54, 5  ;;  %v12312_v45 = vld [vmem:[#allocation2 + $0x44] sm:$0x1] }
 0x3a1   : > { %v7092_v24 = vrot.slane %v7091_v28, 4  ;;  %v5747_v13 = vrot.slane %v5745_v17, 4  ;;  %v5750_v43 = vrot.slane %v5748_v25, 5  ;;  %v5756_v23 = vrot.slane %v5754_v20, 5  ;;  %v6365_v38 = vld [vmem:[#allocation3 + $0x28] sm:$0xe] }
 0x3a2   : > { %v7083_v27 = vsel %vm10511_vm14, %v7078_v11, %v7082_v44  ;;  %v5737_v60 = vor.u32 %v5736_v7, %v5733_v47  ;;  %v923_v0 = vadd.f32 %v12033_v12, %v11892_v16  ;;  %v5759_v42 = vshrl.u32 %v5670_v59, 16  ;;  %v12322_v16 = vld [vmem:[#allocation2 + $0x4c] sm:$0x1]  ;;  %v12349_v17 = vld [vmem:[#allocation3 + $0x28] sm:$0xf] }
 0x3a3   : > { %v7097_v14 = vsel %vm10511_vm14, %v7092_v24, %v7096_v21  ;;  %v7164_v8 = vmax.bf16 %v7083_v27, %v6940_v62  ;;  %v5751_v32 = vor.u32 %v5750_v43, %v5747_v13  ;;  %v5762_v12 = vshll.u32 %v5670_v59, 16  ;;  %v12354_v59 = vld [vmem:[#allocation3 + $0x30] sm:$0xf]  ;;  %v6341_v13 = vld [vmem:[#allocation3 + $0x20] sm:$0xe] }
 0x3a4   : > { %v7165_v49 = vmax.bf16 %v7097_v14, %v6941_v1  ;;  %v5738_v48 = vrot.slane %v5737_v60, 4  ;;  %v939_v3 = vmax.f32 %v923_v0, 0.0  ;;  %v5761_v57 = vrot.slane %v5759_v42, 4  ;;  %v12331_v1 = vld [vmem:[#allocation3 + $0x20] sm:$0xf] }
 0x3a5   : > { %v7228_v46 = vmax.bf16 %v12265_v36, %v7164_v8  ;;  %v5752_v5 = vrot.slane %v5751_v32, 4  ;;  %v5768_v29 = vshll.u32 %v12312_v45, 16  ;;  %v5764_v61 = vrot.slane %v5762_v12, 5  ;;  %v6342_v14 = vld [vmem:[#allocation3 + $0x28] sm:$0xe] }
 0x3a6   : > { %v7229_v30 = vmax.bf16 %v12273_v39, %v7165_v49  ;;  %v5743_v62 = vsel %vm10511_vm14, %v5738_v48, %v5742_v58  ;;  %947 = vst.msk [vmem:[%s12081_s1 + $0x28] sm:$0xff] %vm852_vm5, %v939_v3  ;;  %v5773_v37 = vshrl.u32 %v5672_v2, 16  ;;  %v5776_v55 = vshll.u32 %v5672_v2, 16  ;;  %v12360_v8 = vld [vmem:[#allocation3 + $0x2c] sm:$0x1] }
 0x3a7   : > { %v5757_v19 = vsel %vm10511_vm14, %v5752_v5, %v5756_v23  ;;  %v5782_v36 = vshll.u32 %v12322_v16, 16  ;;  %v5765_v39 = vor.u32 %v5764_v61, %v5761_v57  ;;  %v5770_v41 = vrot.slane %v5768_v29, 5  ;;  %v6366_v49 = vld [vmem:[#allocation3 + $0x30] sm:$0xe] }
 0x3a8   : > { %v8083_v4 = vcombine.low %v7228_v46, %v7229_v30  ;;  %v8032_v15 = vcombine.low %v5743_v62, %v5757_v19  ;;  %v5775_v63 = vrot.slane %v5773_v37, 4  ;;  %v5778_v44 = vrot.slane %v5776_v55, 5  ;;  %v6358_v46 = vld [vmem:[#allocation3 + $0x34] sm:$0x1]  ;;  %v6374_v30 = vld [vmem:[#allocation3 + $0x30] sm:$0xf] }
 0x3a9   : > { %v6451_v56 = vshrl.u32 %v12331_v1, 16  ;;  %v6454_v26 = vshll.u32 %v12331_v1, 16  ;;  %v5766_v33 = vrot.slane %v5765_v39, 4  ;;  %v5784_v21 = vrot.slane %v5782_v36, 5 }
 0x3aa   : > { %8524 = vmatmul.mubr.msk.bf16.vlgmr.msra.gmra.mrb[16].mxu0 %vm852_vm5, %v8083_v4  ;;  %8507 = vmatprep.mubr.msk.bf16.mxu1 %vm1309_vm15, %v8032_v15  ;;  %v6465_v35 = vshrl.u32 %v12336_v51, 16  ;;  %v6468_v52 = vshll.u32 %v12336_v51, 16  ;;  %v5779_v10 = vor.u32 %v5778_v44, %v5775_v63  ;;  %v6460_v54 = vshll.u32 %v12338_v53, 16  ;;  %v6375_v4 = vld [vmem:[#allocation3 + $0x38] sm:$0xf] }
 0x3ab   : > { %v6453_v34 = vrot.slane %v6451_v56, 4  ;;  %v6456_v28 = vrot.slane %v6454_v26, 5  ;;  %v6474_v47 = vshll.u32 %v12340_v40, 16  ;;  %v5771_v7 = vsel %vm10511_vm14, %v5766_v33, %v5770_v41  ;;  %v12366_v15 = vld [vmem:[#allocation3 + $0x34] sm:$0x1] }
 0x3ac   : > { %v6467_v25 = vrot.slane %v6465_v35, 4  ;;  %v6470_v11 = vrot.slane %v6468_v52, 5  ;;  %v5780_v20 = vrot.slane %v5779_v10, 4  ;;  %v6538_v58 = vrot.slane %v12349_v17, 7  ;;  %v12373_v35 = vld [vmem:[#allocation3 + $0x3c] sm:$0x1] }
 0x3ad   : > { %v6457_v24 = vor.u32 %v6456_v28, %v6453_v34  ;;  %v6540_v27 = vrot.slane %v12354_v59, 7  ;;  %v6651_v60 = vshrl.u32 %v6365_v38, 16  ;;  %v6654_v23 = vshll.u32 %v6365_v38, 16 }
 0x3ae   : > { %v6471_v43 = vor.u32 %v6470_v11, %v6467_v25  ;;  %v5785_v0 = vsel %vm10511_vm14, %v5780_v20, %v5784_v21  ;;  %v6462_v2 = vrot.slane %v6460_v54, 5  ;;  %v6476_v3 = vrot.slane %v6474_v47, 5 }
 0x3af   : > { %v6458_v32 = vrot.slane %v6457_v24, 4  ;;  %v8033_v42 = vcombine.low %v5771_v7, %v5785_v0  ;;  %v6539_v12 = vrot.slane %v6538_v58, 4  ;;  %v6541_v5 = vrot.slane %v6540_v27, 4 }
 0x3b0   : > { %v6472_v48 = vrot.slane %v6471_v43, 4  ;;  %v6653_v57 = vrot.slane %v6651_v60, 4  ;;  %v6656_v29 = vrot.slane %v6654_v23, 5  ;;  %v6570_v62 = vmax.bf16 %v6538_v58, %v6341_v13 }
 0x3b1   : > { %8508 = vmatmul.mubr.msk.bf16.gmra.mrb[0].mxu1 %vm1309_vm15, %v8033_v42  ;;  %v6660_v61 = vshll.u32 %v12360_v8, 16  ;;  %v6463_v37 = vsel %vm10511_vm14, %v6458_v32, %v6462_v2  ;;  %v6572_v19 = vmax.bf16 %v6540_v27, %v6342_v14  ;;  %v6669_v36 = vshrl.u32 %v6366_v49, 16  ;;  %v6390_v2 = vld [vmem:[#allocation3 + $0x30] sm:$0xe] }
 0x3b2   : > { %v6657_v55 = vor.u32 %v6656_v29, %v6653_v57  ;;  %v6477_v39 = vsel %vm10511_vm14, %v6472_v48, %v6476_v3  ;;  %v6571_v63 = vmax.bf16 %v6539_v12, %v12338_v53  ;;  %v6672_v41 = vshll.u32 %v6366_v49, 16  ;;  %v12382_v12 = vld [vmem:[#allocation3 + $0x30] sm:$0xf] }
 0x3b3   : > { %v6678_v44 = vshll.u32 %v6358_v46, 16  ;;  %v6573_v56 = vmax.bf16 %v6541_v5, %v12340_v40  ;;  %v6664_v26 = vshrl.u32 %v12360_v8, 16  ;;  %v6671_v33 = vrot.slane %v6669_v36, 4 }
 0x3b4   : > { %v6811_v21 = vshrl.u32 %v6374_v30, 16  ;;  %v6662_v52 = vrot.slane %v6660_v61, 5  ;;  %v6674_v10 = vrot.slane %v6672_v41, 5  ;;  %v6682_v38 = vshrl.u32 %v6358_v46, 16 }
 0x3b5   : > { %v6814_v34 = vshll.u32 %v6374_v30, 16  ;;  %v6658_v28 = vrot.slane %v6657_v55, 4  ;;  %v6820_v25 = vshll.u32 %v12366_v15, 16  ;;  %v6825_v11 = vshrl.u32 %v6375_v4, 16 }
 0x3b6   : > { %v6813_v54 = vrot.slane %v6811_v21, 4  ;;  %v6675_v53 = vor.u32 %v6674_v10, %v6671_v33  ;;  %v6680_v47 = vrot.slane %v6678_v44, 5  ;;  %v6828_v20 = vshll.u32 %v6375_v4, 16  ;;  %v12411_v21 = vld [vmem:[#allocation3 + $0x34] sm:$0x1] }
 0x3b7   : > { %v6816_v7 = vrot.slane %v6814_v34, 5  ;;  %v6822_v40 = vrot.slane %v6820_v25, 5  ;;  %v6827_v24 = vrot.slane %v6825_v11, 4  ;;  %v6834_v58 = vshll.u32 %v12373_v35, 16  ;;  %v12416_v25 = vld [vmem:[#allocation3 + $0x3c] sm:$0x1] }
 0x3b8   : > { %v8069_v13 = vrot.slane %v6570_v62, 9  ;;  %v6676_v43 = vrot.slane %v6675_v53, 4  ;;  %v6830_v60 = vrot.slane %v6828_v20, 5  ;;  %v6916_v23 = vrot.slane %v6571_v63, 5  ;;  %v6391_v63 = vld [vmem:[#allocation3 + $0x38] sm:$0xe] }
 0x3b9   : > { %v6817_v27 = vor.u32 %v6816_v7, %v6813_v54  ;;  %v6663_v0 = vsel %vm10511_vm14, %v6658_v28, %v6662_v52  ;;  %v8070_v14 = vrot.slane %v6572_v19, 9  ;;  %v6920_v32 = vrot.slane %v6573_v56, 5 }
 0x3ba   : > { %v12380_v42 = vmax.bf16 %v6463_v37, %v12331_v1  ;;  %v6831_v48 = vor.u32 %v6830_v60, %v6827_v24  ;;  %v6836_v3 = vrot.slane %v6834_v58, 5  ;;  %v12385_v5 = vmax.bf16 %v6477_v39, %v12336_v51  ;;  %v12401_v39 = vld [vmem:[#allocation3 + $0x38] sm:$0xf] }
 0x3bb   : > { %v6818_v49 = vrot.slane %v6817_v27, 4  ;;  %v6681_v57 = vsel %vm10511_vm14, %v6676_v43, %v6680_v47  ;;  %v6747_v29 = vmax.bf16 %v6664_v26, %v12360_v8  ;;  %v12392_v62 = vsel %vm11097_vm2, %v8069_v13, %v6916_v23  ;;  %v12425_v58 = vld [vmem:[#allocation3 + $0x38] sm:$0xf] }
 0x3bc   : > { %v6746_v1 = vmax.bf16 %v6663_v0, %v12349_v17  ;;  %v6749_v61 = vmax.bf16 %v6682_v38, %v6358_v46  ;;  %v6832_v19 = vrot.slane %v6831_v48, 4  ;;  %v12399_v51 = vsel %vm11097_vm2, %v8070_v14, %v6920_v32  ;;  %v12429_v32 = vld [vmem:[#allocation3 + $0x40] sm:$0xf] }
 0x3bd   : > { %v6823_v37 = vsel %vm10511_vm14, %v6818_v49, %v6822_v40  ;;  %v8077_v36 = vrot.slane %v6390_v2, 9  ;;  %v6479_v8 = vshrl.u32 %v12382_v12, 16  ;;  %v6748_v41 = vmax.bf16 %v6681_v57, %v12354_v59 }
 0x3be   : > { %v6878_v55 = vmax.bf16 %v6823_v37, %v6374_v30  ;;  %v6837_v17 = vsel %vm10511_vm14, %v6832_v19, %v6836_v3  ;;  %v6942_v46 = vmax.bf16 %v12392_v62, %v12380_v42  ;;  %v6482_v30 = vshll.u32 %v12382_v12, 16 }
 0x3bf   : > { %v6879_v44 = vmax.bf16 %v6837_v17, %v6375_v4  ;;  %v7204_v33 = vrot.slane %v12366_v15, 5  ;;  %v6943_v52 = vmax.bf16 %v12399_v51, %v12385_v5  ;;  %v6481_v10 = vrot.slane %v6479_v8, 4 }
 0x3c0   : > { %v6979_v56 = vshrl.u32 %v6878_v55, 16  ;;  %v6982_v26 = vshll.u32 %v6878_v55, 16  ;;  %v6484_v59 = vrot.slane %v6482_v30, 5  ;;  %v6493_v38 = vshrl.u32 %v12401_v39, 16 }
 0x3c1   : > { %v6987_v28 = vshrl.u32 %v6879_v44, 16  ;;  %v6990_v54 = vshll.u32 %v6879_v44, 16  ;;  %v6496_v4 = vshll.u32 %v12401_v39, 16  ;;  %v8078_v11 = vrot.slane %v6391_v63, 9 }
 0x3c2   : > { %v6981_v34 = vrot.slane %v6979_v56, 7  ;;  %v7208_v53 = vrot.slane %v12373_v35, 5  ;;  %v6485_v15 = vor.u32 %v6484_v59, %v6481_v10  ;;  %v6488_v47 = vshll.u32 %v12411_v21, 16  ;;  %v12444_v10 = vld [vmem:[#allocation3 + $0x3c] sm:$0x1] }
 0x3c3   : > { %v6989_v40 = vrot.slane %v6987_v28, 7  ;;  %v12423_v24 = vsel %vm11097_vm2, %v8077_v36, %v7204_v33  ;;  %v6495_v13 = vrot.slane %v6493_v38, 4  ;;  %v6498_v43 = vrot.slane %v6496_v4, 5  ;;  %v6343_v36 = vld [vmem:[#allocation3 + $0x30] sm:$0xe] }
 0x3c4   : > { %v6984_v7 = vor.u32 %v6982_v26, %v6981_v34  ;;  %v6985_v20 = vrot.slane %v6981_v34, 4  ;;  %v6502_v27 = vshll.u32 %v12416_v25, 16  ;;  %v6542_v60 = vrot.slane %v12425_v58, 7  ;;  %v6367_v26 = vld [vmem:[#allocation3 + $0x38] sm:$0xe] }
 0x3c5   : > { %v6992_v23 = vor.u32 %v6990_v54, %v6989_v40  ;;  %v6993_v35 = vrot.slane %v6989_v40, 4  ;;  %v12433_v2 = vsel %vm11097_vm2, %v8078_v11, %v7208_v53  ;;  %v12435_v49 = vrot.slane %v6485_v15, 4  ;;  %v6368_v59 = vld [vmem:[#allocation3 + $0x40] sm:$0xe]  ;;  %v12454_v53 = vld [vmem:[#allocation3 + $0x44] sm:$0x1] }
 0x3c6   : > { %v7034_v0 = vmax.bf16 %v6984_v7, %v6746_v1  ;;  %v7035_v14 = vmax.bf16 %v6985_v20, %v6747_v29  ;;  %v12437_v48 = vrot.slane %v6488_v47, 5  ;;  %v6544_v3 = vrot.slane %v12429_v32, 7 }
 0x3c7   : > { %v7036_v57 = vmax.bf16 %v6992_v23, %v6748_v41  ;;  %v7037_v37 = vmax.bf16 %v6993_v35, %v6749_v61  ;;  %v6499_v1 = vor.u32 %v6498_v43, %v6495_v13  ;;  %v12440_v29 = vrot.slane %v6502_v27, 5  ;;  %v6344_v13 = vld [vmem:[#allocation3 + $0x38] sm:$0xe]  ;;  %v12457_v23 = vld [vmem:[#allocation3 + $0x40] sm:$0xf] }
 0x3c8   : > { %v7099_v19 = vshrl.u32 %v7034_v0, 16  ;;  %v7102_v55 = vshll.u32 %v7034_v0, 16  ;;  %v7108_v8 = vshll.u32 %v7035_v14, 16  ;;  %v12442_v63 = vrot.slane %v6542_v60, 4 }
 0x3c9   : > { %v7113_v44 = vshrl.u32 %v7036_v57, 16  ;;  %v7116_v56 = vshll.u32 %v7036_v57, 16  ;;  %v7122_v33 = vshll.u32 %v7037_v37, 16  ;;  %v6491_v61 = vsel %vm10511_vm14, %v12435_v49, %v12437_v48 }
 0x3ca   : > { %v7101_v17 = vrot.slane %v7099_v19, 4  ;;  %v7104_v30 = vrot.slane %v7102_v55, 5  ;;  %v12450_v41 = vrot.slane %v6544_v3, 4  ;;  %v12452_v38 = vmax.bf16 %v6542_v60, %v6343_v36  ;;  %v12467_v55 = vld [vmem:[#allocation3 + $0x44] sm:$0x1] }
 0x3cb   : > { %v7110_v28 = vrot.slane %v7108_v8, 5  ;;  %v7115_v54 = vrot.slane %v7113_v44, 4  ;;  %v7118_v4 = vrot.slane %v7116_v56, 5  ;;  %v7124_v11 = vrot.slane %v7122_v33, 5  ;;  %v12481_v56 = vld [vmem:[#allocation3 + $0x4c] sm:$0x1] }
 0x3cc   : > { %v7105_v34 = vor.u32 %v7104_v30, %v7101_v17  ;;  %v6500_v15 = vrot.slane %v6499_v1, 4  ;;  %v6687_v47 = vshrl.u32 %v6367_v26, 16  ;;  %v6690_v7 = vshll.u32 %v6367_v26, 16 }
 0x3cd   : > { %v7119_v40 = vor.u32 %v7118_v4, %v7115_v54  ;;  %v6696_v43 = vshll.u32 %v12444_v10, 16  ;;  %v6705_v27 = vshrl.u32 %v6368_v59, 16  ;;  %v6575_v60 = vmax.bf16 %v12442_v63, %v12411_v21  ;;  %v6377_v63 = vld [vmem:[#allocation3 + $0x48] sm:$0xf] }
 0x3ce   : > { %v7106_v20 = vrot.slane %v7105_v34, 4  ;;  %v6689_v35 = vrot.slane %v6687_v47, 4  ;;  %v6692_v0 = vrot.slane %v6690_v7, 5  ;;  %v6708_v14 = vshll.u32 %v6368_v59, 16 }
 0x3cf   : > { %v7120_v48 = vrot.slane %v7119_v40, 4  ;;  %v6707_v57 = vrot.slane %v6705_v27, 4  ;;  %v6714_v37 = vshll.u32 %v12454_v53, 16  ;;  %v12469_v36 = vmax.bf16 %v6544_v3, %v6344_v13  ;;  %v12500_v27 = vld [vmem:[#allocation3 + $0x40] sm:$0xe] }
 0x3d0   : > { %v7111_v49 = vsel %vm10511_vm14, %v7106_v20, %v7110_v28  ;;  %v6693_v8 = vor.u32 %v6692_v0, %v6689_v35  ;;  %v6710_v21 = vrot.slane %v6708_v14, 5  ;;  %v6505_v17 = vsel %vm10511_vm14, %v6500_v15, %v12440_v29 }
 0x3d1   : > { %v7166_v19 = vmax.bf16 %v7111_v49, %v6942_v46  ;;  %v7125_v1 = vsel %vm10511_vm14, %v7120_v48, %v7124_v11  ;;  %v6698_v30 = vrot.slane %v6696_v43, 5  ;;  %v6839_v44 = vshrl.u32 %v12457_v23, 16  ;;  %v5892_v48 = vld [vmem:[#allocation2 + $0x10] sm:$0xe] }
 0x3d2   : > { %v7167_v42 = vmax.bf16 %v7125_v1, %v6943_v52  ;;  %v6694_v46 = vrot.slane %v6693_v8, 4  ;;  %v6711_v3 = vor.u32 %v6710_v21, %v6707_v57  ;;  %v6716_v26 = vrot.slane %v6714_v37, 5  ;;  %v5894_v21 = vld [vmem:[#allocation2 + $0x20] sm:$0xe] }
 0x3d3   : > { %v7230_v62 = vmax.bf16 %v12423_v24, %v7166_v19  ;;  %v6841_v33 = vrot.slane %v6839_v44, 4  ;;  %v6842_v59 = vshll.u32 %v12457_v23, 16  ;;  %v6848_v34 = vshll.u32 %v12467_v55, 16 }
 0x3d4   : > { %v7231_v29 = vmax.bf16 %v12433_v2, %v7167_v42  ;;  %v6577_v28 = vmax.bf16 %v12450_v41, %v12416_v25  ;;  %v6712_v54 = vrot.slane %v6711_v3, 4  ;;  %v6853_v5 = vshrl.u32 %v6377_v63, 16 }
 0x3d5   : > { %v6700_v51 = vshrl.u32 %v12444_v10, 16  ;;  %v6718_v52 = vshrl.u32 %v12454_v53, 16  ;;  %v6844_v24 = vrot.slane %v6842_v59, 5  ;;  %v6856_v4 = vshll.u32 %v6377_v63, 16  ;;  %v5896_v59 = vld [vmem:[#allocation2 + $0x30] sm:$0xe] }
 0x3d6   : > { %v8084_v11 = vcombine.low %v7230_v62, %v7231_v29  ;;  %v6699_v15 = vsel %vm10511_vm14, %v6694_v46, %v6698_v30  ;;  %v6855_v47 = vrot.slane %v6853_v5, 4  ;;  %v6862_v7 = vshll.u32 %v12481_v56, 16  ;;  %v9013_v30 = vld [vmem:[#allocation2 + $0x14] sm:$0x1]  ;;  %v9014_v62 = vld [vmem:[#allocation2 + $0x1c] sm:$0x1] }
 0x3d7   : > { %v6717_v2 = vsel %vm10511_vm14, %v6712_v54, %v6716_v26  ;;  %v6845_v20 = vor.u32 %v6844_v24, %v6841_v33  ;;  %v6850_v25 = vrot.slane %v6848_v34, 5  ;;  %v6858_v41 = vrot.slane %v6856_v4, 5  ;;  %v5897_v5 = vld [vmem:[#allocation2 + $0x38] sm:$0xe] }
 0x3d8   : > { %8527 = vmatprep.mubr.msk.bf16.mxu0 %vm852_vm5, %v8084_v11  ;;  %v12497_v40 = vmax.bf16 %v6491_v61, %v12382_v12  ;;  %v8071_v13 = vrot.slane %v12452_v38, 9  ;;  %v6924_v43 = vrot.slane %v6575_v60, 5  ;;  %v12503_v35 = vmax.bf16 %v6505_v17, %v12401_v39  ;;  %v5893_v61 = vld [vmem:[#allocation2 + $0x18] sm:$0xe]  ;;  %v5898_v11 = vld [vmem:[#allocation2 + $0x40] sm:$0xe] }
 0x3d9   : > { %v6846_v0 = vrot.slane %v6845_v20, 4  ;;  %v6859_v14 = vor.u32 %v6858_v41, %v6855_v47  ;;  %v6864_v49 = vrot.slane %v6862_v7, 5  ;;  %v6750_v57 = vmax.bf16 %v6699_v15, %v12425_v58  ;;  %v5899_v41 = vld [vmem:[#allocation2 + $0x48] sm:$0xe] }
 0x3da   : > { %v6751_v37 = vmax.bf16 %v6700_v51, %v12444_v10  ;;  %v6752_v19 = vmax.bf16 %v6717_v2, %v12429_v32  ;;  %v6753_v12 = vmax.bf16 %v6718_v52, %v12454_v53  ;;  %v8072_v39 = vrot.slane %v12469_v36, 9  ;;  %v5895_v53 = vld [vmem:[#allocation2 + $0x28] sm:$0xe] }
 0x3db   : > { %v6851_v38 = vsel %vm10511_vm14, %v6846_v0, %v6850_v25  ;;  %v6860_v60 = vrot.slane %v6859_v14, 4  ;;  %v12512_v8 = vrot.slane %v6577_v28, 5  ;;  %v12517_v58 = vsel %vm11097_vm2, %v8071_v13, %v6924_v43 }
 0x3dc   : > { %v6880_v1 = vmax.bf16 %v6851_v38, %v12457_v23  ;;  %v8079_v32 = vrot.slane %v12500_v27, 9  ;;  %v8039_v10 = vrot.slane %v5892_v48, 9  ;;  %v5918_v44 = vrot.slane %v9013_v30, 5 }
 0x3dd   : > { %v6865_v17 = vsel %vm10511_vm14, %v6860_v60, %v6864_v49  ;;  %v8040_v42 = vrot.slane %v5893_v61, 9  ;;  %v5922_v46 = vrot.slane %v9014_v62, 5  ;;  %v8041_v23 = vrot.slane %v5894_v21, 9 }
 0x3de   : > { %v6881_v3 = vmax.bf16 %v6865_v17, %v6377_v63  ;;  %v6995_v26 = vshrl.u32 %v6880_v1, 16  ;;  %v6998_v33 = vshll.u32 %v6880_v1, 16  ;;  %v5919_v34 = vsel %vm11097_vm2, %v8039_v10, %v5918_v44 }
 0x3df   : > { %v5923_v29 = vsel %vm11097_vm2, %v8040_v42, %v5922_v46  ;;  %v5926_v28 = vrot.slane %v12257_v31, 5  ;;  %v8042_v54 = vrot.slane %v5895_v53, 9  ;;  %v5930_v15 = vrot.slane %v12275_v22, 5 }
 0x3e0   : > { %v6997_v51 = vrot.slane %v6995_v26, 7  ;;  %v7003_v52 = vshrl.u32 %v6881_v3, 16  ;;  %v7006_v24 = vshll.u32 %v6881_v3, 16  ;;  %v8047_v4 = vcombine.low %v5919_v34, %v5923_v29 }
 0x3e1   : > { %v5927_v63 = vsel %vm11097_vm2, %v8041_v23, %v5926_v28  ;;  %v8043_v47 = vrot.slane %v5896_v59, 9  ;;  %v5934_v7 = vrot.slane %v12296_v6, 5  ;;  %v8044_v31 = vrot.slane %v5897_v5, 9 }
 0x3e2   : > { %v7000_v2 = vor.u32 %v6998_v33, %v6997_v51  ;;  %v7001_v20 = vrot.slane %v6997_v51, 4  ;;  %v7005_v25 = vrot.slane %v7003_v52, 7  ;;  %8513 = vmatprep.mubr.msk.bf16.mxu1 %vm1309_vm15, %v8047_v4  ;;  %v5931_v13 = vsel %vm11097_vm2, %v8042_v54, %v5930_v15 }
 0x3e3   : > { %v5935_v43 = vsel %vm11097_vm2, %v8043_v47, %v5934_v7  ;;  %v5938_v0 = vrot.slane %v12300_v50, 5  ;;  %v8045_v14 = vrot.slane %v5898_v11, 9  ;;  %v8048_v61 = vcombine.low %v5927_v63, %v5931_v13 }
 0x3e4   : > { %v7008_v22 = vor.u32 %v7006_v24, %v7005_v25  ;;  %v7009_v49 = vrot.slane %v7005_v25, 4  ;;  %v7038_v48 = vmax.bf16 %v7000_v2, %v6750_v57  ;;  %v7039_v6 = vmax.bf16 %v7001_v20, %v6751_v37  ;;  %v6393_v37 = vld [vmem:[#allocation3 + $0x48] sm:$0xe]  ;;  %v12569_v25 = vld [vmem:[#allocation22] ss:$0 sm:$0xff] }
 0x3e5   : > { %v5939_v38 = vsel %vm11097_vm2, %v8044_v31, %v5938_v0  ;;  %v5942_v60 = vrot.slane %v12312_v45, 5  ;;  %v8046_v21 = vrot.slane %v5899_v41, 9  ;;  %8514 = vmatmul.mubr.msk.bf16.vlgmr.msra.gmra.mrb[4].mxu1 %vm1309_vm15, %v8048_v61  ;;  %v5946_v57 = vrot.slane %v12322_v16, 5 }
 0x3e6   : > { %v7040_v1 = vmax.bf16 %v7008_v22, %v6752_v19  ;;  %v7041_v10 = vmax.bf16 %v7009_v49, %v6753_v12  ;;  %v7127_v53 = vshrl.u32 %v7038_v48, 16  ;;  %v7130_v17 = vshll.u32 %v7038_v48, 16 }
 0x3e7   : > { %v7136_v30 = vshll.u32 %v7039_v6, 16  ;;  %v8049_v50 = vcombine.low %v5935_v43, %v5939_v38  ;;  %v5943_v44 = vsel %vm11097_vm2, %v8045_v14, %v5942_v60  ;;  %v6929_v45 = vsel %vm11097_vm2, %v8072_v39, %v12512_v8 }
 0x3e8   : > { %v7129_v42 = vrot.slane %v7127_v53, 4  ;;  %v7132_v62 = vrot.slane %v7130_v17, 5  ;;  %v7141_v46 = vshrl.u32 %v7040_v1, 16  ;;  %v7144_v3 = vshll.u32 %v7040_v1, 16 }
 0x3e9   : > { %v7150_v19 = vshll.u32 %v7041_v10, 16  ;;  %v7212_v12 = vrot.slane %v12467_v55, 5  ;;  %8517 = vmatprep.mubr.msk.bf16.mxu1 %vm1309_vm15, %v8049_v50  ;;  %v5947_v26 = vsel %vm11097_vm2, %v8046_v21, %v5946_v57  ;;  %v7138_v33 = vrot.slane %v7136_v30, 5 }
 0x3ea   : > { %v7133_v16 = vor.u32 %v7132_v62, %v7129_v42  ;;  %v7143_v23 = vrot.slane %v7141_v46, 4  ;;  %v7146_v59 = vrot.slane %v7144_v3, 5  ;;  %v6944_v34 = vmax.bf16 %v12517_v58, %v12497_v40  ;;  %v8056_v3 = vld [vmem:[#allocation21] ss:$0 sm:$0xff] }
 0x3eb   : > { %v8080_v29 = vrot.slane %v6393_v37, 9  ;;  %v8050_v36 = vcombine.low %v5943_v44, %v5947_v26  ;;  %v7152_v39 = vrot.slane %v7150_v19, 5  ;;  %v7216_v8 = vrot.slane %v12481_v56, 5 }
 0x3ec   : > { %v7134_v28 = vrot.slane %v7133_v16, 4  ;;  %v7147_v54 = vor.u32 %v7146_v59, %v7143_v23  ;;  %v6945_v55 = vmax.bf16 %v6929_v45, %v12503_v35  ;;  %v7213_v52 = vsel %vm11097_vm2, %v8079_v32, %v7212_v12 }
 0x3ed   : > { %8518 = vmatmul.mubr.msk.bf16.gmra.mrb[0].mxu1 %vm1309_vm15, %v8050_v36  ;;  %v7217_v56 = vsel %vm11097_vm2, %v8080_v29, %v7216_v8  ;;  %vm7382_vm4 = vcmask 392512  }
 0x3ee   : > { %v7139_v5 = vsel %vm10511_vm14, %v7134_v28, %v7138_v33  ;;  %v7148_v51 = vrot.slane %v7147_v54, 4 }
 0x3ef   : > { %v7168_v24 = vmax.bf16 %v7139_v5, %v6944_v34 }
 0x3f0   : > { %v7153_v40 = vsel %vm10511_vm14, %v7148_v51, %v7152_v39 }
 0x3f1   : > { %v7169_v58 = vmax.bf16 %v7153_v40, %v6945_v55  ;;  %v7232_v35 = vmax.bf16 %v7213_v52, %v7168_v24 }
 0x3f3   : > { %v7233_v4 = vmax.bf16 %v7217_v56, %v7169_v58 }
 0x3f5   : > { %v8085_v11 = vcombine.low %v7232_v35, %v7233_v4 }
 0x3f7   : > { %8528 = vmatmul.mubr.msk.bf16.gmra.mrb[20].mxu0 %vm852_vm5, %v8085_v11 }
 0x431   : > { %v8369_v63 = vpop.f32.mrb[12].mxu0 }
 0x432   : > { %v3314_v27 = vpop.f32.mrb[13].mxu0 }
 0x433   : > { %v8370_v15 = vpop.f32.mrb[14].mxu0 }
 0x434   : > { %v3317_v47 = vpop.f32.mrb[15].mxu0 }
 0x439   : > { %v8375_v32 = vpop.f32.mrb[8].mxu0 }
 0x43a   : > { %v3420_v7 = vpop.f32.mrb[9].mxu0 }
 0x43b   : > { %v8376_v2 = vpop.f32.mrb[10].mxu0 }
 0x43c   : > { %v3423_v20 = vpop.f32.mrb[11].mxu0 }
 0x47d   : > { %v8525_v18 = vpop.f32.mrb[16].mxu0 }
 0x47e   : > { %v7320_v9 = vadd.f32 %v8525_v18, %v12569_v25  ;;  %v7311_v31 = vpop.f32.mrb[17].mxu0 }
 0x47f   : > { %v7312_v41 = vadd.f32 %v12569_v25, %v7311_v31  ;;  %v8526_v13 = vpop.f32.mrb[18].mxu0 }
 0x480   : > { %v7344_v43 = vmax.f32 %v7320_v9, 0.0  ;;  %v7323_v0 = vadd.f32 %v8526_v13, %v12569_v25  ;;  %v7314_v14 = vpop.f32.mrb[19].mxu0 }
 0x481   : > { %v7315_v22 = vadd.f32 %v12569_v25, %v7314_v14  ;;  %v7342_v49 = vmax.f32 %v7312_v41, 0.0 }
 0x482   : > { %v7345_v48 = vmax.f32 %v7323_v0, 0.0  ;;  %7362 = vrot.lane.b32.xlu0 %v7344_v43, %s9562_s8 }
 0x483   : > { %v7343_v6 = vmax.f32 %v7315_v22, 0.0 }
 0x484   : > { %7364 = vrot.lane.b32.xlu1 %v7345_v48, %s9562_s8 }
 0x486   : > { %7358 = vrot.lane.b32.xlu0 %v7342_v49, %s9562_s8 }
 0x488   : > { %7360 = vrot.lane.b32.xlu1 %v7343_v6, %s9562_s8 }
 0x4b8   : > { %v8515_v61 = vpop.f32.mrb[4].mxu1 }
 0x4b9   : > { %v8533_v38 = vadd.f32 %v8515_v61, %v8375_v32  ;;  %v6015_v60 = vpop.f32.mrb[5].mxu1 }
 0x4ba   : > { %v8534_v21 = vadd.f32 %v6015_v60, %v3420_v7  ;;  %v8516_v1 = vpop.f32.mrb[6].mxu1 }
 0x4bb   : > { %v8535_v10 = vadd.f32 %v8516_v1, %v8376_v2  ;;  %v6018_v53 = vpop.f32.mrb[7].mxu1  ;;  %v6063_v34 = vadd.f32 %v8533_v38, %v8056_v3 }
 0x4bc   : > { %v8536_v17 = vadd.f32 %v6018_v53, %v3423_v20  ;;  %v6061_v16 = vadd.f32 %v8534_v21, %v8056_v3 }
 0x4bd   : > { %v6071_v28 = vmax.f32 %v6063_v34, 0.0  ;;  %v6064_v39 = vadd.f32 %v8535_v10, %v8056_v3 }
 0x4be   : > { %v6069_v36 = vmax.f32 %v6061_v16, 0.0  ;;  %v6062_v54 = vadd.f32 %v8536_v17, %v8056_v3 }
 0x4bf   : > { %v6072_v51 = vmax.f32 %v6064_v39, 0.0 }
 0x4c0   : > { %v8519_v30 = vpop.f32.mrb[0].mxu1  ;;  %v6070_v55 = vmax.f32 %v6062_v54, 0.0 }
 0x4c1   : > { %v8537_v50 = vadd.f32 %v8519_v30, %v8369_v63  ;;  %v6031_v44 = vpop.f32.mrb[1].mxu1 }
 0x4c2   : > { %v8538_v57 = vadd.f32 %v6031_v44, %v3314_v27  ;;  %v8520_v37 = vpop.f32.mrb[2].mxu1 }
 0x4c3   : > { %v8539_v42 = vadd.f32 %v8520_v37, %v8370_v15  ;;  %v6034_v62 = vpop.f32.mrb[3].mxu1  ;;  %v6067_v8 = vadd.f32 %v8537_v50, %v8056_v3 }
 0x4c4   : > { %v8540_v46 = vadd.f32 %v6034_v62, %v3317_v47  ;;  %v6065_v24 = vadd.f32 %v8538_v57, %v8056_v3 }
 0x4c5   : > { %v6068_v5 = vadd.f32 %v8539_v42, %v8056_v3  ;;  %v6075_v52 = vmax.f32 %v6067_v8, 0.0 }
 0x4c6   : > { %v6066_v56 = vadd.f32 %v8540_v46, %v8056_v3  ;;  %v6073_v35 = vmax.f32 %v6065_v24, 0.0 }
 0x4c7   : > { %v6076_v40 = vmax.f32 %v6068_v5, 0.0 }
 0x4c8   : > { %v6074_v11 = vmax.f32 %v6066_v56, 0.0 }
 0x4ca   : > { %v8529_v45 = vpop.f32.mrb[20].mxu0 }
 0x4cb   : > { %v7327_v19 = vpop.f32.mrb[21].mxu0  ;;  %v7336_v58 = vadd.f32 %v8529_v45, %v12569_v25 }
 0x4cc   : > { %v7328_v12 = vadd.f32 %v12569_v25, %v7327_v19  ;;  %v8530_v26 = vpop.f32.mrb[22].mxu0 }
 0x4cd   : > { %v7330_v33 = vpop.f32.mrb[23].mxu0  ;;  %v7339_v4 = vadd.f32 %v8530_v26, %v12569_v25  ;;  %v7348_v63 = vmax.f32 %v7336_v58, 0.0 }
 0x4ce   : > { %v7346_v23 = vmax.f32 %v7328_v12, 0.0  ;;  %v7331_v59 = vadd.f32 %v12569_v25, %v7330_v33 }
 0x4cf   : > { %v7349_v27 = vmax.f32 %v7339_v4, 0.0 }
 0x4d0   : > { %v7347_v29 = vmax.f32 %v7331_v59, 0.0  ;;  %7366 = vrot.lane.b32.xlu0 %v7346_v23, %s9562_s8 }
 0x4d2   : > { %7368 = vrot.lane.b32.xlu1 %v7347_v29, %s9562_s8 }
 0x4d4   : > { %6085 = vrot.lane.b32.xlu0 %v6069_v36, %s9563_s24 }
 0x4d6   : > { %6089 = vrot.lane.b32.xlu1 %v6071_v28, %s9563_s24 }
 0x4d8   : > { %6087 = vrot.lane.b32.xlu0 %v6070_v55, %s9563_s24 }
 0x4da   : > { %6091 = vrot.lane.b32.xlu1 %v6072_v51, %s9563_s24 }
 0x4dc   : > { %6097 = vrot.lane.b32.xlu0 %v6075_v52, %s9563_s24 }
 0x4de   : > { %6099 = vrot.lane.b32.xlu1 %v6076_v40, %s9563_s24 }
 0x4e0   : > { %6093 = vrot.lane.b32.xlu0 %v6073_v35, %s9563_s24 }
 0x4e2   : > { %6095 = vrot.lane.b32.xlu1 %v6074_v11, %s9563_s24 }
 0x4e4   : > { %7370 = vrot.lane.b32.xlu0 %v7348_v63, %s9562_s8 }
 0x4e6   : > { %7372 = vrot.lane.b32.xlu1 %v7349_v27, %s9562_s8 }
 0x4f4   : > { %v7363_v15 = vpop.permute.xlu0 %7362 }
 0x4f6   : > { %v7365_v47 = vpop.permute.xlu1 %7364 }
 0x4f8   : > { %v7359_v32 = vpop.permute.xlu0 %7358 }
 0x4fa   : > { %v7361_v7 = vpop.permute.xlu1 %7360 }
 0x542   : > { %v7367_v2 = vpop.permute.xlu0 %7366 }
 0x544   : > { %v7369_v20 = vpop.permute.xlu1 %7368 }
 0x546   : > { %v6086_v25 = vpop.permute.xlu0 %6085 }
 0x547   : > { %6110 = vst.msk [vmem:[%s12081_s1] sm:$0xff] %vm6109_vm3, %v6086_v25 }
 0x548   : > { %v6090_v18 = vpop.permute.xlu1 %6089  ;;  %7383 = vst.msk [vmem:[%s12081_s1] sm:$0xff] %vm7382_vm4, %v7359_v32 }
 0x549   : > { %6112 = vst.msk [vmem:[%s12081_s1 + $0x10] sm:$0xff] %vm6109_vm3, %v6090_v18 }
 0x54a   : > { %7385 = vst.msk [vmem:[%s12081_s1 + $0x10] sm:$0xff] %vm7382_vm4, %v7363_v15  ;;  %v6088_v9 = vpop.permute.xlu0 %6087 }
 0x54b   : > { %6111 = vst.msk [vmem:[%s12081_s1 + $0x8] sm:$0xff] %vm6109_vm3, %v6088_v9 }
 0x54c   : > { %v6092_v31 = vpop.permute.xlu1 %6091  ;;  %7384 = vst.msk [vmem:[%s12081_s1 + $0x8] sm:$0xff] %vm7382_vm4, %v7361_v7 }
 0x54d   : > { %6113 = vst.msk [vmem:[%s12081_s1 + $0x18] sm:$0xff] %vm6109_vm3, %v6092_v31 }
 0x54e   : > { %7386 = vst.msk [vmem:[%s12081_s1 + $0x18] sm:$0xff] %vm7382_vm4, %v7365_v47  ;;  %v6098_v41 = vpop.permute.xlu0 %6097 }
 0x54f   : > { %6116 = vst.msk [vmem:[%s12081_s1 + $0x30] sm:$0xff] %vm6109_vm3, %v6098_v41 }
 0x550   : > { %v6100_v13 = vpop.permute.xlu1 %6099 }
 0x551   : > { %6117 = vst.msk [vmem:[%s12081_s1 + $0x38] sm:$0xff] %vm6109_vm3, %v6100_v13 }
 0x552   : > { %v6094_v43 = vpop.permute.xlu0 %6093 }
 0x553   : > { %6114 = vst.msk [vmem:[%s12081_s1 + $0x20] sm:$0xff] %vm6109_vm3, %v6094_v43 }
 0x554   : > { %7387 = vst.msk [vmem:[%s12081_s1 + $0x20] sm:$0xff] %vm7382_vm4, %v7367_v2  ;;  %v6096_v0 = vpop.permute.xlu1 %6095 }
 0x555   : > { %6115 = vst.msk [vmem:[%s12081_s1 + $0x28] sm:$0xff] %vm6109_vm3, %v6096_v0 }
 0x556   : > { %7388 = vst.msk [vmem:[%s12081_s1 + $0x28] sm:$0xff] %vm7382_vm4, %v7369_v20  ;;  %v7371_v14 = vpop.permute.xlu0 %7370 }
 0x557   : > { %7389 = vst.msk [vmem:[%s12081_s1 + $0x30] sm:$0xff] %vm7382_vm4, %v7371_v14 }
 0x558   : > { %v7373_v22 = vpop.permute.xlu1 %7372 }
 0x559   : > { %7390 = vst.msk [vmem:[%s12081_s1 + $0x38] sm:$0xff] %vm7382_vm4, %v7373_v22 }
 0x55a   : > { %9376 = shalt.err (!%p9373_p7)
}
 0x55b   : > { %s9377_s28 = scalar_lea.hbm %s12633_s14, 1024  ;;  %s9381_s8 = scalar_lea.hbm %s13200_s19, 8192 }
 0x55c   : > { %p9378_p1 = scmp.ne.s32.totalorder %s12633_s14, %s9377_s28  ;;  %p9382_p13 = scmp.lt.u32.totalorder %s12633_s14, %s13200_s19 }
 0x55d   : > { %p9383_p8 = scmp.lt.u32.totalorder %s9381_s8, %s9377_s28  ;;  %p9385_p3 = scmp.lt.u32.totalorder %s9377_s28, %s12633_s14 }
 0x55e   : > { %p9379_p12 = pnand %p9378_p1, %p13201_p5 }
 0x55f   : > { %p9384_p2 = por %p9383_p8, %p9382_p13 }
 0x560   : > { %p9380_p10 = pneg %p9379_p12 }
 0x561   : > { %p9386_p0 = por %p9385_p3, %p9384_p2 }
 0x563   : > { %p9387_p4 = pnand %p9386_p0, %p9380_p10 }
 0x565   : > { %9390 = shalt.err (!%p9387_p4)
}
 0x566   : > { %s9565_s7 = smov 128  }
 0x567   : > { %8779 = dma.vmem_to_hbm [thread:$0]  (%p13201_p5), %s12626_s20, 1024, %s12633_s14, %s7392_s13, %s9565_s7, %s9565_s7, %s9563_s24  }
 0x568 PF: > { %s13202_s23 = sld [smem:[#allocation39_spill]]  ;;  %p8836_p6 = scmp.ge.s32.totalorder %s9545_s16, 2 }
 0x569   : > { %s13203_s11 = sld [smem:[#allocation52_spill]] }
 0x56e   : > { %s7422_s22 = sand.u32 1, %s13202_s23  }
 0x56f   : > { %p13204_p9 = scmp.ne.s32.totalorder %s13203_s11, 0  ;;  %s7423_s15 = scalar_lea.sflag [#allocation6], %s7422_s22 }
 0x571   : > { %p8820_p11 = pnand %p8836_p6, %p13204_p9 }
 0x573   : > { %9488 = dma.done.wait (!%p8820_p11), %s7423_s15, 1024  }
 0x574   : > { %9490 = vsyncadd (!%p8820_p11), %s7423_s15, 4294966272  ;;  %s40_s16 = sadd.s32 1, %s9545_s16   ;;  %s13206_s2 = sld [smem:[#allocation37_spill]] }
 0x575   : > { %p12667_p7 = scmp.ge.s32.totalorder %s40_s16, 10   ;;  %s13207_s22 = sld [smem:[#allocation38_spill]] }
 0x576   : > { %s13208_s24 = sld [smem:[#allocation40_spill]]  ;;  %s13209_s25 = sld [smem:[#allocation41_spill]] }
 0x577   : > { %s13210_s20 = sld [smem:[#allocation58_spill]]  ;;  %s13211_s27 = sld [smem:[#allocation42_spill]] }
 0x578   : > { %s13212_s14 = sld [smem:[#allocation57_spill]]  ;;  %s13213_s13 = sld [smem:[#allocation45_spill]] }
 0x579   : > { %s13214_s17 = sld [smem:[#allocation46_spill]]  ;;  %s13215_s0 = smov %s9803_s21 }
 0x57a   : > { %s13216_s15 = sld [smem:[#allocation55_spill]]  ;;  %s13218_s21 = smov %s13206_s2 }
 0x57b   : > { %s13219_s23 = smov %s13239_s30  ;;  %s13221_s28 = smov %s9525_s29 }
 0x57c   :  { %39 = sbr.rel (!%p12667_p7) target bundleno = 32 (0x20), region = 228 }
 0x57d   : > { %s13220_s26 = smov %s13210_s20 }
 0x57e   : > { %s13222_s29 = smov %s13212_s14  ;;  %s13223_s30 = smov %s13213_s13 }
 0x57f   : > { %s13224_s13 = smov %s13214_s17  ;;  %s13225_s14 = smov %s13215_s0 }
 0x583   :  { %7428 = vsyncpa [#allocation5], 1 }
 0x584   :  { %7430 = vsyncpa [#allocation5 + $0x1], 1 }
 0x585   :  { %7431 = vsyncpa [#allocation8], 1 }
 0x586   :  { %7433 = vsyncpa [#allocation8 + $0x1], 1 }
 0x587   :  { %7434 = vsyncpa [#allocation11], 1 }
 0x588   :  { %7436 = vsyncpa [#allocation11 + $0x1], 1 }
 0x589   :  { %7437 = vsyncpa [#allocation14], 1 }
 0x58a   :  { %7439 = vsyncpa [#allocation14 + $0x1], 1 }
 0x58b   :  { %7440 = vsyncpa [#allocation17], 1 }
 0x58c   :  { %7441 = vsyncpa [#allocation20], 1 }
 0x58d   :  { %7442 = vsyncpa [#allocation23], 1 }
 0x58e   :  { %7443 = vsyncpa [#allocation6], 1 }
 0x58f   :  { %7445 = vsyncpa [#allocation6 + $0x1], 1 }

</bundles_post_ra>
